<compile_context>
chip_gen: v7x
topology: tpu7x:2x2x1
jax: 0.10.0
libtpu: 0.0.40
codegen_flags: <defaults>
</compile_context>

<pallas_src>
import functools

import jax
import jax.numpy as jnp
from jax import lax
from jax.experimental import pallas as pl
from jax.experimental.pallas import tpu as pltpu

LANE = 128     # vreg lane width
SUBLANE = 8    # vreg sublane count (f32)


def _round_up(x, m):
    return ((x + m - 1) // m) * m


def _vmem_spec(shape):
    """Whole-array VMEM block (gridless call)."""
    n = len(shape)
    return pl.BlockSpec(shape, lambda *_: (0,) * n)


def _lstm_cell(gates, c, Hp):
    """PyTorch gate order i, f, g, o; each gate block is Hp (=128k) lanes wide."""
    i = jax.nn.sigmoid(gates[:, 0 * Hp:1 * Hp])
    f = jax.nn.sigmoid(gates[:, 1 * Hp:2 * Hp])
    g = jnp.tanh(gates[:, 2 * Hp:3 * Hp])
    o = jax.nn.sigmoid(gates[:, 3 * Hp:4 * Hp])
    c_new = f * c + i * g
    h_new = o * jnp.tanh(c_new)
    return h_new, c_new


# ----------------------------------------------------------------------------
# Fused BiLSTM kernel: all layers + both directions + projection head
# ----------------------------------------------------------------------------
def _bilstm_fused_kernel(*refs, num_layers, T, Bp, Hp, unroll):
    nw = 6 * num_layers
    x_ref = refs[0]                                   # (T*Bp, in_pad)
    w_refs = refs[1:1 + nw]                           # per layer: wih_f, whh_f, b_f, wih_b, whh_b, b_b
    w1_ref, b1_ref, w2_ref, b2_ref = refs[1 + nw:5 + nw]
    out_ref = refs[5 + nw]                            # (T*Bp, out_pad)
    hcat_ref, gf_ref, gb_ref = refs[6 + nw:9 + nw]    # VMEM scratch

    for layer in range(num_layers):
        wih_f, whh_f, b_f, wih_b, whh_b, b_b = w_refs[6 * layer:6 * layer + 6]

        # ---- Hoisted input->hidden matmuls (no recurrence dependence) ----
        # Layer 0 reads the padded input; layer>=1 reads the previous layer's
        # lane-concatenated [h_fwd | h_bwd] slab.  NOTE: hcat_ref is consumed
        # here in full (into gf/gb slabs) before the recurrence below starts
        # overwriting it; do not chunk T without restructuring this.
        xin = (x_ref if layer == 0 else hcat_ref)[...].astype(jnp.bfloat16)
        gf_ref[...] = jnp.dot(xin, wih_f[...],
                              preferred_element_type=jnp.float32) + b_f[...]
        gb_ref[...] = jnp.dot(xin, wih_b[...],
                              preferred_element_type=jnp.float32) + b_b[...]

        # ---- Sequential recurrence over time (both directions interleaved) ----
        def step(t, carry):
            h_f, c_f, h_b, c_b = carry
            rt = T - 1 - t
            row_f = pl.multiple_of(t * Bp, Bp)    # Bp is a multiple of 8 -> tile aligned
            row_b = pl.multiple_of(rt * Bp, Bp)

            g_f = gf_ref[pl.ds(row_f, Bp), :] + jnp.dot(
                h_f.astype(jnp.bfloat16), whh_f[...],
                preferred_element_type=jnp.float32)
            g_b = gb_ref[pl.ds(row_b, Bp), :] + jnp.dot(
                h_b.astype(jnp.bfloat16), whh_b[...],
                preferred_element_type=jnp.float32)

            h_f, c_f = _lstm_cell(g_f, c_f, Hp)
            h_b, c_b = _lstm_cell(g_b, c_b, Hp)

            # Store forward half at time t, backward half at time T-1-t, into the
            # lane-concatenated hidden slab (lane blocks are 128-aligned).
            hcat_ref[pl.ds(row_f, Bp), 0:Hp] = h_f
            hcat_ref[pl.ds(row_b, Bp), Hp:2 * Hp] = h_b
            return h_f, c_f, h_b, c_b

        z = jnp.zeros((Bp, Hp), jnp.float32)
        lax.fori_loop(0, T, step, (z, z, z, z), unroll=unroll)

    # ---- Fused projection head (proj -> proj2) on VMEM-resident activations ----
    # Dropout(p=0.05): identity in eval mode.
    h_all = hcat_ref[...].astype(jnp.bfloat16)                       # (T*Bp, 2Hp)
    y1 = jnp.dot(h_all, w1_ref[...],
                 preferred_element_type=jnp.float32) + b1_ref[...]   # (T*Bp, Hp)
    y2 = jnp.dot(y1.astype(jnp.bfloat16), w2_ref[...],
                 preferred_element_type=jnp.float32) + b2_ref[...]   # (T*Bp, out_pad)
    out_ref[...] = y2


# ----------------------------------------------------------------------------
# Parameter construction (PyTorch-shaped) and one-time kernel-format prep
# ----------------------------------------------------------------------------
def init_params(key, num_layers, in_dims, hidden_dims, out_dims):
    k = 1.0 / jnp.sqrt(hidden_dims)
    params = {"lstm": []}
    for layer in range(num_layers):
        input_size = in_dims if layer == 0 else 2 * hidden_dims
        dirs = []
        for _d in range(2):  # forward, backward
            key, k1, k2, k3, k4 = jax.random.split(key, 5)
            w_ih = jax.random.uniform(k1, (4 * hidden_dims, input_size), jnp.float32, -k, k)
            w_hh = jax.random.uniform(k2, (4 * hidden_dims, hidden_dims), jnp.float32, -k, k)
            b_ih = jax.random.uniform(k3, (4 * hidden_dims,), jnp.float32, -k, k)
            b_hh = jax.random.uniform(k4, (4 * hidden_dims,), jnp.float32, -k, k)
            dirs.append(dict(w_ih=w_ih, w_hh=w_hh, b_ih=b_ih, b_hh=b_hh))
        params["lstm"].append(dirs)

    kp = 1.0 / jnp.sqrt(2 * hidden_dims)
    key, k1, k2 = jax.random.split(key, 3)
    params["proj_w"] = jax.random.uniform(k1, (hidden_dims, 2 * hidden_dims), jnp.float32, -kp, kp)
    params["proj_b"] = jax.random.uniform(k2, (hidden_dims,), jnp.float32, -kp, kp)

    kp2 = 1.0 / jnp.sqrt(hidden_dims)
    key, k1, k2 = jax.random.split(key, 3)
    params["proj2_w"] = jax.random.uniform(k1, (out_dims, hidden_dims), jnp.float32, -kp2, kp2)
    params["proj2_b"] = jax.random.uniform(k2, (out_dims,), jnp.float32, -kp2, kp2)
    return params


def prepare_params(params, *, num_layers, in_dims, hidden_dims, out_dims):
    """One-time transpose + zero-pad to (8,128)-aligned layouts + bf16 weight cast.

    Padding with zeros is exact: padded gate lanes get 0 pre-activation, so
    c_pad stays 0 and h_pad stays 0; padded weight rows/cols contribute nothing.
    Biases stay f32 (added after the f32 accumulation).
    """
    H = hidden_dims
    Hp = _round_up(H, LANE)
    in_pad = _round_up(in_dims, LANE)
    out_pad = _round_up(out_dims, LANE)
    f32, bf16 = jnp.float32, jnp.bfloat16

    def gate_cols(w_t):  # (rows, 4H) with [i,f,g,o] blocks -> (rows, 4Hp), blocks at Hp boundaries
        rows = w_t.shape[0]
        out = jnp.zeros((rows, 4 * Hp), f32)
        for g in range(4):
            out = out.at[:, g * Hp:g * Hp + H].set(w_t[:, g * H:(g + 1) * H])
        return out

    def pad_rows_plain(w, rows_pad):
        return jnp.zeros((rows_pad, w.shape[1]), f32).at[:w.shape[0]].set(w)

    def pad_rows_bidir(w):  # (2H, N) -> (2Hp, N): fwd rows -> [0:H], bwd rows -> [Hp:Hp+H]
        out = jnp.zeros((2 * Hp, w.shape[1]), f32)
        out = out.at[0:H].set(w[0:H])
        out = out.at[Hp:Hp + H].set(w[H:2 * H])
        return out

    flat = []
    for layer, layer_params in enumerate(params["lstm"]):
        for p in layer_params:  # forward, then backward
            w_ih_t = gate_cols(jnp.transpose(p["w_ih"]))          # (in_rows, 4Hp)
            if layer == 0:
                w_ih_p = pad_rows_plain(w_ih_t, in_pad)           # (in_pad, 4Hp)
            else:
                w_ih_p = pad_rows_bidir(w_ih_t)                   # (2Hp, 4Hp)
            w_hh_p = pad_rows_plain(gate_cols(jnp.transpose(p["w_hh"])), Hp)  # (Hp, 4Hp)
            b_p = gate_cols((p["b_ih"] + p["b_hh"])[None, :])     # (1, 4Hp) summed bias
            flat.append(w_ih_p.astype(bf16))
            flat.append(w_hh_p.astype(bf16))
            flat.append(b_p)

    # Head: proj (2H -> H), proj2 (H -> out), padded + lane-dense output columns.
    w1 = jnp.zeros((2 * H, Hp), f32).at[:, :H].set(jnp.transpose(params["proj_w"]))
    flat.append(pad_rows_bidir(w1).astype(bf16))                                  # (2Hp, Hp)
    flat.append(jnp.zeros((1, Hp), f32).at[0, :H].set(params["proj_b"]))          # (1, Hp)
    w2 = jnp.zeros((Hp, out_pad), f32).at[:H, :out_dims].set(jnp.transpose(params["proj2_w"]))
    flat.append(w2.astype(bf16))                                                  # (Hp, out_pad)
    flat.append(jnp.zeros((1, out_pad), f32).at[0, :out_dims].set(params["proj2_b"]))
    return flat


# ----------------------------------------------------------------------------
# Forward pass: one pallas_call for the whole module
# ----------------------------------------------------------------------------
def bilstm_forward(prepared, feat, *, num_layers, hidden_dims, out_dims):
    T, B, in_dims = feat.shape
    Hp = _round_up(hidden_dims, LANE)
    in_pad = _round_up(in_dims, LANE)
    out_pad = _round_up(out_dims, LANE)
    Bp = _round_up(B, SUBLANE)

    # Zero-pad batch (sublanes) and features (lanes); slice the output back.
    x_p = jnp.zeros((T, Bp, in_pad), jnp.float32).at[:, :B, :in_dims].set(feat)
    x_flat = x_p.reshape(T * Bp, in_pad)

    unroll = T if T <= 16 else 4   # full unroll only for tiny T (review item)

    kernel = functools.partial(
        _bilstm_fused_kernel,
        num_layers=num_layers, T=T, Bp=Bp, Hp=Hp, unroll=unroll)

    args = (x_flat, *prepared)

    # Advisory cost estimate so XLA can schedule around the serial recurrence.
    M = T * Bp
    flops = 0
    for layer in range(num_layers):
        K = in_pad if layer == 0 else 2 * Hp
        flops += 2 * (2 * M * K * 4 * Hp)           # hoisted x @ W_ih (both dirs)
        flops += 2 * (2 * T * Bp * Hp * 4 * Hp)     # recurrent h @ W_hh (both dirs)
    flops += 2 * M * (2 * Hp) * Hp + 2 * M * Hp * out_pad
    transcendentals = num_layers * 2 * T * 5 * Bp * Hp
    bytes_accessed = (int(x_flat.size) * 4
                      + sum(int(w.size) * w.dtype.itemsize for w in prepared)
                      + M * out_pad * 4)

    out_flat = pl.pallas_call(
        kernel,
        out_shape=jax.ShapeDtypeStruct((T * Bp, out_pad), jnp.float32),
        in_specs=[_vmem_spec(a.shape) for a in args],
        out_specs=_vmem_spec((T * Bp, out_pad)),
        scratch_shapes=[
            pltpu.VMEM((T * Bp, 2 * Hp), jnp.float32),   # [h_fwd | h_bwd] slab (layer output)
            pltpu.VMEM((T * Bp, 4 * Hp), jnp.float32),   # hoisted fwd input gates
            pltpu.VMEM((T * Bp, 4 * Hp), jnp.float32),   # hoisted bwd input gates
        ],
        compiler_params=pltpu.CompilerParams(vmem_limit_bytes=64 * 1024 * 1024),
        cost_estimate=pl.CostEstimate(flops=flops, transcendentals=transcendentals,
                                      bytes_accessed=bytes_accessed),
    )(*args)
    return out_flat.reshape(T, Bp, out_pad)[:, :B, :out_dims]


# ----------------------------------------------------------------------------
# Pure-JAX reference (for correctness check)
# ----------------------------------------------------------------------------
def _ref_lstm_dir(x, p, hidden, reverse):
    xs = x[::-1] if reverse else x

    def step(carry, x_t):
        h, c = carry
        gates = x_t @ p["w_ih"].T + h @ p["w_hh"].T + p["b_ih"] + p["b_hh"]
        i, f, g, o = jnp.split(gates, 4, axis=-1)
        c = jax.nn.sigmoid(f) * c + jax.nn.sigmoid(i) * jnp.tanh(g)
        h = jax.nn.sigmoid(o) * jnp.tanh(c)
        return (h, c), h

    B = x.shape[1]
    h0 = jnp.zeros((B, hidden), jnp.float32)
    _, hs = jax.lax.scan(step, (h0, h0), xs)
    return hs[::-1] if reverse else hs


def bilstm_reference(params, feat, *, hidden_dims):
    x = feat
    for layer_params in params["lstm"]:
        fwd = _ref_lstm_dir(x, layer_params[0], hidden_dims, reverse=False)
        bwd = _ref_lstm_dir(x, layer_params[1], hidden_dims, reverse=True)
        x = jnp.concatenate([fwd, bwd], axis=-1)
    y = x @ params["proj_w"].T + params["proj_b"]
    y = y @ params["proj2_w"].T + params["proj2_b"]
    return y


def _bf16_weight_params(params):
    """Round weight matrices (not biases) to bf16, matching the kernel's weights."""
    rt = lambda x: x.astype(jnp.bfloat16).astype(jnp.float32)
    q = {"lstm": []}
    for layer_params in params["lstm"]:
        q["lstm"].append([dict(w_ih=rt(p["w_ih"]), w_hh=rt(p["w_hh"]),
                               b_ih=p["b_ih"], b_hh=p["b_hh"]) for p in layer_params])
    q["proj_w"] = rt(params["proj_w"]); q["proj_b"] = params["proj_b"]
    q["proj2_w"] = rt(params["proj2_w"]); q["proj2_b"] = params["proj2_b"]
    return q


if __name__ == "__main__":
    num_layers, in_dims, hidden_dims, out_dims = 2, 16, 32, 8
    seq_len, batch = 8, 2

    key = jax.random.PRNGKey(0)
    key, pkey, xkey = jax.random.split(key, 3)
    params = init_params(pkey, num_layers, in_dims, hidden_dims, out_dims)
    prepared = prepare_params(params, num_layers=num_layers, in_dims=in_dims,
                              hidden_dims=hidden_dims, out_dims=out_dims)
    feat = jax.random.normal(xkey, (seq_len, batch, in_dims), jnp.float32)

    @jax.jit
    def fwd(prepared, feat):
        return bilstm_forward(prepared, feat, num_layers=num_layers,
                              hidden_dims=hidden_dims, out_dims=out_dims)

    out = jax.block_until_ready(fwd(prepared, feat))

    # Reference uses bf16-rounded weights (kernel uses bf16 weights on the MXU,
    # f32 accumulation and f32 gate math), so tolerance is relaxed accordingly.
    ref_params = _bf16_weight_params(params)
    ref = jax.block_until_ready(bilstm_reference(ref_params, feat, hidden_dims=hidden_dims))

    assert out.shape == (seq_len, batch, out_dims), out.shape
    max_err = float(jnp.max(jnp.abs(out - ref)))
    assert jnp.allclose(out, ref, rtol=3e-2, atol=3e-2), max_err

    print("KERNEL_OK")
</pallas_src>

<mosaic_0001>
module attributes {stable_mosaic.version = 11 : i64} {
  func.func @_bilstm_fused_kernel(%arg0: memref<64x128xf32, #tpu.memory_space<vmem>>, %arg1: memref<128x512xbf16, #tpu.memory_space<vmem>>, %arg2: memref<128x512xbf16, #tpu.memory_space<vmem>>, %arg3: memref<1x512xf32, #tpu.memory_space<vmem>>, %arg4: memref<128x512xbf16, #tpu.memory_space<vmem>>, %arg5: memref<128x512xbf16, #tpu.memory_space<vmem>>, %arg6: memref<1x512xf32, #tpu.memory_space<vmem>>, %arg7: memref<256x512xbf16, #tpu.memory_space<vmem>>, %arg8: memref<128x512xbf16, #tpu.memory_space<vmem>>, %arg9: memref<1x512xf32, #tpu.memory_space<vmem>>, %arg10: memref<256x512xbf16, #tpu.memory_space<vmem>>, %arg11: memref<128x512xbf16, #tpu.memory_space<vmem>>, %arg12: memref<1x512xf32, #tpu.memory_space<vmem>>, %arg13: memref<256x128xbf16, #tpu.memory_space<vmem>>, %arg14: memref<1x128xf32, #tpu.memory_space<vmem>>, %arg15: memref<128x128xbf16, #tpu.memory_space<vmem>>, %arg16: memref<1x128xf32, #tpu.memory_space<vmem>>, %arg17: memref<64x128xf32, #tpu.memory_space<vmem>>, %arg18: memref<64x256xf32, #tpu.memory_space<vmem>>, %arg19: memref<64x512xf32, #tpu.memory_space<vmem>>, %arg20: memref<64x512xf32, #tpu.memory_space<vmem>>) attributes {dimension_semantics = [], scalar_prefetch = 0 : i64, scratch_operands = 3 : i64, tpu.core_type = #tpu.core_type<tc>} {
    %c0 = arith.constant 0 : index
    %c0_0 = arith.constant 0 : index
    %0 = vector.load %arg0[%c0, %c0_0] : memref<64x128xf32, #tpu.memory_space<vmem>>, vector<64x128xf32>
    %1 = arith.truncf %0 : vector<64x128xf32> to vector<64x128xbf16>
    %c0_1 = arith.constant 0 : index
    %c0_2 = arith.constant 0 : index
    %2 = vector.load %arg1[%c0_1, %c0_2] : memref<128x512xbf16, #tpu.memory_space<vmem>>, vector<128x512xbf16>
    %cst = arith.constant dense<0.000000e+00> : vector<64x512xf32>
    %3 = tpu.matmul %1, %2, %cst {dimension_numbers = #tpu.dot_dimension_numbers<[1], [0], [0], [1], [0, 0, 1, 1], [], []>} : vector<64x128xbf16>, vector<128x512xbf16>, vector<64x512xf32> -> vector<64x512xf32>
    %c0_3 = arith.constant 0 : index
    %c0_4 = arith.constant 0 : index
    %4 = vector.load %arg3[%c0_3, %c0_4] : memref<1x512xf32, #tpu.memory_space<vmem>>, vector<1x512xf32>
    %5 = vector.broadcast %4 : vector<1x512xf32> to vector<64x512xf32>
    %6 = arith.addf %3, %5 : vector<64x512xf32>
    %c0_5 = arith.constant 0 : index
    %c0_6 = arith.constant 0 : index
    %7 = vector.load %arg19[%c0_5, %c0_6] : memref<64x512xf32, #tpu.memory_space<vmem>>, vector<64x512xf32>
    tpu.vector_store %arg19[%c0_5, %c0_6], %6 {strides = array<i32>} : memref<64x512xf32, #tpu.memory_space<vmem>>, vector<64x512xf32>,
    %c0_7 = arith.constant 0 : index
    %c0_8 = arith.constant 0 : index
    %8 = vector.load %arg4[%c0_7, %c0_8] : memref<128x512xbf16, #tpu.memory_space<vmem>>, vector<128x512xbf16>
    %cst_9 = arith.constant dense<0.000000e+00> : vector<64x512xf32>
    %9 = tpu.matmul %1, %8, %cst_9 {dimension_numbers = #tpu.dot_dimension_numbers<[1], [0], [0], [1], [0, 0, 1, 1], [], []>} : vector<64x128xbf16>, vector<128x512xbf16>, vector<64x512xf32> -> vector<64x512xf32>
    %c0_10 = arith.constant 0 : index
    %c0_11 = arith.constant 0 : index
    %10 = vector.load %arg6[%c0_10, %c0_11] : memref<1x512xf32, #tpu.memory_space<vmem>>, vector<1x512xf32>
    %11 = vector.broadcast %10 : vector<1x512xf32> to vector<64x512xf32>
    %12 = arith.addf %9, %11 : vector<64x512xf32>
    %c0_12 = arith.constant 0 : index
    %c0_13 = arith.constant 0 : index
    %13 = vector.load %arg20[%c0_12, %c0_13] : memref<64x512xf32, #tpu.memory_space<vmem>>, vector<64x512xf32>
    tpu.vector_store %arg20[%c0_12, %c0_13], %12 {strides = array<i32>} : memref<64x512xf32, #tpu.memory_space<vmem>>, vector<64x512xf32>,
    %cst_14 = arith.constant 0.000000e+00 : f32
    %14 = vector.broadcast %cst_14 : f32 to vector<8x128xf32>
    %c0_i32 = arith.constant 0 : i32
    %c7_i32 = arith.constant 7 : i32
    %15 = arith.subi %c7_i32, %c0_i32 : i32
    %c8_i32 = arith.constant 8 : i32
    %16 = arith.muli %c0_i32, %c8_i32 : i32
    %17 = tpu.assume_multiple %16, 8 : i32
    %c8_i32_15 = arith.constant 8 : i32
    %18 = arith.muli %15, %c8_i32_15 : i32
    %19 = tpu.assume_multiple %18, 8 : i32
    %20 = arith.index_cast %17 : i32 to index
    %c0_16 = arith.constant 0 : index
    %21 = vector.load %arg19[%20, %c0_16] : memref<64x512xf32, #tpu.memory_space<vmem>>, vector<8x512xf32>
    %22 = arith.truncf %14 : vector<8x128xf32> to vector<8x128xbf16>
    %c0_17 = arith.constant 0 : index
    %c0_18 = arith.constant 0 : index
    %23 = vector.load %arg2[%c0_17, %c0_18] : memref<128x512xbf16, #tpu.memory_space<vmem>>, vector<128x512xbf16>
    %cst_19 = arith.constant dense<0.000000e+00> : vector<8x512xf32>
    %24 = tpu.matmul %22, %23, %cst_19 {dimension_numbers = #tpu.dot_dimension_numbers<[1], [0], [0], [1], [0, 0, 1, 1], [], []>} : vector<8x128xbf16>, vector<128x512xbf16>, vector<8x512xf32> -> vector<8x512xf32>
    %25 = arith.addf %21, %24 : vector<8x512xf32>
    %26 = arith.index_cast %19 : i32 to index
    %c0_20 = arith.constant 0 : index
    %27 = vector.load %arg20[%26, %c0_20] : memref<64x512xf32, #tpu.memory_space<vmem>>, vector<8x512xf32>
    %28 = arith.truncf %14 : vector<8x128xf32> to vector<8x128xbf16>
    %c0_21 = arith.constant 0 : index
    %c0_22 = arith.constant 0 : index
    %29 = vector.load %arg5[%c0_21, %c0_22] : memref<128x512xbf16, #tpu.memory_space<vmem>>, vector<128x512xbf16>
    %cst_23 = arith.constant dense<0.000000e+00> : vector<8x512xf32>
    %30 = tpu.matmul %28, %29, %cst_23 {dimension_numbers = #tpu.dot_dimension_numbers<[1], [0], [0], [1], [0, 0, 1, 1], [], []>} : vector<8x128xbf16>, vector<128x512xbf16>, vector<8x512xf32> -> vector<8x512xf32>
    %31 = arith.addf %27, %30 : vector<8x512xf32>
    %32 = vector.extract_strided_slice %25 {offsets = [0, 0], sizes = [8, 128], strides = [1, 1]} : vector<8x512xf32> to vector<8x128xf32>
    %33 = arith.negf %32 : vector<8x128xf32>
    %34 = math.exp %33 : vector<8x128xf32>
    %cst_24 = arith.constant 1.000000e+00 : f32
    %35 = vector.broadcast %cst_24 : f32 to vector<8x128xf32>
    %36 = arith.addf %35, %34 : vector<8x128xf32>
    %37 = arith.divf %35, %36 : vector<8x128xf32>
    %38 = vector.extract_strided_slice %25 {offsets = [0, 128], sizes = [8, 128], strides = [1, 1]} : vector<8x512xf32> to vector<8x128xf32>
    %39 = arith.negf %38 : vector<8x128xf32>
    %40 = math.exp %39 : vector<8x128xf32>
    %cst_25 = arith.constant 1.000000e+00 : f32
    %41 = vector.broadcast %cst_25 : f32 to vector<8x128xf32>
    %42 = arith.addf %41, %40 : vector<8x128xf32>
    %43 = arith.divf %41, %42 : vector<8x128xf32>
    %44 = vector.extract_strided_slice %25 {offsets = [0, 256], sizes = [8, 128], strides = [1, 1]} : vector<8x512xf32> to vector<8x128xf32>
    %45 = math.tanh %44 : vector<8x128xf32>
    %46 = vector.extract_strided_slice %25 {offsets = [0, 384], sizes = [8, 128], strides = [1, 1]} : vector<8x512xf32> to vector<8x128xf32>
    %47 = arith.negf %46 : vector<8x128xf32>
    %48 = math.exp %47 : vector<8x128xf32>
    %cst_26 = arith.constant 1.000000e+00 : f32
    %49 = vector.broadcast %cst_26 : f32 to vector<8x128xf32>
    %50 = arith.addf %49, %48 : vector<8x128xf32>
    %51 = arith.divf %49, %50 : vector<8x128xf32>
    %52 = arith.mulf %43, %14 : vector<8x128xf32>
    %53 = arith.mulf %37, %45 : vector<8x128xf32>
    %54 = arith.addf %52, %53 : vector<8x128xf32>
    %55 = math.tanh %54 : vector<8x128xf32>
    %56 = arith.mulf %51, %55 : vector<8x128xf32>
    %57 = vector.extract_strided_slice %31 {offsets = [0, 0], sizes = [8, 128], strides = [1, 1]} : vector<8x512xf32> to vector<8x128xf32>
    %58 = arith.negf %57 : vector<8x128xf32>
    %59 = math.exp %58 : vector<8x128xf32>
    %cst_27 = arith.constant 1.000000e+00 : f32
    %60 = vector.broadcast %cst_27 : f32 to vector<8x128xf32>
    %61 = arith.addf %60, %59 : vector<8x128xf32>
    %62 = arith.divf %60, %61 : vector<8x128xf32>
    %63 = vector.extract_strided_slice %31 {offsets = [0, 128], sizes = [8, 128], strides = [1, 1]} : vector<8x512xf32> to vector<8x128xf32>
    %64 = arith.negf %63 : vector<8x128xf32>
    %65 = math.exp %64 : vector<8x128xf32>
    %cst_28 = arith.constant 1.000000e+00 : f32
    %66 = vector.broadcast %cst_28 : f32 to vector<8x128xf32>
    %67 = arith.addf %66, %65 : vector<8x128xf32>
    %68 = arith.divf %66, %67 : vector<8x128xf32>
    %69 = vector.extract_strided_slice %31 {offsets = [0, 256], sizes = [8, 128], strides = [1, 1]} : vector<8x512xf32> to vector<8x128xf32>
    %70 = math.tanh %69 : vector<8x128xf32>
    %71 = vector.extract_strided_slice %31 {offsets = [0, 384], sizes = [8, 128], strides = [1, 1]} : vector<8x512xf32> to vector<8x128xf32>
    %72 = arith.negf %71 : vector<8x128xf32>
    %73 = math.exp %72 : vector<8x128xf32>
    %cst_29 = arith.constant 1.000000e+00 : f32
    %74 = vector.broadcast %cst_29 : f32 to vector<8x128xf32>
    %75 = arith.addf %74, %73 : vector<8x128xf32>
    %76 = arith.divf %74, %75 : vector<8x128xf32>
    %77 = arith.mulf %68, %14 : vector<8x128xf32>
    %78 = arith.mulf %62, %70 : vector<8x128xf32>
    %79 = arith.addf %77, %78 : vector<8x128xf32>
    %80 = math.tanh %79 : vector<8x128xf32>
    %81 = arith.mulf %76, %80 : vector<8x128xf32>
    %82 = arith.index_cast %17 : i32 to index
    %c0_30 = arith.constant 0 : index
    %83 = vector.load %arg18[%82, %c0_30] : memref<64x256xf32, #tpu.memory_space<vmem>>, vector<8x128xf32>
    tpu.vector_store %arg18[%82, %c0_30], %56 {strides = array<i32>} : memref<64x256xf32, #tpu.memory_space<vmem>>, vector<8x128xf32>,
    %84 = arith.index_cast %19 : i32 to index
    %c128 = arith.constant 128 : index
    %85 = vector.load %arg18[%84, %c128] : memref<64x256xf32, #tpu.memory_space<vmem>>, vector<8x128xf32>
    tpu.vector_store %arg18[%84, %c128], %81 {strides = array<i32>} : memref<64x256xf32, #tpu.memory_space<vmem>>, vector<8x128xf32>,
    %c1_i32 = arith.constant 1 : i32
    %c7_i32_31 = arith.constant 7 : i32
    %86 = arith.subi %c7_i32_31, %c1_i32 : i32
    %c8_i32_32 = arith.constant 8 : i32
    %87 = arith.muli %c1_i32, %c8_i32_32 : i32
    %88 = tpu.assume_multiple %87, 8 : i32
    %c8_i32_33 = arith.constant 8 : i32
    %89 = arith.muli %86, %c8_i32_33 : i32
    %90 = tpu.assume_multiple %89, 8 : i32
    %91 = arith.index_cast %88 : i32 to index
    %c0_34 = arith.constant 0 : index
    %92 = vector.load %arg19[%91, %c0_34] : memref<64x512xf32, #tpu.memory_space<vmem>>, vector<8x512xf32>
    %93 = arith.truncf %56 : vector<8x128xf32> to vector<8x128xbf16>
    %c0_35 = arith.constant 0 : index
    %c0_36 = arith.constant 0 : index
    %94 = vector.load %arg2[%c0_35, %c0_36] : memref<128x512xbf16, #tpu.memory_space<vmem>>, vector<128x512xbf16>
    %cst_37 = arith.constant dense<0.000000e+00> : vector<8x512xf32>
    %95 = tpu.matmul %93, %94, %cst_37 {dimension_numbers = #tpu.dot_dimension_numbers<[1], [0], [0], [1], [0, 0, 1, 1], [], []>} : vector<8x128xbf16>, vector<128x512xbf16>, vector<8x512xf32> -> vector<8x512xf32>
    %96 = arith.addf %92, %95 : vector<8x512xf32>
    %97 = arith.index_cast %90 : i32 to index
    %c0_38 = arith.constant 0 : index
    %98 = vector.load %arg20[%97, %c0_38] : memref<64x512xf32, #tpu.memory_space<vmem>>, vector<8x512xf32>
    %99 = arith.truncf %81 : vector<8x128xf32> to vector<8x128xbf16>
    %c0_39 = arith.constant 0 : index
    %c0_40 = arith.constant 0 : index
    %100 = vector.load %arg5[%c0_39, %c0_40] : memref<128x512xbf16, #tpu.memory_space<vmem>>, vector<128x512xbf16>
    %cst_41 = arith.constant dense<0.000000e+00> : vector<8x512xf32>
    %101 = tpu.matmul %99, %100, %cst_41 {dimension_numbers = #tpu.dot_dimension_numbers<[1], [0], [0], [1], [0, 0, 1, 1], [], []>} : vector<8x128xbf16>, vector<128x512xbf16>, vector<8x512xf32> -> vector<8x512xf32>
    %102 = arith.addf %98, %101 : vector<8x512xf32>
    %103 = vector.extract_strided_slice %96 {offsets = [0, 0], sizes = [8, 128], strides = [1, 1]} : vector<8x512xf32> to vector<8x128xf32>
    %104 = arith.negf %103 : vector<8x128xf32>
    %105 = math.exp %104 : vector<8x128xf32>
    %cst_42 = arith.constant 1.000000e+00 : f32
    %106 = vector.broadcast %cst_42 : f32 to vector<8x128xf32>
    %107 = arith.addf %106, %105 : vector<8x128xf32>
    %108 = arith.divf %106, %107 : vector<8x128xf32>
    %109 = vector.extract_strided_slice %96 {offsets = [0, 128], sizes = [8, 128], strides = [1, 1]} : vector<8x512xf32> to vector<8x128xf32>
    %110 = arith.negf %109 : vector<8x128xf32>
    %111 = math.exp %110 : vector<8x128xf32>
    %cst_43 = arith.constant 1.000000e+00 : f32
    %112 = vector.broadcast %cst_43 : f32 to vector<8x128xf32>
    %113 = arith.addf %112, %111 : vector<8x128xf32>
    %114 = arith.divf %112, %113 : vector<8x128xf32>
    %115 = vector.extract_strided_slice %96 {offsets = [0, 256], sizes = [8, 128], strides = [1, 1]} : vector<8x512xf32> to vector<8x128xf32>
    %116 = math.tanh %115 : vector<8x128xf32>
    %117 = vector.extract_strided_slice %96 {offsets = [0, 384], sizes = [8, 128], strides = [1, 1]} : vector<8x512xf32> to vector<8x128xf32>
    %118 = arith.negf %117 : vector<8x128xf32>
    %119 = math.exp %118 : vector<8x128xf32>
    %cst_44 = arith.constant 1.000000e+00 : f32
    %120 = vector.broadcast %cst_44 : f32 to vector<8x128xf32>
    %121 = arith.addf %120, %119 : vector<8x128xf32>
    %122 = arith.divf %120, %121 : vector<8x128xf32>
    %123 = arith.mulf %114, %54 : vector<8x128xf32>
    %124 = arith.mulf %108, %116 : vector<8x128xf32>
    %125 = arith.addf %123, %124 : vector<8x128xf32>
    %126 = math.tanh %125 : vector<8x128xf32>
    %127 = arith.mulf %122, %126 : vector<8x128xf32>
    %128 = vector.extract_strided_slice %102 {offsets = [0, 0], sizes = [8, 128], strides = [1, 1]} : vector<8x512xf32> to vector<8x128xf32>
    %129 = arith.negf %128 : vector<8x128xf32>
    %130 = math.exp %129 : vector<8x128xf32>
    %cst_45 = arith.constant 1.000000e+00 : f32
    %131 = vector.broadcast %cst_45 : f32 to vector<8x128xf32>
    %132 = arith.addf %131, %130 : vector<8x128xf32>
    %133 = arith.divf %131, %132 : vector<8x128xf32>
    %134 = vector.extract_strided_slice %102 {offsets = [0, 128], sizes = [8, 128], strides = [1, 1]} : vector<8x512xf32> to vector<8x128xf32>
    %135 = arith.negf %134 : vector<8x128xf32>
    %136 = math.exp %135 : vector<8x128xf32>
    %cst_46 = arith.constant 1.000000e+00 : f32
    %137 = vector.broadcast %cst_46 : f32 to vector<8x128xf32>
    %138 = arith.addf %137, %136 : vector<8x128xf32>
    %139 = arith.divf %137, %138 : vector<8x128xf32>
    %140 = vector.extract_strided_slice %102 {offsets = [0, 256], sizes = [8, 128], strides = [1, 1]} : vector<8x512xf32> to vector<8x128xf32>
    %141 = math.tanh %140 : vector<8x128xf32>
    %142 = vector.extract_strided_slice %102 {offsets = [0, 384], sizes = [8, 128], strides = [1, 1]} : vector<8x512xf32> to vector<8x128xf32>
    %143 = arith.negf %142 : vector<8x128xf32>
    %144 = math.exp %143 : vector<8x128xf32>
    %cst_47 = arith.constant 1.000000e+00 : f32
    %145 = vector.broadcast %cst_47 : f32 to vector<8x128xf32>
    %146 = arith.addf %145, %144 : vector<8x128xf32>
    %147 = arith.divf %145, %146 : vector<8x128xf32>
    %148 = arith.mulf %139, %79 : vector<8x128xf32>
    %149 = arith.mulf %133, %141 : vector<8x128xf32>
    %150 = arith.addf %148, %149 : vector<8x128xf32>
    %151 = math.tanh %150 : vector<8x128xf32>
    %152 = arith.mulf %147, %151 : vector<8x128xf32>
    %153 = arith.index_cast %88 : i32 to index
    %c0_48 = arith.constant 0 : index
    %154 = vector.load %arg18[%153, %c0_48] : memref<64x256xf32, #tpu.memory_space<vmem>>, vector<8x128xf32>
    tpu.vector_store %arg18[%153, %c0_48], %127 {strides = array<i32>} : memref<64x256xf32, #tpu.memory_space<vmem>>, vector<8x128xf32>,
    %155 = arith.index_cast %90 : i32 to index
    %c128_49 = arith.constant 128 : index
    %156 = vector.load %arg18[%155, %c128_49] : memref<64x256xf32, #tpu.memory_space<vmem>>, vector<8x128xf32>
    tpu.vector_store %arg18[%155, %c128_49], %152 {strides = array<i32>} : memref<64x256xf32, #tpu.memory_space<vmem>>, vector<8x128xf32>,
    %c2_i32 = arith.constant 2 : i32
    %c7_i32_50 = arith.constant 7 : i32
    %157 = arith.subi %c7_i32_50, %c2_i32 : i32
    %c8_i32_51 = arith.constant 8 : i32
    %158 = arith.muli %c2_i32, %c8_i32_51 : i32
    %159 = tpu.assume_multiple %158, 8 : i32
    %c8_i32_52 = arith.constant 8 : i32
    %160 = arith.muli %157, %c8_i32_52 : i32
    %161 = tpu.assume_multiple %160, 8 : i32
    %162 = arith.index_cast %159 : i32 to index
    %c0_53 = arith.constant 0 : index
    %163 = vector.load %arg19[%162, %c0_53] : memref<64x512xf32, #tpu.memory_space<vmem>>, vector<8x512xf32>
    %164 = arith.truncf %127 : vector<8x128xf32> to vector<8x128xbf16>
    %c0_54 = arith.constant 0 : index
    %c0_55 = arith.constant 0 : index
    %165 = vector.load %arg2[%c0_54, %c0_55] : memref<128x512xbf16, #tpu.memory_space<vmem>>, vector<128x512xbf16>
    %cst_56 = arith.constant dense<0.000000e+00> : vector<8x512xf32>
    %166 = tpu.matmul %164, %165, %cst_56 {dimension_numbers = #tpu.dot_dimension_numbers<[1], [0], [0], [1], [0, 0, 1, 1], [], []>} : vector<8x128xbf16>, vector<128x512xbf16>, vector<8x512xf32> -> vector<8x512xf32>
    %167 = arith.addf %163, %166 : vector<8x512xf32>
    %168 = arith.index_cast %161 : i32 to index
    %c0_57 = arith.constant 0 : index
    %169 = vector.load %arg20[%168, %c0_57] : memref<64x512xf32, #tpu.memory_space<vmem>>, vector<8x512xf32>
    %170 = arith.truncf %152 : vector<8x128xf32> to vector<8x128xbf16>
    %c0_58 = arith.constant 0 : index
    %c0_59 = arith.constant 0 : index
    %171 = vector.load %arg5[%c0_58, %c0_59] : memref<128x512xbf16, #tpu.memory_space<vmem>>, vector<128x512xbf16>
    %cst_60 = arith.constant dense<0.000000e+00> : vector<8x512xf32>
    %172 = tpu.matmul %170, %171, %cst_60 {dimension_numbers = #tpu.dot_dimension_numbers<[1], [0], [0], [1], [0, 0, 1, 1], [], []>} : vector<8x128xbf16>, vector<128x512xbf16>, vector<8x512xf32> -> vector<8x512xf32>
    %173 = arith.addf %169, %172 : vector<8x512xf32>
    %174 = vector.extract_strided_slice %167 {offsets = [0, 0], sizes = [8, 128], strides = [1, 1]} : vector<8x512xf32> to vector<8x128xf32>
    %175 = arith.negf %174 : vector<8x128xf32>
    %176 = math.exp %175 : vector<8x128xf32>
    %cst_61 = arith.constant 1.000000e+00 : f32
    %177 = vector.broadcast %cst_61 : f32 to vector<8x128xf32>
    %178 = arith.addf %177, %176 : vector<8x128xf32>
    %179 = arith.divf %177, %178 : vector<8x128xf32>
    %180 = vector.extract_strided_slice %167 {offsets = [0, 128], sizes = [8, 128], strides = [1, 1]} : vector<8x512xf32> to vector<8x128xf32>
    %181 = arith.negf %180 : vector<8x128xf32>
    %182 = math.exp %181 : vector<8x128xf32>
    %cst_62 = arith.constant 1.000000e+00 : f32
    %183 = vector.broadcast %cst_62 : f32 to vector<8x128xf32>
    %184 = arith.addf %183, %182 : vector<8x128xf32>
    %185 = arith.divf %183, %184 : vector<8x128xf32>
    %186 = vector.extract_strided_slice %167 {offsets = [0, 256], sizes = [8, 128], strides = [1, 1]} : vector<8x512xf32> to vector<8x128xf32>
    %187 = math.tanh %186 : vector<8x128xf32>
    %188 = vector.extract_strided_slice %167 {offsets = [0, 384], sizes = [8, 128], strides = [1, 1]} : vector<8x512xf32> to vector<8x128xf32>
    %189 = arith.negf %188 : vector<8x128xf32>
    %190 = math.exp %189 : vector<8x128xf32>
    %cst_63 = arith.constant 1.000000e+00 : f32
    %191 = vector.broadcast %cst_63 : f32 to vector<8x128xf32>
    %192 = arith.addf %191, %190 : vector<8x128xf32>
    %193 = arith.divf %191, %192 : vector<8x128xf32>
    %194 = arith.mulf %185, %125 : vector<8x128xf32>
    %195 = arith.mulf %179, %187 : vector<8x128xf32>
    %196 = arith.addf %194, %195 : vector<8x128xf32>
    %197 = math.tanh %196 : vector<8x128xf32>
    %198 = arith.mulf %193, %197 : vector<8x128xf32>
    %199 = vector.extract_strided_slice %173 {offsets = [0, 0], sizes = [8, 128], strides = [1, 1]} : vector<8x512xf32> to vector<8x128xf32>
    %200 = arith.negf %199 : vector<8x128xf32>
    %201 = math.exp %200 : vector<8x128xf32>
    %cst_64 = arith.constant 1.000000e+00 : f32
    %202 = vector.broadcast %cst_64 : f32 to vector<8x128xf32>
    %203 = arith.addf %202, %201 : vector<8x128xf32>
    %204 = arith.divf %202, %203 : vector<8x128xf32>
    %205 = vector.extract_strided_slice %173 {offsets = [0, 128], sizes = [8, 128], strides = [1, 1]} : vector<8x512xf32> to vector<8x128xf32>
    %206 = arith.negf %205 : vector<8x128xf32>
    %207 = math.exp %206 : vector<8x128xf32>
    %cst_65 = arith.constant 1.000000e+00 : f32
    %208 = vector.broadcast %cst_65 : f32 to vector<8x128xf32>
    %209 = arith.addf %208, %207 : vector<8x128xf32>
    %210 = arith.divf %208, %209 : vector<8x128xf32>
    %211 = vector.extract_strided_slice %173 {offsets = [0, 256], sizes = [8, 128], strides = [1, 1]} : vector<8x512xf32> to vector<8x128xf32>
    %212 = math.tanh %211 : vector<8x128xf32>
    %213 = vector.extract_strided_slice %173 {offsets = [0, 384], sizes = [8, 128], strides = [1, 1]} : vector<8x512xf32> to vector<8x128xf32>
    %214 = arith.negf %213 : vector<8x128xf32>
    %215 = math.exp %214 : vector<8x128xf32>
    %cst_66 = arith.constant 1.000000e+00 : f32
    %216 = vector.broadcast %cst_66 : f32 to vector<8x128xf32>
    %217 = arith.addf %216, %215 : vector<8x128xf32>
    %218 = arith.divf %216, %217 : vector<8x128xf32>
    %219 = arith.mulf %210, %150 : vector<8x128xf32>
    %220 = arith.mulf %204, %212 : vector<8x128xf32>
    %221 = arith.addf %219, %220 : vector<8x128xf32>
    %222 = math.tanh %221 : vector<8x128xf32>
    %223 = arith.mulf %218, %222 : vector<8x128xf32>
    %224 = arith.index_cast %159 : i32 to index
    %c0_67 = arith.constant 0 : index
    %225 = vector.load %arg18[%224, %c0_67] : memref<64x256xf32, #tpu.memory_space<vmem>>, vector<8x128xf32>
    tpu.vector_store %arg18[%224, %c0_67], %198 {strides = array<i32>} : memref<64x256xf32, #tpu.memory_space<vmem>>, vector<8x128xf32>,
    %226 = arith.index_cast %161 : i32 to index
    %c128_68 = arith.constant 128 : index
    %227 = vector.load %arg18[%226, %c128_68] : memref<64x256xf32, #tpu.memory_space<vmem>>, vector<8x128xf32>
    tpu.vector_store %arg18[%226, %c128_68], %223 {strides = array<i32>} : memref<64x256xf32, #tpu.memory_space<vmem>>, vector<8x128xf32>,
    %c3_i32 = arith.constant 3 : i32
    %c7_i32_69 = arith.constant 7 : i32
    %228 = arith.subi %c7_i32_69, %c3_i32 : i32
    %c8_i32_70 = arith.constant 8 : i32
    %229 = arith.muli %c3_i32, %c8_i32_70 : i32
    %230 = tpu.assume_multiple %229, 8 : i32
    %c8_i32_71 = arith.constant 8 : i32
    %231 = arith.muli %228, %c8_i32_71 : i32
    %232 = tpu.assume_multiple %231, 8 : i32
    %233 = arith.index_cast %230 : i32 to index
    %c0_72 = arith.constant 0 : index
    %234 = vector.load %arg19[%233, %c0_72] : memref<64x512xf32, #tpu.memory_space<vmem>>, vector<8x512xf32>
    %235 = arith.truncf %198 : vector<8x128xf32> to vector<8x128xbf16>
    %c0_73 = arith.constant 0 : index
    %c0_74 = arith.constant 0 : index
    %236 = vector.load %arg2[%c0_73, %c0_74] : memref<128x512xbf16, #tpu.memory_space<vmem>>, vector<128x512xbf16>
    %cst_75 = arith.constant dense<0.000000e+00> : vector<8x512xf32>
    %237 = tpu.matmul %235, %236, %cst_75 {dimension_numbers = #tpu.dot_dimension_numbers<[1], [0], [0], [1], [0, 0, 1, 1], [], []>} : vector<8x128xbf16>, vector<128x512xbf16>, vector<8x512xf32> -> vector<8x512xf32>
    %238 = arith.addf %234, %237 : vector<8x512xf32>
    %239 = arith.index_cast %232 : i32 to index
    %c0_76 = arith.constant 0 : index
    %240 = vector.load %arg20[%239, %c0_76] : memref<64x512xf32, #tpu.memory_space<vmem>>, vector<8x512xf32>
    %241 = arith.truncf %223 : vector<8x128xf32> to vector<8x128xbf16>
    %c0_77 = arith.constant 0 : index
    %c0_78 = arith.constant 0 : index
    %242 = vector.load %arg5[%c0_77, %c0_78] : memref<128x512xbf16, #tpu.memory_space<vmem>>, vector<128x512xbf16>
    %cst_79 = arith.constant dense<0.000000e+00> : vector<8x512xf32>
    %243 = tpu.matmul %241, %242, %cst_79 {dimension_numbers = #tpu.dot_dimension_numbers<[1], [0], [0], [1], [0, 0, 1, 1], [], []>} : vector<8x128xbf16>, vector<128x512xbf16>, vector<8x512xf32> -> vector<8x512xf32>
    %244 = arith.addf %240, %243 : vector<8x512xf32>
    %245 = vector.extract_strided_slice %238 {offsets = [0, 0], sizes = [8, 128], strides = [1, 1]} : vector<8x512xf32> to vector<8x128xf32>
    %246 = arith.negf %245 : vector<8x128xf32>
    %247 = math.exp %246 : vector<8x128xf32>
    %cst_80 = arith.constant 1.000000e+00 : f32
    %248 = vector.broadcast %cst_80 : f32 to vector<8x128xf32>
    %249 = arith.addf %248, %247 : vector<8x128xf32>
    %250 = arith.divf %248, %249 : vector<8x128xf32>
    %251 = vector.extract_strided_slice %238 {offsets = [0, 128], sizes = [8, 128], strides = [1, 1]} : vector<8x512xf32> to vector<8x128xf32>
    %252 = arith.negf %251 : vector<8x128xf32>
    %253 = math.exp %252 : vector<8x128xf32>
    %cst_81 = arith.constant 1.000000e+00 : f32
    %254 = vector.broadcast %cst_81 : f32 to vector<8x128xf32>
    %255 = arith.addf %254, %253 : vector<8x128xf32>
    %256 = arith.divf %254, %255 : vector<8x128xf32>
    %257 = vector.extract_strided_slice %238 {offsets = [0, 256], sizes = [8, 128], strides = [1, 1]} : vector<8x512xf32> to vector<8x128xf32>
    %258 = math.tanh %257 : vector<8x128xf32>
    %259 = vector.extract_strided_slice %238 {offsets = [0, 384], sizes = [8, 128], strides = [1, 1]} : vector<8x512xf32> to vector<8x128xf32>
    %260 = arith.negf %259 : vector<8x128xf32>
    %261 = math.exp %260 : vector<8x128xf32>
    %cst_82 = arith.constant 1.000000e+00 : f32
    %262 = vector.broadcast %cst_82 : f32 to vector<8x128xf32>
    %263 = arith.addf %262, %261 : vector<8x128xf32>
    %264 = arith.divf %262, %263 : vector<8x128xf32>
    %265 = arith.mulf %256, %196 : vector<8x128xf32>
    %266 = arith.mulf %250, %258 : vector<8x128xf32>
    %267 = arith.addf %265, %266 : vector<8x128xf32>
    %268 = math.tanh %267 : vector<8x128xf32>
    %269 = arith.mulf %264, %268 : vector<8x128xf32>
    %270 = vector.extract_strided_slice %244 {offsets = [0, 0], sizes = [8, 128], strides = [1, 1]} : vector<8x512xf32> to vector<8x128xf32>
    %271 = arith.negf %270 : vector<8x128xf32>
    %272 = math.exp %271 : vector<8x128xf32>
    %cst_83 = arith.constant 1.000000e+00 : f32
    %273 = vector.broadcast %cst_83 : f32 to vector<8x128xf32>
    %274 = arith.addf %273, %272 : vector<8x128xf32>
    %275 = arith.divf %273, %274 : vector<8x128xf32>
    %276 = vector.extract_strided_slice %244 {offsets = [0, 128], sizes = [8, 128], strides = [1, 1]} : vector<8x512xf32> to vector<8x128xf32>
    %277 = arith.negf %276 : vector<8x128xf32>
    %278 = math.exp %277 : vector<8x128xf32>
    %cst_84 = arith.constant 1.000000e+00 : f32
    %279 = vector.broadcast %cst_84 : f32 to vector<8x128xf32>
    %280 = arith.addf %279, %278 : vector<8x128xf32>
    %281 = arith.divf %279, %280 : vector<8x128xf32>
    %282 = vector.extract_strided_slice %244 {offsets = [0, 256], sizes = [8, 128], strides = [1, 1]} : vector<8x512xf32> to vector<8x128xf32>
    %283 = math.tanh %282 : vector<8x128xf32>
    %284 = vector.extract_strided_slice %244 {offsets = [0, 384], sizes = [8, 128], strides = [1, 1]} : vector<8x512xf32> to vector<8x128xf32>
    %285 = arith.negf %284 : vector<8x128xf32>
    %286 = math.exp %285 : vector<8x128xf32>
    %cst_85 = arith.constant 1.000000e+00 : f32
    %287 = vector.broadcast %cst_85 : f32 to vector<8x128xf32>
    %288 = arith.addf %287, %286 : vector<8x128xf32>
    %289 = arith.divf %287, %288 : vector<8x128xf32>
    %290 = arith.mulf %281, %221 : vector<8x128xf32>
    %291 = arith.mulf %275, %283 : vector<8x128xf32>
    %292 = arith.addf %290, %291 : vector<8x128xf32>
    %293 = math.tanh %292 : vector<8x128xf32>
    %294 = arith.mulf %289, %293 : vector<8x128xf32>
    %295 = arith.index_cast %230 : i32 to index
    %c0_86 = arith.constant 0 : index
    %296 = vector.load %arg18[%295, %c0_86] : memref<64x256xf32, #tpu.memory_space<vmem>>, vector<8x128xf32>
    tpu.vector_store %arg18[%295, %c0_86], %269 {strides = array<i32>} : memref<64x256xf32, #tpu.memory_space<vmem>>, vector<8x128xf32>,
    %297 = arith.index_cast %232 : i32 to index
    %c128_87 = arith.constant 128 : index
    %298 = vector.load %arg18[%297, %c128_87] : memref<64x256xf32, #tpu.memory_space<vmem>>, vector<8x128xf32>
    tpu.vector_store %arg18[%297, %c128_87], %294 {strides = array<i32>} : memref<64x256xf32, #tpu.memory_space<vmem>>, vector<8x128xf32>,
    %c4_i32 = arith.constant 4 : i32
    %c7_i32_88 = arith.constant 7 : i32
    %299 = arith.subi %c7_i32_88, %c4_i32 : i32
    %c8_i32_89 = arith.constant 8 : i32
    %300 = arith.muli %c4_i32, %c8_i32_89 : i32
    %301 = tpu.assume_multiple %300, 8 : i32
    %c8_i32_90 = arith.constant 8 : i32
    %302 = arith.muli %299, %c8_i32_90 : i32
    %303 = tpu.assume_multiple %302, 8 : i32
    %304 = arith.index_cast %301 : i32 to index
    %c0_91 = arith.constant 0 : index
    %305 = vector.load %arg19[%304, %c0_91] : memref<64x512xf32, #tpu.memory_space<vmem>>, vector<8x512xf32>
    %306 = arith.truncf %269 : vector<8x128xf32> to vector<8x128xbf16>
    %c0_92 = arith.constant 0 : index
    %c0_93 = arith.constant 0 : index
    %307 = vector.load %arg2[%c0_92, %c0_93] : memref<128x512xbf16, #tpu.memory_space<vmem>>, vector<128x512xbf16>
    %cst_94 = arith.constant dense<0.000000e+00> : vector<8x512xf32>
    %308 = tpu.matmul %306, %307, %cst_94 {dimension_numbers = #tpu.dot_dimension_numbers<[1], [0], [0], [1], [0, 0, 1, 1], [], []>} : vector<8x128xbf16>, vector<128x512xbf16>, vector<8x512xf32> -> vector<8x512xf32>
    %309 = arith.addf %305, %308 : vector<8x512xf32>
    %310 = arith.index_cast %303 : i32 to index
    %c0_95 = arith.constant 0 : index
    %311 = vector.load %arg20[%310, %c0_95] : memref<64x512xf32, #tpu.memory_space<vmem>>, vector<8x512xf32>
    %312 = arith.truncf %294 : vector<8x128xf32> to vector<8x128xbf16>
    %c0_96 = arith.constant 0 : index
    %c0_97 = arith.constant 0 : index
    %313 = vector.load %arg5[%c0_96, %c0_97] : memref<128x512xbf16, #tpu.memory_space<vmem>>, vector<128x512xbf16>
    %cst_98 = arith.constant dense<0.000000e+00> : vector<8x512xf32>
    %314 = tpu.matmul %312, %313, %cst_98 {dimension_numbers = #tpu.dot_dimension_numbers<[1], [0], [0], [1], [0, 0, 1, 1], [], []>} : vector<8x128xbf16>, vector<128x512xbf16>, vector<8x512xf32> -> vector<8x512xf32>
    %315 = arith.addf %311, %314 : vector<8x512xf32>
    %316 = vector.extract_strided_slice %309 {offsets = [0, 0], sizes = [8, 128], strides = [1, 1]} : vector<8x512xf32> to vector<8x128xf32>
    %317 = arith.negf %316 : vector<8x128xf32>
    %318 = math.exp %317 : vector<8x128xf32>
    %cst_99 = arith.constant 1.000000e+00 : f32
    %319 = vector.broadcast %cst_99 : f32 to vector<8x128xf32>
    %320 = arith.addf %319, %318 : vector<8x128xf32>
    %321 = arith.divf %319, %320 : vector<8x128xf32>
    %322 = vector.extract_strided_slice %309 {offsets = [0, 128], sizes = [8, 128], strides = [1, 1]} : vector<8x512xf32> to vector<8x128xf32>
    %323 = arith.negf %322 : vector<8x128xf32>
    %324 = math.exp %323 : vector<8x128xf32>
    %cst_100 = arith.constant 1.000000e+00 : f32
    %325 = vector.broadcast %cst_100 : f32 to vector<8x128xf32>
    %326 = arith.addf %325, %324 : vector<8x128xf32>
    %327 = arith.divf %325, %326 : vector<8x128xf32>
    %328 = vector.extract_strided_slice %309 {offsets = [0, 256], sizes = [8, 128], strides = [1, 1]} : vector<8x512xf32> to vector<8x128xf32>
    %329 = math.tanh %328 : vector<8x128xf32>
    %330 = vector.extract_strided_slice %309 {offsets = [0, 384], sizes = [8, 128], strides = [1, 1]} : vector<8x512xf32> to vector<8x128xf32>
    %331 = arith.negf %330 : vector<8x128xf32>
    %332 = math.exp %331 : vector<8x128xf32>
    %cst_101 = arith.constant 1.000000e+00 : f32
    %333 = vector.broadcast %cst_101 : f32 to vector<8x128xf32>
    %334 = arith.addf %333, %332 : vector<8x128xf32>
    %335 = arith.divf %333, %334 : vector<8x128xf32>
    %336 = arith.mulf %327, %267 : vector<8x128xf32>
    %337 = arith.mulf %321, %329 : vector<8x128xf32>
    %338 = arith.addf %336, %337 : vector<8x128xf32>
    %339 = math.tanh %338 : vector<8x128xf32>
    %340 = arith.mulf %335, %339 : vector<8x128xf32>
    %341 = vector.extract_strided_slice %315 {offsets = [0, 0], sizes = [8, 128], strides = [1, 1]} : vector<8x512xf32> to vector<8x128xf32>
    %342 = arith.negf %341 : vector<8x128xf32>
    %343 = math.exp %342 : vector<8x128xf32>
    %cst_102 = arith.constant 1.000000e+00 : f32
    %344 = vector.broadcast %cst_102 : f32 to vector<8x128xf32>
    %345 = arith.addf %344, %343 : vector<8x128xf32>
    %346 = arith.divf %344, %345 : vector<8x128xf32>
    %347 = vector.extract_strided_slice %315 {offsets = [0, 128], sizes = [8, 128], strides = [1, 1]} : vector<8x512xf32> to vector<8x128xf32>
    %348 = arith.negf %347 : vector<8x128xf32>
    %349 = math.exp %348 : vector<8x128xf32>
    %cst_103 = arith.constant 1.000000e+00 : f32
    %350 = vector.broadcast %cst_103 : f32 to vector<8x128xf32>
    %351 = arith.addf %350, %349 : vector<8x128xf32>
    %352 = arith.divf %350, %351 : vector<8x128xf32>
    %353 = vector.extract_strided_slice %315 {offsets = [0, 256], sizes = [8, 128], strides = [1, 1]} : vector<8x512xf32> to vector<8x128xf32>
    %354 = math.tanh %353 : vector<8x128xf32>
    %355 = vector.extract_strided_slice %315 {offsets = [0, 384], sizes = [8, 128], strides = [1, 1]} : vector<8x512xf32> to vector<8x128xf32>
    %356 = arith.negf %355 : vector<8x128xf32>
    %357 = math.exp %356 : vector<8x128xf32>
    %cst_104 = arith.constant 1.000000e+00 : f32
    %358 = vector.broadcast %cst_104 : f32 to vector<8x128xf32>
    %359 = arith.addf %358, %357 : vector<8x128xf32>
    %360 = arith.divf %358, %359 : vector<8x128xf32>
    %361 = arith.mulf %352, %292 : vector<8x128xf32>
    %362 = arith.mulf %346, %354 : vector<8x128xf32>
    %363 = arith.addf %361, %362 : vector<8x128xf32>
    %364 = math.tanh %363 : vector<8x128xf32>
    %365 = arith.mulf %360, %364 : vector<8x128xf32>
    %366 = arith.index_cast %301 : i32 to index
    %c0_105 = arith.constant 0 : index
    %367 = vector.load %arg18[%366, %c0_105] : memref<64x256xf32, #tpu.memory_space<vmem>>, vector<8x128xf32>
    tpu.vector_store %arg18[%366, %c0_105], %340 {strides = array<i32>} : memref<64x256xf32, #tpu.memory_space<vmem>>, vector<8x128xf32>,
    %368 = arith.index_cast %303 : i32 to index
    %c128_106 = arith.constant 128 : index
    %369 = vector.load %arg18[%368, %c128_106] : memref<64x256xf32, #tpu.memory_space<vmem>>, vector<8x128xf32>
    tpu.vector_store %arg18[%368, %c128_106], %365 {strides = array<i32>} : memref<64x256xf32, #tpu.memory_space<vmem>>, vector<8x128xf32>,
    %c5_i32 = arith.constant 5 : i32
    %c7_i32_107 = arith.constant 7 : i32
    %370 = arith.subi %c7_i32_107, %c5_i32 : i32
    %c8_i32_108 = arith.constant 8 : i32
    %371 = arith.muli %c5_i32, %c8_i32_108 : i32
    %372 = tpu.assume_multiple %371, 8 : i32
    %c8_i32_109 = arith.constant 8 : i32
    %373 = arith.muli %370, %c8_i32_109 : i32
    %374 = tpu.assume_multiple %373, 8 : i32
    %375 = arith.index_cast %372 : i32 to index
    %c0_110 = arith.constant 0 : index
    %376 = vector.load %arg19[%375, %c0_110] : memref<64x512xf32, #tpu.memory_space<vmem>>, vector<8x512xf32>
    %377 = arith.truncf %340 : vector<8x128xf32> to vector<8x128xbf16>
    %c0_111 = arith.constant 0 : index
    %c0_112 = arith.constant 0 : index
    %378 = vector.load %arg2[%c0_111, %c0_112] : memref<128x512xbf16, #tpu.memory_space<vmem>>, vector<128x512xbf16>
    %cst_113 = arith.constant dense<0.000000e+00> : vector<8x512xf32>
    %379 = tpu.matmul %377, %378, %cst_113 {dimension_numbers = #tpu.dot_dimension_numbers<[1], [0], [0], [1], [0, 0, 1, 1], [], []>} : vector<8x128xbf16>, vector<128x512xbf16>, vector<8x512xf32> -> vector<8x512xf32>
    %380 = arith.addf %376, %379 : vector<8x512xf32>
    %381 = arith.index_cast %374 : i32 to index
    %c0_114 = arith.constant 0 : index
    %382 = vector.load %arg20[%381, %c0_114] : memref<64x512xf32, #tpu.memory_space<vmem>>, vector<8x512xf32>
    %383 = arith.truncf %365 : vector<8x128xf32> to vector<8x128xbf16>
    %c0_115 = arith.constant 0 : index
    %c0_116 = arith.constant 0 : index
    %384 = vector.load %arg5[%c0_115, %c0_116] : memref<128x512xbf16, #tpu.memory_space<vmem>>, vector<128x512xbf16>
    %cst_117 = arith.constant dense<0.000000e+00> : vector<8x512xf32>
    %385 = tpu.matmul %383, %384, %cst_117 {dimension_numbers = #tpu.dot_dimension_numbers<[1], [0], [0], [1], [0, 0, 1, 1], [], []>} : vector<8x128xbf16>, vector<128x512xbf16>, vector<8x512xf32> -> vector<8x512xf32>
    %386 = arith.addf %382, %385 : vector<8x512xf32>
    %387 = vector.extract_strided_slice %380 {offsets = [0, 0], sizes = [8, 128], strides = [1, 1]} : vector<8x512xf32> to vector<8x128xf32>
    %388 = arith.negf %387 : vector<8x128xf32>
    %389 = math.exp %388 : vector<8x128xf32>
    %cst_118 = arith.constant 1.000000e+00 : f32
    %390 = vector.broadcast %cst_118 : f32 to vector<8x128xf32>
    %391 = arith.addf %390, %389 : vector<8x128xf32>
    %392 = arith.divf %390, %391 : vector<8x128xf32>
    %393 = vector.extract_strided_slice %380 {offsets = [0, 128], sizes = [8, 128], strides = [1, 1]} : vector<8x512xf32> to vector<8x128xf32>
    %394 = arith.negf %393 : vector<8x128xf32>
    %395 = math.exp %394 : vector<8x128xf32>
    %cst_119 = arith.constant 1.000000e+00 : f32
    %396 = vector.broadcast %cst_119 : f32 to vector<8x128xf32>
    %397 = arith.addf %396, %395 : vector<8x128xf32>
    %398 = arith.divf %396, %397 : vector<8x128xf32>
    %399 = vector.extract_strided_slice %380 {offsets = [0, 256], sizes = [8, 128], strides = [1, 1]} : vector<8x512xf32> to vector<8x128xf32>
    %400 = math.tanh %399 : vector<8x128xf32>
    %401 = vector.extract_strided_slice %380 {offsets = [0, 384], sizes = [8, 128], strides = [1, 1]} : vector<8x512xf32> to vector<8x128xf32>
    %402 = arith.negf %401 : vector<8x128xf32>
    %403 = math.exp %402 : vector<8x128xf32>
    %cst_120 = arith.constant 1.000000e+00 : f32
    %404 = vector.broadcast %cst_120 : f32 to vector<8x128xf32>
    %405 = arith.addf %404, %403 : vector<8x128xf32>
    %406 = arith.divf %404, %405 : vector<8x128xf32>
    %407 = arith.mulf %398, %338 : vector<8x128xf32>
    %408 = arith.mulf %392, %400 : vector<8x128xf32>
    %409 = arith.addf %407, %408 : vector<8x128xf32>
    %410 = math.tanh %409 : vector<8x128xf32>
    %411 = arith.mulf %406, %410 : vector<8x128xf32>
    %412 = vector.extract_strided_slice %386 {offsets = [0, 0], sizes = [8, 128], strides = [1, 1]} : vector<8x512xf32> to vector<8x128xf32>
    %413 = arith.negf %412 : vector<8x128xf32>
    %414 = math.exp %413 : vector<8x128xf32>
    %cst_121 = arith.constant 1.000000e+00 : f32
    %415 = vector.broadcast %cst_121 : f32 to vector<8x128xf32>
    %416 = arith.addf %415, %414 : vector<8x128xf32>
    %417 = arith.divf %415, %416 : vector<8x128xf32>
    %418 = vector.extract_strided_slice %386 {offsets = [0, 128], sizes = [8, 128], strides = [1, 1]} : vector<8x512xf32> to vector<8x128xf32>
    %419 = arith.negf %418 : vector<8x128xf32>
    %420 = math.exp %419 : vector<8x128xf32>
    %cst_122 = arith.constant 1.000000e+00 : f32
    %421 = vector.broadcast %cst_122 : f32 to vector<8x128xf32>
    %422 = arith.addf %421, %420 : vector<8x128xf32>
    %423 = arith.divf %421, %422 : vector<8x128xf32>
    %424 = vector.extract_strided_slice %386 {offsets = [0, 256], sizes = [8, 128], strides = [1, 1]} : vector<8x512xf32> to vector<8x128xf32>
    %425 = math.tanh %424 : vector<8x128xf32>
    %426 = vector.extract_strided_slice %386 {offsets = [0, 384], sizes = [8, 128], strides = [1, 1]} : vector<8x512xf32> to vector<8x128xf32>
    %427 = arith.negf %426 : vector<8x128xf32>
    %428 = math.exp %427 : vector<8x128xf32>
    %cst_123 = arith.constant 1.000000e+00 : f32
    %429 = vector.broadcast %cst_123 : f32 to vector<8x128xf32>
    %430 = arith.addf %429, %428 : vector<8x128xf32>
    %431 = arith.divf %429, %430 : vector<8x128xf32>
    %432 = arith.mulf %423, %363 : vector<8x128xf32>
    %433 = arith.mulf %417, %425 : vector<8x128xf32>
    %434 = arith.addf %432, %433 : vector<8x128xf32>
    %435 = math.tanh %434 : vector<8x128xf32>
    %436 = arith.mulf %431, %435 : vector<8x128xf32>
    %437 = arith.index_cast %372 : i32 to index
    %c0_124 = arith.constant 0 : index
    %438 = vector.load %arg18[%437, %c0_124] : memref<64x256xf32, #tpu.memory_space<vmem>>, vector<8x128xf32>
    tpu.vector_store %arg18[%437, %c0_124], %411 {strides = array<i32>} : memref<64x256xf32, #tpu.memory_space<vmem>>, vector<8x128xf32>,
    %439 = arith.index_cast %374 : i32 to index
    %c128_125 = arith.constant 128 : index
    %440 = vector.load %arg18[%439, %c128_125] : memref<64x256xf32, #tpu.memory_space<vmem>>, vector<8x128xf32>
    tpu.vector_store %arg18[%439, %c128_125], %436 {strides = array<i32>} : memref<64x256xf32, #tpu.memory_space<vmem>>, vector<8x128xf32>,
    %c6_i32 = arith.constant 6 : i32
    %c7_i32_126 = arith.constant 7 : i32
    %441 = arith.subi %c7_i32_126, %c6_i32 : i32
    %c8_i32_127 = arith.constant 8 : i32
    %442 = arith.muli %c6_i32, %c8_i32_127 : i32
    %443 = tpu.assume_multiple %442, 8 : i32
    %c8_i32_128 = arith.constant 8 : i32
    %444 = arith.muli %441, %c8_i32_128 : i32
    %445 = tpu.assume_multiple %444, 8 : i32
    %446 = arith.index_cast %443 : i32 to index
    %c0_129 = arith.constant 0 : index
    %447 = vector.load %arg19[%446, %c0_129] : memref<64x512xf32, #tpu.memory_space<vmem>>, vector<8x512xf32>
    %448 = arith.truncf %411 : vector<8x128xf32> to vector<8x128xbf16>
    %c0_130 = arith.constant 0 : index
    %c0_131 = arith.constant 0 : index
    %449 = vector.load %arg2[%c0_130, %c0_131] : memref<128x512xbf16, #tpu.memory_space<vmem>>, vector<128x512xbf16>
    %cst_132 = arith.constant dense<0.000000e+00> : vector<8x512xf32>
    %450 = tpu.matmul %448, %449, %cst_132 {dimension_numbers = #tpu.dot_dimension_numbers<[1], [0], [0], [1], [0, 0, 1, 1], [], []>} : vector<8x128xbf16>, vector<128x512xbf16>, vector<8x512xf32> -> vector<8x512xf32>
    %451 = arith.addf %447, %450 : vector<8x512xf32>
    %452 = arith.index_cast %445 : i32 to index
    %c0_133 = arith.constant 0 : index
    %453 = vector.load %arg20[%452, %c0_133] : memref<64x512xf32, #tpu.memory_space<vmem>>, vector<8x512xf32>
    %454 = arith.truncf %436 : vector<8x128xf32> to vector<8x128xbf16>
    %c0_134 = arith.constant 0 : index
    %c0_135 = arith.constant 0 : index
    %455 = vector.load %arg5[%c0_134, %c0_135] : memref<128x512xbf16, #tpu.memory_space<vmem>>, vector<128x512xbf16>
    %cst_136 = arith.constant dense<0.000000e+00> : vector<8x512xf32>
    %456 = tpu.matmul %454, %455, %cst_136 {dimension_numbers = #tpu.dot_dimension_numbers<[1], [0], [0], [1], [0, 0, 1, 1], [], []>} : vector<8x128xbf16>, vector<128x512xbf16>, vector<8x512xf32> -> vector<8x512xf32>
    %457 = arith.addf %453, %456 : vector<8x512xf32>
    %458 = vector.extract_strided_slice %451 {offsets = [0, 0], sizes = [8, 128], strides = [1, 1]} : vector<8x512xf32> to vector<8x128xf32>
    %459 = arith.negf %458 : vector<8x128xf32>
    %460 = math.exp %459 : vector<8x128xf32>
    %cst_137 = arith.constant 1.000000e+00 : f32
    %461 = vector.broadcast %cst_137 : f32 to vector<8x128xf32>
    %462 = arith.addf %461, %460 : vector<8x128xf32>
    %463 = arith.divf %461, %462 : vector<8x128xf32>
    %464 = vector.extract_strided_slice %451 {offsets = [0, 128], sizes = [8, 128], strides = [1, 1]} : vector<8x512xf32> to vector<8x128xf32>
    %465 = arith.negf %464 : vector<8x128xf32>
    %466 = math.exp %465 : vector<8x128xf32>
    %cst_138 = arith.constant 1.000000e+00 : f32
    %467 = vector.broadcast %cst_138 : f32 to vector<8x128xf32>
    %468 = arith.addf %467, %466 : vector<8x128xf32>
    %469 = arith.divf %467, %468 : vector<8x128xf32>
    %470 = vector.extract_strided_slice %451 {offsets = [0, 256], sizes = [8, 128], strides = [1, 1]} : vector<8x512xf32> to vector<8x128xf32>
    %471 = math.tanh %470 : vector<8x128xf32>
    %472 = vector.extract_strided_slice %451 {offsets = [0, 384], sizes = [8, 128], strides = [1, 1]} : vector<8x512xf32> to vector<8x128xf32>
    %473 = arith.negf %472 : vector<8x128xf32>
    %474 = math.exp %473 : vector<8x128xf32>
    %cst_139 = arith.constant 1.000000e+00 : f32
    %475 = vector.broadcast %cst_139 : f32 to vector<8x128xf32>
    %476 = arith.addf %475, %474 : vector<8x128xf32>
    %477 = arith.divf %475, %476 : vector<8x128xf32>
    %478 = arith.mulf %469, %409 : vector<8x128xf32>
    %479 = arith.mulf %463, %471 : vector<8x128xf32>
    %480 = arith.addf %478, %479 : vector<8x128xf32>
    %481 = math.tanh %480 : vector<8x128xf32>
    %482 = arith.mulf %477, %481 : vector<8x128xf32>
    %483 = vector.extract_strided_slice %457 {offsets = [0, 0], sizes = [8, 128], strides = [1, 1]} : vector<8x512xf32> to vector<8x128xf32>
    %484 = arith.negf %483 : vector<8x128xf32>
    %485 = math.exp %484 : vector<8x128xf32>
    %cst_140 = arith.constant 1.000000e+00 : f32
    %486 = vector.broadcast %cst_140 : f32 to vector<8x128xf32>
    %487 = arith.addf %486, %485 : vector<8x128xf32>
    %488 = arith.divf %486, %487 : vector<8x128xf32>
    %489 = vector.extract_strided_slice %457 {offsets = [0, 128], sizes = [8, 128], strides = [1, 1]} : vector<8x512xf32> to vector<8x128xf32>
    %490 = arith.negf %489 : vector<8x128xf32>
    %491 = math.exp %490 : vector<8x128xf32>
    %cst_141 = arith.constant 1.000000e+00 : f32
    %492 = vector.broadcast %cst_141 : f32 to vector<8x128xf32>
    %493 = arith.addf %492, %491 : vector<8x128xf32>
    %494 = arith.divf %492, %493 : vector<8x128xf32>
    %495 = vector.extract_strided_slice %457 {offsets = [0, 256], sizes = [8, 128], strides = [1, 1]} : vector<8x512xf32> to vector<8x128xf32>
    %496 = math.tanh %495 : vector<8x128xf32>
    %497 = vector.extract_strided_slice %457 {offsets = [0, 384], sizes = [8, 128], strides = [1, 1]} : vector<8x512xf32> to vector<8x128xf32>
    %498 = arith.negf %497 : vector<8x128xf32>
    %499 = math.exp %498 : vector<8x128xf32>
    %cst_142 = arith.constant 1.000000e+00 : f32
    %500 = vector.broadcast %cst_142 : f32 to vector<8x128xf32>
    %501 = arith.addf %500, %499 : vector<8x128xf32>
    %502 = arith.divf %500, %501 : vector<8x128xf32>
    %503 = arith.mulf %494, %434 : vector<8x128xf32>
    %504 = arith.mulf %488, %496 : vector<8x128xf32>
    %505 = arith.addf %503, %504 : vector<8x128xf32>
    %506 = math.tanh %505 : vector<8x128xf32>
    %507 = arith.mulf %502, %506 : vector<8x128xf32>
    %508 = arith.index_cast %443 : i32 to index
    %c0_143 = arith.constant 0 : index
    %509 = vector.load %arg18[%508, %c0_143] : memref<64x256xf32, #tpu.memory_space<vmem>>, vector<8x128xf32>
    tpu.vector_store %arg18[%508, %c0_143], %482 {strides = array<i32>} : memref<64x256xf32, #tpu.memory_space<vmem>>, vector<8x128xf32>,
    %510 = arith.index_cast %445 : i32 to index
    %c128_144 = arith.constant 128 : index
    %511 = vector.load %arg18[%510, %c128_144] : memref<64x256xf32, #tpu.memory_space<vmem>>, vector<8x128xf32>
    tpu.vector_store %arg18[%510, %c128_144], %507 {strides = array<i32>} : memref<64x256xf32, #tpu.memory_space<vmem>>, vector<8x128xf32>,
    %c7_i32_145 = arith.constant 7 : i32
    %c7_i32_146 = arith.constant 7 : i32
    %512 = arith.subi %c7_i32_146, %c7_i32_145 : i32
    %c8_i32_147 = arith.constant 8 : i32
    %513 = arith.muli %c7_i32_145, %c8_i32_147 : i32
    %514 = tpu.assume_multiple %513, 8 : i32
    %c8_i32_148 = arith.constant 8 : i32
    %515 = arith.muli %512, %c8_i32_148 : i32
    %516 = tpu.assume_multiple %515, 8 : i32
    %517 = arith.index_cast %514 : i32 to index
    %c0_149 = arith.constant 0 : index
    %518 = vector.load %arg19[%517, %c0_149] : memref<64x512xf32, #tpu.memory_space<vmem>>, vector<8x512xf32>
    %519 = arith.truncf %482 : vector<8x128xf32> to vector<8x128xbf16>
    %c0_150 = arith.constant 0 : index
    %c0_151 = arith.constant 0 : index
    %520 = vector.load %arg2[%c0_150, %c0_151] : memref<128x512xbf16, #tpu.memory_space<vmem>>, vector<128x512xbf16>
    %cst_152 = arith.constant dense<0.000000e+00> : vector<8x512xf32>
    %521 = tpu.matmul %519, %520, %cst_152 {dimension_numbers = #tpu.dot_dimension_numbers<[1], [0], [0], [1], [0, 0, 1, 1], [], []>} : vector<8x128xbf16>, vector<128x512xbf16>, vector<8x512xf32> -> vector<8x512xf32>
    %522 = arith.addf %518, %521 : vector<8x512xf32>
    %523 = arith.index_cast %516 : i32 to index
    %c0_153 = arith.constant 0 : index
    %524 = vector.load %arg20[%523, %c0_153] : memref<64x512xf32, #tpu.memory_space<vmem>>, vector<8x512xf32>
    %525 = arith.truncf %507 : vector<8x128xf32> to vector<8x128xbf16>
    %c0_154 = arith.constant 0 : index
    %c0_155 = arith.constant 0 : index
    %526 = vector.load %arg5[%c0_154, %c0_155] : memref<128x512xbf16, #tpu.memory_space<vmem>>, vector<128x512xbf16>
    %cst_156 = arith.constant dense<0.000000e+00> : vector<8x512xf32>
    %527 = tpu.matmul %525, %526, %cst_156 {dimension_numbers = #tpu.dot_dimension_numbers<[1], [0], [0], [1], [0, 0, 1, 1], [], []>} : vector<8x128xbf16>, vector<128x512xbf16>, vector<8x512xf32> -> vector<8x512xf32>
    %528 = arith.addf %524, %527 : vector<8x512xf32>
    %529 = vector.extract_strided_slice %522 {offsets = [0, 0], sizes = [8, 128], strides = [1, 1]} : vector<8x512xf32> to vector<8x128xf32>
    %530 = arith.negf %529 : vector<8x128xf32>
    %531 = math.exp %530 : vector<8x128xf32>
    %cst_157 = arith.constant 1.000000e+00 : f32
    %532 = vector.broadcast %cst_157 : f32 to vector<8x128xf32>
    %533 = arith.addf %532, %531 : vector<8x128xf32>
    %534 = arith.divf %532, %533 : vector<8x128xf32>
    %535 = vector.extract_strided_slice %522 {offsets = [0, 128], sizes = [8, 128], strides = [1, 1]} : vector<8x512xf32> to vector<8x128xf32>
    %536 = arith.negf %535 : vector<8x128xf32>
    %537 = math.exp %536 : vector<8x128xf32>
    %cst_158 = arith.constant 1.000000e+00 : f32
    %538 = vector.broadcast %cst_158 : f32 to vector<8x128xf32>
    %539 = arith.addf %538, %537 : vector<8x128xf32>
    %540 = arith.divf %538, %539 : vector<8x128xf32>
    %541 = vector.extract_strided_slice %522 {offsets = [0, 256], sizes = [8, 128], strides = [1, 1]} : vector<8x512xf32> to vector<8x128xf32>
    %542 = math.tanh %541 : vector<8x128xf32>
    %543 = vector.extract_strided_slice %522 {offsets = [0, 384], sizes = [8, 128], strides = [1, 1]} : vector<8x512xf32> to vector<8x128xf32>
    %544 = arith.negf %543 : vector<8x128xf32>
    %545 = math.exp %544 : vector<8x128xf32>
    %cst_159 = arith.constant 1.000000e+00 : f32
    %546 = vector.broadcast %cst_159 : f32 to vector<8x128xf32>
    %547 = arith.addf %546, %545 : vector<8x128xf32>
    %548 = arith.divf %546, %547 : vector<8x128xf32>
    %549 = arith.mulf %540, %480 : vector<8x128xf32>
    %550 = arith.mulf %534, %542 : vector<8x128xf32>
    %551 = arith.addf %549, %550 : vector<8x128xf32>
    %552 = math.tanh %551 : vector<8x128xf32>
    %553 = arith.mulf %548, %552 : vector<8x128xf32>
    %554 = vector.extract_strided_slice %528 {offsets = [0, 0], sizes = [8, 128], strides = [1, 1]} : vector<8x512xf32> to vector<8x128xf32>
    %555 = arith.negf %554 : vector<8x128xf32>
    %556 = math.exp %555 : vector<8x128xf32>
    %cst_160 = arith.constant 1.000000e+00 : f32
    %557 = vector.broadcast %cst_160 : f32 to vector<8x128xf32>
    %558 = arith.addf %557, %556 : vector<8x128xf32>
    %559 = arith.divf %557, %558 : vector<8x128xf32>
    %560 = vector.extract_strided_slice %528 {offsets = [0, 128], sizes = [8, 128], strides = [1, 1]} : vector<8x512xf32> to vector<8x128xf32>
    %561 = arith.negf %560 : vector<8x128xf32>
    %562 = math.exp %561 : vector<8x128xf32>
    %cst_161 = arith.constant 1.000000e+00 : f32
    %563 = vector.broadcast %cst_161 : f32 to vector<8x128xf32>
    %564 = arith.addf %563, %562 : vector<8x128xf32>
    %565 = arith.divf %563, %564 : vector<8x128xf32>
    %566 = vector.extract_strided_slice %528 {offsets = [0, 256], sizes = [8, 128], strides = [1, 1]} : vector<8x512xf32> to vector<8x128xf32>
    %567 = math.tanh %566 : vector<8x128xf32>
    %568 = vector.extract_strided_slice %528 {offsets = [0, 384], sizes = [8, 128], strides = [1, 1]} : vector<8x512xf32> to vector<8x128xf32>
    %569 = arith.negf %568 : vector<8x128xf32>
    %570 = math.exp %569 : vector<8x128xf32>
    %cst_162 = arith.constant 1.000000e+00 : f32
    %571 = vector.broadcast %cst_162 : f32 to vector<8x128xf32>
    %572 = arith.addf %571, %570 : vector<8x128xf32>
    %573 = arith.divf %571, %572 : vector<8x128xf32>
    %574 = arith.mulf %565, %505 : vector<8x128xf32>
    %575 = arith.mulf %559, %567 : vector<8x128xf32>
    %576 = arith.addf %574, %575 : vector<8x128xf32>
    %577 = math.tanh %576 : vector<8x128xf32>
    %578 = arith.mulf %573, %577 : vector<8x128xf32>
    %579 = arith.index_cast %514 : i32 to index
    %c0_163 = arith.constant 0 : index
    %580 = vector.load %arg18[%579, %c0_163] : memref<64x256xf32, #tpu.memory_space<vmem>>, vector<8x128xf32>
    tpu.vector_store %arg18[%579, %c0_163], %553 {strides = array<i32>} : memref<64x256xf32, #tpu.memory_space<vmem>>, vector<8x128xf32>,
    %581 = arith.index_cast %516 : i32 to index
    %c128_164 = arith.constant 128 : index
    %582 = vector.load %arg18[%581, %c128_164] : memref<64x256xf32, #tpu.memory_space<vmem>>, vector<8x128xf32>
    tpu.vector_store %arg18[%581, %c128_164], %578 {strides = array<i32>} : memref<64x256xf32, #tpu.memory_space<vmem>>, vector<8x128xf32>,
    %c8_i32_165 = arith.constant 8 : i32
    %c0_166 = arith.constant 0 : index
    %c0_167 = arith.constant 0 : index
    %583 = vector.load %arg18[%c0_166, %c0_167] : memref<64x256xf32, #tpu.memory_space<vmem>>, vector<64x256xf32>
    %584 = arith.truncf %583 : vector<64x256xf32> to vector<64x256xbf16>
    %c0_168 = arith.constant 0 : index
    %c0_169 = arith.constant 0 : index
    %585 = vector.load %arg7[%c0_168, %c0_169] : memref<256x512xbf16, #tpu.memory_space<vmem>>, vector<256x512xbf16>
    %cst_170 = arith.constant dense<0.000000e+00> : vector<64x512xf32>
    %586 = tpu.matmul %584, %585, %cst_170 {dimension_numbers = #tpu.dot_dimension_numbers<[1], [0], [0], [1], [0, 0, 1, 1], [], []>} : vector<64x256xbf16>, vector<256x512xbf16>, vector<64x512xf32> -> vector<64x512xf32>
    %c0_171 = arith.constant 0 : index
    %c0_172 = arith.constant 0 : index
    %587 = vector.load %arg9[%c0_171, %c0_172] : memref<1x512xf32, #tpu.memory_space<vmem>>, vector<1x512xf32>
    %588 = vector.broadcast %587 : vector<1x512xf32> to vector<64x512xf32>
    %589 = arith.addf %586, %588 : vector<64x512xf32>
    %c0_173 = arith.constant 0 : index
    %c0_174 = arith.constant 0 : index
    %590 = vector.load %arg19[%c0_173, %c0_174] : memref<64x512xf32, #tpu.memory_space<vmem>>, vector<64x512xf32>
    tpu.vector_store %arg19[%c0_173, %c0_174], %589 {strides = array<i32>} : memref<64x512xf32, #tpu.memory_space<vmem>>, vector<64x512xf32>,
    %c0_175 = arith.constant 0 : index
    %c0_176 = arith.constant 0 : index
    %591 = vector.load %arg10[%c0_175, %c0_176] : memref<256x512xbf16, #tpu.memory_space<vmem>>, vector<256x512xbf16>
    %cst_177 = arith.constant dense<0.000000e+00> : vector<64x512xf32>
    %592 = tpu.matmul %584, %591, %cst_177 {dimension_numbers = #tpu.dot_dimension_numbers<[1], [0], [0], [1], [0, 0, 1, 1], [], []>} : vector<64x256xbf16>, vector<256x512xbf16>, vector<64x512xf32> -> vector<64x512xf32>
    %c0_178 = arith.constant 0 : index
    %c0_179 = arith.constant 0 : index
    %593 = vector.load %arg12[%c0_178, %c0_179] : memref<1x512xf32, #tpu.memory_space<vmem>>, vector<1x512xf32>
    %594 = vector.broadcast %593 : vector<1x512xf32> to vector<64x512xf32>
    %595 = arith.addf %592, %594 : vector<64x512xf32>
    %c0_180 = arith.constant 0 : index
    %c0_181 = arith.constant 0 : index
    %596 = vector.load %arg20[%c0_180, %c0_181] : memref<64x512xf32, #tpu.memory_space<vmem>>, vector<64x512xf32>
    tpu.vector_store %arg20[%c0_180, %c0_181], %595 {strides = array<i32>} : memref<64x512xf32, #tpu.memory_space<vmem>>, vector<64x512xf32>,
    %cst_182 = arith.constant 0.000000e+00 : f32
    %597 = vector.broadcast %cst_182 : f32 to vector<8x128xf32>
    %c0_i32_183 = arith.constant 0 : i32
    %c7_i32_184 = arith.constant 7 : i32
    %598 = arith.subi %c7_i32_184, %c0_i32_183 : i32
    %c8_i32_185 = arith.constant 8 : i32
    %599 = arith.muli %c0_i32_183, %c8_i32_185 : i32
    %600 = tpu.assume_multiple %599, 8 : i32
    %c8_i32_186 = arith.constant 8 : i32
    %601 = arith.muli %598, %c8_i32_186 : i32
    %602 = tpu.assume_multiple %601, 8 : i32
    %603 = arith.index_cast %600 : i32 to index
    %c0_187 = arith.constant 0 : index
    %604 = vector.load %arg19[%603, %c0_187] : memref<64x512xf32, #tpu.memory_space<vmem>>, vector<8x512xf32>
    %605 = arith.truncf %597 : vector<8x128xf32> to vector<8x128xbf16>
    %c0_188 = arith.constant 0 : index
    %c0_189 = arith.constant 0 : index
    %606 = vector.load %arg8[%c0_188, %c0_189] : memref<128x512xbf16, #tpu.memory_space<vmem>>, vector<128x512xbf16>
    %cst_190 = arith.constant dense<0.000000e+00> : vector<8x512xf32>
    %607 = tpu.matmul %605, %606, %cst_190 {dimension_numbers = #tpu.dot_dimension_numbers<[1], [0], [0], [1], [0, 0, 1, 1], [], []>} : vector<8x128xbf16>, vector<128x512xbf16>, vector<8x512xf32> -> vector<8x512xf32>
    %608 = arith.addf %604, %607 : vector<8x512xf32>
    %609 = arith.index_cast %602 : i32 to index
    %c0_191 = arith.constant 0 : index
    %610 = vector.load %arg20[%609, %c0_191] : memref<64x512xf32, #tpu.memory_space<vmem>>, vector<8x512xf32>
    %611 = arith.truncf %597 : vector<8x128xf32> to vector<8x128xbf16>
    %c0_192 = arith.constant 0 : index
    %c0_193 = arith.constant 0 : index
    %612 = vector.load %arg11[%c0_192, %c0_193] : memref<128x512xbf16, #tpu.memory_space<vmem>>, vector<128x512xbf16>
    %cst_194 = arith.constant dense<0.000000e+00> : vector<8x512xf32>
    %613 = tpu.matmul %611, %612, %cst_194 {dimension_numbers = #tpu.dot_dimension_numbers<[1], [0], [0], [1], [0, 0, 1, 1], [], []>} : vector<8x128xbf16>, vector<128x512xbf16>, vector<8x512xf32> -> vector<8x512xf32>
    %614 = arith.addf %610, %613 : vector<8x512xf32>
    %615 = vector.extract_strided_slice %608 {offsets = [0, 0], sizes = [8, 128], strides = [1, 1]} : vector<8x512xf32> to vector<8x128xf32>
    %616 = arith.negf %615 : vector<8x128xf32>
    %617 = math.exp %616 : vector<8x128xf32>
    %cst_195 = arith.constant 1.000000e+00 : f32
    %618 = vector.broadcast %cst_195 : f32 to vector<8x128xf32>
    %619 = arith.addf %618, %617 : vector<8x128xf32>
    %620 = arith.divf %618, %619 : vector<8x128xf32>
    %621 = vector.extract_strided_slice %608 {offsets = [0, 128], sizes = [8, 128], strides = [1, 1]} : vector<8x512xf32> to vector<8x128xf32>
    %622 = arith.negf %621 : vector<8x128xf32>
    %623 = math.exp %622 : vector<8x128xf32>
    %cst_196 = arith.constant 1.000000e+00 : f32
    %624 = vector.broadcast %cst_196 : f32 to vector<8x128xf32>
    %625 = arith.addf %624, %623 : vector<8x128xf32>
    %626 = arith.divf %624, %625 : vector<8x128xf32>
    %627 = vector.extract_strided_slice %608 {offsets = [0, 256], sizes = [8, 128], strides = [1, 1]} : vector<8x512xf32> to vector<8x128xf32>
    %628 = math.tanh %627 : vector<8x128xf32>
    %629 = vector.extract_strided_slice %608 {offsets = [0, 384], sizes = [8, 128], strides = [1, 1]} : vector<8x512xf32> to vector<8x128xf32>
    %630 = arith.negf %629 : vector<8x128xf32>
    %631 = math.exp %630 : vector<8x128xf32>
    %cst_197 = arith.constant 1.000000e+00 : f32
    %632 = vector.broadcast %cst_197 : f32 to vector<8x128xf32>
    %633 = arith.addf %632, %631 : vector<8x128xf32>
    %634 = arith.divf %632, %633 : vector<8x128xf32>
    %635 = arith.mulf %626, %597 : vector<8x128xf32>
    %636 = arith.mulf %620, %628 : vector<8x128xf32>
    %637 = arith.addf %635, %636 : vector<8x128xf32>
    %638 = math.tanh %637 : vector<8x128xf32>
    %639 = arith.mulf %634, %638 : vector<8x128xf32>
    %640 = vector.extract_strided_slice %614 {offsets = [0, 0], sizes = [8, 128], strides = [1, 1]} : vector<8x512xf32> to vector<8x128xf32>
    %641 = arith.negf %640 : vector<8x128xf32>
    %642 = math.exp %641 : vector<8x128xf32>
    %cst_198 = arith.constant 1.000000e+00 : f32
    %643 = vector.broadcast %cst_198 : f32 to vector<8x128xf32>
    %644 = arith.addf %643, %642 : vector<8x128xf32>
    %645 = arith.divf %643, %644 : vector<8x128xf32>
    %646 = vector.extract_strided_slice %614 {offsets = [0, 128], sizes = [8, 128], strides = [1, 1]} : vector<8x512xf32> to vector<8x128xf32>
    %647 = arith.negf %646 : vector<8x128xf32>
    %648 = math.exp %647 : vector<8x128xf32>
    %cst_199 = arith.constant 1.000000e+00 : f32
    %649 = vector.broadcast %cst_199 : f32 to vector<8x128xf32>
    %650 = arith.addf %649, %648 : vector<8x128xf32>
    %651 = arith.divf %649, %650 : vector<8x128xf32>
    %652 = vector.extract_strided_slice %614 {offsets = [0, 256], sizes = [8, 128], strides = [1, 1]} : vector<8x512xf32> to vector<8x128xf32>
    %653 = math.tanh %652 : vector<8x128xf32>
    %654 = vector.extract_strided_slice %614 {offsets = [0, 384], sizes = [8, 128], strides = [1, 1]} : vector<8x512xf32> to vector<8x128xf32>
    %655 = arith.negf %654 : vector<8x128xf32>
    %656 = math.exp %655 : vector<8x128xf32>
    %cst_200 = arith.constant 1.000000e+00 : f32
    %657 = vector.broadcast %cst_200 : f32 to vector<8x128xf32>
    %658 = arith.addf %657, %656 : vector<8x128xf32>
    %659 = arith.divf %657, %658 : vector<8x128xf32>
    %660 = arith.mulf %651, %597 : vector<8x128xf32>
    %661 = arith.mulf %645, %653 : vector<8x128xf32>
    %662 = arith.addf %660, %661 : vector<8x128xf32>
    %663 = math.tanh %662 : vector<8x128xf32>
    %664 = arith.mulf %659, %663 : vector<8x128xf32>
    %665 = arith.index_cast %600 : i32 to index
    %c0_201 = arith.constant 0 : index
    %666 = vector.load %arg18[%665, %c0_201] : memref<64x256xf32, #tpu.memory_space<vmem>>, vector<8x128xf32>
    tpu.vector_store %arg18[%665, %c0_201], %639 {strides = array<i32>} : memref<64x256xf32, #tpu.memory_space<vmem>>, vector<8x128xf32>,
    %667 = arith.index_cast %602 : i32 to index
    %c128_202 = arith.constant 128 : index
    %668 = vector.load %arg18[%667, %c128_202] : memref<64x256xf32, #tpu.memory_space<vmem>>, vector<8x128xf32>
    tpu.vector_store %arg18[%667, %c128_202], %664 {strides = array<i32>} : memref<64x256xf32, #tpu.memory_space<vmem>>, vector<8x128xf32>,
    %c1_i32_203 = arith.constant 1 : i32
    %c7_i32_204 = arith.constant 7 : i32
    %669 = arith.subi %c7_i32_204, %c1_i32_203 : i32
    %c8_i32_205 = arith.constant 8 : i32
    %670 = arith.muli %c1_i32_203, %c8_i32_205 : i32
    %671 = tpu.assume_multiple %670, 8 : i32
    %c8_i32_206 = arith.constant 8 : i32
    %672 = arith.muli %669, %c8_i32_206 : i32
    %673 = tpu.assume_multiple %672, 8 : i32
    %674 = arith.index_cast %671 : i32 to index
    %c0_207 = arith.constant 0 : index
    %675 = vector.load %arg19[%674, %c0_207] : memref<64x512xf32, #tpu.memory_space<vmem>>, vector<8x512xf32>
    %676 = arith.truncf %639 : vector<8x128xf32> to vector<8x128xbf16>
    %c0_208 = arith.constant 0 : index
    %c0_209 = arith.constant 0 : index
    %677 = vector.load %arg8[%c0_208, %c0_209] : memref<128x512xbf16, #tpu.memory_space<vmem>>, vector<128x512xbf16>
    %cst_210 = arith.constant dense<0.000000e+00> : vector<8x512xf32>
    %678 = tpu.matmul %676, %677, %cst_210 {dimension_numbers = #tpu.dot_dimension_numbers<[1], [0], [0], [1], [0, 0, 1, 1], [], []>} : vector<8x128xbf16>, vector<128x512xbf16>, vector<8x512xf32> -> vector<8x512xf32>
    %679 = arith.addf %675, %678 : vector<8x512xf32>
    %680 = arith.index_cast %673 : i32 to index
    %c0_211 = arith.constant 0 : index
    %681 = vector.load %arg20[%680, %c0_211] : memref<64x512xf32, #tpu.memory_space<vmem>>, vector<8x512xf32>
    %682 = arith.truncf %664 : vector<8x128xf32> to vector<8x128xbf16>
    %c0_212 = arith.constant 0 : index
    %c0_213 = arith.constant 0 : index
    %683 = vector.load %arg11[%c0_212, %c0_213] : memref<128x512xbf16, #tpu.memory_space<vmem>>, vector<128x512xbf16>
    %cst_214 = arith.constant dense<0.000000e+00> : vector<8x512xf32>
    %684 = tpu.matmul %682, %683, %cst_214 {dimension_numbers = #tpu.dot_dimension_numbers<[1], [0], [0], [1], [0, 0, 1, 1], [], []>} : vector<8x128xbf16>, vector<128x512xbf16>, vector<8x512xf32> -> vector<8x512xf32>
    %685 = arith.addf %681, %684 : vector<8x512xf32>
    %686 = vector.extract_strided_slice %679 {offsets = [0, 0], sizes = [8, 128], strides = [1, 1]} : vector<8x512xf32> to vector<8x128xf32>
    %687 = arith.negf %686 : vector<8x128xf32>
    %688 = math.exp %687 : vector<8x128xf32>
    %cst_215 = arith.constant 1.000000e+00 : f32
    %689 = vector.broadcast %cst_215 : f32 to vector<8x128xf32>
    %690 = arith.addf %689, %688 : vector<8x128xf32>
    %691 = arith.divf %689, %690 : vector<8x128xf32>
    %692 = vector.extract_strided_slice %679 {offsets = [0, 128], sizes = [8, 128], strides = [1, 1]} : vector<8x512xf32> to vector<8x128xf32>
    %693 = arith.negf %692 : vector<8x128xf32>
    %694 = math.exp %693 : vector<8x128xf32>
    %cst_216 = arith.constant 1.000000e+00 : f32
    %695 = vector.broadcast %cst_216 : f32 to vector<8x128xf32>
    %696 = arith.addf %695, %694 : vector<8x128xf32>
    %697 = arith.divf %695, %696 : vector<8x128xf32>
    %698 = vector.extract_strided_slice %679 {offsets = [0, 256], sizes = [8, 128], strides = [1, 1]} : vector<8x512xf32> to vector<8x128xf32>
    %699 = math.tanh %698 : vector<8x128xf32>
    %700 = vector.extract_strided_slice %679 {offsets = [0, 384], sizes = [8, 128], strides = [1, 1]} : vector<8x512xf32> to vector<8x128xf32>
    %701 = arith.negf %700 : vector<8x128xf32>
    %702 = math.exp %701 : vector<8x128xf32>
    %cst_217 = arith.constant 1.000000e+00 : f32
    %703 = vector.broadcast %cst_217 : f32 to vector<8x128xf32>
    %704 = arith.addf %703, %702 : vector<8x128xf32>
    %705 = arith.divf %703, %704 : vector<8x128xf32>
    %706 = arith.mulf %697, %637 : vector<8x128xf32>
    %707 = arith.mulf %691, %699 : vector<8x128xf32>
    %708 = arith.addf %706, %707 : vector<8x128xf32>
    %709 = math.tanh %708 : vector<8x128xf32>
    %710 = arith.mulf %705, %709 : vector<8x128xf32>
    %711 = vector.extract_strided_slice %685 {offsets = [0, 0], sizes = [8, 128], strides = [1, 1]} : vector<8x512xf32> to vector<8x128xf32>
    %712 = arith.negf %711 : vector<8x128xf32>
    %713 = math.exp %712 : vector<8x128xf32>
    %cst_218 = arith.constant 1.000000e+00 : f32
    %714 = vector.broadcast %cst_218 : f32 to vector<8x128xf32>
    %715 = arith.addf %714, %713 : vector<8x128xf32>
    %716 = arith.divf %714, %715 : vector<8x128xf32>
    %717 = vector.extract_strided_slice %685 {offsets = [0, 128], sizes = [8, 128], strides = [1, 1]} : vector<8x512xf32> to vector<8x128xf32>
    %718 = arith.negf %717 : vector<8x128xf32>
    %719 = math.exp %718 : vector<8x128xf32>
    %cst_219 = arith.constant 1.000000e+00 : f32
    %720 = vector.broadcast %cst_219 : f32 to vector<8x128xf32>
    %721 = arith.addf %720, %719 : vector<8x128xf32>
    %722 = arith.divf %720, %721 : vector<8x128xf32>
    %723 = vector.extract_strided_slice %685 {offsets = [0, 256], sizes = [8, 128], strides = [1, 1]} : vector<8x512xf32> to vector<8x128xf32>
    %724 = math.tanh %723 : vector<8x128xf32>
    %725 = vector.extract_strided_slice %685 {offsets = [0, 384], sizes = [8, 128], strides = [1, 1]} : vector<8x512xf32> to vector<8x128xf32>
    %726 = arith.negf %725 : vector<8x128xf32>
    %727 = math.exp %726 : vector<8x128xf32>
    %cst_220 = arith.constant 1.000000e+00 : f32
    %728 = vector.broadcast %cst_220 : f32 to vector<8x128xf32>
    %729 = arith.addf %728, %727 : vector<8x128xf32>
    %730 = arith.divf %728, %729 : vector<8x128xf32>
    %731 = arith.mulf %722, %662 : vector<8x128xf32>
    %732 = arith.mulf %716, %724 : vector<8x128xf32>
    %733 = arith.addf %731, %732 : vector<8x128xf32>
    %734 = math.tanh %733 : vector<8x128xf32>
    %735 = arith.mulf %730, %734 : vector<8x128xf32>
    %736 = arith.index_cast %671 : i32 to index
    %c0_221 = arith.constant 0 : index
    %737 = vector.load %arg18[%736, %c0_221] : memref<64x256xf32, #tpu.memory_space<vmem>>, vector<8x128xf32>
    tpu.vector_store %arg18[%736, %c0_221], %710 {strides = array<i32>} : memref<64x256xf32, #tpu.memory_space<vmem>>, vector<8x128xf32>,
    %738 = arith.index_cast %673 : i32 to index
    %c128_222 = arith.constant 128 : index
    %739 = vector.load %arg18[%738, %c128_222] : memref<64x256xf32, #tpu.memory_space<vmem>>, vector<8x128xf32>
    tpu.vector_store %arg18[%738, %c128_222], %735 {strides = array<i32>} : memref<64x256xf32, #tpu.memory_space<vmem>>, vector<8x128xf32>,
    %c2_i32_223 = arith.constant 2 : i32
    %c7_i32_224 = arith.constant 7 : i32
    %740 = arith.subi %c7_i32_224, %c2_i32_223 : i32
    %c8_i32_225 = arith.constant 8 : i32
    %741 = arith.muli %c2_i32_223, %c8_i32_225 : i32
    %742 = tpu.assume_multiple %741, 8 : i32
    %c8_i32_226 = arith.constant 8 : i32
    %743 = arith.muli %740, %c8_i32_226 : i32
    %744 = tpu.assume_multiple %743, 8 : i32
    %745 = arith.index_cast %742 : i32 to index
    %c0_227 = arith.constant 0 : index
    %746 = vector.load %arg19[%745, %c0_227] : memref<64x512xf32, #tpu.memory_space<vmem>>, vector<8x512xf32>
    %747 = arith.truncf %710 : vector<8x128xf32> to vector<8x128xbf16>
    %c0_228 = arith.constant 0 : index
    %c0_229 = arith.constant 0 : index
    %748 = vector.load %arg8[%c0_228, %c0_229] : memref<128x512xbf16, #tpu.memory_space<vmem>>, vector<128x512xbf16>
    %cst_230 = arith.constant dense<0.000000e+00> : vector<8x512xf32>
    %749 = tpu.matmul %747, %748, %cst_230 {dimension_numbers = #tpu.dot_dimension_numbers<[1], [0], [0], [1], [0, 0, 1, 1], [], []>} : vector<8x128xbf16>, vector<128x512xbf16>, vector<8x512xf32> -> vector<8x512xf32>
    %750 = arith.addf %746, %749 : vector<8x512xf32>
    %751 = arith.index_cast %744 : i32 to index
    %c0_231 = arith.constant 0 : index
    %752 = vector.load %arg20[%751, %c0_231] : memref<64x512xf32, #tpu.memory_space<vmem>>, vector<8x512xf32>
    %753 = arith.truncf %735 : vector<8x128xf32> to vector<8x128xbf16>
    %c0_232 = arith.constant 0 : index
    %c0_233 = arith.constant 0 : index
    %754 = vector.load %arg11[%c0_232, %c0_233] : memref<128x512xbf16, #tpu.memory_space<vmem>>, vector<128x512xbf16>
    %cst_234 = arith.constant dense<0.000000e+00> : vector<8x512xf32>
    %755 = tpu.matmul %753, %754, %cst_234 {dimension_numbers = #tpu.dot_dimension_numbers<[1], [0], [0], [1], [0, 0, 1, 1], [], []>} : vector<8x128xbf16>, vector<128x512xbf16>, vector<8x512xf32> -> vector<8x512xf32>
    %756 = arith.addf %752, %755 : vector<8x512xf32>
    %757 = vector.extract_strided_slice %750 {offsets = [0, 0], sizes = [8, 128], strides = [1, 1]} : vector<8x512xf32> to vector<8x128xf32>
    %758 = arith.negf %757 : vector<8x128xf32>
    %759 = math.exp %758 : vector<8x128xf32>
    %cst_235 = arith.constant 1.000000e+00 : f32
    %760 = vector.broadcast %cst_235 : f32 to vector<8x128xf32>
    %761 = arith.addf %760, %759 : vector<8x128xf32>
    %762 = arith.divf %760, %761 : vector<8x128xf32>
    %763 = vector.extract_strided_slice %750 {offsets = [0, 128], sizes = [8, 128], strides = [1, 1]} : vector<8x512xf32> to vector<8x128xf32>
    %764 = arith.negf %763 : vector<8x128xf32>
    %765 = math.exp %764 : vector<8x128xf32>
    %cst_236 = arith.constant 1.000000e+00 : f32
    %766 = vector.broadcast %cst_236 : f32 to vector<8x128xf32>
    %767 = arith.addf %766, %765 : vector<8x128xf32>
    %768 = arith.divf %766, %767 : vector<8x128xf32>
    %769 = vector.extract_strided_slice %750 {offsets = [0, 256], sizes = [8, 128], strides = [1, 1]} : vector<8x512xf32> to vector<8x128xf32>
    %770 = math.tanh %769 : vector<8x128xf32>
    %771 = vector.extract_strided_slice %750 {offsets = [0, 384], sizes = [8, 128], strides = [1, 1]} : vector<8x512xf32> to vector<8x128xf32>
    %772 = arith.negf %771 : vector<8x128xf32>
    %773 = math.exp %772 : vector<8x128xf32>
    %cst_237 = arith.constant 1.000000e+00 : f32
    %774 = vector.broadcast %cst_237 : f32 to vector<8x128xf32>
    %775 = arith.addf %774, %773 : vector<8x128xf32>
    %776 = arith.divf %774, %775 : vector<8x128xf32>
    %777 = arith.mulf %768, %708 : vector<8x128xf32>
    %778 = arith.mulf %762, %770 : vector<8x128xf32>
    %779 = arith.addf %777, %778 : vector<8x128xf32>
    %780 = math.tanh %779 : vector<8x128xf32>
    %781 = arith.mulf %776, %780 : vector<8x128xf32>
    %782 = vector.extract_strided_slice %756 {offsets = [0, 0], sizes = [8, 128], strides = [1, 1]} : vector<8x512xf32> to vector<8x128xf32>
    %783 = arith.negf %782 : vector<8x128xf32>
    %784 = math.exp %783 : vector<8x128xf32>
    %cst_238 = arith.constant 1.000000e+00 : f32
    %785 = vector.broadcast %cst_238 : f32 to vector<8x128xf32>
    %786 = arith.addf %785, %784 : vector<8x128xf32>
    %787 = arith.divf %785, %786 : vector<8x128xf32>
    %788 = vector.extract_strided_slice %756 {offsets = [0, 128], sizes = [8, 128], strides = [1, 1]} : vector<8x512xf32> to vector<8x128xf32>
    %789 = arith.negf %788 : vector<8x128xf32>
    %790 = math.exp %789 : vector<8x128xf32>
    %cst_239 = arith.constant 1.000000e+00 : f32
    %791 = vector.broadcast %cst_239 : f32 to vector<8x128xf32>
    %792 = arith.addf %791, %790 : vector<8x128xf32>
    %793 = arith.divf %791, %792 : vector<8x128xf32>
    %794 = vector.extract_strided_slice %756 {offsets = [0, 256], sizes = [8, 128], strides = [1, 1]} : vector<8x512xf32> to vector<8x128xf32>
    %795 = math.tanh %794 : vector<8x128xf32>
    %796 = vector.extract_strided_slice %756 {offsets = [0, 384], sizes = [8, 128], strides = [1, 1]} : vector<8x512xf32> to vector<8x128xf32>
    %797 = arith.negf %796 : vector<8x128xf32>
    %798 = math.exp %797 : vector<8x128xf32>
    %cst_240 = arith.constant 1.000000e+00 : f32
    %799 = vector.broadcast %cst_240 : f32 to vector<8x128xf32>
    %800 = arith.addf %799, %798 : vector<8x128xf32>
    %801 = arith.divf %799, %800 : vector<8x128xf32>
    %802 = arith.mulf %793, %733 : vector<8x128xf32>
    %803 = arith.mulf %787, %795 : vector<8x128xf32>
    %804 = arith.addf %802, %803 : vector<8x128xf32>
    %805 = math.tanh %804 : vector<8x128xf32>
    %806 = arith.mulf %801, %805 : vector<8x128xf32>
    %807 = arith.index_cast %742 : i32 to index
    %c0_241 = arith.constant 0 : index
    %808 = vector.load %arg18[%807, %c0_241] : memref<64x256xf32, #tpu.memory_space<vmem>>, vector<8x128xf32>
    tpu.vector_store %arg18[%807, %c0_241], %781 {strides = array<i32>} : memref<64x256xf32, #tpu.memory_space<vmem>>, vector<8x128xf32>,
    %809 = arith.index_cast %744 : i32 to index
    %c128_242 = arith.constant 128 : index
    %810 = vector.load %arg18[%809, %c128_242] : memref<64x256xf32, #tpu.memory_space<vmem>>, vector<8x128xf32>
    tpu.vector_store %arg18[%809, %c128_242], %806 {strides = array<i32>} : memref<64x256xf32, #tpu.memory_space<vmem>>, vector<8x128xf32>,
    %c3_i32_243 = arith.constant 3 : i32
    %c7_i32_244 = arith.constant 7 : i32
    %811 = arith.subi %c7_i32_244, %c3_i32_243 : i32
    %c8_i32_245 = arith.constant 8 : i32
    %812 = arith.muli %c3_i32_243, %c8_i32_245 : i32
    %813 = tpu.assume_multiple %812, 8 : i32
    %c8_i32_246 = arith.constant 8 : i32
    %814 = arith.muli %811, %c8_i32_246 : i32
    %815 = tpu.assume_multiple %814, 8 : i32
    %816 = arith.index_cast %813 : i32 to index
    %c0_247 = arith.constant 0 : index
    %817 = vector.load %arg19[%816, %c0_247] : memref<64x512xf32, #tpu.memory_space<vmem>>, vector<8x512xf32>
    %818 = arith.truncf %781 : vector<8x128xf32> to vector<8x128xbf16>
    %c0_248 = arith.constant 0 : index
    %c0_249 = arith.constant 0 : index
    %819 = vector.load %arg8[%c0_248, %c0_249] : memref<128x512xbf16, #tpu.memory_space<vmem>>, vector<128x512xbf16>
    %cst_250 = arith.constant dense<0.000000e+00> : vector<8x512xf32>
    %820 = tpu.matmul %818, %819, %cst_250 {dimension_numbers = #tpu.dot_dimension_numbers<[1], [0], [0], [1], [0, 0, 1, 1], [], []>} : vector<8x128xbf16>, vector<128x512xbf16>, vector<8x512xf32> -> vector<8x512xf32>
    %821 = arith.addf %817, %820 : vector<8x512xf32>
    %822 = arith.index_cast %815 : i32 to index
    %c0_251 = arith.constant 0 : index
    %823 = vector.load %arg20[%822, %c0_251] : memref<64x512xf32, #tpu.memory_space<vmem>>, vector<8x512xf32>
    %824 = arith.truncf %806 : vector<8x128xf32> to vector<8x128xbf16>
    %c0_252 = arith.constant 0 : index
    %c0_253 = arith.constant 0 : index
    %825 = vector.load %arg11[%c0_252, %c0_253] : memref<128x512xbf16, #tpu.memory_space<vmem>>, vector<128x512xbf16>
    %cst_254 = arith.constant dense<0.000000e+00> : vector<8x512xf32>
    %826 = tpu.matmul %824, %825, %cst_254 {dimension_numbers = #tpu.dot_dimension_numbers<[1], [0], [0], [1], [0, 0, 1, 1], [], []>} : vector<8x128xbf16>, vector<128x512xbf16>, vector<8x512xf32> -> vector<8x512xf32>
    %827 = arith.addf %823, %826 : vector<8x512xf32>
    %828 = vector.extract_strided_slice %821 {offsets = [0, 0], sizes = [8, 128], strides = [1, 1]} : vector<8x512xf32> to vector<8x128xf32>
    %829 = arith.negf %828 : vector<8x128xf32>
    %830 = math.exp %829 : vector<8x128xf32>
    %cst_255 = arith.constant 1.000000e+00 : f32
    %831 = vector.broadcast %cst_255 : f32 to vector<8x128xf32>
    %832 = arith.addf %831, %830 : vector<8x128xf32>
    %833 = arith.divf %831, %832 : vector<8x128xf32>
    %834 = vector.extract_strided_slice %821 {offsets = [0, 128], sizes = [8, 128], strides = [1, 1]} : vector<8x512xf32> to vector<8x128xf32>
    %835 = arith.negf %834 : vector<8x128xf32>
    %836 = math.exp %835 : vector<8x128xf32>
    %cst_256 = arith.constant 1.000000e+00 : f32
    %837 = vector.broadcast %cst_256 : f32 to vector<8x128xf32>
    %838 = arith.addf %837, %836 : vector<8x128xf32>
    %839 = arith.divf %837, %838 : vector<8x128xf32>
    %840 = vector.extract_strided_slice %821 {offsets = [0, 256], sizes = [8, 128], strides = [1, 1]} : vector<8x512xf32> to vector<8x128xf32>
    %841 = math.tanh %840 : vector<8x128xf32>
    %842 = vector.extract_strided_slice %821 {offsets = [0, 384], sizes = [8, 128], strides = [1, 1]} : vector<8x512xf32> to vector<8x128xf32>
    %843 = arith.negf %842 : vector<8x128xf32>
    %844 = math.exp %843 : vector<8x128xf32>
    %cst_257 = arith.constant 1.000000e+00 : f32
    %845 = vector.broadcast %cst_257 : f32 to vector<8x128xf32>
    %846 = arith.addf %845, %844 : vector<8x128xf32>
    %847 = arith.divf %845, %846 : vector<8x128xf32>
    %848 = arith.mulf %839, %779 : vector<8x128xf32>
    %849 = arith.mulf %833, %841 : vector<8x128xf32>
    %850 = arith.addf %848, %849 : vector<8x128xf32>
    %851 = math.tanh %850 : vector<8x128xf32>
    %852 = arith.mulf %847, %851 : vector<8x128xf32>
    %853 = vector.extract_strided_slice %827 {offsets = [0, 0], sizes = [8, 128], strides = [1, 1]} : vector<8x512xf32> to vector<8x128xf32>
    %854 = arith.negf %853 : vector<8x128xf32>
    %855 = math.exp %854 : vector<8x128xf32>
    %cst_258 = arith.constant 1.000000e+00 : f32
    %856 = vector.broadcast %cst_258 : f32 to vector<8x128xf32>
    %857 = arith.addf %856, %855 : vector<8x128xf32>
    %858 = arith.divf %856, %857 : vector<8x128xf32>
    %859 = vector.extract_strided_slice %827 {offsets = [0, 128], sizes = [8, 128], strides = [1, 1]} : vector<8x512xf32> to vector<8x128xf32>
    %860 = arith.negf %859 : vector<8x128xf32>
    %861 = math.exp %860 : vector<8x128xf32>
    %cst_259 = arith.constant 1.000000e+00 : f32
    %862 = vector.broadcast %cst_259 : f32 to vector<8x128xf32>
    %863 = arith.addf %862, %861 : vector<8x128xf32>
    %864 = arith.divf %862, %863 : vector<8x128xf32>
    %865 = vector.extract_strided_slice %827 {offsets = [0, 256], sizes = [8, 128], strides = [1, 1]} : vector<8x512xf32> to vector<8x128xf32>
    %866 = math.tanh %865 : vector<8x128xf32>
    %867 = vector.extract_strided_slice %827 {offsets = [0, 384], sizes = [8, 128], strides = [1, 1]} : vector<8x512xf32> to vector<8x128xf32>
    %868 = arith.negf %867 : vector<8x128xf32>
    %869 = math.exp %868 : vector<8x128xf32>
    %cst_260 = arith.constant 1.000000e+00 : f32
    %870 = vector.broadcast %cst_260 : f32 to vector<8x128xf32>
    %871 = arith.addf %870, %869 : vector<8x128xf32>
    %872 = arith.divf %870, %871 : vector<8x128xf32>
    %873 = arith.mulf %864, %804 : vector<8x128xf32>
    %874 = arith.mulf %858, %866 : vector<8x128xf32>
    %875 = arith.addf %873, %874 : vector<8x128xf32>
    %876 = math.tanh %875 : vector<8x128xf32>
    %877 = arith.mulf %872, %876 : vector<8x128xf32>
    %878 = arith.index_cast %813 : i32 to index
    %c0_261 = arith.constant 0 : index
    %879 = vector.load %arg18[%878, %c0_261] : memref<64x256xf32, #tpu.memory_space<vmem>>, vector<8x128xf32>
    tpu.vector_store %arg18[%878, %c0_261], %852 {strides = array<i32>} : memref<64x256xf32, #tpu.memory_space<vmem>>, vector<8x128xf32>,
    %880 = arith.index_cast %815 : i32 to index
    %c128_262 = arith.constant 128 : index
    %881 = vector.load %arg18[%880, %c128_262] : memref<64x256xf32, #tpu.memory_space<vmem>>, vector<8x128xf32>
    tpu.vector_store %arg18[%880, %c128_262], %877 {strides = array<i32>} : memref<64x256xf32, #tpu.memory_space<vmem>>, vector<8x128xf32>,
    %c4_i32_263 = arith.constant 4 : i32
    %c7_i32_264 = arith.constant 7 : i32
    %882 = arith.subi %c7_i32_264, %c4_i32_263 : i32
    %c8_i32_265 = arith.constant 8 : i32
    %883 = arith.muli %c4_i32_263, %c8_i32_265 : i32
    %884 = tpu.assume_multiple %883, 8 : i32
    %c8_i32_266 = arith.constant 8 : i32
    %885 = arith.muli %882, %c8_i32_266 : i32
    %886 = tpu.assume_multiple %885, 8 : i32
    %887 = arith.index_cast %884 : i32 to index
    %c0_267 = arith.constant 0 : index
    %888 = vector.load %arg19[%887, %c0_267] : memref<64x512xf32, #tpu.memory_space<vmem>>, vector<8x512xf32>
    %889 = arith.truncf %852 : vector<8x128xf32> to vector<8x128xbf16>
    %c0_268 = arith.constant 0 : index
    %c0_269 = arith.constant 0 : index
    %890 = vector.load %arg8[%c0_268, %c0_269] : memref<128x512xbf16, #tpu.memory_space<vmem>>, vector<128x512xbf16>
    %cst_270 = arith.constant dense<0.000000e+00> : vector<8x512xf32>
    %891 = tpu.matmul %889, %890, %cst_270 {dimension_numbers = #tpu.dot_dimension_numbers<[1], [0], [0], [1], [0, 0, 1, 1], [], []>} : vector<8x128xbf16>, vector<128x512xbf16>, vector<8x512xf32> -> vector<8x512xf32>
    %892 = arith.addf %888, %891 : vector<8x512xf32>
    %893 = arith.index_cast %886 : i32 to index
    %c0_271 = arith.constant 0 : index
    %894 = vector.load %arg20[%893, %c0_271] : memref<64x512xf32, #tpu.memory_space<vmem>>, vector<8x512xf32>
    %895 = arith.truncf %877 : vector<8x128xf32> to vector<8x128xbf16>
    %c0_272 = arith.constant 0 : index
    %c0_273 = arith.constant 0 : index
    %896 = vector.load %arg11[%c0_272, %c0_273] : memref<128x512xbf16, #tpu.memory_space<vmem>>, vector<128x512xbf16>
    %cst_274 = arith.constant dense<0.000000e+00> : vector<8x512xf32>
    %897 = tpu.matmul %895, %896, %cst_274 {dimension_numbers = #tpu.dot_dimension_numbers<[1], [0], [0], [1], [0, 0, 1, 1], [], []>} : vector<8x128xbf16>, vector<128x512xbf16>, vector<8x512xf32> -> vector<8x512xf32>
    %898 = arith.addf %894, %897 : vector<8x512xf32>
    %899 = vector.extract_strided_slice %892 {offsets = [0, 0], sizes = [8, 128], strides = [1, 1]} : vector<8x512xf32> to vector<8x128xf32>
    %900 = arith.negf %899 : vector<8x128xf32>
    %901 = math.exp %900 : vector<8x128xf32>
    %cst_275 = arith.constant 1.000000e+00 : f32
    %902 = vector.broadcast %cst_275 : f32 to vector<8x128xf32>
    %903 = arith.addf %902, %901 : vector<8x128xf32>
    %904 = arith.divf %902, %903 : vector<8x128xf32>
    %905 = vector.extract_strided_slice %892 {offsets = [0, 128], sizes = [8, 128], strides = [1, 1]} : vector<8x512xf32> to vector<8x128xf32>
    %906 = arith.negf %905 : vector<8x128xf32>
    %907 = math.exp %906 : vector<8x128xf32>
    %cst_276 = arith.constant 1.000000e+00 : f32
    %908 = vector.broadcast %cst_276 : f32 to vector<8x128xf32>
    %909 = arith.addf %908, %907 : vector<8x128xf32>
    %910 = arith.divf %908, %909 : vector<8x128xf32>
    %911 = vector.extract_strided_slice %892 {offsets = [0, 256], sizes = [8, 128], strides = [1, 1]} : vector<8x512xf32> to vector<8x128xf32>
    %912 = math.tanh %911 : vector<8x128xf32>
    %913 = vector.extract_strided_slice %892 {offsets = [0, 384], sizes = [8, 128], strides = [1, 1]} : vector<8x512xf32> to vector<8x128xf32>
    %914 = arith.negf %913 : vector<8x128xf32>
    %915 = math.exp %914 : vector<8x128xf32>
    %cst_277 = arith.constant 1.000000e+00 : f32
    %916 = vector.broadcast %cst_277 : f32 to vector<8x128xf32>
    %917 = arith.addf %916, %915 : vector<8x128xf32>
    %918 = arith.divf %916, %917 : vector<8x128xf32>
    %919 = arith.mulf %910, %850 : vector<8x128xf32>
    %920 = arith.mulf %904, %912 : vector<8x128xf32>
    %921 = arith.addf %919, %920 : vector<8x128xf32>
    %922 = math.tanh %921 : vector<8x128xf32>
    %923 = arith.mulf %918, %922 : vector<8x128xf32>
    %924 = vector.extract_strided_slice %898 {offsets = [0, 0], sizes = [8, 128], strides = [1, 1]} : vector<8x512xf32> to vector<8x128xf32>
    %925 = arith.negf %924 : vector<8x128xf32>
    %926 = math.exp %925 : vector<8x128xf32>
    %cst_278 = arith.constant 1.000000e+00 : f32
    %927 = vector.broadcast %cst_278 : f32 to vector<8x128xf32>
    %928 = arith.addf %927, %926 : vector<8x128xf32>
    %929 = arith.divf %927, %928 : vector<8x128xf32>
    %930 = vector.extract_strided_slice %898 {offsets = [0, 128], sizes = [8, 128], strides = [1, 1]} : vector<8x512xf32> to vector<8x128xf32>
    %931 = arith.negf %930 : vector<8x128xf32>
    %932 = math.exp %931 : vector<8x128xf32>
    %cst_279 = arith.constant 1.000000e+00 : f32
    %933 = vector.broadcast %cst_279 : f32 to vector<8x128xf32>
    %934 = arith.addf %933, %932 : vector<8x128xf32>
    %935 = arith.divf %933, %934 : vector<8x128xf32>
    %936 = vector.extract_strided_slice %898 {offsets = [0, 256], sizes = [8, 128], strides = [1, 1]} : vector<8x512xf32> to vector<8x128xf32>
    %937 = math.tanh %936 : vector<8x128xf32>
    %938 = vector.extract_strided_slice %898 {offsets = [0, 384], sizes = [8, 128], strides = [1, 1]} : vector<8x512xf32> to vector<8x128xf32>
    %939 = arith.negf %938 : vector<8x128xf32>
    %940 = math.exp %939 : vector<8x128xf32>
    %cst_280 = arith.constant 1.000000e+00 : f32
    %941 = vector.broadcast %cst_280 : f32 to vector<8x128xf32>
    %942 = arith.addf %941, %940 : vector<8x128xf32>
    %943 = arith.divf %941, %942 : vector<8x128xf32>
    %944 = arith.mulf %935, %875 : vector<8x128xf32>
    %945 = arith.mulf %929, %937 : vector<8x128xf32>
    %946 = arith.addf %944, %945 : vector<8x128xf32>
    %947 = math.tanh %946 : vector<8x128xf32>
    %948 = arith.mulf %943, %947 : vector<8x128xf32>
    %949 = arith.index_cast %884 : i32 to index
    %c0_281 = arith.constant 0 : index
    %950 = vector.load %arg18[%949, %c0_281] : memref<64x256xf32, #tpu.memory_space<vmem>>, vector<8x128xf32>
    tpu.vector_store %arg18[%949, %c0_281], %923 {strides = array<i32>} : memref<64x256xf32, #tpu.memory_space<vmem>>, vector<8x128xf32>,
    %951 = arith.index_cast %886 : i32 to index
    %c128_282 = arith.constant 128 : index
    %952 = vector.load %arg18[%951, %c128_282] : memref<64x256xf32, #tpu.memory_space<vmem>>, vector<8x128xf32>
    tpu.vector_store %arg18[%951, %c128_282], %948 {strides = array<i32>} : memref<64x256xf32, #tpu.memory_space<vmem>>, vector<8x128xf32>,
    %c5_i32_283 = arith.constant 5 : i32
    %c7_i32_284 = arith.constant 7 : i32
    %953 = arith.subi %c7_i32_284, %c5_i32_283 : i32
    %c8_i32_285 = arith.constant 8 : i32
    %954 = arith.muli %c5_i32_283, %c8_i32_285 : i32
    %955 = tpu.assume_multiple %954, 8 : i32
    %c8_i32_286 = arith.constant 8 : i32
    %956 = arith.muli %953, %c8_i32_286 : i32
    %957 = tpu.assume_multiple %956, 8 : i32
    %958 = arith.index_cast %955 : i32 to index
    %c0_287 = arith.constant 0 : index
    %959 = vector.load %arg19[%958, %c0_287] : memref<64x512xf32, #tpu.memory_space<vmem>>, vector<8x512xf32>
    %960 = arith.truncf %923 : vector<8x128xf32> to vector<8x128xbf16>
    %c0_288 = arith.constant 0 : index
    %c0_289 = arith.constant 0 : index
    %961 = vector.load %arg8[%c0_288, %c0_289] : memref<128x512xbf16, #tpu.memory_space<vmem>>, vector<128x512xbf16>
    %cst_290 = arith.constant dense<0.000000e+00> : vector<8x512xf32>
    %962 = tpu.matmul %960, %961, %cst_290 {dimension_numbers = #tpu.dot_dimension_numbers<[1], [0], [0], [1], [0, 0, 1, 1], [], []>} : vector<8x128xbf16>, vector<128x512xbf16>, vector<8x512xf32> -> vector<8x512xf32>
    %963 = arith.addf %959, %962 : vector<8x512xf32>
    %964 = arith.index_cast %957 : i32 to index
    %c0_291 = arith.constant 0 : index
    %965 = vector.load %arg20[%964, %c0_291] : memref<64x512xf32, #tpu.memory_space<vmem>>, vector<8x512xf32>
    %966 = arith.truncf %948 : vector<8x128xf32> to vector<8x128xbf16>
    %c0_292 = arith.constant 0 : index
    %c0_293 = arith.constant 0 : index
    %967 = vector.load %arg11[%c0_292, %c0_293] : memref<128x512xbf16, #tpu.memory_space<vmem>>, vector<128x512xbf16>
    %cst_294 = arith.constant dense<0.000000e+00> : vector<8x512xf32>
    %968 = tpu.matmul %966, %967, %cst_294 {dimension_numbers = #tpu.dot_dimension_numbers<[1], [0], [0], [1], [0, 0, 1, 1], [], []>} : vector<8x128xbf16>, vector<128x512xbf16>, vector<8x512xf32> -> vector<8x512xf32>
    %969 = arith.addf %965, %968 : vector<8x512xf32>
    %970 = vector.extract_strided_slice %963 {offsets = [0, 0], sizes = [8, 128], strides = [1, 1]} : vector<8x512xf32> to vector<8x128xf32>
    %971 = arith.negf %970 : vector<8x128xf32>
    %972 = math.exp %971 : vector<8x128xf32>
    %cst_295 = arith.constant 1.000000e+00 : f32
    %973 = vector.broadcast %cst_295 : f32 to vector<8x128xf32>
    %974 = arith.addf %973, %972 : vector<8x128xf32>
    %975 = arith.divf %973, %974 : vector<8x128xf32>
    %976 = vector.extract_strided_slice %963 {offsets = [0, 128], sizes = [8, 128], strides = [1, 1]} : vector<8x512xf32> to vector<8x128xf32>
    %977 = arith.negf %976 : vector<8x128xf32>
    %978 = math.exp %977 : vector<8x128xf32>
    %cst_296 = arith.constant 1.000000e+00 : f32
    %979 = vector.broadcast %cst_296 : f32 to vector<8x128xf32>
    %980 = arith.addf %979, %978 : vector<8x128xf32>
    %981 = arith.divf %979, %980 : vector<8x128xf32>
    %982 = vector.extract_strided_slice %963 {offsets = [0, 256], sizes = [8, 128], strides = [1, 1]} : vector<8x512xf32> to vector<8x128xf32>
    %983 = math.tanh %982 : vector<8x128xf32>
    %984 = vector.extract_strided_slice %963 {offsets = [0, 384], sizes = [8, 128], strides = [1, 1]} : vector<8x512xf32> to vector<8x128xf32>
    %985 = arith.negf %984 : vector<8x128xf32>
    %986 = math.exp %985 : vector<8x128xf32>
    %cst_297 = arith.constant 1.000000e+00 : f32
    %987 = vector.broadcast %cst_297 : f32 to vector<8x128xf32>
    %988 = arith.addf %987, %986 : vector<8x128xf32>
    %989 = arith.divf %987, %988 : vector<8x128xf32>
    %990 = arith.mulf %981, %921 : vector<8x128xf32>
    %991 = arith.mulf %975, %983 : vector<8x128xf32>
    %992 = arith.addf %990, %991 : vector<8x128xf32>
    %993 = math.tanh %992 : vector<8x128xf32>
    %994 = arith.mulf %989, %993 : vector<8x128xf32>
    %995 = vector.extract_strided_slice %969 {offsets = [0, 0], sizes = [8, 128], strides = [1, 1]} : vector<8x512xf32> to vector<8x128xf32>
    %996 = arith.negf %995 : vector<8x128xf32>
    %997 = math.exp %996 : vector<8x128xf32>
    %cst_298 = arith.constant 1.000000e+00 : f32
    %998 = vector.broadcast %cst_298 : f32 to vector<8x128xf32>
    %999 = arith.addf %998, %997 : vector<8x128xf32>
    %1000 = arith.divf %998, %999 : vector<8x128xf32>
    %1001 = vector.extract_strided_slice %969 {offsets = [0, 128], sizes = [8, 128], strides = [1, 1]} : vector<8x512xf32> to vector<8x128xf32>
    %1002 = arith.negf %1001 : vector<8x128xf32>
    %1003 = math.exp %1002 : vector<8x128xf32>
    %cst_299 = arith.constant 1.000000e+00 : f32
    %1004 = vector.broadcast %cst_299 : f32 to vector<8x128xf32>
    %1005 = arith.addf %1004, %1003 : vector<8x128xf32>
    %1006 = arith.divf %1004, %1005 : vector<8x128xf32>
    %1007 = vector.extract_strided_slice %969 {offsets = [0, 256], sizes = [8, 128], strides = [1, 1]} : vector<8x512xf32> to vector<8x128xf32>
    %1008 = math.tanh %1007 : vector<8x128xf32>
    %1009 = vector.extract_strided_slice %969 {offsets = [0, 384], sizes = [8, 128], strides = [1, 1]} : vector<8x512xf32> to vector<8x128xf32>
    %1010 = arith.negf %1009 : vector<8x128xf32>
    %1011 = math.exp %1010 : vector<8x128xf32>
    %cst_300 = arith.constant 1.000000e+00 : f32
    %1012 = vector.broadcast %cst_300 : f32 to vector<8x128xf32>
    %1013 = arith.addf %1012, %1011 : vector<8x128xf32>
    %1014 = arith.divf %1012, %1013 : vector<8x128xf32>
    %1015 = arith.mulf %1006, %946 : vector<8x128xf32>
    %1016 = arith.mulf %1000, %1008 : vector<8x128xf32>
    %1017 = arith.addf %1015, %1016 : vector<8x128xf32>
    %1018 = math.tanh %1017 : vector<8x128xf32>
    %1019 = arith.mulf %1014, %1018 : vector<8x128xf32>
    %1020 = arith.index_cast %955 : i32 to index
    %c0_301 = arith.constant 0 : index
    %1021 = vector.load %arg18[%1020, %c0_301] : memref<64x256xf32, #tpu.memory_space<vmem>>, vector<8x128xf32>
    tpu.vector_store %arg18[%1020, %c0_301], %994 {strides = array<i32>} : memref<64x256xf32, #tpu.memory_space<vmem>>, vector<8x128xf32>,
    %1022 = arith.index_cast %957 : i32 to index
    %c128_302 = arith.constant 128 : index
    %1023 = vector.load %arg18[%1022, %c128_302] : memref<64x256xf32, #tpu.memory_space<vmem>>, vector<8x128xf32>
    tpu.vector_store %arg18[%1022, %c128_302], %1019 {strides = array<i32>} : memref<64x256xf32, #tpu.memory_space<vmem>>, vector<8x128xf32>,
    %c6_i32_303 = arith.constant 6 : i32
    %c7_i32_304 = arith.constant 7 : i32
    %1024 = arith.subi %c7_i32_304, %c6_i32_303 : i32
    %c8_i32_305 = arith.constant 8 : i32
    %1025 = arith.muli %c6_i32_303, %c8_i32_305 : i32
    %1026 = tpu.assume_multiple %1025, 8 : i32
    %c8_i32_306 = arith.constant 8 : i32
    %1027 = arith.muli %1024, %c8_i32_306 : i32
    %1028 = tpu.assume_multiple %1027, 8 : i32
    %1029 = arith.index_cast %1026 : i32 to index
    %c0_307 = arith.constant 0 : index
    %1030 = vector.load %arg19[%1029, %c0_307] : memref<64x512xf32, #tpu.memory_space<vmem>>, vector<8x512xf32>
    %1031 = arith.truncf %994 : vector<8x128xf32> to vector<8x128xbf16>
    %c0_308 = arith.constant 0 : index
    %c0_309 = arith.constant 0 : index
    %1032 = vector.load %arg8[%c0_308, %c0_309] : memref<128x512xbf16, #tpu.memory_space<vmem>>, vector<128x512xbf16>
    %cst_310 = arith.constant dense<0.000000e+00> : vector<8x512xf32>
    %1033 = tpu.matmul %1031, %1032, %cst_310 {dimension_numbers = #tpu.dot_dimension_numbers<[1], [0], [0], [1], [0, 0, 1, 1], [], []>} : vector<8x128xbf16>, vector<128x512xbf16>, vector<8x512xf32> -> vector<8x512xf32>
    %1034 = arith.addf %1030, %1033 : vector<8x512xf32>
    %1035 = arith.index_cast %1028 : i32 to index
    %c0_311 = arith.constant 0 : index
    %1036 = vector.load %arg20[%1035, %c0_311] : memref<64x512xf32, #tpu.memory_space<vmem>>, vector<8x512xf32>
    %1037 = arith.truncf %1019 : vector<8x128xf32> to vector<8x128xbf16>
    %c0_312 = arith.constant 0 : index
    %c0_313 = arith.constant 0 : index
    %1038 = vector.load %arg11[%c0_312, %c0_313] : memref<128x512xbf16, #tpu.memory_space<vmem>>, vector<128x512xbf16>
    %cst_314 = arith.constant dense<0.000000e+00> : vector<8x512xf32>
    %1039 = tpu.matmul %1037, %1038, %cst_314 {dimension_numbers = #tpu.dot_dimension_numbers<[1], [0], [0], [1], [0, 0, 1, 1], [], []>} : vector<8x128xbf16>, vector<128x512xbf16>, vector<8x512xf32> -> vector<8x512xf32>
    %1040 = arith.addf %1036, %1039 : vector<8x512xf32>
    %1041 = vector.extract_strided_slice %1034 {offsets = [0, 0], sizes = [8, 128], strides = [1, 1]} : vector<8x512xf32> to vector<8x128xf32>
    %1042 = arith.negf %1041 : vector<8x128xf32>
    %1043 = math.exp %1042 : vector<8x128xf32>
    %cst_315 = arith.constant 1.000000e+00 : f32
    %1044 = vector.broadcast %cst_315 : f32 to vector<8x128xf32>
    %1045 = arith.addf %1044, %1043 : vector<8x128xf32>
    %1046 = arith.divf %1044, %1045 : vector<8x128xf32>
    %1047 = vector.extract_strided_slice %1034 {offsets = [0, 128], sizes = [8, 128], strides = [1, 1]} : vector<8x512xf32> to vector<8x128xf32>
    %1048 = arith.negf %1047 : vector<8x128xf32>
    %1049 = math.exp %1048 : vector<8x128xf32>
    %cst_316 = arith.constant 1.000000e+00 : f32
    %1050 = vector.broadcast %cst_316 : f32 to vector<8x128xf32>
    %1051 = arith.addf %1050, %1049 : vector<8x128xf32>
    %1052 = arith.divf %1050, %1051 : vector<8x128xf32>
    %1053 = vector.extract_strided_slice %1034 {offsets = [0, 256], sizes = [8, 128], strides = [1, 1]} : vector<8x512xf32> to vector<8x128xf32>
    %1054 = math.tanh %1053 : vector<8x128xf32>
    %1055 = vector.extract_strided_slice %1034 {offsets = [0, 384], sizes = [8, 128], strides = [1, 1]} : vector<8x512xf32> to vector<8x128xf32>
    %1056 = arith.negf %1055 : vector<8x128xf32>
    %1057 = math.exp %1056 : vector<8x128xf32>
    %cst_317 = arith.constant 1.000000e+00 : f32
    %1058 = vector.broadcast %cst_317 : f32 to vector<8x128xf32>
    %1059 = arith.addf %1058, %1057 : vector<8x128xf32>
    %1060 = arith.divf %1058, %1059 : vector<8x128xf32>
    %1061 = arith.mulf %1052, %992 : vector<8x128xf32>
    %1062 = arith.mulf %1046, %1054 : vector<8x128xf32>
    %1063 = arith.addf %1061, %1062 : vector<8x128xf32>
    %1064 = math.tanh %1063 : vector<8x128xf32>
    %1065 = arith.mulf %1060, %1064 : vector<8x128xf32>
    %1066 = vector.extract_strided_slice %1040 {offsets = [0, 0], sizes = [8, 128], strides = [1, 1]} : vector<8x512xf32> to vector<8x128xf32>
    %1067 = arith.negf %1066 : vector<8x128xf32>
    %1068 = math.exp %1067 : vector<8x128xf32>
    %cst_318 = arith.constant 1.000000e+00 : f32
    %1069 = vector.broadcast %cst_318 : f32 to vector<8x128xf32>
    %1070 = arith.addf %1069, %1068 : vector<8x128xf32>
    %1071 = arith.divf %1069, %1070 : vector<8x128xf32>
    %1072 = vector.extract_strided_slice %1040 {offsets = [0, 128], sizes = [8, 128], strides = [1, 1]} : vector<8x512xf32> to vector<8x128xf32>
    %1073 = arith.negf %1072 : vector<8x128xf32>
    %1074 = math.exp %1073 : vector<8x128xf32>
    %cst_319 = arith.constant 1.000000e+00 : f32
    %1075 = vector.broadcast %cst_319 : f32 to vector<8x128xf32>
    %1076 = arith.addf %1075, %1074 : vector<8x128xf32>
    %1077 = arith.divf %1075, %1076 : vector<8x128xf32>
    %1078 = vector.extract_strided_slice %1040 {offsets = [0, 256], sizes = [8, 128], strides = [1, 1]} : vector<8x512xf32> to vector<8x128xf32>
    %1079 = math.tanh %1078 : vector<8x128xf32>
    %1080 = vector.extract_strided_slice %1040 {offsets = [0, 384], sizes = [8, 128], strides = [1, 1]} : vector<8x512xf32> to vector<8x128xf32>
    %1081 = arith.negf %1080 : vector<8x128xf32>
    %1082 = math.exp %1081 : vector<8x128xf32>
    %cst_320 = arith.constant 1.000000e+00 : f32
    %1083 = vector.broadcast %cst_320 : f32 to vector<8x128xf32>
    %1084 = arith.addf %1083, %1082 : vector<8x128xf32>
    %1085 = arith.divf %1083, %1084 : vector<8x128xf32>
    %1086 = arith.mulf %1077, %1017 : vector<8x128xf32>
    %1087 = arith.mulf %1071, %1079 : vector<8x128xf32>
    %1088 = arith.addf %1086, %1087 : vector<8x128xf32>
    %1089 = math.tanh %1088 : vector<8x128xf32>
    %1090 = arith.mulf %1085, %1089 : vector<8x128xf32>
    %1091 = arith.index_cast %1026 : i32 to index
    %c0_321 = arith.constant 0 : index
    %1092 = vector.load %arg18[%1091, %c0_321] : memref<64x256xf32, #tpu.memory_space<vmem>>, vector<8x128xf32>
    tpu.vector_store %arg18[%1091, %c0_321], %1065 {strides = array<i32>} : memref<64x256xf32, #tpu.memory_space<vmem>>, vector<8x128xf32>,
    %1093 = arith.index_cast %1028 : i32 to index
    %c128_322 = arith.constant 128 : index
    %1094 = vector.load %arg18[%1093, %c128_322] : memref<64x256xf32, #tpu.memory_space<vmem>>, vector<8x128xf32>
    tpu.vector_store %arg18[%1093, %c128_322], %1090 {strides = array<i32>} : memref<64x256xf32, #tpu.memory_space<vmem>>, vector<8x128xf32>,
    %c7_i32_323 = arith.constant 7 : i32
    %c7_i32_324 = arith.constant 7 : i32
    %1095 = arith.subi %c7_i32_324, %c7_i32_323 : i32
    %c8_i32_325 = arith.constant 8 : i32
    %1096 = arith.muli %c7_i32_323, %c8_i32_325 : i32
    %1097 = tpu.assume_multiple %1096, 8 : i32
    %c8_i32_326 = arith.constant 8 : i32
    %1098 = arith.muli %1095, %c8_i32_326 : i32
    %1099 = tpu.assume_multiple %1098, 8 : i32
    %1100 = arith.index_cast %1097 : i32 to index
    %c0_327 = arith.constant 0 : index
    %1101 = vector.load %arg19[%1100, %c0_327] : memref<64x512xf32, #tpu.memory_space<vmem>>, vector<8x512xf32>
    %1102 = arith.truncf %1065 : vector<8x128xf32> to vector<8x128xbf16>
    %c0_328 = arith.constant 0 : index
    %c0_329 = arith.constant 0 : index
    %1103 = vector.load %arg8[%c0_328, %c0_329] : memref<128x512xbf16, #tpu.memory_space<vmem>>, vector<128x512xbf16>
    %cst_330 = arith.constant dense<0.000000e+00> : vector<8x512xf32>
    %1104 = tpu.matmul %1102, %1103, %cst_330 {dimension_numbers = #tpu.dot_dimension_numbers<[1], [0], [0], [1], [0, 0, 1, 1], [], []>} : vector<8x128xbf16>, vector<128x512xbf16>, vector<8x512xf32> -> vector<8x512xf32>
    %1105 = arith.addf %1101, %1104 : vector<8x512xf32>
    %1106 = arith.index_cast %1099 : i32 to index
    %c0_331 = arith.constant 0 : index
    %1107 = vector.load %arg20[%1106, %c0_331] : memref<64x512xf32, #tpu.memory_space<vmem>>, vector<8x512xf32>
    %1108 = arith.truncf %1090 : vector<8x128xf32> to vector<8x128xbf16>
    %c0_332 = arith.constant 0 : index
    %c0_333 = arith.constant 0 : index
    %1109 = vector.load %arg11[%c0_332, %c0_333] : memref<128x512xbf16, #tpu.memory_space<vmem>>, vector<128x512xbf16>
    %cst_334 = arith.constant dense<0.000000e+00> : vector<8x512xf32>
    %1110 = tpu.matmul %1108, %1109, %cst_334 {dimension_numbers = #tpu.dot_dimension_numbers<[1], [0], [0], [1], [0, 0, 1, 1], [], []>} : vector<8x128xbf16>, vector<128x512xbf16>, vector<8x512xf32> -> vector<8x512xf32>
    %1111 = arith.addf %1107, %1110 : vector<8x512xf32>
    %1112 = vector.extract_strided_slice %1105 {offsets = [0, 0], sizes = [8, 128], strides = [1, 1]} : vector<8x512xf32> to vector<8x128xf32>
    %1113 = arith.negf %1112 : vector<8x128xf32>
    %1114 = math.exp %1113 : vector<8x128xf32>
    %cst_335 = arith.constant 1.000000e+00 : f32
    %1115 = vector.broadcast %cst_335 : f32 to vector<8x128xf32>
    %1116 = arith.addf %1115, %1114 : vector<8x128xf32>
    %1117 = arith.divf %1115, %1116 : vector<8x128xf32>
    %1118 = vector.extract_strided_slice %1105 {offsets = [0, 128], sizes = [8, 128], strides = [1, 1]} : vector<8x512xf32> to vector<8x128xf32>
    %1119 = arith.negf %1118 : vector<8x128xf32>
    %1120 = math.exp %1119 : vector<8x128xf32>
    %cst_336 = arith.constant 1.000000e+00 : f32
    %1121 = vector.broadcast %cst_336 : f32 to vector<8x128xf32>
    %1122 = arith.addf %1121, %1120 : vector<8x128xf32>
    %1123 = arith.divf %1121, %1122 : vector<8x128xf32>
    %1124 = vector.extract_strided_slice %1105 {offsets = [0, 256], sizes = [8, 128], strides = [1, 1]} : vector<8x512xf32> to vector<8x128xf32>
    %1125 = math.tanh %1124 : vector<8x128xf32>
    %1126 = vector.extract_strided_slice %1105 {offsets = [0, 384], sizes = [8, 128], strides = [1, 1]} : vector<8x512xf32> to vector<8x128xf32>
    %1127 = arith.negf %1126 : vector<8x128xf32>
    %1128 = math.exp %1127 : vector<8x128xf32>
    %cst_337 = arith.constant 1.000000e+00 : f32
    %1129 = vector.broadcast %cst_337 : f32 to vector<8x128xf32>
    %1130 = arith.addf %1129, %1128 : vector<8x128xf32>
    %1131 = arith.divf %1129, %1130 : vector<8x128xf32>
    %1132 = arith.mulf %1123, %1063 : vector<8x128xf32>
    %1133 = arith.mulf %1117, %1125 : vector<8x128xf32>
    %1134 = arith.addf %1132, %1133 : vector<8x128xf32>
    %1135 = math.tanh %1134 : vector<8x128xf32>
    %1136 = arith.mulf %1131, %1135 : vector<8x128xf32>
    %1137 = vector.extract_strided_slice %1111 {offsets = [0, 0], sizes = [8, 128], strides = [1, 1]} : vector<8x512xf32> to vector<8x128xf32>
    %1138 = arith.negf %1137 : vector<8x128xf32>
    %1139 = math.exp %1138 : vector<8x128xf32>
    %cst_338 = arith.constant 1.000000e+00 : f32
    %1140 = vector.broadcast %cst_338 : f32 to vector<8x128xf32>
    %1141 = arith.addf %1140, %1139 : vector<8x128xf32>
    %1142 = arith.divf %1140, %1141 : vector<8x128xf32>
    %1143 = vector.extract_strided_slice %1111 {offsets = [0, 128], sizes = [8, 128], strides = [1, 1]} : vector<8x512xf32> to vector<8x128xf32>
    %1144 = arith.negf %1143 : vector<8x128xf32>
    %1145 = math.exp %1144 : vector<8x128xf32>
    %cst_339 = arith.constant 1.000000e+00 : f32
    %1146 = vector.broadcast %cst_339 : f32 to vector<8x128xf32>
    %1147 = arith.addf %1146, %1145 : vector<8x128xf32>
    %1148 = arith.divf %1146, %1147 : vector<8x128xf32>
    %1149 = vector.extract_strided_slice %1111 {offsets = [0, 256], sizes = [8, 128], strides = [1, 1]} : vector<8x512xf32> to vector<8x128xf32>
    %1150 = math.tanh %1149 : vector<8x128xf32>
    %1151 = vector.extract_strided_slice %1111 {offsets = [0, 384], sizes = [8, 128], strides = [1, 1]} : vector<8x512xf32> to vector<8x128xf32>
    %1152 = arith.negf %1151 : vector<8x128xf32>
    %1153 = math.exp %1152 : vector<8x128xf32>
    %cst_340 = arith.constant 1.000000e+00 : f32
    %1154 = vector.broadcast %cst_340 : f32 to vector<8x128xf32>
    %1155 = arith.addf %1154, %1153 : vector<8x128xf32>
    %1156 = arith.divf %1154, %1155 : vector<8x128xf32>
    %1157 = arith.mulf %1148, %1088 : vector<8x128xf32>
    %1158 = arith.mulf %1142, %1150 : vector<8x128xf32>
    %1159 = arith.addf %1157, %1158 : vector<8x128xf32>
    %1160 = math.tanh %1159 : vector<8x128xf32>
    %1161 = arith.mulf %1156, %1160 : vector<8x128xf32>
    %1162 = arith.index_cast %1097 : i32 to index
    %c0_341 = arith.constant 0 : index
    %1163 = vector.load %arg18[%1162, %c0_341] : memref<64x256xf32, #tpu.memory_space<vmem>>, vector<8x128xf32>
    tpu.vector_store %arg18[%1162, %c0_341], %1136 {strides = array<i32>} : memref<64x256xf32, #tpu.memory_space<vmem>>, vector<8x128xf32>,
    %1164 = arith.index_cast %1099 : i32 to index
    %c128_342 = arith.constant 128 : index
    %1165 = vector.load %arg18[%1164, %c128_342] : memref<64x256xf32, #tpu.memory_space<vmem>>, vector<8x128xf32>
    tpu.vector_store %arg18[%1164, %c128_342], %1161 {strides = array<i32>} : memref<64x256xf32, #tpu.memory_space<vmem>>, vector<8x128xf32>,
    %c8_i32_343 = arith.constant 8 : i32
    %c0_344 = arith.constant 0 : index
    %c0_345 = arith.constant 0 : index
    %1166 = vector.load %arg18[%c0_344, %c0_345] : memref<64x256xf32, #tpu.memory_space<vmem>>, vector<64x256xf32>
    %1167 = arith.truncf %1166 : vector<64x256xf32> to vector<64x256xbf16>
    %c0_346 = arith.constant 0 : index
    %c0_347 = arith.constant 0 : index
    %1168 = vector.load %arg13[%c0_346, %c0_347] : memref<256x128xbf16, #tpu.memory_space<vmem>>, vector<256x128xbf16>
    %cst_348 = arith.constant dense<0.000000e+00> : vector<64x128xf32>
    %1169 = tpu.matmul %1167, %1168, %cst_348 {dimension_numbers = #tpu.dot_dimension_numbers<[1], [0], [0], [1], [0, 0, 1, 1], [], []>} : vector<64x256xbf16>, vector<256x128xbf16>, vector<64x128xf32> -> vector<64x128xf32>
    %c0_349 = arith.constant 0 : index
    %c0_350 = arith.constant 0 : index
    %1170 = vector.load %arg14[%c0_349, %c0_350] : memref<1x128xf32, #tpu.memory_space<vmem>>, vector<1x128xf32>
    %1171 = vector.broadcast %1170 : vector<1x128xf32> to vector<64x128xf32>
    %1172 = arith.addf %1169, %1171 : vector<64x128xf32>
    %1173 = arith.truncf %1172 : vector<64x128xf32> to vector<64x128xbf16>
    %c0_351 = arith.constant 0 : index
    %c0_352 = arith.constant 0 : index
    %1174 = vector.load %arg15[%c0_351, %c0_352] : memref<128x128xbf16, #tpu.memory_space<vmem>>, vector<128x128xbf16>
    %cst_353 = arith.constant dense<0.000000e+00> : vector<64x128xf32>
    %1175 = tpu.matmul %1173, %1174, %cst_353 {dimension_numbers = #tpu.dot_dimension_numbers<[1], [0], [0], [1], [0, 0, 1, 1], [], []>} : vector<64x128xbf16>, vector<128x128xbf16>, vector<64x128xf32> -> vector<64x128xf32>
    %c0_354 = arith.constant 0 : index
    %c0_355 = arith.constant 0 : index
    %1176 = vector.load %arg16[%c0_354, %c0_355] : memref<1x128xf32, #tpu.memory_space<vmem>>, vector<1x128xf32>
    %1177 = vector.broadcast %1176 : vector<1x128xf32> to vector<64x128xf32>
    %1178 = arith.addf %1175, %1177 : vector<64x128xf32>
    %c0_356 = arith.constant 0 : index
    %c0_357 = arith.constant 0 : index
    %1179 = vector.load %arg17[%c0_356, %c0_357] : memref<64x128xf32, #tpu.memory_space<vmem>>, vector<64x128xf32>
    tpu.vector_store %arg17[%c0_356, %c0_357], %1178 {strides = array<i32>} : memref<64x128xf32, #tpu.memory_space<vmem>>, vector<64x128xf32>,
    return
  }
}

</mosaic_0001>

<bundles_post_ra>
// kernel: fwd.1
= control target key start
LH: loop header
LB: loop body
LE: loop exit
PB: predicated region body
PF: predicated region fallthrough
CT: control target
= control target key end

     0   :  { %s19323_s0 = inlined_call_operand.hbm [shape: f32[64,128], index: 0, kind: input, shape index: {}]   ;;  %s19324_s1 = inlined_call_operand.hbm [shape: bf16[128,512], index: 1, kind: input, shape index: {}]   ;;  %s19325_s2 = inlined_call_operand.hbm [shape: bf16[128,512], index: 2, kind: input, shape index: {}]   ;;  %s19326_s3 = inlined_call_operand.hbm [shape: f32[1,512], index: 3, kind: input, shape index: {}]   ;;  %s19327_s4 = inlined_call_operand.hbm [shape: bf16[128,512], index: 4, kind: input, shape index: {}]   ;;  %s19328_s5 = inlined_call_operand.hbm [shape: bf16[128,512], index: 5, kind: input, shape index: {}]   ;;  %s19329_s6 = inlined_call_operand.hbm [shape: f32[1,512], index: 6, kind: input, shape index: {}]   ;;  %s19330_s7 = inlined_call_operand.hbm [shape: bf16[256,512], index: 7, kind: input, shape index: {}]   ;;  %s19331_s8 = inlined_call_operand.hbm [shape: bf16[128,512], index: 8, kind: input, shape index: {}]   ;;  %s19332_s9 = inlined_call_operand.hbm [shape: f32[1,512], index: 9, kind: input, shape index: {}]   ;;  %s19333_s10 = inlined_call_operand.hbm [shape: bf16[256,512], index: 10, kind: input, shape index: {}]   ;;  %s19334_s11 = inlined_call_operand.hbm [shape: bf16[128,512], index: 11, kind: input, shape index: {}]   ;;  %s19335_s12 = inlined_call_operand.hbm [shape: f32[1,512], index: 12, kind: input, shape index: {}]   ;;  %s19336_s13 = inlined_call_operand.hbm [shape: bf16[256,128], index: 13, kind: input, shape index: {}]   ;;  %s19337_s14 = inlined_call_operand.hbm [shape: f32[1,128], index: 14, kind: input, shape index: {}]   ;;  %s19338_s15 = inlined_call_operand.hbm [shape: bf16[128,128], index: 15, kind: input, shape index: {}]   ;;  %s19339_s16 = inlined_call_operand.hbm [shape: f32[1,128], index: 16, kind: input, shape index: {}]   ;;  %s19340_s17 = inlined_call_operand.hbm [shape: f32[64,128], index: 17, kind: output, shape index: {}]  }
   0x1   :  { %19422 = sst [smem:[#allocation106_spill]] %s19323_s0 }
   0x2   :  { %19423 = sst [smem:[#allocation107_spill]] %s19324_s1 }
   0x3   :  { %19424 = sst [smem:[#allocation108_spill]] %s19339_s16 }
   0x4   :  { %19425 = sst [smem:[#allocation109_spill]] %s19340_s17 }
   0x5   :  { %22 = vsyncpa [#allocation6], 0 }
   0x6   :  { %23 = vsyncpa [#allocation9], 0 }
   0x7   :  { %24 = vsyncpa [#allocation12], 0 }
   0x8   :  { %25 = vsyncpa [#allocation15], 0 }
   0x9   :  { %26 = vsyncpa [#allocation18], 0 }
   0xa   :  { %27 = vsyncpa [#allocation21], 0 }
   0xb   :  { %28 = vsyncpa [#allocation24], 0 }
   0xc   :  { %29 = vsyncpa [#allocation27], 0 }
   0xd   :  { %30 = vsyncpa [#allocation30], 0 }
   0xe   :  { %31 = vsyncpa [#allocation7], 0  ;;  %s16075_s24 = smov [#allocation8]   ;;  %s19426_s28 = sld [smem:[#allocation107_spill]] }
   0xf   :  { %s49_s25 = sshll.u32 %s16075_s24, 4  ;;  %s50_s25 = int_to_ptr.vmem [resolvable:$true] %s49_s25 }
  0x14   :  { %s15659_s29 = scalar_lea.hbm %s19426_s28, 4096 }
  0x15   :  { %p15660_p0 = scmp.ne.s32.totalorder %s19426_s28, %s15659_s29  ;;  %p15663_p1 = scmp.lt.u32.totalorder %s15659_s29, %s19426_s28 }
  0x17   :  { %p15665_p2 = pnand %p15663_p1, %p15660_p0 }
  0x19   :  { %15668 = shalt.err (!%p15665_p2)
}
  0x1a   :  { %s15669_s1 = scalar_lea.vmem %s50_s25, 4096  ;;  %p15674_p4 = scmp.lt.s32.totalorder %s50_s25, %s50_s25 }
  0x1b   :  { %p15670_p3 = scmp.ne.s32.totalorder %s50_s25, %s15669_s1  ;;  %p15675_p5 = scmp.lt.s32.totalorder %s15669_s1, %s15669_s1 }
  0x1d   :  { %p15676_p6 = por %p15675_p5, %p15674_p4 }
  0x1f   :  { %p15677_p7 = pnand %p15676_p6, %p15670_p3 }
  0x21   :  { %15680 = shalt.err (!%p15677_p7)
}
  0x22   :  { %s16076_s20 = smov 256   ;;  %s16077_s21 = smov 16  }
  0x23   :  { %55 = dma.hbm_to_vmem [thread:$0]  %s19426_s28, 4096, %s50_s25, [#allocation9], %s16076_s20, %s16076_s20, %s16077_s21  }
  0x24   :  { %s16078_s24 = smov [#allocation11]   ;;  %s16079_s27 = smov [#allocation14]  }
  0x25   :  { %s74_s26 = sshll.u32 %s16078_s24, 4  ;;  %s95_s29 = sshll.u32 %s16079_s27, 4  ;;  %s75_s26 = int_to_ptr.vmem [resolvable:$true] %s74_s26  ;;  %s96_s29 = int_to_ptr.vmem [resolvable:$true] %s95_s29 }
  0x26   :  { %s15681_s18 = scalar_lea.hbm %s19326_s3, 64 }
  0x27   :  { %p15682_p8 = scmp.ne.s32.totalorder %s19326_s3, %s15681_s18  ;;  %p15685_p9 = scmp.lt.u32.totalorder %s15681_s18, %s19326_s3 }
  0x29   :  { %p15687_p10 = pnand %p15685_p9, %p15682_p8 }
  0x2b   :  { %15690 = shalt.err (!%p15687_p10)
}
  0x2c   :  { %s15691_s25 = scalar_lea.vmem %s75_s26, 64  ;;  %p15696_p12 = scmp.lt.s32.totalorder %s75_s26, %s75_s26 }
  0x2d   :  { %p15692_p11 = scmp.ne.s32.totalorder %s75_s26, %s15691_s25  ;;  %p15697_p13 = scmp.lt.s32.totalorder %s15691_s25, %s15691_s25 }
  0x2f   :  { %p15698_p0 = por %p15697_p13, %p15696_p12 }
  0x31   :  { %p15699_p1 = pnand %p15698_p0, %p15692_p11 }
  0x33   :  { %15702 = shalt.err (!%p15699_p1)
}
  0x34   :  { %77 = dma.hbm_to_vmem [thread:$0]  %s19326_s3, 64, %s75_s26, [#allocation12]  }
  0x35   :  { %s15703_s27 = scalar_lea.hbm %s19328_s5, 4096 }
  0x36   :  { %p15704_p2 = scmp.ne.s32.totalorder %s19328_s5, %s15703_s27  ;;  %p15707_p3 = scmp.lt.u32.totalorder %s15703_s27, %s19328_s5 }
  0x38   :  { %p15709_p4 = pnand %p15707_p3, %p15704_p2 }
  0x3a   :  { %15712 = shalt.err (!%p15709_p4)
}
  0x3b   :  { %s15713_s18 = scalar_lea.vmem %s96_s29, 4096  ;;  %p15718_p6 = scmp.lt.s32.totalorder %s96_s29, %s96_s29 }
  0x3c   :  { %p15714_p5 = scmp.ne.s32.totalorder %s96_s29, %s15713_s18  ;;  %p15719_p7 = scmp.lt.s32.totalorder %s15713_s18, %s15713_s18 }
  0x3e   :  { %p15720_p8 = por %p15719_p7, %p15718_p6 }
  0x40   :  { %p15721_p9 = pnand %p15720_p8, %p15714_p5 }
  0x42   :  { %15724 = shalt.err (!%p15721_p9)
}
  0x43   :  { %101 = dma.hbm_to_vmem [thread:$0]  %s19328_s5, 4096, %s96_s29, [#allocation15], %s16076_s20, %s16076_s20, %s16077_s21  }
  0x44   :  { %s16080_s19 = smov [#allocation17]   ;;  %s16081_s25 = smov [#allocation20]  }
  0x45   :  { %s117_s1 = sshll.u32 %s16080_s19, 4  ;;  %s142_s28 = sshll.u32 %s16081_s25, 4  ;;  %s118_s1 = int_to_ptr.vmem [resolvable:$true] %s117_s1  ;;  %s143_s28 = int_to_ptr.vmem [resolvable:$true] %s142_s28 }
  0x46   :  { %s15725_s24 = scalar_lea.hbm %s19330_s7, 8192 }
  0x47   :  { %p15726_p10 = scmp.ne.s32.totalorder %s19330_s7, %s15725_s24  ;;  %p15729_p11 = scmp.lt.u32.totalorder %s15725_s24, %s19330_s7 }
  0x49   :  { %p15731_p12 = pnand %p15729_p11, %p15726_p10 }
  0x4b   :  { %15734 = shalt.err (!%p15731_p12)
}
  0x4c   :  { %s15735_s5 = scalar_lea.vmem %s118_s1, 8192  ;;  %p15740_p0 = scmp.lt.s32.totalorder %s118_s1, %s118_s1 }
  0x4d   :  { %p15736_p13 = scmp.ne.s32.totalorder %s118_s1, %s15735_s5  ;;  %p15741_p1 = scmp.lt.s32.totalorder %s15735_s5, %s15735_s5 }
  0x4f   :  { %p15742_p2 = por %p15741_p1, %p15740_p0 }
  0x51   :  { %p15743_p3 = pnand %p15742_p2, %p15736_p13 }
  0x53   :  { %15746 = shalt.err (!%p15743_p3)
}
  0x54   :  { %123 = dma.hbm_to_vmem [thread:$0]  %s19330_s7, 8192, %s118_s1, [#allocation18], %s16076_s20, %s16076_s20, %s16077_s21  }
  0x55   :  { %s15747_s26 = scalar_lea.hbm %s19332_s9, 64 }
  0x56   :  { %p15748_p4 = scmp.ne.s32.totalorder %s19332_s9, %s15747_s26  ;;  %p15751_p5 = scmp.lt.u32.totalorder %s15747_s26, %s19332_s9 }
  0x58   :  { %p15753_p6 = pnand %p15751_p5, %p15748_p4 }
  0x5a   :  { %15756 = shalt.err (!%p15753_p6)
}
  0x5b   :  { %s15757_s24 = scalar_lea.vmem %s143_s28, 64  ;;  %p15762_p8 = scmp.lt.s32.totalorder %s143_s28, %s143_s28 }
  0x5c   :  { %p15758_p7 = scmp.ne.s32.totalorder %s143_s28, %s15757_s24  ;;  %p15763_p9 = scmp.lt.s32.totalorder %s15757_s24, %s15757_s24 }
  0x5e   :  { %p15764_p10 = por %p15763_p9, %p15762_p8 }
  0x60   :  { %p15765_p11 = pnand %p15764_p10, %p15758_p7 }
  0x62   :  { %15768 = shalt.err (!%p15765_p11)
}
  0x63   :  { %145 = dma.hbm_to_vmem [thread:$0]  %s19332_s9, 64, %s143_s28, [#allocation21]  }
  0x64   :  { %s16082_s27 = smov [#allocation23]   ;;  %s16083_s17 = smov [#allocation26]  }
  0x65   :  { %s163_s16 = sshll.u32 %s16082_s27, 4  ;;  %s185_s0 = sshll.u32 %s16083_s17, 4  ;;  %s164_s16 = int_to_ptr.vmem [resolvable:$true] %s163_s16  ;;  %s186_s0 = int_to_ptr.vmem [resolvable:$true] %s185_s0 }
  0x66   :  { %s15769_s30 = scalar_lea.hbm %s19334_s11, 4096 }
  0x67   :  { %p15770_p12 = scmp.ne.s32.totalorder %s19334_s11, %s15769_s30  ;;  %p15773_p13 = scmp.lt.u32.totalorder %s15769_s30, %s19334_s11 }
  0x69   :  { %p15775_p0 = pnand %p15773_p13, %p15770_p12 }
  0x6b   :  { %15778 = shalt.err (!%p15775_p0)
}
  0x6c   :  { %s15779_s9 = scalar_lea.vmem %s164_s16, 4096  ;;  %p15784_p2 = scmp.lt.s32.totalorder %s164_s16, %s164_s16 }
  0x6d   :  { %p15780_p1 = scmp.ne.s32.totalorder %s164_s16, %s15779_s9  ;;  %p15785_p3 = scmp.lt.s32.totalorder %s15779_s9, %s15779_s9 }
  0x6f   :  { %p15786_p4 = por %p15785_p3, %p15784_p2 }
  0x71   :  { %p15787_p5 = pnand %p15786_p4, %p15780_p1 }
  0x73   :  { %15790 = shalt.err (!%p15787_p5)
}
  0x74   :  { %169 = dma.hbm_to_vmem [thread:$0]  %s19334_s11, 4096, %s164_s16, [#allocation24], %s16076_s20, %s16076_s20, %s16077_s21  }
  0x75   :  { %s15791_s24 = scalar_lea.hbm %s19336_s13, 2048 }
  0x76   :  { %p15792_p6 = scmp.ne.s32.totalorder %s19336_s13, %s15791_s24  ;;  %p15795_p7 = scmp.lt.u32.totalorder %s15791_s24, %s19336_s13 }
  0x78   :  { %p15797_p8 = pnand %p15795_p7, %p15792_p6 }
  0x7a   :  { %15800 = shalt.err (!%p15797_p8)
}
  0x7b   :  { %s15801_s5 = scalar_lea.vmem %s186_s0, 2048  ;;  %p15806_p10 = scmp.lt.s32.totalorder %s186_s0, %s186_s0 }
  0x7c   :  { %p15802_p9 = scmp.ne.s32.totalorder %s186_s0, %s15801_s5  ;;  %p15807_p11 = scmp.lt.s32.totalorder %s15801_s5, %s15801_s5 }
  0x7e   :  { %p15808_p12 = por %p15807_p11, %p15806_p10 }
  0x80   :  { %p15809_p13 = pnand %p15808_p12, %p15802_p9 }
  0x82   :  { %15812 = shalt.err (!%p15809_p13)
}
  0x83   :  { %s16084_s11 = smov 64   ;;  %s16085_s16 = smov 4  }
  0x84   :  { %191 = dma.hbm_to_vmem [thread:$0]  %s19336_s13, 2048, %s186_s0, [#allocation27], %s16084_s11, %s16084_s11, %s16085_s16  }
  0x85   :  { %s16086_s18 = smov [#allocation29]   ;;  %s16087_s26 = smov [#allocation5]  }
  0x86   :  { %s207_s3 = sshll.u32 %s16086_s18, 4  ;;  %s37_s19 = sshll.u32 %s16087_s26, 4  ;;  %s208_s3 = int_to_ptr.vmem [resolvable:$true] %s207_s3  ;;  %s38_s19 = int_to_ptr.vmem [resolvable:$true] %s37_s19 }
  0x87   :  { %s15813_s25 = scalar_lea.hbm %s19338_s15, 1024 }
  0x88   :  { %p15814_p0 = scmp.ne.s32.totalorder %s19338_s15, %s15813_s25  ;;  %p15817_p1 = scmp.lt.u32.totalorder %s15813_s25, %s19338_s15 }
  0x8a   :  { %p15819_p2 = pnand %p15817_p1, %p15814_p0 }
  0x8c   :  { %15822 = shalt.err (!%p15819_p2)
}
  0x8d   :  { %s15823_s13 = scalar_lea.vmem %s208_s3, 1024  ;;  %p15828_p4 = scmp.lt.s32.totalorder %s208_s3, %s208_s3 }
  0x8e   :  { %p15824_p3 = scmp.ne.s32.totalorder %s208_s3, %s15823_s13  ;;  %p15829_p5 = scmp.lt.s32.totalorder %s15823_s13, %s15823_s13 }
  0x90   :  { %p15830_p6 = por %p15829_p5, %p15828_p4 }
  0x92   :  { %p15831_p7 = pnand %p15830_p6, %p15824_p3 }
  0x94   :  { %15834 = shalt.err (!%p15831_p7)
}
  0x95   :  { %213 = dma.hbm_to_vmem [thread:$0]  %s19338_s15, 1024, %s208_s3, [#allocation30], %s16084_s11, %s16084_s11, %s16085_s16  }
  0x96   :  { %s19427_s5 = sld [smem:[#allocation106_spill]] }
  0x9c   :  { %s15835_s29 = scalar_lea.hbm %s19427_s5, 1024 }
  0x9d   :  { %p15836_p8 = scmp.ne.s32.totalorder %s19427_s5, %s15835_s29  ;;  %p15839_p9 = scmp.lt.u32.totalorder %s15835_s29, %s19427_s5 }
  0x9f   :  { %p15841_p10 = pnand %p15839_p9, %p15836_p8 }
  0xa1   :  { %15844 = shalt.err (!%p15841_p10)
}
  0xa2   :  { %s15845_s28 = scalar_lea.vmem %s38_s19, 1024  ;;  %p15850_p12 = scmp.lt.s32.totalorder %s38_s19, %s38_s19 }
  0xa3   :  { %p15846_p11 = scmp.ne.s32.totalorder %s38_s19, %s15845_s28  ;;  %p15851_p13 = scmp.lt.s32.totalorder %s15845_s28, %s15845_s28 }
  0xa5   :  { %p15852_p0 = por %p15851_p13, %p15850_p12 }
  0xa7   :  { %p15853_p1 = pnand %p15852_p0, %p15846_p11 }
  0xa9   :  { %15856 = shalt.err (!%p15853_p1)
}
  0xaa   :  { %s16088_s15 = smov 128   ;;  %s16089_s11 = smov 8  }
  0xab   :  { %43 = dma.hbm_to_vmem [thread:$0]  %s19427_s5, 1024, %s38_s19, [#allocation6], %s16088_s15, %s16088_s15, %s16089_s11  }
  0xac   :  { %s16090_s25 = smov [#allocation10]   ;;  %s16091_s23 = smov [#allocation13]  }
  0xad   :  { %s61_s22 = sshll.u32 %s16090_s25, 4  ;;  %s83_s24 = sshll.u32 %s16091_s23, 4  ;;  %s62_s22 = int_to_ptr.vmem [resolvable:$true] %s61_s22  ;;  %s84_s24 = int_to_ptr.vmem [resolvable:$true] %s83_s24 }
  0xae   :  { %s15857_s0 = scalar_lea.hbm %s19325_s2, 4096 }
  0xaf   :  { %p15858_p2 = scmp.ne.s32.totalorder %s19325_s2, %s15857_s0  ;;  %p15861_p3 = scmp.lt.u32.totalorder %s15857_s0, %s19325_s2 }
  0xb1   :  { %p15863_p4 = pnand %p15861_p3, %p15858_p2 }
  0xb3   :  { %15866 = shalt.err (!%p15863_p4)
}
  0xb4   :  { %s15867_s19 = scalar_lea.vmem %s62_s22, 4096  ;;  %p15872_p6 = scmp.lt.s32.totalorder %s62_s22, %s62_s22 }
  0xb5   :  { %p15868_p5 = scmp.ne.s32.totalorder %s62_s22, %s15867_s19  ;;  %p15873_p7 = scmp.lt.s32.totalorder %s15867_s19, %s15867_s19 }
  0xb7   :  { %p15874_p8 = por %p15873_p7, %p15872_p6 }
  0xb9   :  { %p15875_p9 = pnand %p15874_p8, %p15868_p5 }
  0xbb   :  { %15878 = shalt.err (!%p15875_p9)
}
  0xbc   :  { %67 = dma.hbm_to_vmem [thread:$0]  %s19325_s2, 4096, %s62_s22, [#allocation9], %s16076_s20, %s16076_s20, %s16077_s21  }
  0xbd   :  { %s15879_s9 = scalar_lea.hbm %s19327_s4, 4096 }
  0xbe   :  { %p15880_p10 = scmp.ne.s32.totalorder %s19327_s4, %s15879_s9  ;;  %p15883_p11 = scmp.lt.u32.totalorder %s15879_s9, %s19327_s4 }
  0xc0   :  { %p15885_p12 = pnand %p15883_p11, %p15880_p10 }
  0xc2   :  { %15888 = shalt.err (!%p15885_p12)
}
  0xc3   :  { %s15889_s23 = scalar_lea.vmem %s84_s24, 4096  ;;  %p15894_p0 = scmp.lt.s32.totalorder %s84_s24, %s84_s24 }
  0xc4   :  { %p15890_p13 = scmp.ne.s32.totalorder %s84_s24, %s15889_s23  ;;  %p15895_p1 = scmp.lt.s32.totalorder %s15889_s23, %s15889_s23 }
  0xc6   :  { %p15896_p2 = por %p15895_p1, %p15894_p0 }
  0xc8   :  { %p15897_p3 = pnand %p15896_p2, %p15890_p13 }
  0xca   :  { %15900 = shalt.err (!%p15897_p3)
}
  0xcb   :  { %89 = dma.hbm_to_vmem [thread:$0]  %s19327_s4, 4096, %s84_s24, [#allocation12], %s16076_s20, %s16076_s20, %s16077_s21  }
  0xcc   :  { %s16092_s7 = smov [#allocation16]   ;;  %s16093_s0 = smov [#allocation19]  }
  0xcd   :  { %s108_s13 = sshll.u32 %s16092_s7, 4  ;;  %s129_s1 = sshll.u32 %s16093_s0, 4  ;;  %s109_s13 = int_to_ptr.vmem [resolvable:$true] %s108_s13  ;;  %s130_s1 = int_to_ptr.vmem [resolvable:$true] %s129_s1 }
  0xce   :  { %s15901_s29 = scalar_lea.hbm %s19329_s6, 64 }
  0xcf   :  { %p15902_p4 = scmp.ne.s32.totalorder %s19329_s6, %s15901_s29  ;;  %p15905_p5 = scmp.lt.u32.totalorder %s15901_s29, %s19329_s6 }
  0xd1   :  { %p15907_p6 = pnand %p15905_p5, %p15902_p4 }
  0xd3   :  { %15910 = shalt.err (!%p15907_p6)
}
  0xd4   :  { %s15911_s4 = scalar_lea.vmem %s109_s13, 64  ;;  %p15916_p8 = scmp.lt.s32.totalorder %s109_s13, %s109_s13 }
  0xd5   :  { %p15912_p7 = scmp.ne.s32.totalorder %s109_s13, %s15911_s4  ;;  %p15917_p9 = scmp.lt.s32.totalorder %s15911_s4, %s15911_s4 }
  0xd7   :  { %p15918_p10 = por %p15917_p9, %p15916_p8 }
  0xd9   :  { %p15919_p11 = pnand %p15918_p10, %p15912_p7 }
  0xdb   :  { %15922 = shalt.err (!%p15919_p11)
}
  0xdc   :  { %111 = dma.hbm_to_vmem [thread:$0]  %s19329_s6, 64, %s109_s13, [#allocation15]  }
  0xdd   :  { %s15923_s16 = scalar_lea.hbm %s19331_s8, 4096 }
  0xde   :  { %p15924_p12 = scmp.ne.s32.totalorder %s19331_s8, %s15923_s16  ;;  %p15927_p13 = scmp.lt.u32.totalorder %s15923_s16, %s19331_s8 }
  0xe0   :  { %p15929_p0 = pnand %p15927_p13, %p15924_p12 }
  0xe2   :  { %15932 = shalt.err (!%p15929_p0)
}
  0xe3   :  { %s15933_s22 = scalar_lea.vmem %s130_s1, 4096  ;;  %p15938_p2 = scmp.lt.s32.totalorder %s130_s1, %s130_s1 }
  0xe4   :  { %p15934_p1 = scmp.ne.s32.totalorder %s130_s1, %s15933_s22  ;;  %p15939_p3 = scmp.lt.s32.totalorder %s15933_s22, %s15933_s22 }
  0xe6   :  { %p15940_p4 = por %p15939_p3, %p15938_p2 }
  0xe8   :  { %p15941_p5 = pnand %p15940_p4, %p15934_p1 }
  0xea   :  { %15944 = shalt.err (!%p15941_p5)
}
  0xeb   :  { %135 = dma.hbm_to_vmem [thread:$0]  %s19331_s8, 4096, %s130_s1, [#allocation18], %s16076_s20, %s16076_s20, %s16077_s21  }
  0xec   :  { %s16094_s13 = smov [#allocation22]   ;;  %s16095_s27 = smov [#allocation25]  }
  0xed   :  { %s151_s0 = sshll.u32 %s16094_s13, 4  ;;  %s176_s17 = sshll.u32 %s16095_s27, 4  ;;  %s152_s0 = int_to_ptr.vmem [resolvable:$true] %s151_s0  ;;  %s177_s17 = int_to_ptr.vmem [resolvable:$true] %s176_s17 }
  0xee   :  { %s15945_s5 = scalar_lea.hbm %s19333_s10, 8192 }
  0xef   :  { %p15946_p6 = scmp.ne.s32.totalorder %s19333_s10, %s15945_s5  ;;  %p15949_p7 = scmp.lt.u32.totalorder %s15945_s5, %s19333_s10 }
  0xf1   :  { %p15951_p8 = pnand %p15949_p7, %p15946_p6 }
  0xf3   :  { %15954 = shalt.err (!%p15951_p8)
}
  0xf4   :  { %s15955_s8 = scalar_lea.vmem %s152_s0, 8192  ;;  %p15960_p10 = scmp.lt.s32.totalorder %s152_s0, %s152_s0 }
  0xf5   :  { %p15956_p9 = scmp.ne.s32.totalorder %s152_s0, %s15955_s8  ;;  %p15961_p11 = scmp.lt.s32.totalorder %s15955_s8, %s15955_s8 }
  0xf7   :  { %p15962_p12 = por %p15961_p11, %p15960_p10 }
  0xf9   :  { %p15963_p13 = pnand %p15962_p12, %p15956_p9 }
  0xfb   :  { %15966 = shalt.err (!%p15963_p13)
}
  0xfc   :  { %157 = dma.hbm_to_vmem [thread:$0]  %s19333_s10, 8192, %s152_s0, [#allocation21], %s16076_s20, %s16076_s20, %s16077_s21  }
  0xfd   :  { %s15967_s16 = scalar_lea.hbm %s19335_s12, 64 }
  0xfe   :  { %p15968_p0 = scmp.ne.s32.totalorder %s19335_s12, %s15967_s16  ;;  %p15971_p1 = scmp.lt.u32.totalorder %s15967_s16, %s19335_s12 }
 0x100   :  { %p15973_p2 = pnand %p15971_p1, %p15968_p0 }
 0x102   :  { %15976 = shalt.err (!%p15973_p2)
}
 0x103   :  { %s15977_s22 = scalar_lea.vmem %s177_s17, 64  ;;  %p15982_p4 = scmp.lt.s32.totalorder %s177_s17, %s177_s17 }
 0x104   :  { %p15978_p3 = scmp.ne.s32.totalorder %s177_s17, %s15977_s22  ;;  %p15983_p5 = scmp.lt.s32.totalorder %s15977_s22, %s15977_s22 }
 0x106   :  { %p15984_p6 = por %p15983_p5, %p15982_p4 }
 0x108   :  { %p15985_p7 = pnand %p15984_p6, %p15978_p3 }
 0x10a   :  { %15988 = shalt.err (!%p15985_p7)
}
 0x10b   :  { %179 = dma.hbm_to_vmem [thread:$0]  %s19335_s12, 64, %s177_s17, [#allocation24]  }
 0x10c   :  { %s16096_s21 = smov [#allocation28]   ;;  %s16097_s7 = smov [#allocation31]  }
 0x10d   :  { %s198_s6 = sshll.u32 %s16096_s21, 4  ;;  %s220_s13 = sshll.u32 %s16097_s7, 4  ;;  %s199_s6 = int_to_ptr.vmem [resolvable:$true] %s198_s6  ;;  %s221_s13 = int_to_ptr.vmem [resolvable:$true] %s220_s13 }
 0x10e   :  { %s15989_s29 = scalar_lea.hbm %s19337_s14, 16 }
 0x10f   :  { %p15990_p8 = scmp.ne.s32.totalorder %s19337_s14, %s15989_s29  ;;  %p15993_p9 = scmp.lt.u32.totalorder %s15989_s29, %s19337_s14 }
 0x111   :  { %p15995_p10 = pnand %p15993_p9, %p15990_p8 }
 0x113   :  { %15998 = shalt.err (!%p15995_p10)
}
 0x114   :  { %s15999_s12 = scalar_lea.vmem %s199_s6, 16  ;;  %s16003_s17 = scalar_lea.vmem %s199_s6, 32 }
 0x115   :  { %p16000_p11 = scmp.ne.s32.totalorder %s199_s6, %s15999_s12  ;;  %p16004_p12 = scmp.lt.s32.totalorder %s199_s6, %s199_s6 }
 0x116   :  { %p16005_p13 = scmp.lt.s32.totalorder %s16003_s17, %s15999_s12 }
 0x118   :  { %p16006_p0 = por %p16005_p13, %p16004_p12 }
 0x11a   :  { %p16007_p1 = pnand %p16006_p0, %p16000_p11 }
 0x11c   :  { %16010 = shalt.err (!%p16007_p1)
}
 0x11d   :  { %201 = dma.hbm_to_vmem [thread:$0]  %s19337_s14, 16, %s199_s6, [#allocation27]  }
 0x11e   :  { %s19428_s26 = sld [smem:[#allocation108_spill]] }
 0x124   :  { %s16011_s9 = scalar_lea.hbm %s19428_s26, 16 }
 0x125   :  { %p16012_p2 = scmp.ne.s32.totalorder %s19428_s26, %s16011_s9  ;;  %p16015_p3 = scmp.lt.u32.totalorder %s16011_s9, %s19428_s26 }
 0x127   :  { %p16017_p4 = pnand %p16015_p3, %p16012_p2 }
 0x129   :  { %16020 = shalt.err (!%p16017_p4)
}
 0x12a   :  { %s16021_s23 = scalar_lea.vmem %s221_s13, 16  ;;  %s16025_s2 = scalar_lea.vmem %s221_s13, 32 }
 0x12b   :  { %p16022_p5 = scmp.ne.s32.totalorder %s221_s13, %s16021_s23  ;;  %p16026_p6 = scmp.lt.s32.totalorder %s221_s13, %s221_s13 }
 0x12c   :  { %p16027_p7 = scmp.lt.s32.totalorder %s16025_s2, %s16021_s23 }
 0x12e   :  { %p16028_p8 = por %p16027_p7, %p16026_p6 }
 0x130   :  { %p16029_p9 = pnand %p16028_p8, %p16022_p5 }
 0x132   :  { %16032 = shalt.err (!%p16029_p9)
}
 0x133   :  { %223 = dma.hbm_to_vmem [thread:$0]  %s19428_s26, 16, %s221_s13, [#allocation30]  }
 0x134   :  { %16055 = dma.done.wait [#allocation6], 1024  }
 0x135   :  { %16056 = vsyncadd [#allocation6], 4294966272 }
 0x136   :  { %16057 = dma.done.wait [#allocation9], 8192  }
 0x137   :  { %16058 = vsyncadd [#allocation9], 4294959104 }
 0x138   :  { %16059 = dma.done.wait [#allocation12], 4160  }
 0x139   :  { %16060 = vsyncadd [#allocation12], 4294963136 }
 0x13a   :  { %16061 = dma.done.wait [#allocation15], 4160  }
 0x13b   :  { %16062 = vsyncadd [#allocation15], 4294963136 }
 0x13c   :  { %16063 = dma.done.wait [#allocation18], 12288  }
 0x13d   :  { %16064 = vsyncadd [#allocation18], 4294955008 }
 0x13e   :  { %16065 = dma.done.wait [#allocation21], 8256  }
 0x13f   :  { %16066 = vsyncadd [#allocation21], 4294959040 }
 0x140   :  { %16067 = dma.done.wait [#allocation24], 4160  }
 0x141   :  { %16068 = vsyncadd [#allocation24], 4294963136 }
 0x142   :  { %16069 = dma.done.wait [#allocation27], 2064  }
 0x143   :  { %16070 = vsyncadd [#allocation27], 4294965232 }
 0x144   :  { %16071 = dma.done.wait [#allocation30], 1040  }
 0x145   :  { %16072 = vsyncadd [#allocation30], 4294966256  ;;  %v19345_v0 = vmov 0   ;;  %v14037_v1 = vld [vmem:[#allocation8 + $0x4] ss:$16 sps:$4 sm:$0xff]   ;;  %v277_v34 = vld [vmem:[#allocation5 + $0x8] sm:$0xff] }
 0x146   :  { %534 = vmatprep.mubr.bf16.mxu0 %v19345_v0  ;;  %607 = vmatprep.mubr.bf16.mxu1 %v19345_v0  ;;  %v14039_v2 = vld [vmem:[#allocation8 + $0xc] ss:$16 sps:$4 sm:$0xff]   ;;  %v14041_v3 = vld [vmem:[#allocation8] ss:$16 sps:$4 sm:$0xff]   ;;  %v14042_v4 = vld [vmem:[#allocation8 + $0x8] ss:$16 sps:$4 sm:$0xff]  }
 0x147   :  { %502 = vmatprep.subr.bf16.mxu0 %v14037_v1  ;;  %575 = vmatprep.subr.bf16.mxu1 %v14039_v2  ;;  %v14043_v5 = vld [vmem:[#allocation8 + $0x24] ss:$16 sps:$4 sm:$0xff]   ;;  %v14045_v6 = vld [vmem:[#allocation8 + $0x2c] ss:$16 sps:$4 sm:$0xff]   ;;  %v14047_v7 = vld [vmem:[#allocation8 + $0x20] ss:$16 sps:$4 sm:$0xff]  }
 0x148   :  { %503 = vmatpush1.bf16.msra.mxu0 %v14041_v3  ;;  %576 = vmatpush1.bf16.msra.mxu1 %v14042_v4  ;;  %v14048_v8 = vld [vmem:[#allocation8 + $0x28] ss:$16 sps:$4 sm:$0xff]   ;;  %v14049_v9 = vld [vmem:[#allocation8 + $0x44] ss:$16 sps:$4 sm:$0xff]   ;;  %v14051_v10 = vld [vmem:[#allocation8 + $0x4c] ss:$16 sps:$4 sm:$0xff]  }
 0x149   :  { %504 = vmatprep.subr.bf16.mxu0 %v14043_v5  ;;  %577 = vmatprep.subr.bf16.mxu1 %v14045_v6  ;;  %v14053_v11 = vld [vmem:[#allocation8 + $0x40] ss:$16 sps:$4 sm:$0xff]   ;;  %v14054_v12 = vld [vmem:[#allocation8 + $0x48] ss:$16 sps:$4 sm:$0xff]   ;;  %v14055_v13 = vld [vmem:[#allocation8 + $0x64] ss:$16 sps:$4 sm:$0xff]  }
 0x14a   :  { %v14057_v14 = vld [vmem:[#allocation8 + $0x6c] ss:$16 sps:$4 sm:$0xff]   ;;  %v14059_v15 = vld [vmem:[#allocation8 + $0x60] ss:$16 sps:$4 sm:$0xff]   ;;  %v14060_v16 = vld [vmem:[#allocation8 + $0x68] ss:$16 sps:$4 sm:$0xff]  }
 0x14b   :  { %v14061_v17 = vld [vmem:[#allocation8 + $0x84] ss:$16 sps:$4 sm:$0xff]   ;;  %v14063_v18 = vld [vmem:[#allocation8 + $0x8c] ss:$16 sps:$4 sm:$0xff]   ;;  %v14065_v19 = vld [vmem:[#allocation8 + $0x80] ss:$16 sps:$4 sm:$0xff]  }
 0x14c   :  { %505 = vmatpush1.bf16.msra.mxu0 %v14047_v7  ;;  %578 = vmatpush1.bf16.msra.mxu1 %v14048_v8  ;;  %v14066_v20 = vld [vmem:[#allocation8 + $0x88] ss:$16 sps:$4 sm:$0xff]   ;;  %v14067_v21 = vld [vmem:[#allocation8 + $0xa4] ss:$16 sps:$4 sm:$0xff]   ;;  %v14069_v22 = vld [vmem:[#allocation8 + $0xac] ss:$16 sps:$4 sm:$0xff]  }
 0x14d   :  { %506 = vmatprep.subr.bf16.mxu0 %v14049_v9  ;;  %579 = vmatprep.subr.bf16.mxu1 %v14051_v10  ;;  %v14071_v23 = vld [vmem:[#allocation8 + $0xa0] ss:$16 sps:$4 sm:$0xff]   ;;  %v14072_v24 = vld [vmem:[#allocation8 + $0xa8] ss:$16 sps:$4 sm:$0xff]   ;;  %v14073_v25 = vld [vmem:[#allocation8 + $0xc4] ss:$16 sps:$4 sm:$0xff]  }
 0x14e   :  { %v14075_v26 = vld [vmem:[#allocation8 + $0xcc] ss:$16 sps:$4 sm:$0xff]   ;;  %v14077_v27 = vld [vmem:[#allocation8 + $0xc0] ss:$16 sps:$4 sm:$0xff]   ;;  %v14078_v28 = vld [vmem:[#allocation8 + $0xc8] ss:$16 sps:$4 sm:$0xff]  }
 0x14f   :  { %v14079_v29 = vld [vmem:[#allocation8 + $0xe4] ss:$16 sps:$4 sm:$0xff]   ;;  %v14081_v30 = vld [vmem:[#allocation8 + $0xec] ss:$16 sps:$4 sm:$0xff]   ;;  %v14083_v31 = vld [vmem:[#allocation8 + $0xe0] ss:$16 sps:$4 sm:$0xff]  }
 0x150   :  { %507 = vmatpush1.bf16.msra.mxu0 %v14053_v11  ;;  %580 = vmatpush1.bf16.msra.mxu1 %v14054_v12  ;;  %v14084_v32 = vld [vmem:[#allocation8 + $0xe8] ss:$16 sps:$4 sm:$0xff]   ;;  %v276_v33 = vld [vmem:[#allocation5] sm:$0xff]  ;;  %v14088_v39 = vld [vmem:[#allocation13 + $0x8] ss:$16 sps:$4 sm:$0xff]   ;;  %s16099_s10 = smov [#allocation32]  }
 0x151   :  { %508 = vmatprep.subr.bf16.mxu0 %v14055_v13  ;;  %581 = vmatprep.subr.bf16.mxu1 %v14057_v14  ;;  %v14087_v35 = vld [vmem:[#allocation13 + $0x4] ss:$16 sps:$4 sm:$0xff]   ;;  %v14090_v36 = vld [vmem:[#allocation13 + $0xc] ss:$16 sps:$4 sm:$0xff]   ;;  %v16423_v37 = vpack.c.bf16 %v277_v34, %v276_v33  ;;  %v14085_v38 = vld [vmem:[#allocation13] ss:$16 sps:$4 sm:$0xff]  }
 0x152   :  { %v14093_v40 = vld [vmem:[#allocation13 + $0x24] ss:$16 sps:$4 sm:$0xff]   ;;  %v14096_v41 = vld [vmem:[#allocation13 + $0x2c] ss:$16 sps:$4 sm:$0xff]   ;;  %v14091_v42 = vld [vmem:[#allocation13 + $0x20] ss:$16 sps:$4 sm:$0xff]  }
 0x153   :  { %v14094_v43 = vld [vmem:[#allocation13 + $0x28] ss:$16 sps:$4 sm:$0xff]   ;;  %v278_v44 = vld [vmem:[#allocation5 + $0x10] sm:$0xff]  ;;  %v14099_v46 = vld [vmem:[#allocation13 + $0x44] ss:$16 sps:$4 sm:$0xff]   ;;  %s12557_s20 = sshll.u32 %s16099_s10, 4  ;;  %s12558_s20 = int_to_ptr.vmem [resolvable:$true] %s12557_s20 }
 0x154   :  { %509 = vmatpush1.bf16.msra.mxu0 %v14059_v15  ;;  %582 = vmatpush1.bf16.msra.mxu1 %v14060_v16  ;;  %v279_v45 = vld [vmem:[#allocation5 + $0x18] sm:$0xff]  ;;  %v14102_v47 = vld [vmem:[#allocation13 + $0x4c] ss:$16 sps:$4 sm:$0xff]   ;;  %v14097_v49 = vld [vmem:[#allocation13 + $0x40] ss:$16 sps:$4 sm:$0xff]   ;;  %s16033_s21 = scalar_lea.vmem %s12558_s20, 1024  ;;  %p16038_p11 = scmp.lt.s32.totalorder %s12558_s20, %s12558_s20 }
 0x155   :  { %510 = vmatprep.subr.bf16.mxu0 %v14061_v17  ;;  %583 = vmatprep.subr.bf16.mxu1 %v14063_v18  ;;  %v16429_v48 = vpack.c.bf16 %v279_v45, %v278_v44  ;;  %v14100_v50 = vld [vmem:[#allocation13 + $0x48] ss:$16 sps:$4 sm:$0xff]   ;;  %v14105_v51 = vld [vmem:[#allocation13 + $0x64] ss:$16 sps:$4 sm:$0xff]   ;;  %v14108_v52 = vld [vmem:[#allocation13 + $0x6c] ss:$16 sps:$4 sm:$0xff]   ;;  %p16034_p10 = scmp.ne.s32.totalorder %s12558_s20, %s16033_s21  ;;  %p16039_p12 = scmp.lt.s32.totalorder %s16033_s21, %s16033_s21 }
 0x156   :  { %v14103_v53 = vld [vmem:[#allocation13 + $0x60] ss:$16 sps:$4 sm:$0xff]   ;;  %v14106_v54 = vld [vmem:[#allocation13 + $0x68] ss:$16 sps:$4 sm:$0xff]   ;;  %v14111_v57 = vld [vmem:[#allocation13 + $0x84] ss:$16 sps:$4 sm:$0xff]  }
 0x157   :  { %v280_v55 = vld [vmem:[#allocation5 + $0x20] sm:$0xff]  ;;  %v281_v56 = vld [vmem:[#allocation5 + $0x28] sm:$0xff]  ;;  %v282_v3 = vld [vmem:[#allocation5 + $0x30] sm:$0xff]  ;;  %p16040_p13 = por %p16039_p12, %p16038_p11 }
 0x158   :  { %511 = vmatpush1.bf16.msra.mxu0 %v14065_v19  ;;  %584 = vmatpush1.bf16.msra.mxu1 %v14066_v20  ;;  %v14114_v58 = vld [vmem:[#allocation13 + $0x8c] ss:$16 sps:$4 sm:$0xff]   ;;  %v16435_v59 = vpack.c.bf16 %v281_v56, %v280_v55  ;;  %v14109_v60 = vld [vmem:[#allocation13 + $0x80] ss:$16 sps:$4 sm:$0xff]   ;;  %v14112_v61 = vld [vmem:[#allocation13 + $0x88] ss:$16 sps:$4 sm:$0xff]  }
 0x159   :  { %512 = vmatprep.subr.bf16.mxu0 %v14067_v21  ;;  %585 = vmatprep.subr.bf16.mxu1 %v14069_v22  ;;  %v14117_v62 = vld [vmem:[#allocation13 + $0xa4] ss:$16 sps:$4 sm:$0xff]   ;;  %v14120_v63 = vld [vmem:[#allocation13 + $0xac] ss:$16 sps:$4 sm:$0xff]   ;;  %v14115_v1 = vld [vmem:[#allocation13 + $0xa0] ss:$16 sps:$4 sm:$0xff]   ;;  %p16041_p0 = pnand %p16040_p13, %p16034_p10 }
 0x15a   :  { %v14118_v2 = vld [vmem:[#allocation13 + $0xa8] ss:$16 sps:$4 sm:$0xff]   ;;  %v14123_v5 = vld [vmem:[#allocation13 + $0xc4] ss:$16 sps:$4 sm:$0xff]   ;;  %v14126_v6 = vld [vmem:[#allocation13 + $0xcc] ss:$16 sps:$4 sm:$0xff]  }
 0x15b   :  { %v283_v4 = vld [vmem:[#allocation5 + $0x38] sm:$0xff]  ;;  %v14121_v8 = vld [vmem:[#allocation13 + $0xc0] ss:$16 sps:$4 sm:$0xff]   ;;  %v14132_v11 = vld [vmem:[#allocation13 + $0xec] ss:$16 sps:$4 sm:$0xff]  }
 0x15c   :  { %513 = vmatpush1.bf16.msra.mxu0 %v14071_v23  ;;  %586 = vmatpush1.bf16.msra.mxu1 %v14072_v24  ;;  %v16441_v7 = vpack.c.bf16 %v283_v4, %v282_v3  ;;  %v14124_v9 = vld [vmem:[#allocation13 + $0xc8] ss:$16 sps:$4 sm:$0xff]   ;;  %v14129_v10 = vld [vmem:[#allocation13 + $0xe4] ss:$16 sps:$4 sm:$0xff]   ;;  %v14127_v12 = vld [vmem:[#allocation13 + $0xe0] ss:$16 sps:$4 sm:$0xff]  }
 0x15d   :  { %514 = vmatprep.subr.bf16.mxu0 %v14073_v25  ;;  %587 = vmatprep.subr.bf16.mxu1 %v14075_v26  ;;  %v14130_v13 = vld [vmem:[#allocation13 + $0xe8] ss:$16 sps:$4 sm:$0xff]   ;;  %v16445_v14 = vld [vmem:[#allocation10 + $0x4] ss:$16 sps:$4 sm:$0xff]   ;;  %v16451_v16 = vld [vmem:[#allocation10] ss:$16 sps:$4 sm:$0xff]  }
 0x15e   :  { %v16447_v15 = vld [vmem:[#allocation10 + $0xc] ss:$16 sps:$4 sm:$0xff]   ;;  %v16453_v17 = vld [vmem:[#allocation10 + $0x8] ss:$16 sps:$4 sm:$0xff]   ;;  %v16455_v18 = vld [vmem:[#allocation10 + $0x24] ss:$16 sps:$4 sm:$0xff]  }
 0x15f   :  { %v16459_v19 = vld [vmem:[#allocation10 + $0x2c] ss:$16 sps:$4 sm:$0xff]   ;;  %v16463_v20 = vld [vmem:[#allocation10 + $0x20] ss:$16 sps:$4 sm:$0xff]   ;;  %v16465_v21 = vld [vmem:[#allocation10 + $0x28] ss:$16 sps:$4 sm:$0xff]  }
 0x160   :  { %515 = vmatpush1.bf16.msra.mxu0 %v14077_v27  ;;  %588 = vmatpush1.bf16.msra.mxu1 %v14078_v28  ;;  %v16469_v22 = vld [vmem:[#allocation10 + $0x44] ss:$16 sps:$4 sm:$0xff]   ;;  %v16473_v23 = vld [vmem:[#allocation10 + $0x4c] ss:$16 sps:$4 sm:$0xff]   ;;  %v16477_v24 = vld [vmem:[#allocation10 + $0x40] ss:$16 sps:$4 sm:$0xff]  }
 0x161   :  { %516 = vmatprep.subr.bf16.mxu0 %v14079_v29  ;;  %589 = vmatprep.subr.bf16.mxu1 %v14081_v30  ;;  %v16479_v25 = vld [vmem:[#allocation10 + $0x48] ss:$16 sps:$4 sm:$0xff]   ;;  %v16483_v26 = vld [vmem:[#allocation10 + $0x64] ss:$16 sps:$4 sm:$0xff]   ;;  %v16487_v27 = vld [vmem:[#allocation10 + $0x6c] ss:$16 sps:$4 sm:$0xff]  }
 0x162   :  { %v16491_v28 = vld [vmem:[#allocation10 + $0x60] ss:$16 sps:$4 sm:$0xff]   ;;  %v16493_v29 = vld [vmem:[#allocation10 + $0x68] ss:$16 sps:$4 sm:$0xff]   ;;  %v16497_v30 = vld [vmem:[#allocation10 + $0x84] ss:$16 sps:$4 sm:$0xff]  }
 0x163   :  { %v16507_v33 = vld [vmem:[#allocation10 + $0x88] ss:$16 sps:$4 sm:$0xff]   ;;  %v16511_v34 = vld [vmem:[#allocation10 + $0xa4] ss:$16 sps:$4 sm:$0xff]   ;;  %v16545_v44 = vld [vmem:[#allocation10 + $0xe0] ss:$16 sps:$4 sm:$0xff]  }
 0x164   :  { %517 = vmatpush1.bf16.msra.mxu0 %v14083_v31  ;;  %590 = vmatpush1.bf16.msra.mxu1 %v14084_v32  ;;  %v16501_v31 = vld [vmem:[#allocation10 + $0x8c] ss:$16 sps:$4 sm:$0xff]   ;;  %v16505_v32 = vld [vmem:[#allocation10 + $0x80] ss:$16 sps:$4 sm:$0xff]   ;;  %v16547_v45 = vld [vmem:[#allocation10 + $0xe8] ss:$16 sps:$4 sm:$0xff]  }
 0x165   :  { %894 = vmatprep.subr.bf16.mxu0 %v14087_v35  ;;  %967 = vmatprep.subr.bf16.mxu1 %v14090_v36  ;;  %v16515_v35 = vld [vmem:[#allocation10 + $0xac] ss:$16 sps:$4 sm:$0xff]   ;;  %v16519_v36 = vld [vmem:[#allocation10 + $0xa0] ss:$16 sps:$4 sm:$0xff]   ;;  %v14193_v56 = vld [vmem:[#allocation14 + $0x40] ss:$16 sps:$4 sm:$0xff]  }
 0x166   :  { %v14198_v55 = vld [vmem:[#allocation14 + $0x4c] ss:$16 sps:$4 sm:$0xff]   ;;  %v14213_v3 = vld [vmem:[#allocation14 + $0xa4] ss:$16 sps:$4 sm:$0xff]  }
 0x167   :  { %535 = vmatmul.mubr.bf16.vlgmr.msra.gmra.mrb[0].mxu0 %v16423_v37  ;;  %608 = vmatmul.mubr.bf16.vlgmr.msra.gmra.mrb[0].mxu1 %v16423_v37  ;;  %v14216_v4 = vld [vmem:[#allocation14 + $0xac] ss:$16 sps:$4 sm:$0xff]  }
 0x168   :  { %895 = vmatpush1.bf16.msra.mxu0 %v14085_v38  ;;  %968 = vmatpush1.bf16.msra.mxu1 %v14088_v39  ;;  %v16525_v38 = vld [vmem:[#allocation10 + $0xc4] ss:$16 sps:$4 sm:$0xff]   ;;  %v16529_v39 = vld [vmem:[#allocation10 + $0xcc] ss:$16 sps:$4 sm:$0xff]  }
 0x169   :  { %896 = vmatprep.subr.bf16.mxu0 %v14093_v40  ;;  %969 = vmatprep.subr.bf16.mxu1 %v14096_v41  ;;  %v16533_v40 = vld [vmem:[#allocation10 + $0xc0] ss:$16 sps:$4 sm:$0xff]   ;;  %v16535_v41 = vld [vmem:[#allocation10 + $0xc8] ss:$16 sps:$4 sm:$0xff]  }
 0x16a   :  { %544 = vmatprep.mubr.bf16.mxu0 %v19345_v0  ;;  %617 = vmatprep.mubr.bf16.mxu1 %v19345_v0 }
 0x16c   :  { %897 = vmatpush1.bf16.msra.mxu0 %v14091_v42  ;;  %970 = vmatpush1.bf16.msra.mxu1 %v14094_v43  ;;  %v16537_v42 = vld [vmem:[#allocation10 + $0xe4] ss:$16 sps:$4 sm:$0xff]   ;;  %v16541_v43 = vld [vmem:[#allocation10 + $0xec] ss:$16 sps:$4 sm:$0xff]  }
 0x16d   :  { %898 = vmatprep.subr.bf16.mxu0 %v14099_v46  ;;  %971 = vmatprep.subr.bf16.mxu1 %v14102_v47  ;;  %v16551_v46 = vld [vmem:[#allocation14 + $0x4] ss:$16 sps:$4 sm:$0xff]   ;;  %v16553_v47 = vld [vmem:[#allocation14 + $0xc] ss:$16 sps:$4 sm:$0xff]  }
 0x16f   :  { %545 = vmatmul.mubr.bf16.gmra.mrb[4].mxu0 %v16429_v48  ;;  %618 = vmatmul.mubr.bf16.gmra.mrb[4].mxu1 %v16429_v48 }
 0x170   :  { %899 = vmatpush1.bf16.msra.mxu0 %v14097_v49  ;;  %972 = vmatpush1.bf16.msra.mxu1 %v14100_v50  ;;  %v14184_v49 = vld [vmem:[#allocation14 + $0x8] ss:$16 sps:$4 sm:$0xff]   ;;  %v14189_v50 = vld [vmem:[#allocation14 + $0x24] ss:$16 sps:$4 sm:$0xff]  }
 0x171   :  { %900 = vmatprep.subr.bf16.mxu0 %v14105_v51  ;;  %973 = vmatprep.subr.bf16.mxu1 %v14108_v52  ;;  %v14192_v51 = vld [vmem:[#allocation14 + $0x2c] ss:$16 sps:$4 sm:$0xff]   ;;  %v14187_v52 = vld [vmem:[#allocation14 + $0x20] ss:$16 sps:$4 sm:$0xff]  }
 0x172   :  { %554 = vmatprep.mubr.bf16.mxu0 %v19345_v0  ;;  %627 = vmatprep.mubr.bf16.mxu1 %v19345_v0 }
 0x174   :  { %901 = vmatpush1.bf16.msra.mxu0 %v14103_v53  ;;  %974 = vmatpush1.bf16.msra.mxu1 %v14106_v54  ;;  %v14190_v53 = vld [vmem:[#allocation14 + $0x28] ss:$16 sps:$4 sm:$0xff]   ;;  %v14195_v54 = vld [vmem:[#allocation14 + $0x44] ss:$16 sps:$4 sm:$0xff]  }
 0x175   :  { %902 = vmatprep.subr.bf16.mxu0 %v14111_v57  ;;  %975 = vmatprep.subr.bf16.mxu1 %v14114_v58  ;;  %v14196_v57 = vld [vmem:[#allocation14 + $0x48] ss:$16 sps:$4 sm:$0xff]   ;;  %v14201_v58 = vld [vmem:[#allocation14 + $0x64] ss:$16 sps:$4 sm:$0xff]  }
 0x177   :  { %555 = vmatmul.mubr.bf16.gmra.mrb[8].mxu0 %v16435_v59  ;;  %628 = vmatmul.mubr.bf16.gmra.mrb[8].mxu1 %v16435_v59 }
 0x178   :  { %903 = vmatpush1.bf16.msra.mxu0 %v14109_v60  ;;  %976 = vmatpush1.bf16.msra.mxu1 %v14112_v61  ;;  %v14199_v60 = vld [vmem:[#allocation14 + $0x60] ss:$16 sps:$4 sm:$0xff]   ;;  %v14202_v61 = vld [vmem:[#allocation14 + $0x68] ss:$16 sps:$4 sm:$0xff]  }
 0x179   :  { %904 = vmatprep.subr.bf16.mxu0 %v14117_v62  ;;  %977 = vmatprep.subr.bf16.mxu1 %v14120_v63  ;;  %v14207_v62 = vld [vmem:[#allocation14 + $0x84] ss:$16 sps:$4 sm:$0xff]   ;;  %v14210_v63 = vld [vmem:[#allocation14 + $0x8c] ss:$16 sps:$4 sm:$0xff]  }
 0x17a   :  { %564 = vmatprep.mubr.bf16.mxu0 %v19345_v0  ;;  %637 = vmatprep.mubr.bf16.mxu1 %v19345_v0 }
 0x17c   :  { %905 = vmatpush1.bf16.msra.mxu0 %v14115_v1  ;;  %978 = vmatpush1.bf16.msra.mxu1 %v14118_v2  ;;  %v14205_v1 = vld [vmem:[#allocation14 + $0x80] ss:$16 sps:$4 sm:$0xff]   ;;  %v14208_v2 = vld [vmem:[#allocation14 + $0x88] ss:$16 sps:$4 sm:$0xff]  }
 0x17d   :  { %906 = vmatprep.subr.bf16.mxu0 %v14123_v5  ;;  %979 = vmatprep.subr.bf16.mxu1 %v14126_v6  ;;  %v14211_v5 = vld [vmem:[#allocation14 + $0xa0] ss:$16 sps:$4 sm:$0xff]   ;;  %v14214_v6 = vld [vmem:[#allocation14 + $0xa8] ss:$16 sps:$4 sm:$0xff]  }
 0x17f   :  { %565 = vmatmul.mubr.bf16.gmra.mrb[12].mxu0 %v16441_v7  ;;  %638 = vmatmul.mubr.bf16.gmra.mrb[12].mxu1 %v16441_v7 }
 0x180   :  { %907 = vmatpush1.bf16.msra.mxu0 %v14121_v8  ;;  %980 = vmatpush1.bf16.msra.mxu1 %v14124_v9  ;;  %v14222_v8 = vld [vmem:[#allocation14 + $0xcc] ss:$16 sps:$4 sm:$0xff]   ;;  %v14217_v9 = vld [vmem:[#allocation14 + $0xc0] ss:$16 sps:$4 sm:$0xff]  }
 0x181   :  { %908 = vmatprep.subr.bf16.mxu0 %v14129_v10  ;;  %981 = vmatprep.subr.bf16.mxu1 %v14132_v11  ;;  %v14220_v10 = vld [vmem:[#allocation14 + $0xc8] ss:$16 sps:$4 sm:$0xff]   ;;  %v14225_v11 = vld [vmem:[#allocation14 + $0xe4] ss:$16 sps:$4 sm:$0xff]  }
 0x182   :  { %926 = vmatprep.mubr.bf16.mxu0 %v19345_v0  ;;  %999 = vmatprep.mubr.bf16.mxu1 %v19345_v0 }
 0x184   :  { %909 = vmatpush1.bf16.msra.mxu0 %v14127_v12  ;;  %982 = vmatpush1.bf16.msra.mxu1 %v14130_v13  ;;  %v14228_v12 = vld [vmem:[#allocation14 + $0xec] ss:$16 sps:$4 sm:$0xff]   ;;  %v14223_v13 = vld [vmem:[#allocation14 + $0xe0] ss:$16 sps:$4 sm:$0xff]  }
 0x185   :  { %1271 = vmatprep.subr.bf16.mxu0 %v16445_v14  ;;  %1312 = vmatprep.subr.bf16.mxu1 %v16447_v15 }
 0x187   :  { %927 = vmatmul.mubr.bf16.vlgmr.msra.gmra.mrb[16].mxu0 %v16423_v37  ;;  %1000 = vmatmul.mubr.bf16.vlgmr.msra.gmra.mrb[16].mxu1 %v16423_v37  ;;  %v16521_v37 = vld [vmem:[#allocation10 + $0xa8] ss:$16 sps:$4 sm:$0xff]  }
 0x188   :  { %1272 = vmatpush1.bf16.msra.mxu0 %v16451_v16  ;;  %1313 = vmatpush1.bf16.msra.mxu1 %v16453_v17 }
 0x189   :  { %1273 = vmatprep.subr.bf16.mxu0 %v16455_v18  ;;  %1314 = vmatprep.subr.bf16.mxu1 %v16459_v19 }
 0x18a   :  { %936 = vmatprep.mubr.bf16.mxu0 %v19345_v0  ;;  %1009 = vmatprep.mubr.bf16.mxu1 %v19345_v0 }
 0x18c   :  { %1274 = vmatpush1.bf16.msra.mxu0 %v16463_v20  ;;  %1315 = vmatpush1.bf16.msra.mxu1 %v16465_v21 }
 0x18d   :  { %1275 = vmatprep.subr.bf16.mxu0 %v16469_v22  ;;  %1316 = vmatprep.subr.bf16.mxu1 %v16473_v23 }
 0x18f   :  { %937 = vmatmul.mubr.bf16.gmra.mrb[20].mxu0 %v16429_v48  ;;  %1010 = vmatmul.mubr.bf16.gmra.mrb[20].mxu1 %v16429_v48  ;;  %v14181_v48 = vld [vmem:[#allocation14] ss:$16 sps:$4 sm:$0xff]  }
 0x190   :  { %1276 = vmatpush1.bf16.msra.mxu0 %v16477_v24  ;;  %1317 = vmatpush1.bf16.msra.mxu1 %v16479_v25 }
 0x191   :  { %1277 = vmatprep.subr.bf16.mxu0 %v16483_v26  ;;  %1318 = vmatprep.subr.bf16.mxu1 %v16487_v27 }
 0x192   :  { %946 = vmatprep.mubr.bf16.mxu0 %v19345_v0  ;;  %1019 = vmatprep.mubr.bf16.mxu1 %v19345_v0 }
 0x194   :  { %1278 = vmatpush1.bf16.msra.mxu0 %v16491_v28  ;;  %1319 = vmatpush1.bf16.msra.mxu1 %v16493_v29 }
 0x195   :  { %1279 = vmatprep.subr.bf16.mxu0 %v16497_v30  ;;  %1320 = vmatprep.subr.bf16.mxu1 %v16501_v31 }
 0x197   :  { %947 = vmatmul.mubr.bf16.gmra.mrb[24].mxu0 %v16435_v59  ;;  %1020 = vmatmul.mubr.bf16.gmra.mrb[24].mxu1 %v16435_v59  ;;  %v14204_v59 = vld [vmem:[#allocation14 + $0x6c] ss:$16 sps:$4 sm:$0xff]  }
 0x198   :  { %1280 = vmatpush1.bf16.msra.mxu0 %v16505_v32  ;;  %1321 = vmatpush1.bf16.msra.mxu1 %v16507_v33 }
 0x199   :  { %1281 = vmatprep.subr.bf16.mxu0 %v16511_v34  ;;  %1322 = vmatprep.subr.bf16.mxu1 %v16515_v35 }
 0x19a   :  { %956 = vmatprep.mubr.bf16.mxu0 %v19345_v0  ;;  %1029 = vmatprep.mubr.bf16.mxu1 %v19345_v0 }
 0x19c   :  { %1282 = vmatpush1.bf16.msra.mxu0 %v16519_v36  ;;  %1323 = vmatpush1.bf16.msra.mxu1 %v16521_v37 }
 0x19d   :  { %1283 = vmatprep.subr.bf16.mxu0 %v16525_v38  ;;  %1324 = vmatprep.subr.bf16.mxu1 %v16529_v39 }
 0x19f   :  { %957 = vmatmul.mubr.bf16.gmra.mrb[28].mxu0 %v16441_v7  ;;  %1030 = vmatmul.mubr.bf16.gmra.mrb[28].mxu1 %v16441_v7  ;;  %v14219_v7 = vld [vmem:[#allocation14 + $0xc4] ss:$16 sps:$4 sm:$0xff]  }
 0x1a0   :  { %1284 = vmatpush1.bf16.msra.mxu0 %v16533_v40  ;;  %1325 = vmatpush1.bf16.msra.mxu1 %v16535_v41 }
 0x1a1   :  { %1285 = vmatprep.subr.bf16.mxu0 %v16537_v42  ;;  %1326 = vmatprep.subr.bf16.mxu1 %v16541_v43 }
 0x1a2   :  { %1303 = vmatprep.mubr.bf16.mxu0 %v19345_v0  ;;  %1344 = vmatprep.mubr.bf16.mxu1 %v19345_v0 }
 0x1a4   :  { %1286 = vmatpush1.bf16.msra.mxu0 %v16545_v44  ;;  %1327 = vmatpush1.bf16.msra.mxu1 %v16547_v45 }
 0x1a5   :  { %1556 = vmatprep.subr.bf16.mxu0 %v16551_v46  ;;  %1597 = vmatprep.subr.bf16.mxu1 %v16553_v47 }
 0x1a7   :  { %1304 = vmatmul.mubr.bf16.vlgmr.msra.gmra.mrb[32].mxu0 %v19345_v0  ;;  %1345 = vmatmul.mubr.bf16.vlgmr.msra.gmra.mrb[32].mxu1 %v19345_v0 }
 0x1a8   :  { %1557 = vmatpush1.bf16.msra.mxu0 %v14181_v48  ;;  %1598 = vmatpush1.bf16.msra.mxu1 %v14184_v49  ;;  %v14226_v48 = vld [vmem:[#allocation14 + $0xe8] ss:$16 sps:$4 sm:$0xff]  }
 0x1a9   :  { %1558 = vmatprep.subr.bf16.mxu0 %v14189_v50  ;;  %1599 = vmatprep.subr.bf16.mxu1 %v14192_v51 }
 0x1aa   :  { %1588 = vmatprep.mubr.bf16.mxu0 %v19345_v0  ;;  %1629 = vmatprep.mubr.bf16.mxu1 %v19345_v0 }
 0x1ac   :  { %1559 = vmatpush1.bf16.msra.mxu0 %v14187_v52  ;;  %1600 = vmatpush1.bf16.msra.mxu1 %v14190_v53 }
 0x1ad   :  { %1560 = vmatprep.subr.bf16.mxu0 %v14195_v54  ;;  %1601 = vmatprep.subr.bf16.mxu1 %v14198_v55 }
 0x1b0   :  { %1561 = vmatpush1.bf16.msra.mxu0 %v14193_v56  ;;  %1602 = vmatpush1.bf16.msra.mxu1 %v14196_v57 }
 0x1b1   :  { %1562 = vmatprep.subr.bf16.mxu0 %v14201_v58  ;;  %1603 = vmatprep.subr.bf16.mxu1 %v14204_v59 }
 0x1b4   :  { %1563 = vmatpush1.bf16.msra.mxu0 %v14199_v60  ;;  %1604 = vmatpush1.bf16.msra.mxu1 %v14202_v61 }
 0x1b5   :  { %1564 = vmatprep.subr.bf16.mxu0 %v14207_v62  ;;  %1605 = vmatprep.subr.bf16.mxu1 %v14210_v63 }
 0x1b8   :  { %1565 = vmatpush1.bf16.msra.mxu0 %v14205_v1  ;;  %1606 = vmatpush1.bf16.msra.mxu1 %v14208_v2 }
 0x1b9   :  { %1566 = vmatprep.subr.bf16.mxu0 %v14213_v3  ;;  %1607 = vmatprep.subr.bf16.mxu1 %v14216_v4 }
 0x1bc   :  { %1567 = vmatpush1.bf16.msra.mxu0 %v14211_v5  ;;  %1608 = vmatpush1.bf16.msra.mxu1 %v14214_v6 }
 0x1bd   :  { %1568 = vmatprep.subr.bf16.mxu0 %v14219_v7  ;;  %1609 = vmatprep.subr.bf16.mxu1 %v14222_v8  ;;  %v712_v8 = vld [vmem:[#allocation16] sm:$0xf] }
 0x1c0   :  { %1569 = vmatpush1.bf16.msra.mxu0 %v14217_v9  ;;  %1610 = vmatpush1.bf16.msra.mxu1 %v14220_v10 }
 0x1c1   :  { %1570 = vmatprep.subr.bf16.mxu0 %v14225_v11  ;;  %1611 = vmatprep.subr.bf16.mxu1 %v14228_v12 }
 0x1c4   :  { %1571 = vmatpush1.bf16.msra.mxu0 %v14223_v13  ;;  %1612 = vmatpush1.bf16.msra.mxu1 %v14226_v48 }
 0x1c5   :  { %1898 = vmatprep.subr.bf16.mxu0 %v16445_v14  ;;  %1939 = vmatprep.subr.bf16.mxu1 %v16447_v15  ;;  %v322_v14 = vlaneseq }
 0x1c7   :  { %1589 = vmatmul.mubr.bf16.vlgmr.msra.gmra.mrb[36].mxu0 %v19345_v0  ;;  %1630 = vmatmul.mubr.bf16.vlgmr.msra.gmra.mrb[36].mxu1 %v19345_v0  ;;  %v323_v15 = vshrl.u32 %v322_v14, 7 }
 0x1c8   :  { %1899 = vmatpush1.bf16.msra.mxu0 %v16451_v16  ;;  %1940 = vmatpush1.bf16.msra.mxu1 %v16453_v17  ;;  %v320_v16 = vld [vmem:[#allocation11] sm:$0xf] }
 0x1c9   :  { %1900 = vmatprep.subr.bf16.mxu0 %v16455_v18  ;;  %1941 = vmatprep.subr.bf16.mxu1 %v16459_v19  ;;  %v16607_v17 = vsub.s32 0, %v323_v15  ;;  %v16609_v18 = vsub.s32 2, %v323_v15  ;;  %v16611_v19 = vsub.s32 3, %v323_v15 }
 0x1ca   :  { %1930 = vmatprep.mubr.bf16.mxu0 %v19345_v0  ;;  %1971 = vmatprep.mubr.bf16.mxu1 %v19345_v0 }
 0x1cb   :  { %19429 = vst [vmem:[#allocation43_spill] sm:$0xff] %v16607_v17  ;;  %19430 = vst [vmem:[#allocation44_spill] sm:$0xff] %v16609_v18 }
 0x1cc   :  { %1901 = vmatpush1.bf16.msra.mxu0 %v16463_v20  ;;  %1942 = vmatpush1.bf16.msra.mxu1 %v16465_v21  ;;  %19431 = vst [vmem:[#allocation45_spill] sm:$0xff] %v16611_v19  ;;  %v16613_v20 = vsub.s32 1, %v323_v15  ;;  %v16616_v21 = vrot.slane %v320_v16, %v16607_v17 }
 0x1cd   :  { %1902 = vmatprep.subr.bf16.mxu0 %v16469_v22  ;;  %1943 = vmatprep.subr.bf16.mxu1 %v16473_v23  ;;  %v16619_v22 = vrot.slane %v320_v16, %v16609_v18 }
 0x1ce   :  { %19432 = vst [vmem:[#allocation46_spill] sm:$0xff] %v16613_v20 }
 0x1d0   :  { %1903 = vmatpush1.bf16.msra.mxu0 %v16477_v24  ;;  %1944 = vmatpush1.bf16.msra.mxu1 %v16479_v25  ;;  %v16626_v25 = vrot.slane %v320_v16, %v16611_v19 }
 0x1d1   :  { %1904 = vmatprep.subr.bf16.mxu0 %v16483_v26  ;;  %1945 = vmatprep.subr.bf16.mxu1 %v16487_v27 }
 0x1d4   :  { %1905 = vmatpush1.bf16.msra.mxu0 %v16491_v28  ;;  %1946 = vmatpush1.bf16.msra.mxu1 %v16493_v29  ;;  %v16633_v28 = vrot.slane %v320_v16, %v16613_v20 }
 0x1d5   :  { %1906 = vmatprep.subr.bf16.mxu0 %v16497_v30  ;;  %1947 = vmatprep.subr.bf16.mxu1 %v16501_v31 }
 0x1d8   :  { %1907 = vmatpush1.bf16.msra.mxu0 %v16505_v32  ;;  %1948 = vmatpush1.bf16.msra.mxu1 %v16507_v33 }
 0x1d9   :  { %1908 = vmatprep.subr.bf16.mxu0 %v16511_v34  ;;  %1949 = vmatprep.subr.bf16.mxu1 %v16515_v35 }
 0x1dc   :  { %1909 = vmatpush1.bf16.msra.mxu0 %v16519_v36  ;;  %1950 = vmatpush1.bf16.msra.mxu1 %v16521_v37 }
 0x1dd   :  { %1910 = vmatprep.subr.bf16.mxu0 %v16525_v38  ;;  %1951 = vmatprep.subr.bf16.mxu1 %v16529_v39 }
 0x1e0   :  { %1911 = vmatpush1.bf16.msra.mxu0 %v16533_v40  ;;  %1952 = vmatpush1.bf16.msra.mxu1 %v16535_v41 }
 0x1e1   :  { %1912 = vmatprep.subr.bf16.mxu0 %v16537_v42  ;;  %1953 = vmatprep.subr.bf16.mxu1 %v16541_v43 }
 0x1e4   :  { %1913 = vmatpush1.bf16.msra.mxu0 %v16545_v44  ;;  %1954 = vmatpush1.bf16.msra.mxu1 %v16547_v45 }
 0x1e5   :  { %2184 = vmatprep.subr.bf16.mxu0 %v16551_v46  ;;  %2225 = vmatprep.subr.bf16.mxu1 %v16553_v47 }
 0x23a   :  { %v16621_v23 = vpop.f32.mrb[0].mxu0  ;;  %v16623_v24 = vpop.f32.mrb[0].mxu1 }
 0x23b   :  { %v16628_v26 = vpop.f32.mrb[1].mxu0  ;;  %v16630_v27 = vpop.f32.mrb[1].mxu1 }
 0x23c   :  { %v540_v29 = vpop.f32.mrb[2].mxu0  ;;  %v613_v30 = vpop.f32.mrb[2].mxu1 }
 0x23d   :  { %v16636_v31 = vadd.f32 %v540_v29, %v16616_v21  ;;  %v542_v32 = vpop.f32.mrb[3].mxu0  ;;  %v16639_v33 = vadd.f32 %v613_v30, %v16619_v22  ;;  %v615_v34 = vpop.f32.mrb[3].mxu1 }
 0x23e   :  { %v16642_v35 = vadd.f32 %v542_v32, %v16633_v28  ;;  %v16645_v36 = vadd.f32 %v615_v34, %v16626_v25 }
 0x242   :  { %v546_v37 = vpop.f32.mrb[4].mxu0  ;;  %v619_v38 = vpop.f32.mrb[4].mxu1 }
 0x243   :  { %v16648_v39 = vadd.f32 %v546_v37, %v16616_v21  ;;  %v548_v40 = vpop.f32.mrb[5].mxu0  ;;  %v16651_v41 = vadd.f32 %v619_v38, %v16619_v22  ;;  %v621_v42 = vpop.f32.mrb[5].mxu1 }
 0x244   :  { %v16654_v43 = vadd.f32 %v548_v40, %v16633_v28  ;;  %v550_v44 = vpop.f32.mrb[6].mxu0  ;;  %v16657_v45 = vadd.f32 %v621_v42, %v16626_v25  ;;  %v623_v46 = vpop.f32.mrb[6].mxu1  ;;  %v16720_v40 = vrot.slane %v712_v8, %v16607_v17  ;;  %v16723_v42 = vrot.slane %v712_v8, %v16609_v18 }
 0x245   :  { %v16660_v47 = vadd.f32 %v550_v44, %v16616_v21  ;;  %v552_v49 = vpop.f32.mrb[7].mxu0  ;;  %v16663_v50 = vadd.f32 %v623_v46, %v16619_v22  ;;  %v625_v51 = vpop.f32.mrb[7].mxu1  ;;  %v16726_v44 = vrot.slane %v712_v8, %v16613_v20  ;;  %v16729_v46 = vrot.slane %v712_v8, %v16611_v19 }
 0x246   :  { %19433 = vst [vmem:[#allocation47_spill] sm:$0xff] %v16654_v43  ;;  %19434 = vst [vmem:[#allocation48_spill] sm:$0xff] %v16657_v45  ;;  %v16666_v52 = vadd.f32 %v552_v49, %v16633_v28  ;;  %v16669_v53 = vadd.f32 %v625_v51, %v16626_v25 }
 0x247   :  { %19435 = vst [vmem:[#allocation49_spill] sm:$0xff] %v16660_v47  ;;  %19436 = vst [vmem:[#allocation50_spill] sm:$0xff] %v16663_v50 }
 0x248   :  { %19437 = vst [vmem:[#allocation51_spill] sm:$0xff] %v16666_v52  ;;  %19438 = vst [vmem:[#allocation52_spill] sm:$0xff] %v16669_v53 }
 0x24a   :  { %v556_v54 = vpop.f32.mrb[8].mxu0  ;;  %v629_v55 = vpop.f32.mrb[8].mxu1 }
 0x24b   :  { %v16672_v56 = vadd.f32 %v556_v54, %v16616_v21  ;;  %v558_v57 = vpop.f32.mrb[9].mxu0  ;;  %v16675_v58 = vadd.f32 %v629_v55, %v16619_v22  ;;  %v631_v59 = vpop.f32.mrb[9].mxu1 }
 0x24c   :  { %v16678_v60 = vadd.f32 %v558_v57, %v16633_v28  ;;  %v560_v61 = vpop.f32.mrb[10].mxu0  ;;  %v16681_v62 = vadd.f32 %v631_v59, %v16626_v25  ;;  %v633_v63 = vpop.f32.mrb[10].mxu1 }
 0x24d   :  { %19439 = vst [vmem:[#allocation53_spill] sm:$0xff] %v16672_v56  ;;  %19440 = vst [vmem:[#allocation54_spill] sm:$0xff] %v16675_v58  ;;  %v16684_v1 = vadd.f32 %v560_v61, %v16616_v21  ;;  %v562_v2 = vpop.f32.mrb[11].mxu0  ;;  %v16687_v3 = vadd.f32 %v633_v63, %v16619_v22  ;;  %v635_v4 = vpop.f32.mrb[11].mxu1 }
 0x24e   :  { %19441 = vst [vmem:[#allocation55_spill] sm:$0xff] %v16678_v60  ;;  %19442 = vst [vmem:[#allocation56_spill] sm:$0xff] %v16681_v62  ;;  %v16690_v5 = vadd.f32 %v562_v2, %v16633_v28  ;;  %v16693_v6 = vadd.f32 %v635_v4, %v16626_v25  ;;  %v16943_v62 = vld [vmem:[#allocation14 + $0xc] ss:$16 sps:$4 sm:$0xff]  }
 0x24f   :  { %19443 = vst [vmem:[#allocation57_spill] sm:$0xff] %v16684_v1  ;;  %19444 = vst [vmem:[#allocation58_spill] sm:$0xff] %v16687_v3  ;;  %v16929_v1 = vld [vmem:[#allocation10 + $0xe4] ss:$16 sps:$4 sm:$0xff]  }
 0x250   :  { %19445 = vst [vmem:[#allocation59_spill] sm:$0xff] %v16690_v5  ;;  %19446 = vst [vmem:[#allocation60_spill] sm:$0xff] %v16693_v6 }
 0x252   :  { %v566_v7 = vpop.f32.mrb[12].mxu0  ;;  %v639_v9 = vpop.f32.mrb[12].mxu1 }
 0x253   :  { %v16696_v10 = vadd.f32 %v566_v7, %v16616_v21  ;;  %v568_v11 = vpop.f32.mrb[13].mxu0  ;;  %v16699_v12 = vadd.f32 %v639_v9, %v16619_v22  ;;  %v641_v13 = vpop.f32.mrb[13].mxu1 }
 0x254   :  { %v16702_v48 = vadd.f32 %v568_v11, %v16633_v28  ;;  %v570_v14 = vpop.f32.mrb[14].mxu0  ;;  %v16705_v15 = vadd.f32 %v641_v13, %v16626_v25  ;;  %v643_v16 = vpop.f32.mrb[14].mxu1 }
 0x255   :  { %19447 = vst [vmem:[#allocation61_spill] sm:$0xff] %v16696_v10  ;;  %19448 = vst [vmem:[#allocation62_spill] sm:$0xff] %v16699_v12  ;;  %v16708_v29 = vadd.f32 %v570_v14, %v16616_v21  ;;  %v572_v30 = vpop.f32.mrb[15].mxu0  ;;  %v16711_v32 = vadd.f32 %v643_v16, %v16619_v22  ;;  %v645_v34 = vpop.f32.mrb[15].mxu1 }
 0x256   :  { %19449 = vst [vmem:[#allocation63_spill] sm:$0xff] %v16702_v48  ;;  %19450 = vst [vmem:[#allocation64_spill] sm:$0xff] %v16705_v15  ;;  %v16714_v37 = vadd.f32 %v572_v30, %v16633_v28  ;;  %v16717_v38 = vadd.f32 %v645_v34, %v16626_v25  ;;  %v537_v15 = vadd.f32 %v16621_v23, %v16616_v21 }
 0x257   :  { %19451 = vst [vmem:[#allocation65_spill] sm:$0xff] %v16708_v29  ;;  %19452 = vst [vmem:[#allocation66_spill] sm:$0xff] %v16711_v32 }
 0x258   :  { %19453 = vst [vmem:[#allocation67_spill] sm:$0xff] %v16714_v37  ;;  %19454 = vst [vmem:[#allocation68_spill] sm:$0xff] %v16717_v38 }
 0x25a   :  { %v928_v49 = vpop.f32.mrb[16].mxu0  ;;  %v1001_v51 = vpop.f32.mrb[16].mxu1 }
 0x25b   :  { %v16732_v54 = vadd.f32 %v928_v49, %v16720_v40  ;;  %v930_v55 = vpop.f32.mrb[17].mxu0  ;;  %v16735_v57 = vadd.f32 %v1001_v51, %v16723_v42  ;;  %v1003_v59 = vpop.f32.mrb[17].mxu1 }
 0x25c   :  { %v16738_v61 = vadd.f32 %v930_v55, %v16726_v44  ;;  %v932_v63 = vpop.f32.mrb[18].mxu0  ;;  %v16741_v2 = vadd.f32 %v1003_v59, %v16729_v46  ;;  %v1005_v4 = vpop.f32.mrb[18].mxu1 }
 0x25d   :  { %19455 = vst [vmem:[#allocation69_spill] sm:$0xff] %v16732_v54  ;;  %19456 = vst [vmem:[#allocation70_spill] sm:$0xff] %v16735_v57  ;;  %v16744_v7 = vadd.f32 %v932_v63, %v16720_v40  ;;  %v934_v8 = vpop.f32.mrb[19].mxu0  ;;  %v16747_v9 = vadd.f32 %v1005_v4, %v16723_v42  ;;  %v1007_v11 = vpop.f32.mrb[19].mxu1 }
 0x25e   :  { %19457 = vst [vmem:[#allocation71_spill] sm:$0xff] %v16738_v61  ;;  %19458 = vst [vmem:[#allocation72_spill] sm:$0xff] %v16741_v2  ;;  %v16750_v13 = vadd.f32 %v934_v8, %v16726_v44  ;;  %v16753_v14 = vadd.f32 %v1007_v11, %v16729_v46 }
 0x25f   :  { %19459 = vst [vmem:[#allocation73_spill] sm:$0xff] %v16744_v7  ;;  %19460 = vst [vmem:[#allocation74_spill] sm:$0xff] %v16747_v9 }
 0x260   :  { %19461 = vst [vmem:[#allocation75_spill] sm:$0xff] %v16750_v13  ;;  %19462 = vst [vmem:[#allocation76_spill] sm:$0xff] %v16753_v14 }
 0x262   :  { %v938_v16 = vpop.f32.mrb[20].mxu0  ;;  %v1011_v30 = vpop.f32.mrb[20].mxu1 }
 0x263   :  { %v16756_v34 = vadd.f32 %v938_v16, %v16720_v40  ;;  %v940_v49 = vpop.f32.mrb[21].mxu0  ;;  %v16759_v51 = vadd.f32 %v1011_v30, %v16723_v42  ;;  %v1013_v55 = vpop.f32.mrb[21].mxu1 }
 0x264   :  { %v16762_v59 = vadd.f32 %v940_v49, %v16726_v44  ;;  %v942_v63 = vpop.f32.mrb[22].mxu0  ;;  %v16765_v4 = vadd.f32 %v1013_v55, %v16729_v46  ;;  %v1015_v8 = vpop.f32.mrb[22].mxu1 }
 0x265   :  { %19463 = vst [vmem:[#allocation77_spill] sm:$0xff] %v16756_v34  ;;  %19464 = vst [vmem:[#allocation78_spill] sm:$0xff] %v16759_v51  ;;  %v16768_v11 = vadd.f32 %v942_v63, %v16720_v40  ;;  %v944_v0 = vpop.f32.mrb[23].mxu0  ;;  %v16771_v16 = vadd.f32 %v1015_v8, %v16723_v42  ;;  %v1017_v19 = vpop.f32.mrb[23].mxu1 }
 0x266   :  { %19465 = vst [vmem:[#allocation79_spill] sm:$0xff] %v16762_v59  ;;  %19466 = vst [vmem:[#allocation80_spill] sm:$0xff] %v16765_v4  ;;  %v16774_v30 = vadd.f32 %v944_v0, %v16726_v44  ;;  %v16777_v20 = vadd.f32 %v1017_v19, %v16729_v46 }
 0x267   :  { %19467 = vst [vmem:[#allocation81_spill] sm:$0xff] %v16768_v11  ;;  %19468 = vst [vmem:[#allocation82_spill] sm:$0xff] %v16771_v16  ;;  %v16935_v16 = vld [vmem:[#allocation10 + $0xe8] ss:$16 sps:$4 sm:$0xff]  }
 0x268   :  { %19469 = vst [vmem:[#allocation83_spill] sm:$0xff] %v16774_v30  ;;  %19470 = vst [vmem:[#allocation84_spill] sm:$0xff] %v16777_v20  ;;  %v16931_v20 = vld [vmem:[#allocation10 + $0xec] ss:$16 sps:$4 sm:$0xff]   ;;  %v16933_v30 = vld [vmem:[#allocation10 + $0xe0] ss:$16 sps:$4 sm:$0xff]  }
 0x269   :  { %v16941_v11 = vld [vmem:[#allocation14 + $0x4] ss:$16 sps:$4 sm:$0xff]  }
 0x26a   :  { %v948_v49 = vpop.f32.mrb[24].mxu0  ;;  %v1021_v18 = vpop.f32.mrb[24].mxu1 }
 0x26b   :  { %v16780_v55 = vadd.f32 %v948_v49, %v16720_v40  ;;  %v950_v17 = vpop.f32.mrb[25].mxu0  ;;  %v16783_v63 = vadd.f32 %v1021_v18, %v16723_v42  ;;  %v1023_v2 = vpop.f32.mrb[25].mxu1 }
 0x26c   :  { %v16786_v8 = vadd.f32 %v950_v17, %v16726_v44  ;;  %v952_v61 = vpop.f32.mrb[26].mxu0  ;;  %v16789_v0 = vadd.f32 %v1023_v2, %v16729_v46  ;;  %v1025_v57 = vpop.f32.mrb[26].mxu1 }
 0x26d   :  { %19471 = vst [vmem:[#allocation85_spill] sm:$0xff] %v16780_v55  ;;  %19472 = vst [vmem:[#allocation86_spill] sm:$0xff] %v16783_v63  ;;  %v16792_v19 = vadd.f32 %v952_v61, %v16720_v40  ;;  %v954_v54 = vpop.f32.mrb[27].mxu0  ;;  %v16795_v49 = vadd.f32 %v1025_v57, %v16723_v42  ;;  %v1027_v38 = vpop.f32.mrb[27].mxu1 }
 0x26e   :  { %19473 = vst [vmem:[#allocation87_spill] sm:$0xff] %v16786_v8  ;;  %19474 = vst [vmem:[#allocation88_spill] sm:$0xff] %v16789_v0  ;;  %v16798_v18 = vadd.f32 %v954_v54, %v16726_v44  ;;  %v16801_v37 = vadd.f32 %v1027_v38, %v16729_v46 }
 0x26f   :  { %19475 = vst [vmem:[#allocation89_spill] sm:$0xff] %v16792_v19  ;;  %19476 = vst [vmem:[#allocation90_spill] sm:$0xff] %v16795_v49 }
 0x270   :  { %19477 = vst [vmem:[#allocation91_spill] sm:$0xff] %v16798_v18  ;;  %19478 = vst [vmem:[#allocation92_spill] sm:$0xff] %v16801_v37 }
 0x272   :  { %v958_v17 = vpop.f32.mrb[28].mxu0  ;;  %v1031_v32 = vpop.f32.mrb[28].mxu1 }
 0x273   :  { %v16804_v2 = vadd.f32 %v958_v17, %v16720_v40  ;;  %v960_v29 = vpop.f32.mrb[29].mxu0  ;;  %v16807_v61 = vadd.f32 %v1031_v32, %v16723_v42  ;;  %v1033_v14 = vpop.f32.mrb[29].mxu1  ;;  %v610_v17 = vadd.f32 %v16623_v24, %v16619_v22  ;;  %v539_v32 = vadd.f32 %v16628_v26, %v16633_v28 }
 0x274   :  { %v16810_v57 = vadd.f32 %v960_v29, %v16726_v44  ;;  %v962_v13 = vpop.f32.mrb[30].mxu0  ;;  %v16813_v54 = vadd.f32 %v1033_v14, %v16729_v46  ;;  %v1035_v9 = vpop.f32.mrb[30].mxu1  ;;  %v612_v29 = vadd.f32 %v16630_v27, %v16626_v25 }
 0x275   :  { %v964_v38 = vpop.f32.mrb[31].mxu0  ;;  %v1037_v7 = vpop.f32.mrb[31].mxu1 }
 0x27a   :  { %v1305_v48 = vpop.f32.mrb[32].mxu0  ;;  %v1346_v12 = vpop.f32.mrb[32].mxu1 }
 0x27b   :  { %v1353_v10 = vadd.f32 %v1305_v48, %v537_v15  ;;  %v1355_v14 = vadd.f32 %v1346_v12, %v610_v17  ;;  %v1307_v4 = vpop.f32.mrb[33].mxu0  ;;  %v1348_v59 = vpop.f32.mrb[33].mxu1 }
 0x27c   :  { %v1354_v51 = vadd.f32 %v1307_v4, %v539_v32  ;;  %v1356_v34 = vadd.f32 %v1348_v59, %v612_v29  ;;  %v1309_v6 = vpop.f32.mrb[34].mxu0  ;;  %v1350_v5 = vpop.f32.mrb[34].mxu1  ;;  %v1038_v4 = vadd.f32 %v1037_v7, %v16729_v46 }
 0x27d   :  { %v12726_v21 = vmul.f32 -1.442695, %v1353_v10  ;;  %v1310_v23 = vpop.f32.mrb[35].mxu0  ;;  %v1351_v3 = vpop.f32.mrb[35].mxu1 }
 0x27e   :  { %v12727_v22 = vmul.f32 -1.442695, %v1354_v51  ;;  %v12728_v24 = vmul.f32 -1.442695, %v1356_v34  ;;  %v963_v3 = vadd.f32 %v962_v13, %v16720_v40  ;;  %v1036_v51 = vadd.f32 %v1035_v9, %v16723_v42 }
 0x27f   :  { %15117 = vpow2.f32 %v12726_v21  ;;  %v965_v34 = vadd.f32 %v964_v38, %v16726_v44 }
 0x280   :  { %15119 = vpow2.f32 %v12727_v22 }
 0x281   :  { %15121 = vpow2.f32 %v12728_v24 }
 0x282   :  { %15123 = vtanh.f32 %v1355_v14 }
 0x289   :  { %v15118_v26 = vpop.eup %15117 }
 0x28a   :  { %v15120_v28 = vpop.eup %15119  ;;  %v1645_v25 = vadd.f32 1.0, %v15118_v26 }
 0x28b   :  { %v1651_v27 = vadd.f32 1.0, %v15120_v28  ;;  %v15122_v12 = vpop.eup %15121 }
 0x28c   :  { %15125 = vrcp.f32 %v1645_v25  ;;  %v15124_v48 = vpop.eup %15123  ;;  %v1658_v10 = vadd.f32 1.0, %v15122_v12 }
 0x28d   :  { %15127 = vrcp.f32 %v1651_v27 }
 0x28e   :  { %15129 = vrcp.f32 %v1658_v10  ;;  %v15630_v10 = vld [vmem:[#allocation14 + $0x8] ss:$16 sps:$4 sm:$0xff]  }
 0x296   :  { %v15126_v15 = vpop.eup %15125 }
 0x297   :  { %v15128_v6 = vpop.eup %15127  ;;  %v1662_v5 = vmul.f32 %v15126_v15, %v15124_v48 }
 0x298   :  { %v1661_v59 = vmul.f32 0.0, %v15128_v6  ;;  %v15130_v46 = vpop.eup %15129 }
 0x29a   :  { %v16827_v17 = vadd.f32 %v1662_v5, %v1661_v59  ;;  %v1590_v32 = vpop.f32.mrb[36].mxu0  ;;  %v1631_v29 = vpop.f32.mrb[36].mxu1  ;;  %v15629_v5 = vld [vmem:[#allocation14] ss:$16 sps:$4 sm:$0xff]   ;;  %v15631_v59 = vld [vmem:[#allocation14 + $0x24] ss:$16 sps:$4 sm:$0xff]  }
 0x29b   :  { %v1638_v14 = vadd.f32 %v1590_v32, %v963_v3  ;;  %v1640_v21 = vadd.f32 %v1631_v29, %v1036_v51  ;;  %v1592_v23 = vpop.f32.mrb[37].mxu0  ;;  %v1633_v22 = vpop.f32.mrb[37].mxu1  ;;  %v15632_v3 = vld [vmem:[#allocation14 + $0x2c] ss:$16 sps:$4 sm:$0xff]   ;;  %v19480_v51 = vmov 0  }
 0x29c   :  { %15131 = vtanh.f32 %v16827_v17  ;;  %v1639_v24 = vadd.f32 %v1592_v23, %v965_v34  ;;  %v1641_v26 = vadd.f32 %v1633_v22, %v1038_v4  ;;  %v1594_v40 = vpop.f32.mrb[38].mxu0  ;;  %v1635_v13 = vpop.f32.mrb[38].mxu1  ;;  %v15633_v34 = vld [vmem:[#allocation14 + $0x20] ss:$16 sps:$4 sm:$0xff]   ;;  %v15634_v4 = vld [vmem:[#allocation14 + $0x28] ss:$16 sps:$4 sm:$0xff]  }
 0x29d   :  { %v12729_v42 = vmul.f32 -1.442695, %v1638_v14  ;;  %v1595_v9 = vpop.f32.mrb[39].mxu0  ;;  %v1636_v44 = vpop.f32.mrb[39].mxu1  ;;  %v15635_v32 = vld [vmem:[#allocation14 + $0x44] ss:$16 sps:$4 sm:$0xff]  }
 0x29e   :  { %v12730_v38 = vmul.f32 -1.442695, %v1639_v24  ;;  %v12731_v28 = vmul.f32 -1.442695, %v1641_v26  ;;  %v15636_v29 = vld [vmem:[#allocation14 + $0x4c] ss:$16 sps:$4 sm:$0xff]  }
 0x29f   :  { %15133 = vpow2.f32 %v12729_v42  ;;  %v15638_v23 = vld [vmem:[#allocation14 + $0x48] ss:$16 sps:$4 sm:$0xff]   ;;  %v15639_v24 = vld [vmem:[#allocation14 + $0x64] ss:$16 sps:$4 sm:$0xff]   ;;  %v15640_v26 = vld [vmem:[#allocation14 + $0x6c] ss:$16 sps:$4 sm:$0xff]  }
 0x2a0   :  { %15135 = vpow2.f32 %v12730_v38  ;;  %v15641_v38 = vld [vmem:[#allocation14 + $0x60] ss:$16 sps:$4 sm:$0xff]  }
 0x2a1   :  { %15137 = vpow2.f32 %v12731_v28  ;;  %v15644_v28 = vld [vmem:[#allocation14 + $0x8c] ss:$16 sps:$4 sm:$0xff]  }
 0x2a2   :  { %15139 = vtanh.f32 %v1640_v21  ;;  %v15637_v21 = vld [vmem:[#allocation14 + $0x40] ss:$16 sps:$4 sm:$0xff]  }
 0x2a6   :  { %v15132_v7 = vpop.eup %15131 }
 0x2a7   :  { %v16830_v25 = vmul.f32 %v15132_v7, %v15130_v46  ;;  %v15642_v46 = vld [vmem:[#allocation14 + $0x68] ss:$16 sps:$4 sm:$0xff]   ;;  %v15643_v7 = vld [vmem:[#allocation14 + $0x84] ss:$16 sps:$4 sm:$0xff]  }
 0x2a9   :  { %19479 = vst [vmem:[#allocation93_spill] sm:$0xff] %v16830_v25  ;;  %v15134_v27 = vpop.eup %15133  ;;  %v1705_v12 = vpack.c.bf16 %v16830_v25, %v16830_v25  ;;  %v16923_v25 = vld [vmem:[#allocation10 + $0xc8] ss:$16 sps:$4 sm:$0xff]  }
 0x2aa   :  { %v15136_v48 = vpop.eup %15135  ;;  %v1669_v15 = vadd.f32 1.0, %v15134_v27 }
 0x2ab   :  { %v1675_v6 = vadd.f32 1.0, %v15136_v48  ;;  %1931 = vmatmul.mubr.bf16.vlgmr.msra.gmra.mrb[40].mxu0 %v1705_v12  ;;  %1972 = vmatmul.mubr.bf16.vlgmr.msra.gmra.mrb[40].mxu1 %v1705_v12  ;;  %v15138_v14 = vpop.eup %15137  ;;  %v15645_v12 = vld [vmem:[#allocation14 + $0x80] ss:$16 sps:$4 sm:$0xff]   ;;  %v15646_v48 = vld [vmem:[#allocation14 + $0x88] ss:$16 sps:$4 sm:$0xff]  }
 0x2ac   :  { %15141 = vrcp.f32 %v1669_v15  ;;  %2185 = vmatpush1.bf16.msra.mxu0 %v15629_v5  ;;  %2226 = vmatpush1.bf16.msra.mxu1 %v15630_v10  ;;  %v15140_v22 = vpop.eup %15139  ;;  %v1682_v9 = vadd.f32 1.0, %v15138_v14  ;;  %v15647_v15 = vld [vmem:[#allocation14 + $0xa4] ss:$16 sps:$4 sm:$0xff]   ;;  %v15649_v5 = vld [vmem:[#allocation14 + $0xa0] ss:$16 sps:$4 sm:$0xff]  }
 0x2ad   :  { %15143 = vrcp.f32 %v1675_v6  ;;  %2186 = vmatprep.subr.bf16.mxu0 %v15631_v59  ;;  %2227 = vmatprep.subr.bf16.mxu1 %v15632_v3  ;;  %v15648_v6 = vld [vmem:[#allocation14 + $0xac] ss:$16 sps:$4 sm:$0xff]   ;;  %v15650_v10 = vld [vmem:[#allocation14 + $0xa8] ss:$16 sps:$4 sm:$0xff]   ;;  %v15651_v59 = vld [vmem:[#allocation14 + $0xc4] ss:$16 sps:$4 sm:$0xff]  }
 0x2ae   :  { %2216 = vmatprep.mubr.bf16.mxu0 %v19480_v51  ;;  %2257 = vmatprep.mubr.bf16.mxu1 %v19480_v51  ;;  %15145 = vrcp.f32 %v1682_v9  ;;  %v15652_v3 = vld [vmem:[#allocation14 + $0xcc] ss:$16 sps:$4 sm:$0xff]   ;;  %v16851_v9 = vld [vmem:[#allocation10 + $0x8] ss:$16 sps:$4 sm:$0xff]  }
 0x2af   :  { %v15656_v14 = vld [vmem:[#allocation14 + $0xec] ss:$16 sps:$4 sm:$0xff]  }
 0x2b0   :  { %2187 = vmatpush1.bf16.msra.mxu0 %v15633_v34  ;;  %2228 = vmatpush1.bf16.msra.mxu1 %v15634_v4  ;;  %v15653_v34 = vld [vmem:[#allocation14 + $0xc0] ss:$16 sps:$4 sm:$0xff]   ;;  %v15654_v4 = vld [vmem:[#allocation14 + $0xc8] ss:$16 sps:$4 sm:$0xff]  }
 0x2b1   :  { %2188 = vmatprep.subr.bf16.mxu0 %v15635_v32  ;;  %2229 = vmatprep.subr.bf16.mxu1 %v15636_v29  ;;  %v15655_v29 = vld [vmem:[#allocation14 + $0xe4] ss:$16 sps:$4 sm:$0xff]  }
 0x2b4   :  { %2189 = vmatpush1.bf16.msra.mxu0 %v15637_v21  ;;  %2230 = vmatpush1.bf16.msra.mxu1 %v15638_v23 }
 0x2b5   :  { %2190 = vmatprep.subr.bf16.mxu0 %v15639_v24  ;;  %2231 = vmatprep.subr.bf16.mxu1 %v15640_v26  ;;  %v15658_v24 = vld [vmem:[#allocation14 + $0xe8] ss:$16 sps:$4 sm:$0xff]  }
 0x2b6   :  { %v15142_v40 = vpop.eup %15141 }
 0x2b7   :  { %v15144_v13 = vpop.eup %15143  ;;  %v1686_v42 = vmul.f32 %v15142_v40, %v15140_v22  ;;  %v15657_v22 = vld [vmem:[#allocation14 + $0xe0] ss:$16 sps:$4 sm:$0xff]  }
 0x2b8   :  { %v1685_v44 = vmul.f32 0.0, %v15144_v13  ;;  %2191 = vmatpush1.bf16.msra.mxu0 %v15641_v38  ;;  %2232 = vmatpush1.bf16.msra.mxu1 %v15642_v46  ;;  %v15146_v32 = vpop.eup %15145  ;;  %v16845_v40 = vld [vmem:[#allocation10 + $0x4] ss:$16 sps:$4 sm:$0xff]   ;;  %v16847_v13 = vld [vmem:[#allocation10 + $0xc] ss:$16 sps:$4 sm:$0xff]  }
 0x2b9   :  { %2192 = vmatprep.subr.bf16.mxu0 %v15643_v7  ;;  %2233 = vmatprep.subr.bf16.mxu1 %v15644_v28  ;;  %v16859_v38 = vld [vmem:[#allocation10 + $0x2c] ss:$16 sps:$4 sm:$0xff]   ;;  %v16861_v46 = vld [vmem:[#allocation10 + $0x20] ss:$16 sps:$4 sm:$0xff]   ;;  %v16863_v7 = vld [vmem:[#allocation10 + $0x28] ss:$16 sps:$4 sm:$0xff]  }
 0x2ba   :  { %v16836_v27 = vadd.f32 %v1686_v42, %v1685_v44  ;;  %v16849_v42 = vld [vmem:[#allocation10] ss:$16 sps:$4 sm:$0xff]   ;;  %v16857_v44 = vld [vmem:[#allocation10 + $0x24] ss:$16 sps:$4 sm:$0xff]  }
 0x2bb   :  { %v16869_v28 = vld [vmem:[#allocation10 + $0x44] ss:$16 sps:$4 sm:$0xff]  }
 0x2bc   :  { %15147 = vtanh.f32 %v16836_v27  ;;  %2193 = vmatpush1.bf16.msra.mxu0 %v15645_v12  ;;  %2234 = vmatpush1.bf16.msra.mxu1 %v15646_v48  ;;  %v16871_v12 = vld [vmem:[#allocation10 + $0x4c] ss:$16 sps:$4 sm:$0xff]   ;;  %v16873_v48 = vld [vmem:[#allocation10 + $0x40] ss:$16 sps:$4 sm:$0xff]  }
 0x2bd   :  { %2194 = vmatprep.subr.bf16.mxu0 %v15647_v15  ;;  %2235 = vmatprep.subr.bf16.mxu1 %v15648_v6  ;;  %v16875_v15 = vld [vmem:[#allocation10 + $0x48] ss:$16 sps:$4 sm:$0xff]   ;;  %v16881_v6 = vld [vmem:[#allocation10 + $0x64] ss:$16 sps:$4 sm:$0xff]  }
 0x2c0   :  { %2195 = vmatpush1.bf16.msra.mxu0 %v15649_v5  ;;  %2236 = vmatpush1.bf16.msra.mxu1 %v15650_v10  ;;  %v16883_v5 = vld [vmem:[#allocation10 + $0x6c] ss:$16 sps:$4 sm:$0xff]   ;;  %v16885_v10 = vld [vmem:[#allocation10 + $0x60] ss:$16 sps:$4 sm:$0xff]  }
 0x2c1   :  { %2196 = vmatprep.subr.bf16.mxu0 %v15651_v59  ;;  %2237 = vmatprep.subr.bf16.mxu1 %v15652_v3  ;;  %v16887_v59 = vld [vmem:[#allocation10 + $0x68] ss:$16 sps:$4 sm:$0xff]   ;;  %v16893_v3 = vld [vmem:[#allocation10 + $0x84] ss:$16 sps:$4 sm:$0xff]  }
 0x2c4   :  { %2197 = vmatpush1.bf16.msra.mxu0 %v15653_v34  ;;  %2238 = vmatpush1.bf16.msra.mxu1 %v15654_v4  ;;  %v16895_v34 = vld [vmem:[#allocation10 + $0x8c] ss:$16 sps:$4 sm:$0xff]   ;;  %v16897_v4 = vld [vmem:[#allocation10 + $0x80] ss:$16 sps:$4 sm:$0xff]  }
 0x2c5   :  { %2198 = vmatprep.subr.bf16.mxu0 %v15655_v29  ;;  %2239 = vmatprep.subr.bf16.mxu1 %v15656_v14  ;;  %v16905_v29 = vld [vmem:[#allocation10 + $0xa4] ss:$16 sps:$4 sm:$0xff]   ;;  %v16907_v14 = vld [vmem:[#allocation10 + $0xac] ss:$16 sps:$4 sm:$0xff]  }
 0x2c6   :  { %v15148_v21 = vpop.eup %15147 }
 0x2c7   :  { %v16839_v23 = vmul.f32 %v15148_v21, %v15146_v32  ;;  %v16899_v32 = vld [vmem:[#allocation10 + $0x88] ss:$16 sps:$4 sm:$0xff]   ;;  %v16909_v21 = vld [vmem:[#allocation10 + $0xa0] ss:$16 sps:$4 sm:$0xff]  }
 0x2c8   :  { %2199 = vmatpush1.bf16.msra.mxu0 %v15657_v22  ;;  %2240 = vmatpush1.bf16.msra.mxu1 %v15658_v24  ;;  %v16911_v22 = vld [vmem:[#allocation10 + $0xa8] ss:$16 sps:$4 sm:$0xff]   ;;  %v16917_v24 = vld [vmem:[#allocation10 + $0xc4] ss:$16 sps:$4 sm:$0xff]  }
 0x2c9   :  { %19481 = vst [vmem:[#allocation94_spill] sm:$0xff] %v16839_v23  ;;  %v1991_v26 = vpack.c.bf16 %v16839_v23, %v16839_v23  ;;  %2526 = vmatprep.subr.bf16.mxu0 %v16845_v40  ;;  %2567 = vmatprep.subr.bf16.mxu1 %v16847_v13  ;;  %v16921_v23 = vld [vmem:[#allocation10 + $0xc0] ss:$16 sps:$4 sm:$0xff]  }
 0x2cb   :  { %2217 = vmatmul.mubr.bf16.vlgmr.msra.gmra.mrb[44].mxu0 %v1991_v26  ;;  %2258 = vmatmul.mubr.bf16.vlgmr.msra.gmra.mrb[44].mxu1 %v1991_v26  ;;  %v16919_v26 = vld [vmem:[#allocation10 + $0xcc] ss:$16 sps:$4 sm:$0xff]  }
 0x2cc   :  { %2558 = vmatprep.mubr.bf16.mxu0 %v19480_v51  ;;  %2599 = vmatprep.mubr.bf16.mxu1 %v19480_v51 }
 0x2cd   :  { %2527 = vmatpush1.bf16.msra.mxu0 %v16849_v42  ;;  %2568 = vmatpush1.bf16.msra.mxu1 %v16851_v9 }
 0x2ce   :  { %2528 = vmatprep.subr.bf16.mxu0 %v16857_v44  ;;  %2569 = vmatprep.subr.bf16.mxu1 %v16859_v38 }
 0x2d1   :  { %2529 = vmatpush1.bf16.msra.mxu0 %v16861_v46  ;;  %2570 = vmatpush1.bf16.msra.mxu1 %v16863_v7 }
 0x2d2   :  { %2530 = vmatprep.subr.bf16.mxu0 %v16869_v28  ;;  %2571 = vmatprep.subr.bf16.mxu1 %v16871_v12 }
 0x2d5   :  { %2531 = vmatpush1.bf16.msra.mxu0 %v16873_v48  ;;  %2572 = vmatpush1.bf16.msra.mxu1 %v16875_v15 }
 0x2d6   :  { %2532 = vmatprep.subr.bf16.mxu0 %v16881_v6  ;;  %2573 = vmatprep.subr.bf16.mxu1 %v16883_v5 }
 0x2d9   :  { %2533 = vmatpush1.bf16.msra.mxu0 %v16885_v10  ;;  %2574 = vmatpush1.bf16.msra.mxu1 %v16887_v59 }
 0x2da   :  { %2534 = vmatprep.subr.bf16.mxu0 %v16893_v3  ;;  %2575 = vmatprep.subr.bf16.mxu1 %v16895_v34 }
 0x2dd   :  { %2535 = vmatpush1.bf16.msra.mxu0 %v16897_v4  ;;  %2576 = vmatpush1.bf16.msra.mxu1 %v16899_v32 }
 0x2de   :  { %2536 = vmatprep.subr.bf16.mxu0 %v16905_v29  ;;  %2577 = vmatprep.subr.bf16.mxu1 %v16907_v14 }
 0x2e1   :  { %2537 = vmatpush1.bf16.msra.mxu0 %v16909_v21  ;;  %2578 = vmatpush1.bf16.msra.mxu1 %v16911_v22 }
 0x2e2   :  { %2538 = vmatprep.subr.bf16.mxu0 %v16917_v24  ;;  %2579 = vmatprep.subr.bf16.mxu1 %v16919_v26 }
 0x2e5   :  { %2539 = vmatpush1.bf16.msra.mxu0 %v16921_v23  ;;  %2580 = vmatpush1.bf16.msra.mxu1 %v16923_v25 }
 0x2e6   :  { %2540 = vmatprep.subr.bf16.mxu0 %v16929_v1  ;;  %2581 = vmatprep.subr.bf16.mxu1 %v16931_v20 }
 0x2e9   :  { %2541 = vmatpush1.bf16.msra.mxu0 %v16933_v30  ;;  %2582 = vmatpush1.bf16.msra.mxu1 %v16935_v16 }
 0x2ea   :  { %2812 = vmatprep.subr.bf16.mxu0 %v16941_v11  ;;  %2853 = vmatprep.subr.bf16.mxu1 %v16943_v62 }
 0x37e   :  { %v1932_v60 = vpop.f32.mrb[40].mxu0  ;;  %v1973_v58 = vpop.f32.mrb[40].mxu1 }
 0x37f   :  { %v1980_v56 = vadd.f32 %v1932_v60, %v16636_v31  ;;  %v1982_v0 = vadd.f32 %v1973_v58, %v16639_v33  ;;  %v1934_v8 = vpop.f32.mrb[41].mxu0  ;;  %v1975_v63 = vpop.f32.mrb[41].mxu1 }
 0x380   :  { %v1981_v55 = vadd.f32 %v1934_v8, %v16642_v35  ;;  %v1983_v53 = vadd.f32 %v1975_v63, %v16645_v36  ;;  %v1936_v52 = vpop.f32.mrb[42].mxu0  ;;  %v1977_v50 = vpop.f32.mrb[42].mxu1 }
 0x381   :  { %v12796_v47 = vmul.f32 -1.442695, %v1980_v56  ;;  %v1937_v37 = vpop.f32.mrb[43].mxu0  ;;  %v1978_v18 = vpop.f32.mrb[43].mxu1 }
 0x382   :  { %v12797_v49 = vmul.f32 -1.442695, %v1981_v55  ;;  %v12798_v19 = vmul.f32 -1.442695, %v1983_v53 }
 0x383   :  { %15149 = vpow2.f32 %v12796_v47 }
 0x384   :  { %15151 = vpow2.f32 %v12797_v49 }
 0x385   :  { %15153 = vpow2.f32 %v12798_v19 }
 0x386   :  { %15155 = vtanh.f32 %v1982_v0 }
 0x38d   :  { %v15150_v45 = vpop.eup %15149 }
 0x38e   :  { %v15152_v43 = vpop.eup %15151  ;;  %v2273_v31 = vadd.f32 1.0, %v15150_v45 }
 0x38f   :  { %v2279_v33 = vadd.f32 1.0, %v15152_v43  ;;  %v15154_v35 = vpop.eup %15153 }
 0x390   :  { %15157 = vrcp.f32 %v2273_v31  ;;  %v15156_v58 = vpop.eup %15155  ;;  %v2286_v56 = vadd.f32 1.0, %v15154_v35 }
 0x391   :  { %15159 = vrcp.f32 %v2279_v33 }
 0x392   :  { %15161 = vrcp.f32 %v2286_v56  ;;  %v16969_v56 = vld [vmem:[#allocation14 + $0x2c] ss:$16 sps:$4 sm:$0xff]  }
 0x39a   :  { %v15158_v36 = vpop.eup %15157 }
 0x39b   :  { %v15160_v52 = vpop.eup %15159  ;;  %v2290_v50 = vmul.f32 %v15158_v36, %v15156_v58  ;;  %v16961_v36 = vld [vmem:[#allocation14] ss:$16 sps:$4 sm:$0xff]  }
 0x39c   :  { %v2289_v60 = vmul.f32 %v15160_v52, %v16827_v17  ;;  %v15162_v35 = vpop.eup %15161  ;;  %v16963_v52 = vld [vmem:[#allocation14 + $0x8] ss:$16 sps:$4 sm:$0xff]  }
 0x39e   :  { %v16952_v37 = vadd.f32 %v2290_v50, %v2289_v60  ;;  %v2218_v47 = vpop.f32.mrb[44].mxu0  ;;  %v2259_v53 = vpop.f32.mrb[44].mxu1  ;;  %v16967_v50 = vld [vmem:[#allocation14 + $0x24] ss:$16 sps:$4 sm:$0xff]  }
 0x39f   :  { %v2266_v45 = vadd.f32 %v2218_v47, %v16804_v2  ;;  %v2268_v55 = vadd.f32 %v2259_v53, %v16807_v61  ;;  %v2220_v43 = vpop.f32.mrb[45].mxu0  ;;  %v2261_v63 = vpop.f32.mrb[45].mxu1 }
 0x3a0   :  { %15163 = vtanh.f32 %v16952_v37  ;;  %v2267_v8 = vadd.f32 %v2220_v43, %v16810_v57  ;;  %v2269_v0 = vadd.f32 %v2261_v63, %v16813_v54  ;;  %v2222_v19 = vpop.f32.mrb[46].mxu0  ;;  %v2263_v49 = vpop.f32.mrb[46].mxu1  ;;  %v16975_v43 = vld [vmem:[#allocation14 + $0x28] ss:$16 sps:$4 sm:$0xff]   ;;  %v16979_v63 = vld [vmem:[#allocation14 + $0x44] ss:$16 sps:$4 sm:$0xff]  }
 0x3a1   :  { %v12799_v18 = vmul.f32 -1.442695, %v2266_v45  ;;  %v2223_v17 = vpop.f32.mrb[47].mxu0  ;;  %v2264_v31 = vpop.f32.mrb[47].mxu1  ;;  %v16973_v45 = vld [vmem:[#allocation14 + $0x20] ss:$16 sps:$4 sm:$0xff]  }
 0x3a2   :  { %v12800_v33 = vmul.f32 -1.442695, %v2267_v8  ;;  %v12801_v58 = vmul.f32 -1.442695, %v2269_v0  ;;  %v16987_v8 = vld [vmem:[#allocation14 + $0x40] ss:$16 sps:$4 sm:$0xff]  }
 0x3a3   :  { %15165 = vpow2.f32 %v12799_v18  ;;  %v16989_v0 = vld [vmem:[#allocation14 + $0x48] ss:$16 sps:$4 sm:$0xff]   ;;  %v16993_v19 = vld [vmem:[#allocation14 + $0x64] ss:$16 sps:$4 sm:$0xff]   ;;  %v16995_v49 = vld [vmem:[#allocation14 + $0x6c] ss:$16 sps:$4 sm:$0xff]  }
 0x3a4   :  { %15167 = vpow2.f32 %v12800_v33  ;;  %19483 = vst [vmem:[#allocation96_spill] sm:$0xff] %v16993_v19  ;;  %19484 = vst [vmem:[#allocation97_spill] sm:$0xff] %v16995_v49  ;;  %v16999_v17 = vld [vmem:[#allocation14 + $0x60] ss:$16 sps:$4 sm:$0xff]   ;;  %v17001_v31 = vld [vmem:[#allocation14 + $0x68] ss:$16 sps:$4 sm:$0xff]  }
 0x3a5   :  { %15169 = vpow2.f32 %v12801_v58 }
 0x3a6   :  { %15171 = vtanh.f32 %v2268_v55  ;;  %v16981_v55 = vld [vmem:[#allocation14 + $0x4c] ss:$16 sps:$4 sm:$0xff]  }
 0x3aa   :  { %v15164_v2 = vpop.eup %15163 }
 0x3ab   :  { %v16959_v61 = vmul.f32 %v15164_v2, %v15162_v35  ;;  %v17005_v35 = vld [vmem:[#allocation14 + $0x84] ss:$16 sps:$4 sm:$0xff]   ;;  %v17007_v2 = vld [vmem:[#allocation14 + $0x8c] ss:$16 sps:$4 sm:$0xff]  }
 0x3ad   :  { %19482 = vst [vmem:[#allocation95_spill] sm:$0xff] %v16959_v61  ;;  %v15166_v57 = vpop.eup %15165  ;;  %v2333_v54 = vpack.c.bf16 %v16959_v61, %v16959_v61  ;;  %v17014_v61 = vld [vmem:[#allocation14 + $0x88] ss:$16 sps:$4 sm:$0xff]  }
 0x3ae   :  { %v15168_v60 = vpop.eup %15167  ;;  %v2297_v47 = vadd.f32 1.0, %v15166_v57  ;;  %19485 = vst [vmem:[#allocation98_spill] sm:$0xff] %v17014_v61 }
 0x3af   :  { %v2303_v53 = vadd.f32 1.0, %v15168_v60  ;;  %2559 = vmatmul.mubr.bf16.vlgmr.msra.gmra.mrb[48].mxu0 %v2333_v54  ;;  %2600 = vmatmul.mubr.bf16.vlgmr.msra.gmra.mrb[48].mxu1 %v2333_v54  ;;  %v15170_v18 = vpop.eup %15169 }
 0x3b0   :  { %15173 = vrcp.f32 %v2297_v47  ;;  %2813 = vmatpush1.bf16.msra.mxu0 %v16961_v36  ;;  %2854 = vmatpush1.bf16.msra.mxu1 %v16963_v52  ;;  %v15172_v33 = vpop.eup %15171  ;;  %v2310_v60 = vadd.f32 1.0, %v15170_v18  ;;  %v17029_v18 = vld [vmem:[#allocation14 + $0xa8] ss:$16 sps:$4 sm:$0xff]  }
 0x3b1   :  { %15175 = vrcp.f32 %v2303_v53  ;;  %2814 = vmatprep.subr.bf16.mxu0 %v16967_v50  ;;  %2855 = vmatprep.subr.bf16.mxu1 %v16969_v56  ;;  %v17012_v53 = vld [vmem:[#allocation14 + $0x80] ss:$16 sps:$4 sm:$0xff]   ;;  %19489 = vst [vmem:[#allocation102_spill] sm:$0xff] %v17029_v18 }
 0x3b2   :  { %2844 = vmatprep.mubr.bf16.mxu0 %v19480_v51  ;;  %2885 = vmatprep.mubr.bf16.mxu1 %v19480_v51  ;;  %15177 = vrcp.f32 %v2310_v60  ;;  %v17041_v60 = vld [vmem:[#allocation14 + $0xc8] ss:$16 sps:$4 sm:$0xff]  }
 0x3b4   :  { %2815 = vmatpush1.bf16.msra.mxu0 %v16973_v45  ;;  %2856 = vmatpush1.bf16.msra.mxu1 %v16975_v43 }
 0x3b5   :  { %2816 = vmatprep.subr.bf16.mxu0 %v16979_v63  ;;  %2857 = vmatprep.subr.bf16.mxu1 %v16981_v55 }
 0x3b8   :  { %2817 = vmatpush1.bf16.msra.mxu0 %v16987_v8  ;;  %2858 = vmatpush1.bf16.msra.mxu1 %v16989_v0 }
 0x3b9   :  { %2818 = vmatprep.subr.bf16.mxu0 %v16993_v19  ;;  %2859 = vmatprep.subr.bf16.mxu1 %v16995_v49  ;;  %v17018_v49 = vld [vmem:[#allocation14 + $0xa4] ss:$16 sps:$4 sm:$0xff]   ;;  %v17020_v19 = vld [vmem:[#allocation14 + $0xac] ss:$16 sps:$4 sm:$0xff]  }
 0x3ba   :  { %v15174_v58 = vpop.eup %15173  ;;  %19486 = vst [vmem:[#allocation99_spill] sm:$0xff] %v17018_v49  ;;  %19487 = vst [vmem:[#allocation100_spill] sm:$0xff] %v17020_v19 }
 0x3bb   :  { %v15176_v57 = vpop.eup %15175  ;;  %v2314_v54 = vmul.f32 %v15174_v58, %v15172_v33  ;;  %v17033_v58 = vld [vmem:[#allocation14 + $0xc4] ss:$16 sps:$4 sm:$0xff]  }
 0x3bc   :  { %v2313_v47 = vmul.f32 %v15176_v57, %v16836_v27  ;;  %2819 = vmatpush1.bf16.msra.mxu0 %v16999_v17  ;;  %2860 = vmatpush1.bf16.msra.mxu1 %v17001_v31  ;;  %v17027_v27 = vld [vmem:[#allocation14 + $0xa0] ss:$16 sps:$4 sm:$0xff]   ;;  %19490 = vst [vmem:[#allocation103_spill] sm:$0xff] %v17033_v58  ;;  %v17035_v57 = vld [vmem:[#allocation14 + $0xcc] ss:$16 sps:$4 sm:$0xff]  }
 0x3bd   :  { %2820 = vmatprep.subr.bf16.mxu0 %v17005_v35  ;;  %2861 = vmatprep.subr.bf16.mxu1 %v17007_v2  ;;  %19488 = vst [vmem:[#allocation101_spill] sm:$0xff] %v17027_v27 }
 0x3be   :  { %v17022_v33 = vadd.f32 %v2314_v54, %v2313_v47  ;;  %v17039_v54 = vld [vmem:[#allocation14 + $0xc0] ss:$16 sps:$4 sm:$0xff]   ;;  %v17045_v47 = vld [vmem:[#allocation14 + $0xe4] ss:$16 sps:$4 sm:$0xff]  }
 0x3bf   :  { %19491 = vst [vmem:[#allocation104_spill] sm:$0xff] %v17039_v54 }
 0x3c0   :  { %15179 = vtanh.f32 %v17022_v33  ;;  %2821 = vmatpush1.bf16.msra.mxu0 %v17012_v53  ;;  %2862 = vmatpush1.bf16.msra.mxu1 %v17014_v61 }
 0x3c1   :  { %2822 = vmatprep.subr.bf16.mxu0 %v17018_v49  ;;  %2863 = vmatprep.subr.bf16.mxu1 %v17020_v19  ;;  %v17047_v49 = vld [vmem:[#allocation14 + $0xec] ss:$16 sps:$4 sm:$0xff]   ;;  %v17051_v19 = vld [vmem:[#allocation14 + $0xe0] ss:$16 sps:$4 sm:$0xff]  }
 0x3c4   :  { %2823 = vmatpush1.bf16.msra.mxu0 %v17027_v27  ;;  %2864 = vmatpush1.bf16.msra.mxu1 %v17029_v18  ;;  %v17053_v27 = vld [vmem:[#allocation14 + $0xe8] ss:$16 sps:$4 sm:$0xff]   ;;  %v15178_v18 = vpop.eup %15177 }
 0x3c5   :  { %2824 = vmatprep.subr.bf16.mxu0 %v17033_v58  ;;  %2865 = vmatprep.subr.bf16.mxu1 %v17035_v57 }
 0x3c8   :  { %2825 = vmatpush1.bf16.msra.mxu0 %v17039_v54  ;;  %2866 = vmatpush1.bf16.msra.mxu1 %v17041_v60 }
 0x3c9   :  { %2826 = vmatprep.subr.bf16.mxu0 %v17045_v47  ;;  %2867 = vmatprep.subr.bf16.mxu1 %v17047_v49 }
 0x3ca   :  { %v15180_v58 = vpop.eup %15179 }
 0x3cb   :  { %v17057_v61 = vmul.f32 %v15180_v58, %v15178_v18  ;;  %v19497_v58 = vld [vmem:[#allocation91_spill] sm:$0xff] }
 0x3cc   :  { %2827 = vmatpush1.bf16.msra.mxu0 %v17051_v19  ;;  %2868 = vmatpush1.bf16.msra.mxu1 %v17053_v27 }
 0x3cd   :  { %19492 = vst [vmem:[#allocation105_spill] sm:$0xff] %v17057_v61  ;;  %v2619_v54 = vpack.c.bf16 %v17057_v61, %v17057_v61  ;;  %3154 = vmatprep.subr.bf16.mxu0 %v16845_v40  ;;  %3195 = vmatprep.subr.bf16.mxu1 %v16847_v13  ;;  %v17324_v61 = vld [vmem:[#allocation14 + $0x80] ss:$16 sps:$4 sm:$0xff]  }
 0x3cf   :  { %2845 = vmatmul.mubr.bf16.vlgmr.msra.gmra.mrb[52].mxu0 %v2619_v54  ;;  %2886 = vmatmul.mubr.bf16.vlgmr.msra.gmra.mrb[52].mxu1 %v2619_v54 }
 0x3d0   :  { %3155 = vmatpush1.bf16.msra.mxu0 %v16849_v42  ;;  %3196 = vmatpush1.bf16.msra.mxu1 %v16851_v9 }
 0x3d1   :  { %3156 = vmatprep.subr.bf16.mxu0 %v16857_v44  ;;  %3197 = vmatprep.subr.bf16.mxu1 %v16859_v38  ;;  %v19493_v44 = vld [vmem:[#allocation47_spill] sm:$0xff]  ;;  %v19494_v38 = vld [vmem:[#allocation48_spill] sm:$0xff] }
 0x3d2   :  { %3186 = vmatprep.mubr.bf16.mxu0 %v19480_v51  ;;  %3227 = vmatprep.mubr.bf16.mxu1 %v19480_v51 }
 0x3d4   :  { %3157 = vmatpush1.bf16.msra.mxu0 %v16861_v46  ;;  %3198 = vmatpush1.bf16.msra.mxu1 %v16863_v7 }
 0x3d5   :  { %3158 = vmatprep.subr.bf16.mxu0 %v16869_v28  ;;  %3199 = vmatprep.subr.bf16.mxu1 %v16871_v12 }
 0x3d8   :  { %3159 = vmatpush1.bf16.msra.mxu0 %v16873_v48  ;;  %3200 = vmatpush1.bf16.msra.mxu1 %v16875_v15 }
 0x3d9   :  { %3160 = vmatprep.subr.bf16.mxu0 %v16881_v6  ;;  %3201 = vmatprep.subr.bf16.mxu1 %v16883_v5 }
 0x3dc   :  { %3161 = vmatpush1.bf16.msra.mxu0 %v16885_v10  ;;  %3202 = vmatpush1.bf16.msra.mxu1 %v16887_v59 }
 0x3dd   :  { %3162 = vmatprep.subr.bf16.mxu0 %v16893_v3  ;;  %3203 = vmatprep.subr.bf16.mxu1 %v16895_v34 }
 0x3e0   :  { %3163 = vmatpush1.bf16.msra.mxu0 %v16897_v4  ;;  %3204 = vmatpush1.bf16.msra.mxu1 %v16899_v32 }
 0x3e1   :  { %3164 = vmatprep.subr.bf16.mxu0 %v16905_v29  ;;  %3205 = vmatprep.subr.bf16.mxu1 %v16907_v14  ;;  %v19495_v14 = vld [vmem:[#allocation89_spill] sm:$0xff] }
 0x3e4   :  { %3165 = vmatpush1.bf16.msra.mxu0 %v16909_v21  ;;  %3206 = vmatpush1.bf16.msra.mxu1 %v16911_v22  ;;  %v19496_v22 = vld [vmem:[#allocation90_spill] sm:$0xff] }
 0x3e5   :  { %3166 = vmatprep.subr.bf16.mxu0 %v16917_v24  ;;  %3207 = vmatprep.subr.bf16.mxu1 %v16919_v26 }
 0x3e8   :  { %3167 = vmatpush1.bf16.msra.mxu0 %v16921_v23  ;;  %3208 = vmatpush1.bf16.msra.mxu1 %v16923_v25 }
 0x3e9   :  { %3168 = vmatprep.subr.bf16.mxu0 %v16929_v1  ;;  %3209 = vmatprep.subr.bf16.mxu1 %v16931_v20 }
 0x3ec   :  { %3169 = vmatpush1.bf16.msra.mxu0 %v16933_v30  ;;  %3210 = vmatpush1.bf16.msra.mxu1 %v16935_v16 }
 0x3ed   :  { %3440 = vmatprep.subr.bf16.mxu0 %v16941_v11  ;;  %3481 = vmatprep.subr.bf16.mxu1 %v16943_v62 }
 0x482   :  { %v2560_v40 = vpop.f32.mrb[48].mxu0  ;;  %v2601_v13 = vpop.f32.mrb[48].mxu1 }
 0x483   :  { %v2608_v42 = vadd.f32 %v2560_v40, %v16648_v39  ;;  %v2610_v23 = vadd.f32 %v2601_v13, %v16651_v41  ;;  %v2562_v9 = vpop.f32.mrb[49].mxu0  ;;  %v2603_v25 = vpop.f32.mrb[49].mxu1  ;;  %v19498_v40 = vld [vmem:[#allocation92_spill] sm:$0xff] }
 0x484   :  { %v2609_v1 = vadd.f32 %v2562_v9, %v19493_v44  ;;  %v2611_v20 = vadd.f32 %v2603_v25, %v19494_v38  ;;  %v2564_v46 = vpop.f32.mrb[50].mxu0  ;;  %v2605_v30 = vpop.f32.mrb[50].mxu1 }
 0x485   :  { %v12866_v7 = vmul.f32 -1.442695, %v2608_v42  ;;  %v2565_v16 = vpop.f32.mrb[51].mxu0  ;;  %v2606_v28 = vpop.f32.mrb[51].mxu1 }
 0x486   :  { %v12867_v11 = vmul.f32 -1.442695, %v2609_v1  ;;  %v12868_v62 = vmul.f32 -1.442695, %v2611_v20 }
 0x487   :  { %15181 = vpow2.f32 %v12866_v7 }
 0x488   :  { %15183 = vpow2.f32 %v12867_v11 }
 0x489   :  { %15185 = vpow2.f32 %v12868_v62 }
 0x48a   :  { %15187 = vtanh.f32 %v2610_v23 }
 0x491   :  { %v15182_v12 = vpop.eup %15181 }
 0x492   :  { %v15184_v48 = vpop.eup %15183  ;;  %v2901_v39 = vadd.f32 1.0, %v15182_v12 }
 0x493   :  { %v2907_v41 = vadd.f32 1.0, %v15184_v48  ;;  %v15186_v15 = vpop.eup %15185 }
 0x494   :  { %15189 = vrcp.f32 %v2901_v39  ;;  %v15188_v6 = vpop.eup %15187  ;;  %v2914_v3 = vadd.f32 1.0, %v15186_v15  ;;  %v17173_v15 = vld [vmem:[#allocation10 + $0x20] ss:$16 sps:$4 sm:$0xff]  }
 0x495   :  { %15191 = vrcp.f32 %v2907_v41 }
 0x496   :  { %15193 = vrcp.f32 %v2914_v3  ;;  %v17187_v3 = vld [vmem:[#allocation10 + $0x48] ss:$16 sps:$4 sm:$0xff]  }
 0x49e   :  { %v15190_v5 = vpop.eup %15189 }
 0x49f   :  { %v15192_v10 = vpop.eup %15191  ;;  %v2918_v59 = vmul.f32 %v15190_v5, %v15188_v6  ;;  %v17175_v6 = vld [vmem:[#allocation10 + $0x28] ss:$16 sps:$4 sm:$0xff]   ;;  %v17181_v5 = vld [vmem:[#allocation10 + $0x44] ss:$16 sps:$4 sm:$0xff]  }
 0x4a0   :  { %v2917_v34 = vmul.f32 %v15192_v10, %v16952_v37  ;;  %v15194_v1 = vpop.eup %15193  ;;  %v17183_v10 = vld [vmem:[#allocation10 + $0x4c] ss:$16 sps:$4 sm:$0xff]  }
 0x4a2   :  { %v17104_v4 = vadd.f32 %v2918_v59, %v2917_v34  ;;  %v2846_v32 = vpop.f32.mrb[52].mxu0  ;;  %v2887_v29 = vpop.f32.mrb[52].mxu1  ;;  %v17185_v59 = vld [vmem:[#allocation10 + $0x40] ss:$16 sps:$4 sm:$0xff]   ;;  %v17193_v34 = vld [vmem:[#allocation10 + $0x64] ss:$16 sps:$4 sm:$0xff]  }
 0x4a3   :  { %v2894_v21 = vadd.f32 %v2846_v32, %v19495_v14  ;;  %v2896_v24 = vadd.f32 %v2887_v29, %v19496_v22  ;;  %v2848_v26 = vpop.f32.mrb[53].mxu0  ;;  %v2889_v18 = vpop.f32.mrb[53].mxu1  ;;  %v17195_v32 = vld [vmem:[#allocation10 + $0x6c] ss:$16 sps:$4 sm:$0xff]   ;;  %v17197_v29 = vld [vmem:[#allocation10 + $0x60] ss:$16 sps:$4 sm:$0xff]  }
 0x4a4   :  { %15195 = vtanh.f32 %v17104_v4  ;;  %v2895_v54 = vadd.f32 %v2848_v26, %v19497_v58  ;;  %v2897_v13 = vadd.f32 %v2889_v18, %v19498_v40  ;;  %v2850_v42 = vpop.f32.mrb[54].mxu0  ;;  %v2891_v23 = vpop.f32.mrb[54].mxu1  ;;  %v17199_v14 = vld [vmem:[#allocation10 + $0x68] ss:$16 sps:$4 sm:$0xff]   ;;  %v17207_v22 = vld [vmem:[#allocation10 + $0x8c] ss:$16 sps:$4 sm:$0xff]  }
 0x4a5   :  { %v12869_v37 = vmul.f32 -1.442695, %v2894_v21  ;;  %v2851_v9 = vpop.f32.mrb[55].mxu0  ;;  %v2892_v25 = vpop.f32.mrb[55].mxu1  ;;  %v17205_v21 = vld [vmem:[#allocation10 + $0x84] ss:$16 sps:$4 sm:$0xff]  }
 0x4a6   :  { %v12870_v44 = vmul.f32 -1.442695, %v2895_v54  ;;  %v12871_v20 = vmul.f32 -1.442695, %v2897_v13  ;;  %v17211_v26 = vld [vmem:[#allocation10 + $0x88] ss:$16 sps:$4 sm:$0xff]  }
 0x4a7   :  { %15197 = vpow2.f32 %v12869_v37  ;;  %v17217_v18 = vld [vmem:[#allocation10 + $0xa4] ss:$16 sps:$4 sm:$0xff]   ;;  %v17219_v58 = vld [vmem:[#allocation10 + $0xac] ss:$16 sps:$4 sm:$0xff]   ;;  %v17221_v54 = vld [vmem:[#allocation10 + $0xa0] ss:$16 sps:$4 sm:$0xff]  }
 0x4a8   :  { %15199 = vpow2.f32 %v12870_v44  ;;  %v17223_v40 = vld [vmem:[#allocation10 + $0xa8] ss:$16 sps:$4 sm:$0xff]   ;;  %v17229_v13 = vld [vmem:[#allocation10 + $0xc4] ss:$16 sps:$4 sm:$0xff]   ;;  %v17231_v42 = vld [vmem:[#allocation10 + $0xcc] ss:$16 sps:$4 sm:$0xff]  }
 0x4a9   :  { %15201 = vpow2.f32 %v12871_v20  ;;  %v17233_v23 = vld [vmem:[#allocation10 + $0xc0] ss:$16 sps:$4 sm:$0xff]   ;;  %v17235_v37 = vld [vmem:[#allocation10 + $0xc8] ss:$16 sps:$4 sm:$0xff]   ;;  %v17241_v9 = vld [vmem:[#allocation10 + $0xe4] ss:$16 sps:$4 sm:$0xff]  }
 0x4aa   :  { %15203 = vtanh.f32 %v2896_v24  ;;  %v17209_v24 = vld [vmem:[#allocation10 + $0x80] ss:$16 sps:$4 sm:$0xff]   ;;  %v17243_v25 = vld [vmem:[#allocation10 + $0xec] ss:$16 sps:$4 sm:$0xff]  }
 0x4ab   :  { %v17245_v44 = vld [vmem:[#allocation10 + $0xe0] ss:$16 sps:$4 sm:$0xff]  }
 0x4ac   :  { %v17255_v20 = vld [vmem:[#allocation14 + $0xc] ss:$16 sps:$4 sm:$0xff]  }
 0x4ae   :  { %v15196_v38 = vpop.eup %15195 }
 0x4af   :  { %v17111_v46 = vmul.f32 %v15196_v38, %v15194_v1  ;;  %v17247_v1 = vld [vmem:[#allocation10 + $0xe8] ss:$16 sps:$4 sm:$0xff]  }
 0x4b0   :  { %v17253_v38 = vld [vmem:[#allocation14 + $0x4] ss:$16 sps:$4 sm:$0xff]  }
 0x4b1   :  { %19499 = vst [vmem:[#allocation47_spill] sm:$0xff] %v17111_v46  ;;  %v15198_v30 = vpop.eup %15197  ;;  %v2961_v7 = vpack.c.bf16 %v17111_v46, %v17111_v46  ;;  %v17332_v46 = vld [vmem:[#allocation14 + $0xac] ss:$16 sps:$4 sm:$0xff]  }
 0x4b2   :  { %v15200_v16 = vpop.eup %15199  ;;  %v2925_v28 = vadd.f32 1.0, %v15198_v30  ;;  %19521 = vst [vmem:[#allocation92_spill] sm:$0xff] %v17332_v46 }
 0x4b3   :  { %v2931_v11 = vadd.f32 1.0, %v15200_v16  ;;  %3187 = vmatmul.mubr.bf16.vlgmr.msra.gmra.mrb[56].mxu0 %v2961_v7  ;;  %3228 = vmatmul.mubr.bf16.vlgmr.msra.gmra.mrb[56].mxu1 %v2961_v7  ;;  %v19510_v16 = vld [vmem:[#allocation49_spill] sm:$0xff] }
 0x4b4   :  { %15205 = vrcp.f32 %v2925_v28  ;;  %3441 = vmatpush1.bf16.msra.mxu0 %v16961_v36  ;;  %3482 = vmatpush1.bf16.msra.mxu1 %v16963_v52  ;;  %v15202_v36 = vpop.eup %15201 }
 0x4b5   :  { %15207 = vrcp.f32 %v2931_v11  ;;  %3442 = vmatprep.subr.bf16.mxu0 %v16967_v50  ;;  %3483 = vmatprep.subr.bf16.mxu1 %v16969_v56  ;;  %v15204_v52 = vpop.eup %15203  ;;  %v19500_v50 = vld [vmem:[#allocation96_spill] sm:$0xff]  ;;  %v19501_v56 = vld [vmem:[#allocation97_spill] sm:$0xff]  ;;  %v19511_v11 = vld [vmem:[#allocation50_spill] sm:$0xff] }
 0x4b6   :  { %3472 = vmatprep.mubr.bf16.mxu0 %v19480_v51  ;;  %3513 = vmatprep.mubr.bf16.mxu1 %v19480_v51 }
 0x4b8   :  { %3443 = vmatpush1.bf16.msra.mxu0 %v16973_v45  ;;  %3484 = vmatpush1.bf16.msra.mxu1 %v16975_v43  ;;  %v2938_v45 = vadd.f32 1.0, %v15202_v36 }
 0x4b9   :  { %3444 = vmatprep.subr.bf16.mxu0 %v16979_v63  ;;  %3485 = vmatprep.subr.bf16.mxu1 %v16981_v55  ;;  %v19502_v55 = vld [vmem:[#allocation98_spill] sm:$0xff] }
 0x4ba   :  { %15209 = vrcp.f32 %v2938_v45 }
 0x4bc   :  { %3445 = vmatpush1.bf16.msra.mxu0 %v16987_v8  ;;  %3486 = vmatpush1.bf16.msra.mxu1 %v16989_v0  ;;  %v19503_v8 = vld [vmem:[#allocation99_spill] sm:$0xff]  ;;  %v19504_v0 = vld [vmem:[#allocation100_spill] sm:$0xff] }
 0x4bd   :  { %3446 = vmatprep.subr.bf16.mxu0 %v19500_v50  ;;  %3487 = vmatprep.subr.bf16.mxu1 %v19501_v56  ;;  %v19512_v56 = vld [vmem:[#allocation51_spill] sm:$0xff] }
 0x4be   :  { %v15206_v62 = vpop.eup %15205 }
 0x4bf   :  { %v15208_v12 = vpop.eup %15207  ;;  %v2942_v48 = vmul.f32 %v15206_v62, %v15204_v52 }
 0x4c0   :  { %v2941_v43 = vmul.f32 %v15208_v12, %v17022_v33  ;;  %3447 = vmatpush1.bf16.msra.mxu0 %v16999_v17  ;;  %3488 = vmatpush1.bf16.msra.mxu1 %v17001_v31  ;;  %v19505_v17 = vld [vmem:[#allocation101_spill] sm:$0xff]  ;;  %v19506_v31 = vld [vmem:[#allocation102_spill] sm:$0xff]  ;;  %v19513_v12 = vld [vmem:[#allocation52_spill] sm:$0xff] }
 0x4c1   :  { %3448 = vmatprep.subr.bf16.mxu0 %v17005_v35  ;;  %3489 = vmatprep.subr.bf16.mxu1 %v17007_v2  ;;  %v19507_v35 = vld [vmem:[#allocation103_spill] sm:$0xff]  ;;  %v19508_v2 = vld [vmem:[#allocation104_spill] sm:$0xff] }
 0x4c2   :  { %v17134_v63 = vadd.f32 %v2942_v48, %v2941_v43 }
 0x4c4   :  { %15211 = vtanh.f32 %v17134_v63  ;;  %3449 = vmatpush1.bf16.msra.mxu0 %v17012_v53  ;;  %3490 = vmatpush1.bf16.msra.mxu1 %v19502_v55  ;;  %v15210_v33 = vpop.eup %15209 }
 0x4c5   :  { %3450 = vmatprep.subr.bf16.mxu0 %v19503_v8  ;;  %3491 = vmatprep.subr.bf16.mxu1 %v19504_v0 }
 0x4c8   :  { %3451 = vmatpush1.bf16.msra.mxu0 %v19505_v17  ;;  %3492 = vmatpush1.bf16.msra.mxu1 %v19506_v31 }
 0x4c9   :  { %3452 = vmatprep.subr.bf16.mxu0 %v19507_v35  ;;  %3493 = vmatprep.subr.bf16.mxu1 %v17035_v57  ;;  %v17157_v57 = vld [vmem:[#allocation10 + $0x4] ss:$16 sps:$4 sm:$0xff]  }
 0x4cc   :  { %3453 = vmatpush1.bf16.msra.mxu0 %v19508_v2  ;;  %3494 = vmatpush1.bf16.msra.mxu1 %v17041_v60  ;;  %v17159_v60 = vld [vmem:[#allocation10 + $0xc] ss:$16 sps:$4 sm:$0xff]  }
 0x4cd   :  { %3454 = vmatprep.subr.bf16.mxu0 %v17045_v47  ;;  %3495 = vmatprep.subr.bf16.mxu1 %v17047_v49  ;;  %v17161_v49 = vld [vmem:[#allocation10] ss:$16 sps:$4 sm:$0xff]   ;;  %v17163_v47 = vld [vmem:[#allocation10 + $0x8] ss:$16 sps:$4 sm:$0xff]  }
 0x4ce   :  { %v15212_v53 = vpop.eup %15211 }
 0x4cf   :  { %v17149_v39 = vmul.f32 %v15212_v53, %v15210_v33 }
 0x4d0   :  { %3455 = vmatpush1.bf16.msra.mxu0 %v17051_v19  ;;  %3496 = vmatpush1.bf16.msra.mxu1 %v17053_v27  ;;  %v17169_v19 = vld [vmem:[#allocation10 + $0x24] ss:$16 sps:$4 sm:$0xff]   ;;  %v17171_v27 = vld [vmem:[#allocation10 + $0x2c] ss:$16 sps:$4 sm:$0xff]  }
 0x4d1   :  { %19509 = vst [vmem:[#allocation48_spill] sm:$0xff] %v17149_v39  ;;  %v3247_v41 = vpack.c.bf16 %v17149_v39, %v17149_v39  ;;  %3781 = vmatprep.subr.bf16.mxu0 %v17157_v57  ;;  %3822 = vmatprep.subr.bf16.mxu1 %v17159_v60  ;;  %v17326_v39 = vld [vmem:[#allocation14 + $0x88] ss:$16 sps:$4 sm:$0xff]  }
 0x4d2   :  { %19519 = vst [vmem:[#allocation90_spill] sm:$0xff] %v17326_v39 }
 0x4d3   :  { %3473 = vmatmul.mubr.bf16.vlgmr.msra.gmra.mrb[60].mxu0 %v3247_v41  ;;  %3514 = vmatmul.mubr.bf16.vlgmr.msra.gmra.mrb[60].mxu1 %v3247_v41 }
 0x4d4   :  { %3813 = vmatprep.mubr.bf16.mxu0 %v19480_v51  ;;  %3854 = vmatprep.mubr.bf16.mxu1 %v19480_v51 }
 0x4d5   :  { %3782 = vmatpush1.bf16.msra.mxu0 %v17161_v49  ;;  %3823 = vmatpush1.bf16.msra.mxu1 %v17163_v47 }
 0x4d6   :  { %3783 = vmatprep.subr.bf16.mxu0 %v17169_v19  ;;  %3824 = vmatprep.subr.bf16.mxu1 %v17171_v27 }
 0x4d9   :  { %3784 = vmatpush1.bf16.msra.mxu0 %v17173_v15  ;;  %3825 = vmatpush1.bf16.msra.mxu1 %v17175_v6 }
 0x4da   :  { %3785 = vmatprep.subr.bf16.mxu0 %v17181_v5  ;;  %3826 = vmatprep.subr.bf16.mxu1 %v17183_v10 }
 0x4dd   :  { %3786 = vmatpush1.bf16.msra.mxu0 %v17185_v59  ;;  %3827 = vmatpush1.bf16.msra.mxu1 %v17187_v3 }
 0x4de   :  { %3787 = vmatprep.subr.bf16.mxu0 %v17193_v34  ;;  %3828 = vmatprep.subr.bf16.mxu1 %v17195_v32 }
 0x4e1   :  { %3788 = vmatpush1.bf16.msra.mxu0 %v17197_v29  ;;  %3829 = vmatpush1.bf16.msra.mxu1 %v17199_v14 }
 0x4e2   :  { %3789 = vmatprep.subr.bf16.mxu0 %v17205_v21  ;;  %3830 = vmatprep.subr.bf16.mxu1 %v17207_v22 }
 0x4e5   :  { %3790 = vmatpush1.bf16.msra.mxu0 %v17209_v24  ;;  %3831 = vmatpush1.bf16.msra.mxu1 %v17211_v26 }
 0x4e6   :  { %3791 = vmatprep.subr.bf16.mxu0 %v17217_v18  ;;  %3832 = vmatprep.subr.bf16.mxu1 %v17219_v58 }
 0x4e9   :  { %3792 = vmatpush1.bf16.msra.mxu0 %v17221_v54  ;;  %3833 = vmatpush1.bf16.msra.mxu1 %v17223_v40 }
 0x4ea   :  { %3793 = vmatprep.subr.bf16.mxu0 %v17229_v13  ;;  %3834 = vmatprep.subr.bf16.mxu1 %v17231_v42 }
 0x4ed   :  { %3794 = vmatpush1.bf16.msra.mxu0 %v17233_v23  ;;  %3835 = vmatpush1.bf16.msra.mxu1 %v17235_v37 }
 0x4ee   :  { %3795 = vmatprep.subr.bf16.mxu0 %v17241_v9  ;;  %3836 = vmatprep.subr.bf16.mxu1 %v17243_v25 }
 0x4f1   :  { %3796 = vmatpush1.bf16.msra.mxu0 %v17245_v44  ;;  %3837 = vmatpush1.bf16.msra.mxu1 %v17247_v1 }
 0x4f2   :  { %4066 = vmatprep.subr.bf16.mxu0 %v17253_v38  ;;  %4107 = vmatprep.subr.bf16.mxu1 %v17255_v20 }
 0x586   :  { %v3188_v30 = vpop.f32.mrb[56].mxu0  ;;  %v3229_v7 = vpop.f32.mrb[56].mxu1 }
 0x587   :  { %v3236_v28 = vadd.f32 %v3188_v30, %v19510_v16  ;;  %v3238_v36 = vadd.f32 %v3229_v7, %v19511_v11  ;;  %v3190_v52 = vpop.f32.mrb[57].mxu0  ;;  %v3231_v50 = vpop.f32.mrb[57].mxu1 }
 0x588   :  { %v3237_v62 = vadd.f32 %v3190_v52, %v19512_v56  ;;  %v3239_v48 = vadd.f32 %v3231_v50, %v19513_v12  ;;  %v3192_v45 = vpop.f32.mrb[58].mxu0  ;;  %v3233_v43 = vpop.f32.mrb[58].mxu1  ;;  %v19514_v12 = vld [vmem:[#allocation85_spill] sm:$0xff] }
 0x589   :  { %v12936_v55 = vmul.f32 -1.442695, %v3236_v28  ;;  %v3193_v8 = vpop.f32.mrb[59].mxu0  ;;  %v3234_v0 = vpop.f32.mrb[59].mxu1  ;;  %v19515_v45 = vld [vmem:[#allocation86_spill] sm:$0xff] }
 0x58a   :  { %v12937_v17 = vmul.f32 -1.442695, %v3237_v62  ;;  %v12938_v31 = vmul.f32 -1.442695, %v3239_v48  ;;  %v19516_v8 = vld [vmem:[#allocation87_spill] sm:$0xff] }
 0x58b   :  { %15213 = vpow2.f32 %v12936_v55 }
 0x58c   :  { %15215 = vpow2.f32 %v12937_v17  ;;  %v19517_v17 = vld [vmem:[#allocation88_spill] sm:$0xff] }
 0x58d   :  { %15217 = vpow2.f32 %v12938_v31 }
 0x58e   :  { %15219 = vtanh.f32 %v3238_v36 }
 0x595   :  { %v15214_v35 = vpop.eup %15213 }
 0x596   :  { %v15216_v2 = vpop.eup %15215  ;;  %v3529_v33 = vadd.f32 1.0, %v15214_v35 }
 0x597   :  { %v3535_v53 = vadd.f32 1.0, %v15216_v2  ;;  %v15218_v41 = vpop.eup %15217 }
 0x598   :  { %15221 = vrcp.f32 %v3529_v33  ;;  %v15220_v30 = vpop.eup %15219  ;;  %v3542_v28 = vadd.f32 1.0, %v15218_v41 }
 0x599   :  { %15223 = vrcp.f32 %v3535_v53 }
 0x59a   :  { %15225 = vrcp.f32 %v3542_v28  ;;  %v17273_v28 = vld [vmem:[#allocation14] ss:$16 sps:$4 sm:$0xff]  }
 0x5a2   :  { %v15222_v7 = vpop.eup %15221 }
 0x5a3   :  { %v15224_v16 = vpop.eup %15223  ;;  %v3546_v11 = vmul.f32 %v15222_v7, %v15220_v30 }
 0x5a4   :  { %v3545_v52 = vmul.f32 %v15224_v16, %v17104_v4  ;;  %v15226_v30 = vpop.eup %15225 }
 0x5a6   :  { %v17264_v50 = vadd.f32 %v3546_v11, %v3545_v52  ;;  %v3474_v56 = vpop.f32.mrb[60].mxu0  ;;  %v3515_v62 = vpop.f32.mrb[60].mxu1  ;;  %v17275_v52 = vld [vmem:[#allocation14 + $0x8] ss:$16 sps:$4 sm:$0xff]  }
 0x5a7   :  { %v3522_v48 = vadd.f32 %v3474_v56, %v19514_v12  ;;  %v3524_v36 = vadd.f32 %v3515_v62, %v19515_v45  ;;  %v3476_v43 = vpop.f32.mrb[61].mxu0  ;;  %v3517_v55 = vpop.f32.mrb[61].mxu1  ;;  %v17279_v12 = vld [vmem:[#allocation14 + $0x24] ss:$16 sps:$4 sm:$0xff]  }
 0x5a8   :  { %15227 = vtanh.f32 %v17264_v50  ;;  %v3523_v0 = vadd.f32 %v3476_v43, %v19516_v8  ;;  %v3525_v31 = vadd.f32 %v3517_v55, %v19517_v17  ;;  %v3478_v35 = vpop.f32.mrb[62].mxu0  ;;  %v3519_v2 = vpop.f32.mrb[62].mxu1  ;;  %v17285_v8 = vld [vmem:[#allocation14 + $0x20] ss:$16 sps:$4 sm:$0xff]   ;;  %v17291_v17 = vld [vmem:[#allocation14 + $0x44] ss:$16 sps:$4 sm:$0xff]  }
 0x5a9   :  { %v12939_v4 = vmul.f32 -1.442695, %v3522_v48  ;;  %v3479_v33 = vpop.f32.mrb[63].mxu0  ;;  %v3520_v53 = vpop.f32.mrb[63].mxu1  ;;  %v17281_v48 = vld [vmem:[#allocation14 + $0x2c] ss:$16 sps:$4 sm:$0xff]  }
 0x5aa   :  { %v12940_v41 = vmul.f32 -1.442695, %v3523_v0  ;;  %v12941_v16 = vmul.f32 -1.442695, %v3525_v31  ;;  %v17287_v0 = vld [vmem:[#allocation14 + $0x28] ss:$16 sps:$4 sm:$0xff]  }
 0x5ab   :  { %15229 = vpow2.f32 %v12939_v4  ;;  %v17299_v31 = vld [vmem:[#allocation14 + $0x40] ss:$16 sps:$4 sm:$0xff]   ;;  %v17301_v35 = vld [vmem:[#allocation14 + $0x48] ss:$16 sps:$4 sm:$0xff]   ;;  %v17305_v2 = vld [vmem:[#allocation14 + $0x64] ss:$16 sps:$4 sm:$0xff]  }
 0x5ac   :  { %15231 = vpow2.f32 %v12940_v41  ;;  %v17307_v4 = vld [vmem:[#allocation14 + $0x6c] ss:$16 sps:$4 sm:$0xff]   ;;  %v17311_v53 = vld [vmem:[#allocation14 + $0x60] ss:$16 sps:$4 sm:$0xff]   ;;  %v17313_v41 = vld [vmem:[#allocation14 + $0x68] ss:$16 sps:$4 sm:$0xff]  }
 0x5ad   :  { %15233 = vpow2.f32 %v12941_v16  ;;  %v17319_v16 = vld [vmem:[#allocation14 + $0x8c] ss:$16 sps:$4 sm:$0xff]  }
 0x5ae   :  { %15235 = vtanh.f32 %v3524_v36  ;;  %v17293_v36 = vld [vmem:[#allocation14 + $0x4c] ss:$16 sps:$4 sm:$0xff]  }
 0x5b2   :  { %v15228_v7 = vpop.eup %15227 }
 0x5b3   :  { %v17271_v11 = vmul.f32 %v15228_v7, %v15226_v30  ;;  %v17317_v7 = vld [vmem:[#allocation14 + $0x84] ss:$16 sps:$4 sm:$0xff]  }
 0x5b5   :  { %19518 = vst [vmem:[#allocation89_spill] sm:$0xff] %v17271_v11  ;;  %v15230_v56 = vpop.eup %15229  ;;  %v3588_v62 = vpack.c.bf16 %v17271_v11, %v17271_v11  ;;  %v17330_v11 = vld [vmem:[#allocation14 + $0xa4] ss:$16 sps:$4 sm:$0xff]  }
 0x5b6   :  { %v15232_v45 = vpop.eup %15231  ;;  %v3553_v43 = vadd.f32 1.0, %v15230_v56  ;;  %19520 = vst [vmem:[#allocation91_spill] sm:$0xff] %v17330_v11 }
 0x5b7   :  { %v3559_v55 = vadd.f32 1.0, %v15232_v45  ;;  %3814 = vmatmul.mubr.bf16.vlgmr.msra.gmra.mrb[64].mxu0 %v3588_v62  ;;  %3855 = vmatmul.mubr.bf16.vlgmr.msra.gmra.mrb[64].mxu1 %v3588_v62  ;;  %v15234_v33 = vpop.eup %15233 }
 0x5b8   :  { %15237 = vrcp.f32 %v3553_v43  ;;  %4067 = vmatpush1.bf16.msra.mxu0 %v17273_v28  ;;  %4108 = vmatpush1.bf16.msra.mxu1 %v17275_v52  ;;  %v15236_v30 = vpop.eup %15235  ;;  %v3566_v43 = vadd.f32 1.0, %v15234_v33  ;;  %v17341_v33 = vld [vmem:[#allocation14 + $0xa8] ss:$16 sps:$4 sm:$0xff]  }
 0x5b9   :  { %15239 = vrcp.f32 %v3559_v55  ;;  %4068 = vmatprep.subr.bf16.mxu0 %v17279_v12  ;;  %4109 = vmatprep.subr.bf16.mxu1 %v17281_v48  ;;  %19523 = vst [vmem:[#allocation97_spill] sm:$0xff] %v17341_v33 }
 0x5ba   :  { %4098 = vmatprep.mubr.bf16.mxu0 %v19480_v51  ;;  %4139 = vmatprep.mubr.bf16.mxu1 %v19480_v51  ;;  %15241 = vrcp.f32 %v3566_v43  ;;  %v17353_v43 = vld [vmem:[#allocation14 + $0xc8] ss:$16 sps:$4 sm:$0xff]  }
 0x5bc   :  { %4069 = vmatpush1.bf16.msra.mxu0 %v17285_v8  ;;  %4110 = vmatpush1.bf16.msra.mxu1 %v17287_v0 }
 0x5bd   :  { %4070 = vmatprep.subr.bf16.mxu0 %v17291_v17  ;;  %4111 = vmatprep.subr.bf16.mxu1 %v17293_v36 }
 0x5c0   :  { %4071 = vmatpush1.bf16.msra.mxu0 %v17299_v31  ;;  %4112 = vmatpush1.bf16.msra.mxu1 %v17301_v35 }
 0x5c1   :  { %4072 = vmatprep.subr.bf16.mxu0 %v17305_v2  ;;  %4113 = vmatprep.subr.bf16.mxu1 %v17307_v4 }
 0x5c2   :  { %v15238_v56 = vpop.eup %15237 }
 0x5c3   :  { %v15240_v62 = vpop.eup %15239  ;;  %v3570_v45 = vmul.f32 %v15238_v56, %v15236_v30  ;;  %v17345_v56 = vld [vmem:[#allocation14 + $0xc4] ss:$16 sps:$4 sm:$0xff]  }
 0x5c4   :  { %v3569_v55 = vmul.f32 %v15240_v62, %v17134_v63  ;;  %4073 = vmatpush1.bf16.msra.mxu0 %v17311_v53  ;;  %4114 = vmatpush1.bf16.msra.mxu1 %v17313_v41  ;;  %v17339_v63 = vld [vmem:[#allocation14 + $0xa0] ss:$16 sps:$4 sm:$0xff]   ;;  %19524 = vst [vmem:[#allocation98_spill] sm:$0xff] %v17345_v56  ;;  %v17347_v62 = vld [vmem:[#allocation14 + $0xcc] ss:$16 sps:$4 sm:$0xff]  }
 0x5c5   :  { %4074 = vmatprep.subr.bf16.mxu0 %v17317_v7  ;;  %4115 = vmatprep.subr.bf16.mxu1 %v17319_v16  ;;  %19522 = vst [vmem:[#allocation96_spill] sm:$0xff] %v17339_v63 }
 0x5c6   :  { %v17334_v30 = vadd.f32 %v3570_v45, %v3569_v55  ;;  %v17351_v45 = vld [vmem:[#allocation14 + $0xc0] ss:$16 sps:$4 sm:$0xff]   ;;  %v17357_v55 = vld [vmem:[#allocation14 + $0xe4] ss:$16 sps:$4 sm:$0xff]  }
 0x5c7   :  { %19525 = vst [vmem:[#allocation99_spill] sm:$0xff] %v17351_v45 }
 0x5c8   :  { %15243 = vtanh.f32 %v17334_v30  ;;  %4075 = vmatpush1.bf16.msra.mxu0 %v17324_v61  ;;  %4116 = vmatpush1.bf16.msra.mxu1 %v17326_v39 }
 0x5c9   :  { %4076 = vmatprep.subr.bf16.mxu0 %v17330_v11  ;;  %4117 = vmatprep.subr.bf16.mxu1 %v17332_v46  ;;  %v17359_v11 = vld [vmem:[#allocation14 + $0xec] ss:$16 sps:$4 sm:$0xff]   ;;  %v17363_v46 = vld [vmem:[#allocation14 + $0xe0] ss:$16 sps:$4 sm:$0xff]  }
 0x5cc   :  { %4077 = vmatpush1.bf16.msra.mxu0 %v17339_v63  ;;  %4118 = vmatpush1.bf16.msra.mxu1 %v17341_v33  ;;  %v17365_v63 = vld [vmem:[#allocation14 + $0xe8] ss:$16 sps:$4 sm:$0xff]   ;;  %v15242_v33 = vpop.eup %15241 }
 0x5cd   :  { %4078 = vmatprep.subr.bf16.mxu0 %v17345_v56  ;;  %4119 = vmatprep.subr.bf16.mxu1 %v17347_v62 }
 0x5d0   :  { %4079 = vmatpush1.bf16.msra.mxu0 %v17351_v45  ;;  %4120 = vmatpush1.bf16.msra.mxu1 %v17353_v43 }
 0x5d1   :  { %4080 = vmatprep.subr.bf16.mxu0 %v17357_v55  ;;  %4121 = vmatprep.subr.bf16.mxu1 %v17359_v11 }
 0x5d2   :  { %v15244_v56 = vpop.eup %15243 }
 0x5d3   :  { %v17369_v39 = vmul.f32 %v15244_v56, %v15242_v33  ;;  %v19532_v56 = vld [vmem:[#allocation82_spill] sm:$0xff] }
 0x5d4   :  { %4081 = vmatpush1.bf16.msra.mxu0 %v17363_v46  ;;  %4122 = vmatpush1.bf16.msra.mxu1 %v17365_v63 }
 0x5d5   :  { %19526 = vst [vmem:[#allocation100_spill] sm:$0xff] %v17369_v39  ;;  %v3873_v45 = vpack.c.bf16 %v17369_v39, %v17369_v39  ;;  %4401 = vmatprep.subr.bf16.mxu0 %v17157_v57  ;;  %4442 = vmatprep.subr.bf16.mxu1 %v17159_v60  ;;  %v17642_v39 = vld [vmem:[#allocation14 + $0xa4] ss:$16 sps:$4 sm:$0xff]  }
 0x5d6   :  { %19554 = vst [vmem:[#allocation49_spill] sm:$0xff] %v17642_v39 }
 0x5d7   :  { %4099 = vmatmul.mubr.bf16.vlgmr.msra.gmra.mrb[68].mxu0 %v3873_v45  ;;  %4140 = vmatmul.mubr.bf16.vlgmr.msra.gmra.mrb[68].mxu1 %v3873_v45 }
 0x5d8   :  { %4402 = vmatpush1.bf16.msra.mxu0 %v17161_v49  ;;  %4443 = vmatpush1.bf16.msra.mxu1 %v17163_v47  ;;  %v19527_v49 = vld [vmem:[#allocation53_spill] sm:$0xff] }
 0x5d9   :  { %4403 = vmatprep.subr.bf16.mxu0 %v17169_v19  ;;  %4444 = vmatprep.subr.bf16.mxu1 %v17171_v27  ;;  %v19528_v19 = vld [vmem:[#allocation54_spill] sm:$0xff] }
 0x5da   :  { %4433 = vmatprep.mubr.bf16.mxu0 %v19480_v51  ;;  %4474 = vmatprep.mubr.bf16.mxu1 %v19480_v51 }
 0x5dc   :  { %4404 = vmatpush1.bf16.msra.mxu0 %v17173_v15  ;;  %4445 = vmatpush1.bf16.msra.mxu1 %v17175_v6 }
 0x5dd   :  { %4405 = vmatprep.subr.bf16.mxu0 %v17181_v5  ;;  %4446 = vmatprep.subr.bf16.mxu1 %v17183_v10  ;;  %v19529_v5 = vld [vmem:[#allocation55_spill] sm:$0xff] }
 0x5e0   :  { %4406 = vmatpush1.bf16.msra.mxu0 %v17185_v59  ;;  %4447 = vmatpush1.bf16.msra.mxu1 %v17187_v3  ;;  %v19530_v59 = vld [vmem:[#allocation56_spill] sm:$0xff] }
 0x5e1   :  { %4407 = vmatprep.subr.bf16.mxu0 %v17193_v34  ;;  %4448 = vmatprep.subr.bf16.mxu1 %v17195_v32 }
 0x5e4   :  { %4408 = vmatpush1.bf16.msra.mxu0 %v17197_v29  ;;  %4449 = vmatpush1.bf16.msra.mxu1 %v17199_v14 }
 0x5e5   :  { %4409 = vmatprep.subr.bf16.mxu0 %v17205_v21  ;;  %4450 = vmatprep.subr.bf16.mxu1 %v17207_v22 }
 0x5e8   :  { %4410 = vmatpush1.bf16.msra.mxu0 %v17209_v24  ;;  %4451 = vmatpush1.bf16.msra.mxu1 %v17211_v26 }
 0x5e9   :  { %4411 = vmatprep.subr.bf16.mxu0 %v17217_v18  ;;  %4452 = vmatprep.subr.bf16.mxu1 %v17219_v58 }
 0x5ec   :  { %4412 = vmatpush1.bf16.msra.mxu0 %v17221_v54  ;;  %4453 = vmatpush1.bf16.msra.mxu1 %v17223_v40 }
 0x5ed   :  { %4413 = vmatprep.subr.bf16.mxu0 %v17229_v13  ;;  %4454 = vmatprep.subr.bf16.mxu1 %v17231_v42 }
 0x5f0   :  { %4414 = vmatpush1.bf16.msra.mxu0 %v17233_v23  ;;  %4455 = vmatpush1.bf16.msra.mxu1 %v17235_v37 }
 0x5f1   :  { %4415 = vmatprep.subr.bf16.mxu0 %v17241_v9  ;;  %4456 = vmatprep.subr.bf16.mxu1 %v17243_v25 }
 0x5f4   :  { %4416 = vmatpush1.bf16.msra.mxu0 %v17245_v44  ;;  %4457 = vmatpush1.bf16.msra.mxu1 %v17247_v1 }
 0x5f5   :  { %4686 = vmatprep.subr.bf16.mxu0 %v17253_v38  ;;  %4727 = vmatprep.subr.bf16.mxu1 %v17255_v20  ;;  %v19531_v20 = vld [vmem:[#allocation81_spill] sm:$0xff] }
 0x68a   :  { %v3815_v57 = vpop.f32.mrb[64].mxu0  ;;  %v3856_v60 = vpop.f32.mrb[64].mxu1 }
 0x68b   :  { %v3863_v47 = vadd.f32 %v3815_v57, %v19527_v49  ;;  %v3865_v27 = vadd.f32 %v3856_v60, %v19528_v19  ;;  %v3817_v15 = vpop.f32.mrb[65].mxu0  ;;  %v3858_v6 = vpop.f32.mrb[65].mxu1  ;;  %v19533_v49 = vld [vmem:[#allocation83_spill] sm:$0xff]  ;;  %v19534_v19 = vld [vmem:[#allocation84_spill] sm:$0xff] }
 0x68c   :  { %v3864_v10 = vadd.f32 %v3817_v15, %v19529_v5  ;;  %v3866_v3 = vadd.f32 %v3858_v6, %v19530_v59  ;;  %v3819_v34 = vpop.f32.mrb[66].mxu0  ;;  %v3860_v32 = vpop.f32.mrb[66].mxu1 }
 0x68d   :  { %v13006_v29 = vmul.f32 -1.442695, %v3863_v47  ;;  %v3820_v14 = vpop.f32.mrb[67].mxu0  ;;  %v3861_v21 = vpop.f32.mrb[67].mxu1 }
 0x68e   :  { %v13007_v22 = vmul.f32 -1.442695, %v3864_v10  ;;  %v13008_v24 = vmul.f32 -1.442695, %v3866_v3 }
 0x68f   :  { %15245 = vpow2.f32 %v13006_v29 }
 0x690   :  { %15247 = vpow2.f32 %v13007_v22 }
 0x691   :  { %15249 = vpow2.f32 %v13008_v24 }
 0x692   :  { %15251 = vtanh.f32 %v3865_v27 }
 0x699   :  { %v15246_v26 = vpop.eup %15245 }
 0x69a   :  { %v15248_v18 = vpop.eup %15247  ;;  %v4155_v58 = vadd.f32 1.0, %v15246_v26 }
 0x69b   :  { %v4161_v54 = vadd.f32 1.0, %v15248_v18  ;;  %v15250_v40 = vpop.eup %15249 }
 0x69c   :  { %15253 = vrcp.f32 %v4155_v58  ;;  %v15252_v13 = vpop.eup %15251  ;;  %v4168_v9 = vadd.f32 1.0, %v15250_v40  ;;  %v17485_v58 = vld [vmem:[#allocation10 + $0x20] ss:$16 sps:$4 sm:$0xff]   ;;  %v17493_v40 = vld [vmem:[#allocation10 + $0x44] ss:$16 sps:$4 sm:$0xff]  }
 0x69d   :  { %15255 = vrcp.f32 %v4161_v54  ;;  %v17487_v54 = vld [vmem:[#allocation10 + $0x28] ss:$16 sps:$4 sm:$0xff]  }
 0x69e   :  { %15257 = vrcp.f32 %v4168_v9  ;;  %v17507_v9 = vld [vmem:[#allocation10 + $0x6c] ss:$16 sps:$4 sm:$0xff]  }
 0x6a6   :  { %v15254_v42 = vpop.eup %15253 }
 0x6a7   :  { %v15256_v23 = vpop.eup %15255  ;;  %v4172_v37 = vmul.f32 %v15254_v42, %v15252_v13  ;;  %v17495_v13 = vld [vmem:[#allocation10 + $0x4c] ss:$16 sps:$4 sm:$0xff]   ;;  %v17497_v42 = vld [vmem:[#allocation10 + $0x40] ss:$16 sps:$4 sm:$0xff]  }
 0x6a8   :  { %v4171_v25 = vmul.f32 %v15256_v23, %v17264_v50  ;;  %v15258_v3 = vpop.eup %15257  ;;  %v17499_v23 = vld [vmem:[#allocation10 + $0x48] ss:$16 sps:$4 sm:$0xff]  }
 0x6aa   :  { %v17416_v44 = vadd.f32 %v4172_v37, %v4171_v25  ;;  %v4100_v1 = vpop.f32.mrb[68].mxu0  ;;  %v4141_v38 = vpop.f32.mrb[68].mxu1  ;;  %v17505_v37 = vld [vmem:[#allocation10 + $0x64] ss:$16 sps:$4 sm:$0xff]   ;;  %v17509_v25 = vld [vmem:[#allocation10 + $0x60] ss:$16 sps:$4 sm:$0xff]  }
 0x6ab   :  { %v4148_v33 = vadd.f32 %v4100_v1, %v19531_v20  ;;  %v4150_v45 = vadd.f32 %v4141_v38, %v19532_v56  ;;  %v4102_v57 = vpop.f32.mrb[69].mxu0  ;;  %v4143_v60 = vpop.f32.mrb[69].mxu1  ;;  %v17511_v1 = vld [vmem:[#allocation10 + $0x68] ss:$16 sps:$4 sm:$0xff]   ;;  %v17517_v38 = vld [vmem:[#allocation10 + $0x84] ss:$16 sps:$4 sm:$0xff]  }
 0x6ac   :  { %15259 = vtanh.f32 %v17416_v44  ;;  %v4149_v47 = vadd.f32 %v4102_v57, %v19533_v49  ;;  %v4151_v27 = vadd.f32 %v4143_v60, %v19534_v19  ;;  %v4104_v15 = vpop.f32.mrb[70].mxu0  ;;  %v4145_v6 = vpop.f32.mrb[70].mxu1  ;;  %v17519_v20 = vld [vmem:[#allocation10 + $0x8c] ss:$16 sps:$4 sm:$0xff]   ;;  %v17523_v56 = vld [vmem:[#allocation10 + $0x88] ss:$16 sps:$4 sm:$0xff]  }
 0x6ad   :  { %v13009_v50 = vmul.f32 -1.442695, %v4148_v33  ;;  %v4105_v5 = vpop.f32.mrb[71].mxu0  ;;  %v4146_v10 = vpop.f32.mrb[71].mxu1  ;;  %v17521_v33 = vld [vmem:[#allocation10 + $0x80] ss:$16 sps:$4 sm:$0xff]  }
 0x6ae   :  { %v13010_v59 = vmul.f32 -1.442695, %v4149_v47  ;;  %v13011_v32 = vmul.f32 -1.442695, %v4151_v27  ;;  %v17531_v57 = vld [vmem:[#allocation10 + $0xac] ss:$16 sps:$4 sm:$0xff]  }
 0x6af   :  { %15261 = vpow2.f32 %v13009_v50  ;;  %v17533_v60 = vld [vmem:[#allocation10 + $0xa0] ss:$16 sps:$4 sm:$0xff]   ;;  %v17535_v49 = vld [vmem:[#allocation10 + $0xa8] ss:$16 sps:$4 sm:$0xff]   ;;  %v17541_v47 = vld [vmem:[#allocation10 + $0xc4] ss:$16 sps:$4 sm:$0xff]  }
 0x6b0   :  { %15263 = vpow2.f32 %v13010_v59  ;;  %v17543_v19 = vld [vmem:[#allocation10 + $0xcc] ss:$16 sps:$4 sm:$0xff]   ;;  %v17545_v27 = vld [vmem:[#allocation10 + $0xc0] ss:$16 sps:$4 sm:$0xff]   ;;  %v17547_v15 = vld [vmem:[#allocation10 + $0xc8] ss:$16 sps:$4 sm:$0xff]  }
 0x6b1   :  { %15265 = vpow2.f32 %v13011_v32  ;;  %v17553_v6 = vld [vmem:[#allocation10 + $0xe4] ss:$16 sps:$4 sm:$0xff]   ;;  %v17555_v50 = vld [vmem:[#allocation10 + $0xec] ss:$16 sps:$4 sm:$0xff]   ;;  %v17557_v5 = vld [vmem:[#allocation10 + $0xe0] ss:$16 sps:$4 sm:$0xff]  }
 0x6b2   :  { %15267 = vtanh.f32 %v4150_v45  ;;  %v17529_v45 = vld [vmem:[#allocation10 + $0xa4] ss:$16 sps:$4 sm:$0xff]   ;;  %v17559_v10 = vld [vmem:[#allocation10 + $0xe8] ss:$16 sps:$4 sm:$0xff]  }
 0x6b3   :  { %v17565_v59 = vld [vmem:[#allocation14 + $0x4] ss:$16 sps:$4 sm:$0xff]  }
 0x6b6   :  { %v15260_v34 = vpop.eup %15259 }
 0x6b7   :  { %v17423_v29 = vmul.f32 %v15260_v34, %v15258_v3  ;;  %v17567_v3 = vld [vmem:[#allocation14 + $0xc] ss:$16 sps:$4 sm:$0xff]  }
 0x6b9   :  { %19535 = vst [vmem:[#allocation101_spill] sm:$0xff] %v17423_v29  ;;  %v15262_v14 = vpop.eup %15261  ;;  %v4208_v21 = vpack.c.bf16 %v17423_v29, %v17423_v29  ;;  %v17638_v29 = vld [vmem:[#allocation14 + $0x88] ss:$16 sps:$4 sm:$0xff]  }
 0x6ba   :  { %v15264_v22 = vpop.eup %15263  ;;  %v4179_v24 = vadd.f32 1.0, %v15262_v14  ;;  %v19544_v14 = vld [vmem:[#allocation57_spill] sm:$0xff]  ;;  %19553 = vst [vmem:[#allocation104_spill] sm:$0xff] %v17638_v29 }
 0x6bb   :  { %v4185_v26 = vadd.f32 1.0, %v15264_v22  ;;  %4434 = vmatmul.mubr.bf16.vlgmr.msra.gmra.mrb[72].mxu0 %v4208_v21  ;;  %4475 = vmatmul.mubr.bf16.vlgmr.msra.gmra.mrb[72].mxu1 %v4208_v21  ;;  %v19545_v22 = vld [vmem:[#allocation58_spill] sm:$0xff] }
 0x6bc   :  { %15269 = vrcp.f32 %v4179_v24  ;;  %4687 = vmatpush1.bf16.msra.mxu0 %v17273_v28  ;;  %4728 = vmatpush1.bf16.msra.mxu1 %v17275_v52  ;;  %v15266_v28 = vpop.eup %15265 }
 0x6bd   :  { %15271 = vrcp.f32 %v4185_v26  ;;  %4688 = vmatprep.subr.bf16.mxu0 %v17279_v12  ;;  %4729 = vmatprep.subr.bf16.mxu1 %v17281_v48  ;;  %v15268_v52 = vpop.eup %15267 }
 0x6be   :  { %4718 = vmatprep.mubr.bf16.mxu0 %v19480_v51  ;;  %4759 = vmatprep.mubr.bf16.mxu1 %v19480_v51 }
 0x6c0   :  { %4689 = vmatpush1.bf16.msra.mxu0 %v17285_v8  ;;  %4730 = vmatpush1.bf16.msra.mxu1 %v17287_v0  ;;  %v4192_v8 = vadd.f32 1.0, %v15266_v28 }
 0x6c1   :  { %4690 = vmatprep.subr.bf16.mxu0 %v17291_v17  ;;  %4731 = vmatprep.subr.bf16.mxu1 %v17293_v36  ;;  %v19536_v36 = vld [vmem:[#allocation90_spill] sm:$0xff] }
 0x6c2   :  { %15273 = vrcp.f32 %v4192_v8 }
 0x6c4   :  { %4691 = vmatpush1.bf16.msra.mxu0 %v17299_v31  ;;  %4732 = vmatpush1.bf16.msra.mxu1 %v17301_v35  ;;  %v19537_v31 = vld [vmem:[#allocation91_spill] sm:$0xff]  ;;  %v19538_v35 = vld [vmem:[#allocation92_spill] sm:$0xff] }
 0x6c5   :  { %4692 = vmatprep.subr.bf16.mxu0 %v17305_v2  ;;  %4733 = vmatprep.subr.bf16.mxu1 %v17307_v4  ;;  %v19539_v2 = vld [vmem:[#allocation96_spill] sm:$0xff]  ;;  %v19540_v4 = vld [vmem:[#allocation97_spill] sm:$0xff] }
 0x6c6   :  { %v15270_v12 = vpop.eup %15269 }
 0x6c7   :  { %v15272_v48 = vpop.eup %15271  ;;  %v4196_v18 = vmul.f32 %v15270_v12, %v15268_v52  ;;  %v19546_v52 = vld [vmem:[#allocation59_spill] sm:$0xff] }
 0x6c8   :  { %v4195_v0 = vmul.f32 %v15272_v48, %v17334_v30  ;;  %4693 = vmatpush1.bf16.msra.mxu0 %v17311_v53  ;;  %4734 = vmatpush1.bf16.msra.mxu1 %v17313_v41  ;;  %v19541_v53 = vld [vmem:[#allocation98_spill] sm:$0xff]  ;;  %v19542_v41 = vld [vmem:[#allocation99_spill] sm:$0xff]  ;;  %v19547_v48 = vld [vmem:[#allocation60_spill] sm:$0xff] }
 0x6c9   :  { %4694 = vmatprep.subr.bf16.mxu0 %v17317_v7  ;;  %4735 = vmatprep.subr.bf16.mxu1 %v17319_v16 }
 0x6ca   :  { %v17446_v17 = vadd.f32 %v4196_v18, %v4195_v0 }
 0x6cc   :  { %15275 = vtanh.f32 %v17446_v17  ;;  %4695 = vmatpush1.bf16.msra.mxu0 %v17324_v61  ;;  %4736 = vmatpush1.bf16.msra.mxu1 %v19536_v36  ;;  %v15274_v7 = vpop.eup %15273 }
 0x6cd   :  { %4696 = vmatprep.subr.bf16.mxu0 %v19537_v31  ;;  %4737 = vmatprep.subr.bf16.mxu1 %v19538_v35 }
 0x6d0   :  { %4697 = vmatpush1.bf16.msra.mxu0 %v19539_v2  ;;  %4738 = vmatpush1.bf16.msra.mxu1 %v19540_v4 }
 0x6d1   :  { %4698 = vmatprep.subr.bf16.mxu0 %v19541_v53  ;;  %4739 = vmatprep.subr.bf16.mxu1 %v17347_v62  ;;  %v17469_v62 = vld [vmem:[#allocation10 + $0x4] ss:$16 sps:$4 sm:$0xff]  }
 0x6d4   :  { %4699 = vmatpush1.bf16.msra.mxu0 %v19542_v41  ;;  %4740 = vmatpush1.bf16.msra.mxu1 %v17353_v43  ;;  %v17471_v43 = vld [vmem:[#allocation10 + $0xc] ss:$16 sps:$4 sm:$0xff]  }
 0x6d5   :  { %4700 = vmatprep.subr.bf16.mxu0 %v17357_v55  ;;  %4741 = vmatprep.subr.bf16.mxu1 %v17359_v11  ;;  %v17473_v11 = vld [vmem:[#allocation10] ss:$16 sps:$4 sm:$0xff]   ;;  %v17475_v55 = vld [vmem:[#allocation10 + $0x8] ss:$16 sps:$4 sm:$0xff]  }
 0x6d6   :  { %v15276_v61 = vpop.eup %15275 }
 0x6d7   :  { %v17461_v16 = vmul.f32 %v15276_v61, %v15274_v7 }
 0x6d8   :  { %4701 = vmatpush1.bf16.msra.mxu0 %v17363_v46  ;;  %4742 = vmatpush1.bf16.msra.mxu1 %v17365_v63  ;;  %v17481_v46 = vld [vmem:[#allocation10 + $0x24] ss:$16 sps:$4 sm:$0xff]   ;;  %v17483_v63 = vld [vmem:[#allocation10 + $0x2c] ss:$16 sps:$4 sm:$0xff]  }
 0x6d9   :  { %19543 = vst [vmem:[#allocation102_spill] sm:$0xff] %v17461_v16  ;;  %v4493_v30 = vpack.c.bf16 %v17461_v16, %v17461_v16  ;;  %5021 = vmatprep.subr.bf16.mxu0 %v17469_v62  ;;  %5062 = vmatprep.subr.bf16.mxu1 %v17471_v43  ;;  %v17644_v16 = vld [vmem:[#allocation14 + $0xac] ss:$16 sps:$4 sm:$0xff]  }
 0x6da   :  { %19555 = vst [vmem:[#allocation50_spill] sm:$0xff] %v17644_v16 }
 0x6db   :  { %4719 = vmatmul.mubr.bf16.vlgmr.msra.gmra.mrb[76].mxu0 %v4493_v30  ;;  %4760 = vmatmul.mubr.bf16.vlgmr.msra.gmra.mrb[76].mxu1 %v4493_v30 }
 0x6dc   :  { %5053 = vmatprep.mubr.bf16.mxu0 %v19480_v51  ;;  %5094 = vmatprep.mubr.bf16.mxu1 %v19480_v51 }
 0x6dd   :  { %5022 = vmatpush1.bf16.msra.mxu0 %v17473_v11  ;;  %5063 = vmatpush1.bf16.msra.mxu1 %v17475_v55 }
 0x6de   :  { %5023 = vmatprep.subr.bf16.mxu0 %v17481_v46  ;;  %5064 = vmatprep.subr.bf16.mxu1 %v17483_v63 }
 0x6e1   :  { %5024 = vmatpush1.bf16.msra.mxu0 %v17485_v58  ;;  %5065 = vmatpush1.bf16.msra.mxu1 %v17487_v54 }
 0x6e2   :  { %5025 = vmatprep.subr.bf16.mxu0 %v17493_v40  ;;  %5066 = vmatprep.subr.bf16.mxu1 %v17495_v13 }
 0x6e5   :  { %5026 = vmatpush1.bf16.msra.mxu0 %v17497_v42  ;;  %5067 = vmatpush1.bf16.msra.mxu1 %v17499_v23 }
 0x6e6   :  { %5027 = vmatprep.subr.bf16.mxu0 %v17505_v37  ;;  %5068 = vmatprep.subr.bf16.mxu1 %v17507_v9 }
 0x6e9   :  { %5028 = vmatpush1.bf16.msra.mxu0 %v17509_v25  ;;  %5069 = vmatpush1.bf16.msra.mxu1 %v17511_v1 }
 0x6ea   :  { %5029 = vmatprep.subr.bf16.mxu0 %v17517_v38  ;;  %5070 = vmatprep.subr.bf16.mxu1 %v17519_v20 }
 0x6ed   :  { %5030 = vmatpush1.bf16.msra.mxu0 %v17521_v33  ;;  %5071 = vmatpush1.bf16.msra.mxu1 %v17523_v56 }
 0x6ee   :  { %5031 = vmatprep.subr.bf16.mxu0 %v17529_v45  ;;  %5072 = vmatprep.subr.bf16.mxu1 %v17531_v57 }
 0x6f1   :  { %5032 = vmatpush1.bf16.msra.mxu0 %v17533_v60  ;;  %5073 = vmatpush1.bf16.msra.mxu1 %v17535_v49 }
 0x6f2   :  { %5033 = vmatprep.subr.bf16.mxu0 %v17541_v47  ;;  %5074 = vmatprep.subr.bf16.mxu1 %v17543_v19 }
 0x6f5   :  { %5034 = vmatpush1.bf16.msra.mxu0 %v17545_v27  ;;  %5075 = vmatpush1.bf16.msra.mxu1 %v17547_v15 }
 0x6f6   :  { %5035 = vmatprep.subr.bf16.mxu0 %v17553_v6  ;;  %5076 = vmatprep.subr.bf16.mxu1 %v17555_v50 }
 0x6f9   :  { %5036 = vmatpush1.bf16.msra.mxu0 %v17557_v5  ;;  %5077 = vmatpush1.bf16.msra.mxu1 %v17559_v10 }
 0x6fa   :  { %5306 = vmatprep.subr.bf16.mxu0 %v17565_v59  ;;  %5347 = vmatprep.subr.bf16.mxu1 %v17567_v3 }
 0x78e   :  { %v4435_v34 = vpop.f32.mrb[72].mxu0  ;;  %v4476_v32 = vpop.f32.mrb[72].mxu1 }
 0x78f   :  { %v4483_v21 = vadd.f32 %v4435_v34, %v19544_v14  ;;  %v4485_v24 = vadd.f32 %v4476_v32, %v19545_v22  ;;  %v4437_v26 = vpop.f32.mrb[73].mxu0  ;;  %v4478_v28 = vpop.f32.mrb[73].mxu1 }
 0x790   :  { %v4484_v12 = vadd.f32 %v4437_v26, %v19546_v52  ;;  %v4486_v18 = vadd.f32 %v4478_v28, %v19547_v48  ;;  %v4439_v8 = vpop.f32.mrb[74].mxu0  ;;  %v4480_v0 = vpop.f32.mrb[74].mxu1  ;;  %v19548_v48 = vld [vmem:[#allocation77_spill] sm:$0xff] }
 0x791   :  { %v13076_v36 = vmul.f32 -1.442695, %v4483_v21  ;;  %v4440_v31 = vpop.f32.mrb[75].mxu0  ;;  %v4481_v35 = vpop.f32.mrb[75].mxu1  ;;  %v19549_v8 = vld [vmem:[#allocation78_spill] sm:$0xff] }
 0x792   :  { %v13077_v2 = vmul.f32 -1.442695, %v4484_v12  ;;  %v13078_v4 = vmul.f32 -1.442695, %v4486_v18  ;;  %v19550_v31 = vld [vmem:[#allocation79_spill] sm:$0xff] }
 0x793   :  { %15277 = vpow2.f32 %v13076_v36 }
 0x794   :  { %15279 = vpow2.f32 %v13077_v2  ;;  %v19551_v2 = vld [vmem:[#allocation80_spill] sm:$0xff] }
 0x795   :  { %15281 = vpow2.f32 %v13078_v4 }
 0x796   :  { %15283 = vtanh.f32 %v4485_v24 }
 0x79d   :  { %v15278_v53 = vpop.eup %15277 }
 0x79e   :  { %v15280_v41 = vpop.eup %15279  ;;  %v4775_v7 = vadd.f32 1.0, %v15278_v53 }
 0x79f   :  { %v4781_v61 = vadd.f32 1.0, %v15280_v41  ;;  %v15282_v30 = vpop.eup %15281 }
 0x7a0   :  { %15285 = vrcp.f32 %v4775_v7  ;;  %v15284_v34 = vpop.eup %15283  ;;  %v4788_v21 = vadd.f32 1.0, %v15282_v30 }
 0x7a1   :  { %15287 = vrcp.f32 %v4781_v61 }
 0x7a2   :  { %15289 = vrcp.f32 %v4788_v21  ;;  %v17585_v21 = vld [vmem:[#allocation14] ss:$16 sps:$4 sm:$0xff]  }
 0x7aa   :  { %v15286_v32 = vpop.eup %15285 }
 0x7ab   :  { %v15288_v14 = vpop.eup %15287  ;;  %v4792_v22 = vmul.f32 %v15286_v32, %v15284_v34 }
 0x7ac   :  { %v4791_v26 = vmul.f32 %v15288_v14, %v17416_v44  ;;  %v15290_v34 = vpop.eup %15289 }
 0x7ae   :  { %v17576_v28 = vadd.f32 %v4792_v22, %v4791_v26  ;;  %v4720_v52 = vpop.f32.mrb[76].mxu0  ;;  %v4761_v12 = vpop.f32.mrb[76].mxu1  ;;  %v17587_v26 = vld [vmem:[#allocation14 + $0x8] ss:$16 sps:$4 sm:$0xff]  }
 0x7af   :  { %v4768_v18 = vadd.f32 %v4720_v52, %v19548_v48  ;;  %v4770_v24 = vadd.f32 %v4761_v12, %v19549_v8  ;;  %v4722_v0 = vpop.f32.mrb[77].mxu0  ;;  %v4763_v36 = vpop.f32.mrb[77].mxu1  ;;  %v17591_v48 = vld [vmem:[#allocation14 + $0x24] ss:$16 sps:$4 sm:$0xff]  }
 0x7b0   :  { %15291 = vtanh.f32 %v17576_v28  ;;  %v4769_v35 = vadd.f32 %v4722_v0, %v19550_v31  ;;  %v4771_v4 = vadd.f32 %v4763_v36, %v19551_v2  ;;  %v4724_v53 = vpop.f32.mrb[78].mxu0  ;;  %v4765_v41 = vpop.f32.mrb[78].mxu1  ;;  %v17597_v31 = vld [vmem:[#allocation14 + $0x20] ss:$16 sps:$4 sm:$0xff]   ;;  %v17603_v2 = vld [vmem:[#allocation14 + $0x44] ss:$16 sps:$4 sm:$0xff]  }
 0x7b1   :  { %v13079_v44 = vmul.f32 -1.442695, %v4768_v18  ;;  %v4725_v7 = vpop.f32.mrb[79].mxu0  ;;  %v4766_v61 = vpop.f32.mrb[79].mxu1  ;;  %v17593_v18 = vld [vmem:[#allocation14 + $0x2c] ss:$16 sps:$4 sm:$0xff]  }
 0x7b2   :  { %v13080_v30 = vmul.f32 -1.442695, %v4769_v35  ;;  %v13081_v14 = vmul.f32 -1.442695, %v4771_v4  ;;  %v17599_v35 = vld [vmem:[#allocation14 + $0x28] ss:$16 sps:$4 sm:$0xff]  }
 0x7b3   :  { %15293 = vpow2.f32 %v13079_v44  ;;  %v17611_v4 = vld [vmem:[#allocation14 + $0x40] ss:$16 sps:$4 sm:$0xff]   ;;  %v17613_v53 = vld [vmem:[#allocation14 + $0x48] ss:$16 sps:$4 sm:$0xff]   ;;  %v17617_v41 = vld [vmem:[#allocation14 + $0x64] ss:$16 sps:$4 sm:$0xff]  }
 0x7b4   :  { %15295 = vpow2.f32 %v13080_v30  ;;  %v17619_v44 = vld [vmem:[#allocation14 + $0x6c] ss:$16 sps:$4 sm:$0xff]   ;;  %v17623_v61 = vld [vmem:[#allocation14 + $0x60] ss:$16 sps:$4 sm:$0xff]   ;;  %v17625_v30 = vld [vmem:[#allocation14 + $0x68] ss:$16 sps:$4 sm:$0xff]  }
 0x7b5   :  { %15297 = vpow2.f32 %v13081_v14  ;;  %v17631_v14 = vld [vmem:[#allocation14 + $0x8c] ss:$16 sps:$4 sm:$0xff]  }
 0x7b6   :  { %15299 = vtanh.f32 %v4770_v24  ;;  %v17605_v24 = vld [vmem:[#allocation14 + $0x4c] ss:$16 sps:$4 sm:$0xff]  }
 0x7ba   :  { %v15292_v32 = vpop.eup %15291 }
 0x7bb   :  { %v17583_v22 = vmul.f32 %v15292_v32, %v15290_v34  ;;  %v17629_v32 = vld [vmem:[#allocation14 + $0x84] ss:$16 sps:$4 sm:$0xff]  }
 0x7bd   :  { %19552 = vst [vmem:[#allocation103_spill] sm:$0xff] %v17583_v22  ;;  %v15294_v52 = vpop.eup %15293  ;;  %v4828_v12 = vpack.c.bf16 %v17583_v22, %v17583_v22  ;;  %v17636_v22 = vld [vmem:[#allocation14 + $0x80] ss:$16 sps:$4 sm:$0xff]  }
 0x7be   :  { %v15296_v8 = vpop.eup %15295  ;;  %v4799_v0 = vadd.f32 1.0, %v15294_v52 }
 0x7bf   :  { %v4805_v36 = vadd.f32 1.0, %v15296_v8  ;;  %5054 = vmatmul.mubr.bf16.vlgmr.msra.gmra.mrb[80].mxu0 %v4828_v12  ;;  %5095 = vmatmul.mubr.bf16.vlgmr.msra.gmra.mrb[80].mxu1 %v4828_v12  ;;  %v15298_v7 = vpop.eup %15297 }
 0x7c0   :  { %15301 = vrcp.f32 %v4799_v0  ;;  %5307 = vmatpush1.bf16.msra.mxu0 %v17585_v21  ;;  %5348 = vmatpush1.bf16.msra.mxu1 %v17587_v26  ;;  %v15300_v34 = vpop.eup %15299  ;;  %v4812_v0 = vadd.f32 1.0, %v15298_v7  ;;  %v17653_v7 = vld [vmem:[#allocation14 + $0xa8] ss:$16 sps:$4 sm:$0xff]  }
 0x7c1   :  { %15303 = vrcp.f32 %v4805_v36  ;;  %5308 = vmatprep.subr.bf16.mxu0 %v17591_v48  ;;  %5349 = vmatprep.subr.bf16.mxu1 %v17593_v18  ;;  %19557 = vst [vmem:[#allocation52_spill] sm:$0xff] %v17653_v7 }
 0x7c2   :  { %5338 = vmatprep.mubr.bf16.mxu0 %v19480_v51  ;;  %5379 = vmatprep.mubr.bf16.mxu1 %v19480_v51  ;;  %15305 = vrcp.f32 %v4812_v0  ;;  %v17665_v0 = vld [vmem:[#allocation14 + $0xc8] ss:$16 sps:$4 sm:$0xff]  }
 0x7c4   :  { %5309 = vmatpush1.bf16.msra.mxu0 %v17597_v31  ;;  %5350 = vmatpush1.bf16.msra.mxu1 %v17599_v35 }
 0x7c5   :  { %5310 = vmatprep.subr.bf16.mxu0 %v17603_v2  ;;  %5351 = vmatprep.subr.bf16.mxu1 %v17605_v24 }
 0x7c8   :  { %5311 = vmatpush1.bf16.msra.mxu0 %v17611_v4  ;;  %5352 = vmatpush1.bf16.msra.mxu1 %v17613_v53 }
 0x7c9   :  { %5312 = vmatprep.subr.bf16.mxu0 %v17617_v41  ;;  %5353 = vmatprep.subr.bf16.mxu1 %v17619_v44 }
 0x7ca   :  { %v15302_v52 = vpop.eup %15301 }
 0x7cb   :  { %v15304_v12 = vpop.eup %15303  ;;  %v4816_v8 = vmul.f32 %v15302_v52, %v15300_v34  ;;  %v17657_v52 = vld [vmem:[#allocation14 + $0xc4] ss:$16 sps:$4 sm:$0xff]  }
 0x7cc   :  { %v4815_v36 = vmul.f32 %v15304_v12, %v17446_v17  ;;  %5313 = vmatpush1.bf16.msra.mxu0 %v17623_v61  ;;  %5354 = vmatpush1.bf16.msra.mxu1 %v17625_v30  ;;  %v17651_v17 = vld [vmem:[#allocation14 + $0xa0] ss:$16 sps:$4 sm:$0xff]   ;;  %19558 = vst [vmem:[#allocation85_spill] sm:$0xff] %v17657_v52  ;;  %v17659_v12 = vld [vmem:[#allocation14 + $0xcc] ss:$16 sps:$4 sm:$0xff]  }
 0x7cd   :  { %5314 = vmatprep.subr.bf16.mxu0 %v17629_v32  ;;  %5355 = vmatprep.subr.bf16.mxu1 %v17631_v14  ;;  %19556 = vst [vmem:[#allocation51_spill] sm:$0xff] %v17651_v17 }
 0x7ce   :  { %v17646_v34 = vadd.f32 %v4816_v8, %v4815_v36  ;;  %v17663_v8 = vld [vmem:[#allocation14 + $0xc0] ss:$16 sps:$4 sm:$0xff]   ;;  %v17669_v36 = vld [vmem:[#allocation14 + $0xe4] ss:$16 sps:$4 sm:$0xff]  }
 0x7cf   :  { %19559 = vst [vmem:[#allocation86_spill] sm:$0xff] %v17663_v8 }
 0x7d0   :  { %15307 = vtanh.f32 %v17646_v34  ;;  %5315 = vmatpush1.bf16.msra.mxu0 %v17636_v22  ;;  %5356 = vmatpush1.bf16.msra.mxu1 %v17638_v29 }
 0x7d1   :  { %5316 = vmatprep.subr.bf16.mxu0 %v17642_v39  ;;  %5357 = vmatprep.subr.bf16.mxu1 %v17644_v16  ;;  %v17671_v39 = vld [vmem:[#allocation14 + $0xec] ss:$16 sps:$4 sm:$0xff]   ;;  %v17675_v16 = vld [vmem:[#allocation14 + $0xe0] ss:$16 sps:$4 sm:$0xff]  }
 0x7d4   :  { %5317 = vmatpush1.bf16.msra.mxu0 %v17651_v17  ;;  %5358 = vmatpush1.bf16.msra.mxu1 %v17653_v7  ;;  %v17677_v17 = vld [vmem:[#allocation14 + $0xe8] ss:$16 sps:$4 sm:$0xff]   ;;  %v15306_v7 = vpop.eup %15305 }
 0x7d5   :  { %5318 = vmatprep.subr.bf16.mxu0 %v17657_v52  ;;  %5359 = vmatprep.subr.bf16.mxu1 %v17659_v12 }
 0x7d8   :  { %5319 = vmatpush1.bf16.msra.mxu0 %v17663_v8  ;;  %5360 = vmatpush1.bf16.msra.mxu1 %v17665_v0 }
 0x7d9   :  { %5320 = vmatprep.subr.bf16.mxu0 %v17669_v36  ;;  %5361 = vmatprep.subr.bf16.mxu1 %v17671_v39 }
 0x7da   :  { %v15308_v52 = vpop.eup %15307 }
 0x7db   :  { %v17681_v29 = vmul.f32 %v15308_v52, %v15306_v7  ;;  %v19565_v52 = vld [vmem:[#allocation74_spill] sm:$0xff] }
 0x7dc   :  { %5321 = vmatpush1.bf16.msra.mxu0 %v17675_v16  ;;  %5362 = vmatpush1.bf16.msra.mxu1 %v17677_v17 }
 0x7dd   :  { %v5113_v8 = vpack.c.bf16 %v17681_v29, %v17681_v29  ;;  %5641 = vmatprep.subr.bf16.mxu0 %v17469_v62  ;;  %5682 = vmatprep.subr.bf16.mxu1 %v17471_v43 }
 0x7df   :  { %5339 = vmatmul.mubr.bf16.vlgmr.msra.gmra.mrb[84].mxu0 %v5113_v8  ;;  %5380 = vmatmul.mubr.bf16.vlgmr.msra.gmra.mrb[84].mxu1 %v5113_v8 }
 0x7e0   :  { %5642 = vmatpush1.bf16.msra.mxu0 %v17473_v11  ;;  %5683 = vmatpush1.bf16.msra.mxu1 %v17475_v55  ;;  %v19560_v11 = vld [vmem:[#allocation61_spill] sm:$0xff] }
 0x7e1   :  { %5643 = vmatprep.subr.bf16.mxu0 %v17481_v46  ;;  %5684 = vmatprep.subr.bf16.mxu1 %v17483_v63  ;;  %v19561_v46 = vld [vmem:[#allocation62_spill] sm:$0xff] }
 0x7e2   :  { %5673 = vmatprep.mubr.bf16.mxu0 %v19480_v51  ;;  %5714 = vmatprep.mubr.bf16.mxu1 %v19480_v51 }
 0x7e4   :  { %5644 = vmatpush1.bf16.msra.mxu0 %v17485_v58  ;;  %5685 = vmatpush1.bf16.msra.mxu1 %v17487_v54 }
 0x7e5   :  { %5645 = vmatprep.subr.bf16.mxu0 %v17493_v40  ;;  %5686 = vmatprep.subr.bf16.mxu1 %v17495_v13  ;;  %v19562_v40 = vld [vmem:[#allocation63_spill] sm:$0xff] }
 0x7e8   :  { %5646 = vmatpush1.bf16.msra.mxu0 %v17497_v42  ;;  %5687 = vmatpush1.bf16.msra.mxu1 %v17499_v23  ;;  %v19563_v42 = vld [vmem:[#allocation64_spill] sm:$0xff] }
 0x7e9   :  { %5647 = vmatprep.subr.bf16.mxu0 %v17505_v37  ;;  %5688 = vmatprep.subr.bf16.mxu1 %v17507_v9 }
 0x7ec   :  { %5648 = vmatpush1.bf16.msra.mxu0 %v17509_v25  ;;  %5689 = vmatpush1.bf16.msra.mxu1 %v17511_v1 }
 0x7ed   :  { %5649 = vmatprep.subr.bf16.mxu0 %v17517_v38  ;;  %5690 = vmatprep.subr.bf16.mxu1 %v17519_v20 }
 0x7f0   :  { %5650 = vmatpush1.bf16.msra.mxu0 %v17521_v33  ;;  %5691 = vmatpush1.bf16.msra.mxu1 %v17523_v56 }
 0x7f1   :  { %5651 = vmatprep.subr.bf16.mxu0 %v17529_v45  ;;  %5692 = vmatprep.subr.bf16.mxu1 %v17531_v57 }
 0x7f4   :  { %5652 = vmatpush1.bf16.msra.mxu0 %v17533_v60  ;;  %5693 = vmatpush1.bf16.msra.mxu1 %v17535_v49 }
 0x7f5   :  { %5653 = vmatprep.subr.bf16.mxu0 %v17541_v47  ;;  %5694 = vmatprep.subr.bf16.mxu1 %v17543_v19 }
 0x7f8   :  { %5654 = vmatpush1.bf16.msra.mxu0 %v17545_v27  ;;  %5695 = vmatpush1.bf16.msra.mxu1 %v17547_v15 }
 0x7f9   :  { %5655 = vmatprep.subr.bf16.mxu0 %v17553_v6  ;;  %5696 = vmatprep.subr.bf16.mxu1 %v17555_v50 }
 0x7fc   :  { %5656 = vmatpush1.bf16.msra.mxu0 %v17557_v5  ;;  %5697 = vmatpush1.bf16.msra.mxu1 %v17559_v10 }
 0x7fd   :  { %5926 = vmatprep.subr.bf16.mxu0 %v17565_v59  ;;  %5967 = vmatprep.subr.bf16.mxu1 %v17567_v3  ;;  %v19564_v3 = vld [vmem:[#allocation73_spill] sm:$0xff] }
 0x892   :  { %v5055_v62 = vpop.f32.mrb[80].mxu0  ;;  %v5096_v43 = vpop.f32.mrb[80].mxu1 }
 0x893   :  { %v5103_v55 = vadd.f32 %v5055_v62, %v19560_v11  ;;  %v5105_v63 = vadd.f32 %v5096_v43, %v19561_v46  ;;  %v5057_v58 = vpop.f32.mrb[81].mxu0  ;;  %v5098_v54 = vpop.f32.mrb[81].mxu1  ;;  %v19566_v11 = vld [vmem:[#allocation75_spill] sm:$0xff]  ;;  %v19567_v46 = vld [vmem:[#allocation76_spill] sm:$0xff] }
 0x894   :  { %v5104_v13 = vadd.f32 %v5057_v58, %v19562_v40  ;;  %v5106_v23 = vadd.f32 %v5098_v54, %v19563_v42  ;;  %v5059_v37 = vpop.f32.mrb[82].mxu0  ;;  %v5100_v9 = vpop.f32.mrb[82].mxu1 }
 0x895   :  { %v13146_v25 = vmul.f32 -1.442695, %v5103_v55  ;;  %v5060_v1 = vpop.f32.mrb[83].mxu0  ;;  %v5101_v38 = vpop.f32.mrb[83].mxu1 }
 0x896   :  { %v13147_v20 = vmul.f32 -1.442695, %v5104_v13  ;;  %v13148_v33 = vmul.f32 -1.442695, %v5106_v23 }
 0x897   :  { %15309 = vpow2.f32 %v13146_v25 }
 0x898   :  { %15311 = vpow2.f32 %v13147_v20 }
 0x899   :  { %15313 = vpow2.f32 %v13148_v33 }
 0x89a   :  { %15315 = vtanh.f32 %v5105_v63 }
 0x8a1   :  { %v15310_v56 = vpop.eup %15309 }
 0x8a2   :  { %v15312_v45 = vpop.eup %15311  ;;  %v5395_v57 = vadd.f32 1.0, %v15310_v56 }
 0x8a3   :  { %v5401_v60 = vadd.f32 1.0, %v15312_v45  ;;  %v15314_v49 = vpop.eup %15313 }
 0x8a4   :  { %15317 = vrcp.f32 %v5395_v57  ;;  %v15316_v47 = vpop.eup %15315  ;;  %v5408_v6 = vadd.f32 1.0, %v15314_v49  ;;  %v14522_v57 = vld [vmem:[#allocation17 + $0xc] ss:$16 sps:$4 sm:$0xff]   ;;  %v14523_v49 = vld [vmem:[#allocation17 + $0x20] ss:$16 sps:$4 sm:$0xff]  }
 0x8a5   :  { %15319 = vrcp.f32 %v5401_v60  ;;  %v14520_v60 = vld [vmem:[#allocation17 + $0x8] ss:$16 sps:$4 sm:$0xff]  }
 0x8a6   :  { %15321 = vrcp.f32 %v5408_v6  ;;  %v14540_v6 = vld [vmem:[#allocation17 + $0x6c] ss:$16 sps:$4 sm:$0xff]  }
 0x8ae   :  { %v15318_v19 = vpop.eup %15317 }
 0x8af   :  { %v15320_v27 = vpop.eup %15319  ;;  %v5412_v15 = vmul.f32 %v15318_v19, %v15316_v47  ;;  %v14526_v47 = vld [vmem:[#allocation17 + $0x28] ss:$16 sps:$4 sm:$0xff]   ;;  %v14529_v19 = vld [vmem:[#allocation17 + $0x40] ss:$16 sps:$4 sm:$0xff]  }
 0x8b0   :  { %v5411_v50 = vmul.f32 %v15320_v27, %v17576_v28  ;;  %v15322_v23 = vpop.eup %15321  ;;  %v14532_v27 = vld [vmem:[#allocation17 + $0x48] ss:$16 sps:$4 sm:$0xff]  }
 0x8b2   :  { %v17728_v5 = vadd.f32 %v5412_v15, %v5411_v50  ;;  %v5340_v10 = vpop.f32.mrb[84].mxu0  ;;  %v5381_v59 = vpop.f32.mrb[84].mxu1  ;;  %v14537_v15 = vld [vmem:[#allocation17 + $0x64] ss:$16 sps:$4 sm:$0xff]   ;;  %v14535_v50 = vld [vmem:[#allocation17 + $0x60] ss:$16 sps:$4 sm:$0xff]  }
 0x8b3   :  { %v5388_v7 = vadd.f32 %v5340_v10, %v19564_v3  ;;  %v5390_v8 = vadd.f32 %v5381_v59, %v19565_v52  ;;  %v5342_v62 = vpop.f32.mrb[85].mxu0  ;;  %v5383_v43 = vpop.f32.mrb[85].mxu1  ;;  %v14538_v10 = vld [vmem:[#allocation17 + $0x68] ss:$16 sps:$4 sm:$0xff]   ;;  %v14543_v59 = vld [vmem:[#allocation17 + $0x84] ss:$16 sps:$4 sm:$0xff]  }
 0x8b4   :  { %15323 = vtanh.f32 %v17728_v5  ;;  %v5389_v55 = vadd.f32 %v5342_v62, %v19566_v11  ;;  %v5391_v63 = vadd.f32 %v5383_v43, %v19567_v46  ;;  %v5344_v58 = vpop.f32.mrb[86].mxu0  ;;  %v5385_v54 = vpop.f32.mrb[86].mxu1  ;;  %v14546_v3 = vld [vmem:[#allocation17 + $0x8c] ss:$16 sps:$4 sm:$0xff]   ;;  %v14544_v52 = vld [vmem:[#allocation17 + $0x88] ss:$16 sps:$4 sm:$0xff]  }
 0x8b5   :  { %v13149_v28 = vmul.f32 -1.442695, %v5388_v7  ;;  %v5345_v40 = vpop.f32.mrb[87].mxu0  ;;  %v5386_v13 = vpop.f32.mrb[87].mxu1  ;;  %v14541_v7 = vld [vmem:[#allocation17 + $0x80] ss:$16 sps:$4 sm:$0xff]  }
 0x8b6   :  { %v13150_v42 = vmul.f32 -1.442695, %v5389_v55  ;;  %v13151_v9 = vmul.f32 -1.442695, %v5391_v63  ;;  %v14552_v62 = vld [vmem:[#allocation17 + $0xac] ss:$16 sps:$4 sm:$0xff]  }
 0x8b7   :  { %15325 = vpow2.f32 %v13149_v28  ;;  %v14547_v43 = vld [vmem:[#allocation17 + $0xa0] ss:$16 sps:$4 sm:$0xff]   ;;  %v14550_v11 = vld [vmem:[#allocation17 + $0xa8] ss:$16 sps:$4 sm:$0xff]   ;;  %v14555_v55 = vld [vmem:[#allocation17 + $0xc4] ss:$16 sps:$4 sm:$0xff]  }
 0x8b8   :  { %15327 = vpow2.f32 %v13150_v42  ;;  %v14558_v46 = vld [vmem:[#allocation17 + $0xcc] ss:$16 sps:$4 sm:$0xff]   ;;  %v14553_v63 = vld [vmem:[#allocation17 + $0xc0] ss:$16 sps:$4 sm:$0xff]   ;;  %v14556_v58 = vld [vmem:[#allocation17 + $0xc8] ss:$16 sps:$4 sm:$0xff]  }
 0x8b9   :  { %15329 = vpow2.f32 %v13151_v9  ;;  %v14561_v54 = vld [vmem:[#allocation17 + $0xe4] ss:$16 sps:$4 sm:$0xff]   ;;  %v14564_v28 = vld [vmem:[#allocation17 + $0xec] ss:$16 sps:$4 sm:$0xff]   ;;  %v14559_v40 = vld [vmem:[#allocation17 + $0xe0] ss:$16 sps:$4 sm:$0xff]  }
 0x8ba   :  { %15331 = vtanh.f32 %v5390_v8  ;;  %v14549_v8 = vld [vmem:[#allocation17 + $0xa4] ss:$16 sps:$4 sm:$0xff]   ;;  %v14562_v13 = vld [vmem:[#allocation17 + $0xe8] ss:$16 sps:$4 sm:$0xff]  }
 0x8bb   :  { %v14567_v42 = vld [vmem:[#allocation17 + $0x104] ss:$16 sps:$4 sm:$0xff]   ;;  %v14568_v9 = vld [vmem:[#allocation17 + $0x108] ss:$16 sps:$4 sm:$0xff]  }
 0x8be   :  { %v15324_v37 = vpop.eup %15323 }
 0x8bf   :  { %v17735_v25 = vmul.f32 %v15324_v37, %v15322_v23  ;;  %v14570_v23 = vld [vmem:[#allocation17 + $0x10c] ss:$16 sps:$4 sm:$0xff]   ;;  %v14565_v37 = vld [vmem:[#allocation17 + $0x100] ss:$16 sps:$4 sm:$0xff]  }
 0x8c1   :  { %v15326_v1 = vpop.eup %15325  ;;  %v5448_v38 = vpack.c.bf16 %v17735_v25, %v17735_v25 }
 0x8c2   :  { %v15328_v20 = vpop.eup %15327  ;;  %v5419_v33 = vadd.f32 1.0, %v15326_v1  ;;  %v14573_v1 = vld [vmem:[#allocation17 + $0x124] ss:$16 sps:$4 sm:$0xff]  }
 0x8c3   :  { %v5425_v56 = vadd.f32 1.0, %v15328_v20  ;;  %5674 = vmatmul.mubr.bf16.vlgmr.msra.gmra.mrb[88].mxu0 %v5448_v38  ;;  %5715 = vmatmul.mubr.bf16.vlgmr.msra.gmra.mrb[88].mxu1 %v5448_v38  ;;  %v14576_v38 = vld [vmem:[#allocation17 + $0x12c] ss:$16 sps:$4 sm:$0xff]   ;;  %v14571_v20 = vld [vmem:[#allocation17 + $0x120] ss:$16 sps:$4 sm:$0xff]  }
 0x8c4   :  { %15333 = vrcp.f32 %v5419_v33  ;;  %5927 = vmatpush1.bf16.msra.mxu0 %v17585_v21  ;;  %5968 = vmatpush1.bf16.msra.mxu1 %v17587_v26  ;;  %v15330_v21 = vpop.eup %15329  ;;  %v14574_v33 = vld [vmem:[#allocation17 + $0x128] ss:$16 sps:$4 sm:$0xff]  }
 0x8c5   :  { %15335 = vrcp.f32 %v5425_v56  ;;  %5928 = vmatprep.subr.bf16.mxu0 %v17591_v48  ;;  %5969 = vmatprep.subr.bf16.mxu1 %v17593_v18  ;;  %v15332_v26 = vpop.eup %15331  ;;  %v14579_v56 = vld [vmem:[#allocation17 + $0x144] ss:$16 sps:$4 sm:$0xff]  }
 0x8c6   :  { %5958 = vmatprep.mubr.bf16.mxu0 %v19480_v51  ;;  %5999 = vmatprep.mubr.bf16.mxu1 %v19480_v51 }
 0x8c8   :  { %5929 = vmatpush1.bf16.msra.mxu0 %v17597_v31  ;;  %5970 = vmatpush1.bf16.msra.mxu1 %v17599_v35  ;;  %v5432_v31 = vadd.f32 1.0, %v15330_v21  ;;  %v14582_v21 = vld [vmem:[#allocation17 + $0x14c] ss:$16 sps:$4 sm:$0xff]  }
 0x8c9   :  { %5930 = vmatprep.subr.bf16.mxu0 %v17603_v2  ;;  %5971 = vmatprep.subr.bf16.mxu1 %v17605_v24  ;;  %v19568_v24 = vld [vmem:[#allocation104_spill] sm:$0xff] }
 0x8ca   :  { %15337 = vrcp.f32 %v5432_v31  ;;  %v14583_v31 = vld [vmem:[#allocation17 + $0x160] ss:$16 sps:$4 sm:$0xff]  }
 0x8cc   :  { %5931 = vmatpush1.bf16.msra.mxu0 %v17611_v4  ;;  %5972 = vmatpush1.bf16.msra.mxu1 %v17613_v53  ;;  %v19569_v4 = vld [vmem:[#allocation49_spill] sm:$0xff]  ;;  %v19570_v53 = vld [vmem:[#allocation50_spill] sm:$0xff] }
 0x8cd   :  { %5932 = vmatprep.subr.bf16.mxu0 %v17617_v41  ;;  %5973 = vmatprep.subr.bf16.mxu1 %v17619_v44  ;;  %v19571_v41 = vld [vmem:[#allocation51_spill] sm:$0xff]  ;;  %v19572_v44 = vld [vmem:[#allocation52_spill] sm:$0xff] }
 0x8ce   :  { %v15334_v48 = vpop.eup %15333 }
 0x8cf   :  { %v15336_v18 = vpop.eup %15335  ;;  %v5436_v45 = vmul.f32 %v15334_v48, %v15332_v26  ;;  %v14577_v26 = vld [vmem:[#allocation17 + $0x140] ss:$16 sps:$4 sm:$0xff]   ;;  %v14580_v48 = vld [vmem:[#allocation17 + $0x148] ss:$16 sps:$4 sm:$0xff]  }
 0x8d0   :  { %v5435_v35 = vmul.f32 %v15336_v18, %v17646_v34  ;;  %5933 = vmatpush1.bf16.msra.mxu0 %v17623_v61  ;;  %5974 = vmatpush1.bf16.msra.mxu1 %v17625_v30  ;;  %v19573_v61 = vld [vmem:[#allocation85_spill] sm:$0xff]  ;;  %v19574_v30 = vld [vmem:[#allocation86_spill] sm:$0xff] }
 0x8d1   :  { %5934 = vmatprep.subr.bf16.mxu0 %v17629_v32  ;;  %5975 = vmatprep.subr.bf16.mxu1 %v17631_v14  ;;  %v14585_v18 = vld [vmem:[#allocation17 + $0x164] ss:$16 sps:$4 sm:$0xff]  }
 0x8d2   :  { %v17758_v2 = vadd.f32 %v5436_v45, %v5435_v35  ;;  %v14588_v45 = vld [vmem:[#allocation17 + $0x16c] ss:$16 sps:$4 sm:$0xff]   ;;  %v14586_v35 = vld [vmem:[#allocation17 + $0x168] ss:$16 sps:$4 sm:$0xff]  }
 0x8d4   :  { %15339 = vtanh.f32 %v17758_v2  ;;  %5935 = vmatpush1.bf16.msra.mxu0 %v17636_v22  ;;  %5976 = vmatpush1.bf16.msra.mxu1 %v19568_v24  ;;  %v15338_v32 = vpop.eup %15337  ;;  %v14591_v24 = vld [vmem:[#allocation17 + $0x184] ss:$16 sps:$4 sm:$0xff]  }
 0x8d5   :  { %5936 = vmatprep.subr.bf16.mxu0 %v19569_v4  ;;  %5977 = vmatprep.subr.bf16.mxu1 %v19570_v53  ;;  %v14594_v4 = vld [vmem:[#allocation17 + $0x18c] ss:$16 sps:$4 sm:$0xff]   ;;  %v14589_v53 = vld [vmem:[#allocation17 + $0x180] ss:$16 sps:$4 sm:$0xff]  }
 0x8d8   :  { %5937 = vmatpush1.bf16.msra.mxu0 %v19571_v41  ;;  %5978 = vmatpush1.bf16.msra.mxu1 %v19572_v44  ;;  %v14592_v41 = vld [vmem:[#allocation17 + $0x188] ss:$16 sps:$4 sm:$0xff]   ;;  %v14597_v44 = vld [vmem:[#allocation17 + $0x1a4] ss:$16 sps:$4 sm:$0xff]  }
 0x8d9   :  { %5938 = vmatprep.subr.bf16.mxu0 %v19573_v61  ;;  %5979 = vmatprep.subr.bf16.mxu1 %v17659_v12  ;;  %v14519_v12 = vld [vmem:[#allocation17 + $0x4] ss:$16 sps:$4 sm:$0xff]   ;;  %v14595_v61 = vld [vmem:[#allocation17 + $0x1a0] ss:$16 sps:$4 sm:$0xff]  }
 0x8dc   :  { %5939 = vmatpush1.bf16.msra.mxu0 %v19574_v30  ;;  %5980 = vmatpush1.bf16.msra.mxu1 %v17665_v0  ;;  %v14517_v0 = vld [vmem:[#allocation17] ss:$16 sps:$4 sm:$0xff]   ;;  %v14598_v30 = vld [vmem:[#allocation17 + $0x1a8] ss:$16 sps:$4 sm:$0xff]  }
 0x8dd   :  { %5940 = vmatprep.subr.bf16.mxu0 %v17669_v36  ;;  %5981 = vmatprep.subr.bf16.mxu1 %v17671_v39  ;;  %v14525_v39 = vld [vmem:[#allocation17 + $0x24] ss:$16 sps:$4 sm:$0xff]   ;;  %v14528_v36 = vld [vmem:[#allocation17 + $0x2c] ss:$16 sps:$4 sm:$0xff]  }
 0x8de   :  { %v15340_v22 = vpop.eup %15339 }
 0x8df   :  { %v17773_v14 = vmul.f32 %v15340_v22, %v15338_v32  ;;  %v14600_v32 = vld [vmem:[#allocation17 + $0x1ac] ss:$16 sps:$4 sm:$0xff]   ;;  %v14603_v22 = vld [vmem:[#allocation17 + $0x1c4] ss:$16 sps:$4 sm:$0xff]  }
 0x8e0   :  { %5941 = vmatpush1.bf16.msra.mxu0 %v17675_v16  ;;  %5982 = vmatpush1.bf16.msra.mxu1 %v17677_v17  ;;  %v14531_v16 = vld [vmem:[#allocation17 + $0x44] ss:$16 sps:$4 sm:$0xff]   ;;  %v14534_v17 = vld [vmem:[#allocation17 + $0x4c] ss:$16 sps:$4 sm:$0xff]  }
 0x8e1   :  { %v5733_v34 = vpack.c.bf16 %v17773_v14, %v17773_v14  ;;  %6492 = vmatprep.subr.bf16.mxu0 %v14519_v12  ;;  %6565 = vmatprep.subr.bf16.mxu1 %v14522_v57  ;;  %v14601_v12 = vld [vmem:[#allocation17 + $0x1c0] ss:$16 sps:$4 sm:$0xff]   ;;  %v14604_v57 = vld [vmem:[#allocation17 + $0x1c8] ss:$16 sps:$4 sm:$0xff]  }
 0x8e3   :  { %5959 = vmatmul.mubr.bf16.vlgmr.msra.gmra.mrb[92].mxu0 %v5733_v34  ;;  %6000 = vmatmul.mubr.bf16.vlgmr.msra.gmra.mrb[92].mxu1 %v5733_v34  ;;  %v14606_v34 = vld [vmem:[#allocation17 + $0x1cc] ss:$16 sps:$4 sm:$0xff]  }
 0x8e4   :  { %6493 = vmatpush1.bf16.msra.mxu0 %v14517_v0  ;;  %6566 = vmatpush1.bf16.msra.mxu1 %v14520_v60  ;;  %v14609_v0 = vld [vmem:[#allocation17 + $0x1e4] ss:$16 sps:$4 sm:$0xff]   ;;  %v14612_v60 = vld [vmem:[#allocation17 + $0x1ec] ss:$16 sps:$4 sm:$0xff]  }
 0x8e5   :  { %6494 = vmatprep.subr.bf16.mxu0 %v14525_v39  ;;  %6567 = vmatprep.subr.bf16.mxu1 %v14528_v36  ;;  %v14607_v39 = vld [vmem:[#allocation17 + $0x1e0] ss:$16 sps:$4 sm:$0xff]   ;;  %v14610_v36 = vld [vmem:[#allocation17 + $0x1e8] ss:$16 sps:$4 sm:$0xff]  }
 0x8e8   :  { %6495 = vmatpush1.bf16.msra.mxu0 %v14523_v49  ;;  %6568 = vmatpush1.bf16.msra.mxu1 %v14526_v47  ;;  %v14615_v49 = vld [vmem:[#allocation22 + $0x4] ss:$16 sps:$4 sm:$0xff]   ;;  %v14618_v47 = vld [vmem:[#allocation22 + $0xc] ss:$16 sps:$4 sm:$0xff]  }
 0x8e9   :  { %6496 = vmatprep.subr.bf16.mxu0 %v14531_v16  ;;  %6569 = vmatprep.subr.bf16.mxu1 %v14534_v17 }
 0x8ec   :  { %6497 = vmatpush1.bf16.msra.mxu0 %v14529_v19  ;;  %6570 = vmatpush1.bf16.msra.mxu1 %v14532_v27  ;;  %v19575_v19 = vld [vmem:[#allocation65_spill] sm:$0xff] }
 0x8ed   :  { %6498 = vmatprep.subr.bf16.mxu0 %v14537_v15  ;;  %6571 = vmatprep.subr.bf16.mxu1 %v14540_v6  ;;  %v19576_v15 = vld [vmem:[#allocation66_spill] sm:$0xff] }
 0x8f0   :  { %6499 = vmatpush1.bf16.msra.mxu0 %v14535_v50  ;;  %6572 = vmatpush1.bf16.msra.mxu1 %v14538_v10 }
 0x8f1   :  { %6500 = vmatprep.subr.bf16.mxu0 %v14543_v59  ;;  %6573 = vmatprep.subr.bf16.mxu1 %v14546_v3  ;;  %v19577_v59 = vld [vmem:[#allocation67_spill] sm:$0xff] }
 0x8f4   :  { %6501 = vmatpush1.bf16.msra.mxu0 %v14541_v7  ;;  %6574 = vmatpush1.bf16.msra.mxu1 %v14544_v52  ;;  %v19578_v7 = vld [vmem:[#allocation68_spill] sm:$0xff] }
 0x8f5   :  { %6502 = vmatprep.subr.bf16.mxu0 %v14549_v8  ;;  %6575 = vmatprep.subr.bf16.mxu1 %v14552_v62 }
 0x8f8   :  { %6503 = vmatpush1.bf16.msra.mxu0 %v14547_v43  ;;  %6576 = vmatpush1.bf16.msra.mxu1 %v14550_v11 }
 0x8f9   :  { %6504 = vmatprep.subr.bf16.mxu0 %v14555_v55  ;;  %6577 = vmatprep.subr.bf16.mxu1 %v14558_v46 }
 0x8fc   :  { %6505 = vmatpush1.bf16.msra.mxu0 %v14553_v63  ;;  %6578 = vmatpush1.bf16.msra.mxu1 %v14556_v58 }
 0x8fd   :  { %6506 = vmatprep.subr.bf16.mxu0 %v14561_v54  ;;  %6579 = vmatprep.subr.bf16.mxu1 %v14564_v28 }
 0x900   :  { %6507 = vmatpush1.bf16.msra.mxu0 %v14559_v40  ;;  %6580 = vmatpush1.bf16.msra.mxu1 %v14562_v13 }
 0x901   :  { %6508 = vmatprep.subr.bf16.mxu0 %v14567_v42  ;;  %6581 = vmatprep.subr.bf16.mxu1 %v14570_v23 }
 0x904   :  { %6509 = vmatpush1.bf16.msra.mxu0 %v14565_v37  ;;  %6582 = vmatpush1.bf16.msra.mxu1 %v14568_v9 }
 0x905   :  { %6510 = vmatprep.subr.bf16.mxu0 %v14573_v1  ;;  %6583 = vmatprep.subr.bf16.mxu1 %v14576_v38 }
 0x908   :  { %6511 = vmatpush1.bf16.msra.mxu0 %v14571_v20  ;;  %6584 = vmatpush1.bf16.msra.mxu1 %v14574_v33 }
 0x909   :  { %6512 = vmatprep.subr.bf16.mxu0 %v14579_v56  ;;  %6585 = vmatprep.subr.bf16.mxu1 %v14582_v21  ;;  %v19579_v21 = vld [vmem:[#allocation69_spill] sm:$0xff] }
 0x90c   :  { %6513 = vmatpush1.bf16.msra.mxu0 %v14577_v26  ;;  %6586 = vmatpush1.bf16.msra.mxu1 %v14580_v48  ;;  %v19580_v48 = vld [vmem:[#allocation70_spill] sm:$0xff] }
 0x90d   :  { %6514 = vmatprep.subr.bf16.mxu0 %v14585_v18  ;;  %6587 = vmatprep.subr.bf16.mxu1 %v14588_v45 }
 0x910   :  { %6515 = vmatpush1.bf16.msra.mxu0 %v14583_v31  ;;  %6588 = vmatpush1.bf16.msra.mxu1 %v14586_v35  ;;  %v19581_v35 = vld [vmem:[#allocation71_spill] sm:$0xff] }
 0x911   :  { %6516 = vmatprep.subr.bf16.mxu0 %v14591_v24  ;;  %6589 = vmatprep.subr.bf16.mxu1 %v14594_v4  ;;  %v19582_v4 = vld [vmem:[#allocation72_spill] sm:$0xff] }
 0x914   :  { %6517 = vmatpush1.bf16.msra.mxu0 %v14589_v53  ;;  %6590 = vmatpush1.bf16.msra.mxu1 %v14592_v41 }
 0x915   :  { %6518 = vmatprep.subr.bf16.mxu0 %v14597_v44  ;;  %6591 = vmatprep.subr.bf16.mxu1 %v14600_v32 }
 0x918   :  { %6519 = vmatpush1.bf16.msra.mxu0 %v14595_v61  ;;  %6592 = vmatpush1.bf16.msra.mxu1 %v14598_v30 }
 0x919   :  { %6520 = vmatprep.subr.bf16.mxu0 %v14603_v22  ;;  %6593 = vmatprep.subr.bf16.mxu1 %v14606_v34 }
 0x91c   :  { %6521 = vmatpush1.bf16.msra.mxu0 %v14601_v12  ;;  %6594 = vmatpush1.bf16.msra.mxu1 %v14604_v57 }
 0x91d   :  { %6522 = vmatprep.subr.bf16.mxu0 %v14609_v0  ;;  %6595 = vmatprep.subr.bf16.mxu1 %v14612_v60 }
 0x920   :  { %6523 = vmatpush1.bf16.msra.mxu0 %v14607_v39  ;;  %6596 = vmatpush1.bf16.msra.mxu1 %v14610_v36 }
 0x921   :  { %7076 = vmatprep.subr.bf16.mxu0 %v14615_v49  ;;  %7149 = vmatprep.subr.bf16.mxu1 %v14618_v47 }
 0x996   :  { %v5675_v16 = vpop.f32.mrb[88].mxu0  ;;  %v5716_v17 = vpop.f32.mrb[88].mxu1 }
 0x997   :  { %v5723_v27 = vadd.f32 %v5675_v16, %v19575_v19  ;;  %v5725_v6 = vadd.f32 %v5716_v17, %v19576_v15  ;;  %v5677_v50 = vpop.f32.mrb[89].mxu0  ;;  %v5718_v10 = vpop.f32.mrb[89].mxu1 }
 0x998   :  { %v5724_v3 = vadd.f32 %v5677_v50, %v19577_v59  ;;  %v5726_v52 = vadd.f32 %v5718_v10, %v19578_v7  ;;  %v5679_v8 = vpop.f32.mrb[90].mxu0  ;;  %v5720_v62 = vpop.f32.mrb[90].mxu1  ;;  %v14613_v7 = vld [vmem:[#allocation22] ss:$16 sps:$4 sm:$0xff]  }
 0x999   :  { %v13216_v43 = vmul.f32 -1.442695, %v5723_v27  ;;  %v5680_v11 = vpop.f32.mrb[91].mxu0  ;;  %v5721_v55 = vpop.f32.mrb[91].mxu1  ;;  %v19583_v8 = vld [vmem:[#allocation93_spill] sm:$0xff]  ;;  %v19584_v62 = vld [vmem:[#allocation95_spill] sm:$0xff] }
 0x99a   :  { %v13217_v46 = vmul.f32 -1.442695, %v5724_v3  ;;  %v13218_v63 = vmul.f32 -1.442695, %v5726_v52  ;;  %v14616_v52 = vld [vmem:[#allocation22 + $0x8] ss:$16 sps:$4 sm:$0xff]  }
 0x99b   :  { %15341 = vpow2.f32 %v13216_v43  ;;  %v17796_v43 = vpack.c.bf16 %v19584_v62, %v19583_v8  ;;  %v14624_v11 = vld [vmem:[#allocation22 + $0x2c] ss:$16 sps:$4 sm:$0xff]   ;;  %v19585_v55 = vld [vmem:[#allocation102_spill] sm:$0xff] }
 0x99c   :  { %15343 = vpow2.f32 %v13217_v46  ;;  %v14619_v46 = vld [vmem:[#allocation22 + $0x20] ss:$16 sps:$4 sm:$0xff]   ;;  %v14690_v8 = vld [vmem:[#allocation22 + $0x18c] ss:$16 sps:$4 sm:$0xff]  }
 0x99d   :  { %15345 = vpow2.f32 %v13218_v63  ;;  %v14622_v63 = vld [vmem:[#allocation22 + $0x28] ss:$16 sps:$4 sm:$0xff]   ;;  %v14685_v62 = vld [vmem:[#allocation22 + $0x180] ss:$16 sps:$4 sm:$0xff]  }
 0x99e   :  { %15347 = vtanh.f32 %v5725_v6 }
 0x9a5   :  { %v15342_v58 = vpop.eup %15341 }
 0x9a6   :  { %v15344_v54 = vpop.eup %15343  ;;  %v6015_v28 = vadd.f32 1.0, %v15342_v58  ;;  %v14627_v58 = vld [vmem:[#allocation22 + $0x44] ss:$16 sps:$4 sm:$0xff]  }
 0x9a7   :  { %v6021_v40 = vadd.f32 1.0, %v15344_v54  ;;  %v15346_v13 = vpop.eup %15345  ;;  %v14630_v54 = vld [vmem:[#allocation22 + $0x4c] ss:$16 sps:$4 sm:$0xff]  }
 0x9a8   :  { %15349 = vrcp.f32 %v6015_v28  ;;  %v15348_v42 = vpop.eup %15347  ;;  %v6028_v1 = vadd.f32 1.0, %v15346_v13  ;;  %v14625_v28 = vld [vmem:[#allocation22 + $0x40] ss:$16 sps:$4 sm:$0xff]   ;;  %v19587_v13 = vld [vmem:[#allocation89_spill] sm:$0xff] }
 0x9a9   :  { %15351 = vrcp.f32 %v6021_v40  ;;  %v14628_v40 = vld [vmem:[#allocation22 + $0x48] ss:$16 sps:$4 sm:$0xff]  }
 0x9aa   :  { %15353 = vrcp.f32 %v6028_v1  ;;  %v19589_v1 = vld [vmem:[#allocation48_spill] sm:$0xff] }
 0x9b2   :  { %v15350_v23 = vpop.eup %15349 }
 0x9b3   :  { %v15352_v37 = vpop.eup %15351  ;;  %v6032_v9 = vmul.f32 %v15350_v23, %v15348_v42  ;;  %v14633_v23 = vld [vmem:[#allocation22 + $0x64] ss:$16 sps:$4 sm:$0xff]  }
 0x9b4   :  { %v6031_v38 = vmul.f32 %v15352_v37, %v17728_v5  ;;  %v15354_v22 = vpop.eup %15353  ;;  %v14636_v37 = vld [vmem:[#allocation22 + $0x6c] ss:$16 sps:$4 sm:$0xff]  }
 0x9b6   :  { %v6033_v20 = vadd.f32 %v6032_v9, %v6031_v38  ;;  %v5960_v33 = vpop.f32.mrb[92].mxu0  ;;  %v6001_v56 = vpop.f32.mrb[92].mxu1  ;;  %v19588_v9 = vld [vmem:[#allocation100_spill] sm:$0xff] }
 0x9b7   :  { %v6008_v26 = vadd.f32 %v5960_v33, %v19579_v21  ;;  %v6010_v18 = vadd.f32 %v6001_v56, %v19580_v48  ;;  %v5962_v45 = vpop.f32.mrb[93].mxu0  ;;  %v6003_v31 = vpop.f32.mrb[93].mxu1  ;;  %v17816_v38 = vpack.c.bf16 %v19589_v1, %v19588_v9  ;;  %v14634_v33 = vld [vmem:[#allocation22 + $0x68] ss:$16 sps:$4 sm:$0xff]   ;;  %v14639_v56 = vld [vmem:[#allocation22 + $0x84] ss:$16 sps:$4 sm:$0xff]  }
 0x9b8   :  { %15355 = vtanh.f32 %v6033_v20  ;;  %v6009_v24 = vadd.f32 %v5962_v45, %v19581_v35  ;;  %v6011_v53 = vadd.f32 %v6003_v31, %v19582_v4  ;;  %v5964_v41 = vpop.f32.mrb[94].mxu0  ;;  %v6005_v44 = vpop.f32.mrb[94].mxu1  ;;  %v14631_v20 = vld [vmem:[#allocation22 + $0x60] ss:$16 sps:$4 sm:$0xff]   ;;  %v14642_v21 = vld [vmem:[#allocation22 + $0x8c] ss:$16 sps:$4 sm:$0xff]  }
 0x9b9   :  { %v13219_v61 = vmul.f32 -1.442695, %v6008_v26  ;;  %v5965_v30 = vpop.f32.mrb[95].mxu0  ;;  %v6006_v5 = vpop.f32.mrb[95].mxu1  ;;  %v14637_v26 = vld [vmem:[#allocation22 + $0x80] ss:$16 sps:$4 sm:$0xff]  }
 0x9ba   :  { %v13220_v32 = vmul.f32 -1.442695, %v6009_v24  ;;  %v13221_v12 = vmul.f32 -1.442695, %v6011_v53  ;;  %v14640_v48 = vld [vmem:[#allocation22 + $0x88] ss:$16 sps:$4 sm:$0xff]  }
 0x9bb   :  { %15357 = vpow2.f32 %v13219_v61  ;;  %v19591_v45 = vld [vmem:[#allocation103_spill] sm:$0xff]  ;;  %v14645_v35 = vld [vmem:[#allocation22 + $0xa4] ss:$16 sps:$4 sm:$0xff]   ;;  %v19592_v4 = vld [vmem:[#allocation105_spill] sm:$0xff] }
 0x9bc   :  { %15359 = vpow2.f32 %v13220_v32  ;;  %v14648_v24 = vld [vmem:[#allocation22 + $0xac] ss:$16 sps:$4 sm:$0xff]   ;;  %v19593_v53 = vld [vmem:[#allocation94_spill] sm:$0xff]  ;;  %v14646_v61 = vld [vmem:[#allocation22 + $0xa8] ss:$16 sps:$4 sm:$0xff]  }
 0x9bd   :  { %15361 = vpow2.f32 %v13221_v12  ;;  %v17828_v41 = vpack.c.bf16 %v19593_v53, %v19592_v4  ;;  %v14643_v44 = vld [vmem:[#allocation22 + $0xa0] ss:$16 sps:$4 sm:$0xff]   ;;  %v14651_v30 = vld [vmem:[#allocation22 + $0xc4] ss:$16 sps:$4 sm:$0xff]   ;;  %v14654_v5 = vld [vmem:[#allocation22 + $0xcc] ss:$16 sps:$4 sm:$0xff]  }
 0x9be   :  { %15363 = vtanh.f32 %v6010_v18  ;;  %v19590_v18 = vld [vmem:[#allocation101_spill] sm:$0xff]  ;;  %v14649_v32 = vld [vmem:[#allocation22 + $0xc0] ss:$16 sps:$4 sm:$0xff]   ;;  %v14657_v12 = vld [vmem:[#allocation22 + $0xe4] ss:$16 sps:$4 sm:$0xff]  }
 0x9bf   :  { %v17822_v31 = vpack.c.bf16 %v19591_v45, %v19590_v18  ;;  %v17840_v9 = vld [vmem:[#allocation19 + $0x4] ss:$16 sps:$4 sm:$0xff]   ;;  %v17842_v1 = vld [vmem:[#allocation19 + $0xc] ss:$16 sps:$4 sm:$0xff]   ;;  %v17888_v4 = vld [vmem:[#allocation19 + $0x60] ss:$16 sps:$4 sm:$0xff]  }
 0x9c0   :  { %v17866_v18 = vld [vmem:[#allocation19 + $0x44] ss:$16 sps:$4 sm:$0xff]   ;;  %v17868_v45 = vld [vmem:[#allocation19 + $0x4c] ss:$16 sps:$4 sm:$0xff]   ;;  %v17890_v53 = vld [vmem:[#allocation19 + $0x68] ss:$16 sps:$4 sm:$0xff]  }
 0x9c2   :  { %v15356_v34 = vpop.eup %15355 }
 0x9c3   :  { %v17788_v57 = vmul.f32 %v15356_v34, %v15354_v22  ;;  %v14652_v22 = vld [vmem:[#allocation22 + $0xc8] ss:$16 sps:$4 sm:$0xff]  }
 0x9c5   :  { %v15358_v0 = vpop.eup %15357  ;;  %v17834_v34 = vpack.c.bf16 %v17788_v57, %v17735_v25  ;;  %v14661_v25 = vld [vmem:[#allocation22 + $0x100] ss:$16 sps:$4 sm:$0xff]   ;;  %v14664_v57 = vld [vmem:[#allocation22 + $0x108] ss:$16 sps:$4 sm:$0xff]  }
 0x9c6   :  { %v15360_v60 = vpop.eup %15359  ;;  %v6039_v39 = vadd.f32 1.0, %v15358_v0  ;;  %v14660_v0 = vld [vmem:[#allocation22 + $0xec] ss:$16 sps:$4 sm:$0xff]  }
 0x9c7   :  { %v6045_v36 = vadd.f32 1.0, %v15360_v60  ;;  %v15362_v49 = vpop.eup %15361  ;;  %v14655_v60 = vld [vmem:[#allocation22 + $0xe0] ss:$16 sps:$4 sm:$0xff]  }
 0x9c8   :  { %15365 = vrcp.f32 %v6039_v39  ;;  %v15364_v47 = vpop.eup %15363  ;;  %v6052_v27 = vadd.f32 1.0, %v15362_v49  ;;  %v14658_v39 = vld [vmem:[#allocation22 + $0xe8] ss:$16 sps:$4 sm:$0xff]   ;;  %v14666_v49 = vld [vmem:[#allocation22 + $0x10c] ss:$16 sps:$4 sm:$0xff]  }
 0x9c9   :  { %15367 = vrcp.f32 %v6045_v36  ;;  %v14663_v36 = vld [vmem:[#allocation22 + $0x104] ss:$16 sps:$4 sm:$0xff]  }
 0x9ca   :  { %15369 = vrcp.f32 %v6052_v27  ;;  %v14675_v27 = vld [vmem:[#allocation22 + $0x144] ss:$16 sps:$4 sm:$0xff]  }
 0x9d2   :  { %v15366_v16 = vpop.eup %15365 }
 0x9d3   :  { %v15368_v17 = vpop.eup %15367  ;;  %v6056_v19 = vmul.f32 %v15366_v16, %v15364_v47  ;;  %v14669_v47 = vld [vmem:[#allocation22 + $0x124] ss:$16 sps:$4 sm:$0xff]   ;;  %v14672_v16 = vld [vmem:[#allocation22 + $0x12c] ss:$16 sps:$4 sm:$0xff]  }
 0x9d4   :  { %v6055_v15 = vmul.f32 %v15368_v17, %v17758_v2  ;;  %v15370_v50 = vpop.eup %15369  ;;  %v14621_v2 = vld [vmem:[#allocation22 + $0x24] ss:$16 sps:$4 sm:$0xff]   ;;  %v14667_v17 = vld [vmem:[#allocation22 + $0x120] ss:$16 sps:$4 sm:$0xff]  }
 0x9d6   :  { %v6057_v6 = vadd.f32 %v6056_v19, %v6055_v15  ;;  %v14670_v19 = vld [vmem:[#allocation22 + $0x128] ss:$16 sps:$4 sm:$0xff]   ;;  %v14678_v15 = vld [vmem:[#allocation22 + $0x14c] ss:$16 sps:$4 sm:$0xff]  }
 0x9d8   :  { %15371 = vtanh.f32 %v6057_v6  ;;  %v14673_v6 = vld [vmem:[#allocation22 + $0x140] ss:$16 sps:$4 sm:$0xff]  }
 0x9e2   :  { %v15372_v10 = vpop.eup %15371 }
 0x9e3   :  { %v6059_v59 = vmul.f32 %v15372_v10, %v15370_v50  ;;  %v14676_v50 = vld [vmem:[#allocation22 + $0x148] ss:$16 sps:$4 sm:$0xff]   ;;  %v14681_v10 = vld [vmem:[#allocation22 + $0x164] ss:$16 sps:$4 sm:$0xff]  }
 0x9e5   :  { %v17792_v3 = vpack.c.bf16 %v17773_v14, %v6059_v59  ;;  %v17804_v14 = vpack.c.bf16 %v19585_v55, %v17681_v29  ;;  %v19586_v29 = vld [vmem:[#allocation47_spill] sm:$0xff] }
 0x9e6   :  { %v17810_v42 = vpack.c.bf16 %v19587_v13, %v19586_v29  ;;  %v14684_v59 = vld [vmem:[#allocation22 + $0x16c] ss:$16 sps:$4 sm:$0xff]   ;;  %v14705_v29 = vld [vmem:[#allocation22 + $0x1e4] ss:$16 sps:$4 sm:$0xff]  }
 0x9e7   :  { %6524 = vmatprep.mubr.bf16.mxu0 %v17792_v3  ;;  %6597 = vmatprep.mubr.bf16.mxu1 %v17792_v3  ;;  %v14696_v55 = vld [vmem:[#allocation22 + $0x1ac] ss:$16 sps:$4 sm:$0xff]  }
 0x9e8   :  { %6525 = vmatmul.mubr.bf16.vlgmr.msra.gmra.mrb[96].mxu0 %v17796_v43  ;;  %6598 = vmatmul.mubr.bf16.vlgmr.msra.gmra.mrb[96].mxu1 %v17796_v43  ;;  %v14708_v13 = vld [vmem:[#allocation22 + $0x1ec] ss:$16 sps:$4 sm:$0xff]  }
 0x9e9   :  { %7077 = vmatpush1.bf16.msra.mxu0 %v14613_v7  ;;  %7150 = vmatpush1.bf16.msra.mxu1 %v14616_v52  ;;  %v14682_v7 = vld [vmem:[#allocation22 + $0x168] ss:$16 sps:$4 sm:$0xff]   ;;  %v14687_v52 = vld [vmem:[#allocation22 + $0x184] ss:$16 sps:$4 sm:$0xff]  }
 0x9ea   :  { %6534 = vmatprep.mubr.bf16.mxu0 %v17804_v14  ;;  %6607 = vmatprep.mubr.bf16.mxu1 %v17804_v14 }
 0x9eb   :  { %7078 = vmatprep.subr.bf16.mxu0 %v14621_v2  ;;  %7151 = vmatprep.subr.bf16.mxu1 %v14624_v11  ;;  %v14688_v2 = vld [vmem:[#allocation22 + $0x188] ss:$16 sps:$4 sm:$0xff]   ;;  %v14693_v11 = vld [vmem:[#allocation22 + $0x1a4] ss:$16 sps:$4 sm:$0xff]  }
 0x9ed   :  { %7079 = vmatpush1.bf16.msra.mxu0 %v14619_v46  ;;  %7152 = vmatpush1.bf16.msra.mxu1 %v14622_v63  ;;  %v14691_v46 = vld [vmem:[#allocation22 + $0x1a0] ss:$16 sps:$4 sm:$0xff]   ;;  %v14694_v63 = vld [vmem:[#allocation22 + $0x1a8] ss:$16 sps:$4 sm:$0xff]  }
 0x9ee   :  { %7080 = vmatprep.subr.bf16.mxu0 %v14627_v58  ;;  %7153 = vmatprep.subr.bf16.mxu1 %v14630_v54  ;;  %v14699_v58 = vld [vmem:[#allocation22 + $0x1c4] ss:$16 sps:$4 sm:$0xff]   ;;  %v14702_v54 = vld [vmem:[#allocation22 + $0x1cc] ss:$16 sps:$4 sm:$0xff]  }
 0x9f0   :  { %6535 = vmatmul.mubr.bf16.gmra.mrb[100].mxu0 %v17810_v42  ;;  %6608 = vmatmul.mubr.bf16.gmra.mrb[100].mxu1 %v17810_v42 }
 0x9f1   :  { %7081 = vmatpush1.bf16.msra.mxu0 %v14625_v28  ;;  %7154 = vmatpush1.bf16.msra.mxu1 %v14628_v40  ;;  %v14697_v28 = vld [vmem:[#allocation22 + $0x1c0] ss:$16 sps:$4 sm:$0xff]   ;;  %v14700_v40 = vld [vmem:[#allocation22 + $0x1c8] ss:$16 sps:$4 sm:$0xff]  }
 0x9f2   :  { %6544 = vmatprep.mubr.bf16.mxu0 %v17816_v38  ;;  %6617 = vmatprep.mubr.bf16.mxu1 %v17816_v38 }
 0x9f3   :  { %7082 = vmatprep.subr.bf16.mxu0 %v14633_v23  ;;  %7155 = vmatprep.subr.bf16.mxu1 %v14636_v37  ;;  %v14703_v23 = vld [vmem:[#allocation22 + $0x1e0] ss:$16 sps:$4 sm:$0xff]   ;;  %v14706_v37 = vld [vmem:[#allocation22 + $0x1e8] ss:$16 sps:$4 sm:$0xff]  }
 0x9f5   :  { %7083 = vmatpush1.bf16.msra.mxu0 %v14631_v20  ;;  %7156 = vmatpush1.bf16.msra.mxu1 %v14634_v33  ;;  %v17844_v20 = vld [vmem:[#allocation19] ss:$16 sps:$4 sm:$0xff]   ;;  %v17847_v33 = vld [vmem:[#allocation19 + $0x8] ss:$16 sps:$4 sm:$0xff]  }
 0x9f6   :  { %7084 = vmatprep.subr.bf16.mxu0 %v14639_v56  ;;  %7157 = vmatprep.subr.bf16.mxu1 %v14642_v21  ;;  %v17850_v56 = vld [vmem:[#allocation19 + $0x24] ss:$16 sps:$4 sm:$0xff]   ;;  %v17852_v21 = vld [vmem:[#allocation19 + $0x2c] ss:$16 sps:$4 sm:$0xff]  }
 0x9f8   :  { %6545 = vmatmul.mubr.bf16.gmra.mrb[104].mxu0 %v17822_v31  ;;  %6618 = vmatmul.mubr.bf16.gmra.mrb[104].mxu1 %v17822_v31 }
 0x9f9   :  { %7085 = vmatpush1.bf16.msra.mxu0 %v14637_v26  ;;  %7158 = vmatpush1.bf16.msra.mxu1 %v14640_v48  ;;  %v17860_v26 = vld [vmem:[#allocation19 + $0x20] ss:$16 sps:$4 sm:$0xff]   ;;  %v17862_v48 = vld [vmem:[#allocation19 + $0x28] ss:$16 sps:$4 sm:$0xff]  }
 0x9fa   :  { %6554 = vmatprep.mubr.bf16.mxu0 %v17828_v41  ;;  %6627 = vmatprep.mubr.bf16.mxu1 %v17828_v41 }
 0x9fb   :  { %7086 = vmatprep.subr.bf16.mxu0 %v14645_v35  ;;  %7159 = vmatprep.subr.bf16.mxu1 %v14648_v24  ;;  %v17878_v35 = vld [vmem:[#allocation19 + $0x64] ss:$16 sps:$4 sm:$0xff]   ;;  %v17880_v24 = vld [vmem:[#allocation19 + $0x6c] ss:$16 sps:$4 sm:$0xff]  }
 0x9fd   :  { %7087 = vmatpush1.bf16.msra.mxu0 %v14643_v44  ;;  %7160 = vmatpush1.bf16.msra.mxu1 %v14646_v61  ;;  %v17894_v44 = vld [vmem:[#allocation19 + $0x84] ss:$16 sps:$4 sm:$0xff]   ;;  %v17896_v61 = vld [vmem:[#allocation19 + $0x8c] ss:$16 sps:$4 sm:$0xff]  }
 0x9fe   :  { %7088 = vmatprep.subr.bf16.mxu0 %v14651_v30  ;;  %7161 = vmatprep.subr.bf16.mxu1 %v14654_v5  ;;  %v17906_v30 = vld [vmem:[#allocation19 + $0xa4] ss:$16 sps:$4 sm:$0xff]   ;;  %v17908_v5 = vld [vmem:[#allocation19 + $0xac] ss:$16 sps:$4 sm:$0xff]  }
 0xa00   :  { %6555 = vmatmul.mubr.bf16.gmra.mrb[108].mxu0 %v17834_v34  ;;  %6628 = vmatmul.mubr.bf16.gmra.mrb[108].mxu1 %v17834_v34 }
 0xa01   :  { %7089 = vmatpush1.bf16.msra.mxu0 %v14649_v32  ;;  %7162 = vmatpush1.bf16.msra.mxu1 %v14652_v22  ;;  %v17916_v32 = vld [vmem:[#allocation19 + $0xa0] ss:$16 sps:$4 sm:$0xff]   ;;  %v17918_v22 = vld [vmem:[#allocation19 + $0xa8] ss:$16 sps:$4 sm:$0xff]  }
 0xa02   :  { %7108 = vmatprep.mubr.bf16.mxu0 %v17792_v3  ;;  %7181 = vmatprep.mubr.bf16.mxu1 %v17792_v3  ;;  %v14679_v3 = vld [vmem:[#allocation22 + $0x160] ss:$16 sps:$4 sm:$0xff]  }
 0xa03   :  { %7090 = vmatprep.subr.bf16.mxu0 %v14657_v12  ;;  %7163 = vmatprep.subr.bf16.mxu1 %v14660_v0  ;;  %v17922_v12 = vld [vmem:[#allocation19 + $0xc4] ss:$16 sps:$4 sm:$0xff]   ;;  %v17924_v0 = vld [vmem:[#allocation19 + $0xcc] ss:$16 sps:$4 sm:$0xff]  }
 0xa05   :  { %7091 = vmatpush1.bf16.msra.mxu0 %v14655_v60  ;;  %7164 = vmatpush1.bf16.msra.mxu1 %v14658_v39  ;;  %v17934_v60 = vld [vmem:[#allocation19 + $0xe4] ss:$16 sps:$4 sm:$0xff]   ;;  %v17936_v39 = vld [vmem:[#allocation19 + $0xec] ss:$16 sps:$4 sm:$0xff]  }
 0xa06   :  { %7092 = vmatprep.subr.bf16.mxu0 %v14663_v36  ;;  %7165 = vmatprep.subr.bf16.mxu1 %v14666_v49  ;;  %v17944_v36 = vld [vmem:[#allocation19 + $0xe0] ss:$16 sps:$4 sm:$0xff]   ;;  %v17946_v49 = vld [vmem:[#allocation19 + $0xe8] ss:$16 sps:$4 sm:$0xff]  }
 0xa09   :  { %7093 = vmatpush1.bf16.msra.mxu0 %v14661_v25  ;;  %7166 = vmatpush1.bf16.msra.mxu1 %v14664_v57  ;;  %v17950_v25 = vld [vmem:[#allocation23 + $0x4] ss:$16 sps:$4 sm:$0xff]   ;;  %v17952_v57 = vld [vmem:[#allocation23 + $0xc] ss:$16 sps:$4 sm:$0xff]  }
 0xa0a   :  { %7094 = vmatprep.subr.bf16.mxu0 %v14669_v47  ;;  %7167 = vmatprep.subr.bf16.mxu1 %v14672_v16  ;;  %v17958_v47 = vld [vmem:[#allocation23 + $0x8] ss:$16 sps:$4 sm:$0xff]   ;;  %v17962_v16 = vld [vmem:[#allocation23 + $0x24] ss:$16 sps:$4 sm:$0xff]  }
 0xa0d   :  { %7095 = vmatpush1.bf16.msra.mxu0 %v14667_v17  ;;  %7168 = vmatpush1.bf16.msra.mxu1 %v14670_v19  ;;  %v17964_v17 = vld [vmem:[#allocation23 + $0x2c] ss:$16 sps:$4 sm:$0xff]   ;;  %v17970_v19 = vld [vmem:[#allocation23 + $0x20] ss:$16 sps:$4 sm:$0xff]  }
 0xa0e   :  { %7096 = vmatprep.subr.bf16.mxu0 %v14675_v27  ;;  %7169 = vmatprep.subr.bf16.mxu1 %v14678_v15  ;;  %v17972_v27 = vld [vmem:[#allocation23 + $0x28] ss:$16 sps:$4 sm:$0xff]   ;;  %v17976_v15 = vld [vmem:[#allocation23 + $0x44] ss:$16 sps:$4 sm:$0xff]  }
 0xa11   :  { %7097 = vmatpush1.bf16.msra.mxu0 %v14673_v6  ;;  %7170 = vmatpush1.bf16.msra.mxu1 %v14676_v50  ;;  %v17978_v6 = vld [vmem:[#allocation23 + $0x4c] ss:$16 sps:$4 sm:$0xff]   ;;  %v17984_v50 = vld [vmem:[#allocation23 + $0x40] ss:$16 sps:$4 sm:$0xff]  }
 0xa12   :  { %7098 = vmatprep.subr.bf16.mxu0 %v14681_v10  ;;  %7171 = vmatprep.subr.bf16.mxu1 %v14684_v59  ;;  %v17986_v10 = vld [vmem:[#allocation23 + $0x48] ss:$16 sps:$4 sm:$0xff]   ;;  %v17990_v59 = vld [vmem:[#allocation23 + $0x64] ss:$16 sps:$4 sm:$0xff]  }
 0xa15   :  { %7099 = vmatpush1.bf16.msra.mxu0 %v14679_v3  ;;  %7172 = vmatpush1.bf16.msra.mxu1 %v14682_v7  ;;  %v17992_v3 = vld [vmem:[#allocation23 + $0x6c] ss:$16 sps:$4 sm:$0xff]   ;;  %v17996_v7 = vld [vmem:[#allocation23 + $0x60] ss:$16 sps:$4 sm:$0xff]  }
 0xa16   :  { %7100 = vmatprep.subr.bf16.mxu0 %v14687_v52  ;;  %7173 = vmatprep.subr.bf16.mxu1 %v14690_v8  ;;  %v17998_v52 = vld [vmem:[#allocation23 + $0x68] ss:$16 sps:$4 sm:$0xff]   ;;  %v18002_v8 = vld [vmem:[#allocation23 + $0x84] ss:$16 sps:$4 sm:$0xff]  }
 0xa19   :  { %7101 = vmatpush1.bf16.msra.mxu0 %v14685_v62  ;;  %7174 = vmatpush1.bf16.msra.mxu1 %v14688_v2  ;;  %v18004_v62 = vld [vmem:[#allocation23 + $0x8c] ss:$16 sps:$4 sm:$0xff]   ;;  %v18008_v2 = vld [vmem:[#allocation23 + $0x80] ss:$16 sps:$4 sm:$0xff]  }
 0xa1a   :  { %7102 = vmatprep.subr.bf16.mxu0 %v14693_v11  ;;  %7175 = vmatprep.subr.bf16.mxu1 %v14696_v55  ;;  %v18010_v11 = vld [vmem:[#allocation23 + $0x88] ss:$16 sps:$4 sm:$0xff]   ;;  %v18014_v55 = vld [vmem:[#allocation23 + $0xa4] ss:$16 sps:$4 sm:$0xff]  }
 0xa1d   :  { %7103 = vmatpush1.bf16.msra.mxu0 %v14691_v46  ;;  %7176 = vmatpush1.bf16.msra.mxu1 %v14694_v63  ;;  %v18016_v46 = vld [vmem:[#allocation23 + $0xac] ss:$16 sps:$4 sm:$0xff]   ;;  %v18020_v63 = vld [vmem:[#allocation23 + $0xa0] ss:$16 sps:$4 sm:$0xff]  }
 0xa1e   :  { %7104 = vmatprep.subr.bf16.mxu0 %v14699_v58  ;;  %7177 = vmatprep.subr.bf16.mxu1 %v14702_v54  ;;  %19594 = vst [vmem:[#allocation87_spill] sm:$0xff] %v18020_v63  ;;  %v18022_v58 = vld [vmem:[#allocation23 + $0xa8] ss:$16 sps:$4 sm:$0xff]   ;;  %v18026_v54 = vld [vmem:[#allocation23 + $0xc4] ss:$16 sps:$4 sm:$0xff]  }
 0xa21   :  { %7105 = vmatpush1.bf16.msra.mxu0 %v14697_v28  ;;  %7178 = vmatpush1.bf16.msra.mxu1 %v14700_v40  ;;  %v18028_v28 = vld [vmem:[#allocation23 + $0xcc] ss:$16 sps:$4 sm:$0xff]   ;;  %v18032_v40 = vld [vmem:[#allocation23 + $0xc0] ss:$16 sps:$4 sm:$0xff]  }
 0xa22   :  { %7106 = vmatprep.subr.bf16.mxu0 %v14705_v29  ;;  %7179 = vmatprep.subr.bf16.mxu1 %v14708_v13  ;;  %v18034_v29 = vld [vmem:[#allocation23 + $0xc8] ss:$16 sps:$4 sm:$0xff]   ;;  %v18038_v13 = vld [vmem:[#allocation23 + $0xe4] ss:$16 sps:$4 sm:$0xff]  }
 0xa25   :  { %7107 = vmatpush1.bf16.msra.mxu0 %v14703_v23  ;;  %7180 = vmatpush1.bf16.msra.mxu1 %v14706_v37  ;;  %v18040_v23 = vld [vmem:[#allocation23 + $0xec] ss:$16 sps:$4 sm:$0xff]   ;;  %v18044_v37 = vld [vmem:[#allocation23 + $0xe0] ss:$16 sps:$4 sm:$0xff]  }
 0xa26   :  { %7450 = vmatprep.subr.bf16.mxu0 %v17840_v9  ;;  %7491 = vmatprep.subr.bf16.mxu1 %v17842_v1 }
 0xa28   :  { %7109 = vmatmul.mubr.bf16.vlgmr.msra.gmra.mrb[112].mxu0 %v17796_v43  ;;  %7182 = vmatmul.mubr.bf16.vlgmr.msra.gmra.mrb[112].mxu1 %v17796_v43  ;;  %v17872_v43 = vld [vmem:[#allocation19 + $0x40] ss:$16 sps:$4 sm:$0xff]  }
 0xa29   :  { %7118 = vmatprep.mubr.bf16.mxu0 %v17804_v14  ;;  %7191 = vmatprep.mubr.bf16.mxu1 %v17804_v14  ;;  %v17874_v14 = vld [vmem:[#allocation19 + $0x48] ss:$16 sps:$4 sm:$0xff]  }
 0xa2a   :  { %7451 = vmatpush1.bf16.msra.mxu0 %v17844_v20  ;;  %7492 = vmatpush1.bf16.msra.mxu1 %v17847_v33 }
 0xa2b   :  { %7452 = vmatprep.subr.bf16.mxu0 %v17850_v56  ;;  %7493 = vmatprep.subr.bf16.mxu1 %v17852_v21 }
 0xa2e   :  { %7453 = vmatpush1.bf16.msra.mxu0 %v17860_v26  ;;  %7494 = vmatpush1.bf16.msra.mxu1 %v17862_v48 }
 0xa2f   :  { %7454 = vmatprep.subr.bf16.mxu0 %v17866_v18  ;;  %7495 = vmatprep.subr.bf16.mxu1 %v17868_v45 }
 0xa30   :  { %7119 = vmatmul.mubr.bf16.gmra.mrb[116].mxu0 %v17810_v42  ;;  %7192 = vmatmul.mubr.bf16.gmra.mrb[116].mxu1 %v17810_v42  ;;  %v17900_v42 = vld [vmem:[#allocation19 + $0x80] ss:$16 sps:$4 sm:$0xff]  }
 0xa31   :  { %7128 = vmatprep.mubr.bf16.mxu0 %v17816_v38  ;;  %7201 = vmatprep.mubr.bf16.mxu1 %v17816_v38  ;;  %v17902_v38 = vld [vmem:[#allocation19 + $0x88] ss:$16 sps:$4 sm:$0xff]  }
 0xa32   :  { %7455 = vmatpush1.bf16.msra.mxu0 %v17872_v43  ;;  %7496 = vmatpush1.bf16.msra.mxu1 %v17874_v14 }
 0xa33   :  { %7456 = vmatprep.subr.bf16.mxu0 %v17878_v35  ;;  %7497 = vmatprep.subr.bf16.mxu1 %v17880_v24 }
 0xa36   :  { %7457 = vmatpush1.bf16.msra.mxu0 %v17888_v4  ;;  %7498 = vmatpush1.bf16.msra.mxu1 %v17890_v53 }
 0xa37   :  { %7458 = vmatprep.subr.bf16.mxu0 %v17894_v44  ;;  %7499 = vmatprep.subr.bf16.mxu1 %v17896_v61 }
 0xa38   :  { %7129 = vmatmul.mubr.bf16.gmra.mrb[120].mxu0 %v17822_v31  ;;  %7202 = vmatmul.mubr.bf16.gmra.mrb[120].mxu1 %v17822_v31  ;;  %v17928_v31 = vld [vmem:[#allocation19 + $0xc0] ss:$16 sps:$4 sm:$0xff]  }
 0xa39   :  { %7138 = vmatprep.mubr.bf16.mxu0 %v17828_v41  ;;  %7211 = vmatprep.mubr.bf16.mxu1 %v17828_v41  ;;  %v17930_v41 = vld [vmem:[#allocation19 + $0xc8] ss:$16 sps:$4 sm:$0xff]  }
 0xa3a   :  { %7459 = vmatpush1.bf16.msra.mxu0 %v17900_v42  ;;  %7500 = vmatpush1.bf16.msra.mxu1 %v17902_v38 }
 0xa3b   :  { %7460 = vmatprep.subr.bf16.mxu0 %v17906_v30  ;;  %7501 = vmatprep.subr.bf16.mxu1 %v17908_v5 }
 0xa3e   :  { %7461 = vmatpush1.bf16.msra.mxu0 %v17916_v32  ;;  %7502 = vmatpush1.bf16.msra.mxu1 %v17918_v22 }
 0xa3f   :  { %7462 = vmatprep.subr.bf16.mxu0 %v17922_v12  ;;  %7503 = vmatprep.subr.bf16.mxu1 %v17924_v0 }
 0xa40   :  { %7139 = vmatmul.mubr.bf16.gmra.mrb[124].mxu0 %v17834_v34  ;;  %7212 = vmatmul.mubr.bf16.gmra.mrb[124].mxu1 %v17834_v34  ;;  %v17956_v34 = vld [vmem:[#allocation23] ss:$16 sps:$4 sm:$0xff]  }
 0xa41   :  { %7482 = vmatprep.mubr.bf16.mxu0 %v19480_v51  ;;  %7523 = vmatprep.mubr.bf16.mxu1 %v19480_v51 }
 0xa42   :  { %7463 = vmatpush1.bf16.msra.mxu0 %v17928_v31  ;;  %7504 = vmatpush1.bf16.msra.mxu1 %v17930_v41 }
 0xa43   :  { %7464 = vmatprep.subr.bf16.mxu0 %v17934_v60  ;;  %7505 = vmatprep.subr.bf16.mxu1 %v17936_v39 }
 0xa46   :  { %7465 = vmatpush1.bf16.msra.mxu0 %v17944_v36  ;;  %7506 = vmatpush1.bf16.msra.mxu1 %v17946_v49 }
 0xa47   :  { %7732 = vmatprep.subr.bf16.mxu0 %v17950_v25  ;;  %7773 = vmatprep.subr.bf16.mxu1 %v17952_v57 }
 0xa49   :  { %7483 = vmatmul.mubr.bf16.vlgmr.msra.gmra.mrb[128].mxu0 %v19480_v51  ;;  %7524 = vmatmul.mubr.bf16.vlgmr.msra.gmra.mrb[128].mxu1 %v19480_v51 }
 0xa4a   :  { %7733 = vmatpush1.bf16.msra.mxu0 %v17956_v34  ;;  %7774 = vmatpush1.bf16.msra.mxu1 %v17958_v47 }
 0xa4b   :  { %7734 = vmatprep.subr.bf16.mxu0 %v17962_v16  ;;  %7775 = vmatprep.subr.bf16.mxu1 %v17964_v17 }
 0xa4c   :  { %7764 = vmatprep.mubr.bf16.mxu0 %v19480_v51  ;;  %7805 = vmatprep.mubr.bf16.mxu1 %v19480_v51 }
 0xa4e   :  { %7735 = vmatpush1.bf16.msra.mxu0 %v17970_v19  ;;  %7776 = vmatpush1.bf16.msra.mxu1 %v17972_v27 }
 0xa4f   :  { %7736 = vmatprep.subr.bf16.mxu0 %v17976_v15  ;;  %7777 = vmatprep.subr.bf16.mxu1 %v17978_v6 }
 0xa52   :  { %7737 = vmatpush1.bf16.msra.mxu0 %v17984_v50  ;;  %7778 = vmatpush1.bf16.msra.mxu1 %v17986_v10 }
 0xa53   :  { %7738 = vmatprep.subr.bf16.mxu0 %v17990_v59  ;;  %7779 = vmatprep.subr.bf16.mxu1 %v17992_v3 }
 0xa56   :  { %7739 = vmatpush1.bf16.msra.mxu0 %v17996_v7  ;;  %7780 = vmatpush1.bf16.msra.mxu1 %v17998_v52 }
 0xa57   :  { %7740 = vmatprep.subr.bf16.mxu0 %v18002_v8  ;;  %7781 = vmatprep.subr.bf16.mxu1 %v18004_v62 }
 0xa5a   :  { %7741 = vmatpush1.bf16.msra.mxu0 %v18008_v2  ;;  %7782 = vmatpush1.bf16.msra.mxu1 %v18010_v11 }
 0xa5b   :  { %7742 = vmatprep.subr.bf16.mxu0 %v18014_v55  ;;  %7783 = vmatprep.subr.bf16.mxu1 %v18016_v46 }
 0xa5e   :  { %7743 = vmatpush1.bf16.msra.mxu0 %v18020_v63  ;;  %7784 = vmatpush1.bf16.msra.mxu1 %v18022_v58  ;;  %v18046_v63 = vld [vmem:[#allocation23 + $0xe8] ss:$16 sps:$4 sm:$0xff]  }
 0xa5f   :  { %7744 = vmatprep.subr.bf16.mxu0 %v18026_v54  ;;  %7785 = vmatprep.subr.bf16.mxu1 %v18028_v28 }
 0xa62   :  { %7745 = vmatpush1.bf16.msra.mxu0 %v18032_v40  ;;  %7786 = vmatpush1.bf16.msra.mxu1 %v18034_v29 }
 0xa63   :  { %7746 = vmatprep.subr.bf16.mxu0 %v18038_v13  ;;  %7787 = vmatprep.subr.bf16.mxu1 %v18040_v23 }
 0xa66   :  { %7747 = vmatpush1.bf16.msra.mxu0 %v18044_v37  ;;  %7788 = vmatpush1.bf16.msra.mxu1 %v18046_v63 }
 0xa67   :  { %8065 = vmatprep.subr.bf16.mxu0 %v17840_v9  ;;  %8106 = vmatprep.subr.bf16.mxu1 %v17842_v1  ;;  %v6150_v9 = vld [vmem:[#allocation20] sm:$0xf] }
 0xa69   :  { %7765 = vmatmul.mubr.bf16.vlgmr.msra.gmra.mrb[132].mxu0 %v19480_v51  ;;  %7806 = vmatmul.mubr.bf16.vlgmr.msra.gmra.mrb[132].mxu1 %v19480_v51 }
 0xa6a   :  { %8066 = vmatpush1.bf16.msra.mxu0 %v17844_v20  ;;  %8107 = vmatpush1.bf16.msra.mxu1 %v17847_v33  ;;  %v19595_v33 = vld [vmem:[#allocation43_spill] sm:$0xff] }
 0xa6b   :  { %8067 = vmatprep.subr.bf16.mxu0 %v17850_v56  ;;  %8108 = vmatprep.subr.bf16.mxu1 %v17852_v21  ;;  %v18095_v56 = vrot.slane %v6150_v9, %v19595_v33  ;;  %v19596_v21 = vld [vmem:[#allocation44_spill] sm:$0xff] }
 0xa6c   :  { %8097 = vmatprep.mubr.bf16.mxu0 %v19480_v51  ;;  %8138 = vmatprep.mubr.bf16.mxu1 %v19480_v51 }
 0xa6e   :  { %8068 = vmatpush1.bf16.msra.mxu0 %v17860_v26  ;;  %8109 = vmatpush1.bf16.msra.mxu1 %v17862_v48  ;;  %v18098_v26 = vrot.slane %v6150_v9, %v19596_v21 }
 0xa6f   :  { %8069 = vmatprep.subr.bf16.mxu0 %v17866_v18  ;;  %8110 = vmatprep.subr.bf16.mxu1 %v17868_v45  ;;  %v19597_v45 = vld [vmem:[#allocation46_spill] sm:$0xff] }
 0xa72   :  { %8070 = vmatpush1.bf16.msra.mxu0 %v17872_v43  ;;  %8111 = vmatpush1.bf16.msra.mxu1 %v17874_v14  ;;  %v18105_v43 = vrot.slane %v6150_v9, %v19597_v45  ;;  %v19598_v14 = vld [vmem:[#allocation45_spill] sm:$0xff] }
 0xa73   :  { %8071 = vmatprep.subr.bf16.mxu0 %v17878_v35  ;;  %8112 = vmatprep.subr.bf16.mxu1 %v17880_v24  ;;  %v18108_v35 = vrot.slane %v6150_v9, %v19598_v14 }
 0xa76   :  { %8072 = vmatpush1.bf16.msra.mxu0 %v17888_v4  ;;  %8113 = vmatpush1.bf16.msra.mxu1 %v17890_v53 }
 0xa77   :  { %8073 = vmatprep.subr.bf16.mxu0 %v17894_v44  ;;  %8114 = vmatprep.subr.bf16.mxu1 %v17896_v61 }
 0xa7a   :  { %8074 = vmatpush1.bf16.msra.mxu0 %v17900_v42  ;;  %8115 = vmatpush1.bf16.msra.mxu1 %v17902_v38 }
 0xa7b   :  { %8075 = vmatprep.subr.bf16.mxu0 %v17906_v30  ;;  %8116 = vmatprep.subr.bf16.mxu1 %v17908_v5 }
 0xa7e   :  { %8076 = vmatpush1.bf16.msra.mxu0 %v17916_v32  ;;  %8117 = vmatpush1.bf16.msra.mxu1 %v17918_v22 }
 0xa7f   :  { %8077 = vmatprep.subr.bf16.mxu0 %v17922_v12  ;;  %8118 = vmatprep.subr.bf16.mxu1 %v17924_v0 }
 0xa82   :  { %8078 = vmatpush1.bf16.msra.mxu0 %v17928_v31  ;;  %8119 = vmatpush1.bf16.msra.mxu1 %v17930_v41 }
 0xa83   :  { %8079 = vmatprep.subr.bf16.mxu0 %v17934_v60  ;;  %8120 = vmatprep.subr.bf16.mxu1 %v17936_v39 }
 0xa86   :  { %8080 = vmatpush1.bf16.msra.mxu0 %v17944_v36  ;;  %8121 = vmatpush1.bf16.msra.mxu1 %v17946_v49 }
 0xa87   :  { %8348 = vmatprep.subr.bf16.mxu0 %v17950_v25  ;;  %8389 = vmatprep.subr.bf16.mxu1 %v17952_v57 }
 0xabb   :  { %v18090_v1 = vpop.f32.mrb[96].mxu0  ;;  %v18092_v20 = vpop.f32.mrb[96].mxu1 }
 0xabc   :  { %v18100_v48 = vpop.f32.mrb[97].mxu0  ;;  %v18102_v18 = vpop.f32.mrb[97].mxu1 }
 0xabd   :  { %v6530_v24 = vpop.f32.mrb[98].mxu0  ;;  %v6603_v4 = vpop.f32.mrb[98].mxu1 }
 0xabe   :  { %v18111_v53 = vadd.f32 %v6530_v24, %v18095_v56  ;;  %v18114_v44 = vadd.f32 %v6603_v4, %v18098_v26  ;;  %v6532_v61 = vpop.f32.mrb[99].mxu0  ;;  %v6605_v42 = vpop.f32.mrb[99].mxu1 }
 0xabf   :  { %v18117_v38 = vadd.f32 %v6532_v61, %v18105_v43  ;;  %v18120_v30 = vadd.f32 %v6605_v42, %v18108_v35 }
 0xac1   :  { %19599 = vst [vmem:[#allocation88_spill] sm:$0xff] %v18120_v30 }
 0xac3   :  { %v6536_v5 = vpop.f32.mrb[100].mxu0  ;;  %v6609_v32 = vpop.f32.mrb[100].mxu1 }
 0xac4   :  { %v18123_v22 = vadd.f32 %v6536_v5, %v18095_v56  ;;  %v18126_v12 = vadd.f32 %v6609_v32, %v18098_v26  ;;  %v6538_v0 = vpop.f32.mrb[101].mxu0  ;;  %v6611_v31 = vpop.f32.mrb[101].mxu1 }
 0xac5   :  { %v18129_v41 = vadd.f32 %v6538_v0, %v18105_v43  ;;  %v18132_v60 = vadd.f32 %v6611_v31, %v18108_v35  ;;  %v6540_v39 = vpop.f32.mrb[102].mxu0  ;;  %v6613_v36 = vpop.f32.mrb[102].mxu1 }
 0xac6   :  { %19600 = vst [vmem:[#allocation53_spill] sm:$0xff] %v18123_v22  ;;  %19601 = vst [vmem:[#allocation54_spill] sm:$0xff] %v18126_v12  ;;  %v18135_v49 = vadd.f32 %v6540_v39, %v18095_v56  ;;  %v18138_v25 = vadd.f32 %v6613_v36, %v18098_v26  ;;  %v6542_v57 = vpop.f32.mrb[103].mxu0  ;;  %v6615_v9 = vpop.f32.mrb[103].mxu1 }
 0xac7   :  { %19602 = vst [vmem:[#allocation55_spill] sm:$0xff] %v18129_v41  ;;  %19603 = vst [vmem:[#allocation56_spill] sm:$0xff] %v18132_v60  ;;  %v18141_v24 = vadd.f32 %v6542_v57, %v18105_v43  ;;  %v18144_v4 = vadd.f32 %v6615_v9, %v18108_v35 }
 0xac8   :  { %19604 = vst [vmem:[#allocation81_spill] sm:$0xff] %v18135_v49  ;;  %19605 = vst [vmem:[#allocation82_spill] sm:$0xff] %v18138_v25 }
 0xac9   :  { %19606 = vst [vmem:[#allocation83_spill] sm:$0xff] %v18141_v24  ;;  %19607 = vst [vmem:[#allocation84_spill] sm:$0xff] %v18144_v4 }
 0xacb   :  { %v6546_v61 = vpop.f32.mrb[104].mxu0  ;;  %v6619_v42 = vpop.f32.mrb[104].mxu1 }
 0xacc   :  { %v18147_v5 = vadd.f32 %v6546_v61, %v18095_v56  ;;  %v18150_v32 = vadd.f32 %v6619_v42, %v18098_v26  ;;  %v6548_v0 = vpop.f32.mrb[105].mxu0  ;;  %v6621_v31 = vpop.f32.mrb[105].mxu1 }
 0xacd   :  { %v18153_v39 = vadd.f32 %v6548_v0, %v18105_v43  ;;  %v18156_v36 = vadd.f32 %v6621_v31, %v18108_v35  ;;  %v6550_v57 = vpop.f32.mrb[106].mxu0  ;;  %v6623_v24 = vpop.f32.mrb[106].mxu1 }
 0xace   :  { %19608 = vst [vmem:[#allocation90_spill] sm:$0xff] %v18147_v5  ;;  %19609 = vst [vmem:[#allocation91_spill] sm:$0xff] %v18150_v32  ;;  %v18159_v9 = vadd.f32 %v6550_v57, %v18095_v56  ;;  %v18162_v4 = vadd.f32 %v6623_v24, %v18098_v26  ;;  %v6552_v61 = vpop.f32.mrb[107].mxu0  ;;  %v6625_v5 = vpop.f32.mrb[107].mxu1 }
 0xacf   :  { %19610 = vst [vmem:[#allocation92_spill] sm:$0xff] %v18153_v39  ;;  %19611 = vst [vmem:[#allocation96_spill] sm:$0xff] %v18156_v36  ;;  %v18165_v42 = vadd.f32 %v6552_v61, %v18105_v43  ;;  %v18168_v32 = vadd.f32 %v6625_v5, %v18108_v35 }
 0xad0   :  { %19612 = vst [vmem:[#allocation97_spill] sm:$0xff] %v18159_v9  ;;  %19613 = vst [vmem:[#allocation98_spill] sm:$0xff] %v18162_v4 }
 0xad1   :  { %19614 = vst [vmem:[#allocation99_spill] sm:$0xff] %v18165_v42  ;;  %19615 = vst [vmem:[#allocation57_spill] sm:$0xff] %v18168_v32 }
 0xad3   :  { %v6556_v0 = vpop.f32.mrb[108].mxu0  ;;  %v6629_v39 = vpop.f32.mrb[108].mxu1 }
 0xad4   :  { %v18171_v31 = vadd.f32 %v6556_v0, %v18095_v56  ;;  %v18174_v36 = vadd.f32 %v6629_v39, %v18098_v26  ;;  %v6558_v57 = vpop.f32.mrb[109].mxu0  ;;  %v6631_v9 = vpop.f32.mrb[109].mxu1 }
 0xad5   :  { %v18177_v24 = vadd.f32 %v6558_v57, %v18105_v43  ;;  %v18180_v4 = vadd.f32 %v6631_v9, %v18108_v35  ;;  %v6560_v61 = vpop.f32.mrb[110].mxu0  ;;  %v6633_v42 = vpop.f32.mrb[110].mxu1  ;;  %v6734_v57 = vld [vmem:[#allocation25] sm:$0xf] }
 0xad6   :  { %19616 = vst [vmem:[#allocation58_spill] sm:$0xff] %v18171_v31  ;;  %19617 = vst [vmem:[#allocation59_spill] sm:$0xff] %v18174_v36  ;;  %v18183_v5 = vadd.f32 %v6560_v61, %v18095_v56  ;;  %v18186_v32 = vadd.f32 %v6633_v42, %v18098_v26  ;;  %v6562_v0 = vpop.f32.mrb[111].mxu0  ;;  %v6635_v31 = vpop.f32.mrb[111].mxu1  ;;  %v18195_v9 = vrot.slane %v6734_v57, %v19595_v33 }
 0xad7   :  { %19618 = vst [vmem:[#allocation60_spill] sm:$0xff] %v18177_v24  ;;  %19619 = vst [vmem:[#allocation77_spill] sm:$0xff] %v18180_v4  ;;  %v18189_v39 = vadd.f32 %v6562_v0, %v18105_v43  ;;  %v18192_v36 = vadd.f32 %v6635_v31, %v18108_v35  ;;  %v18198_v4 = vrot.slane %v6734_v57, %v19596_v21 }
 0xad8   :  { %19620 = vst [vmem:[#allocation78_spill] sm:$0xff] %v18183_v5  ;;  %19621 = vst [vmem:[#allocation79_spill] sm:$0xff] %v18186_v32  ;;  %v18201_v61 = vrot.slane %v6734_v57, %v19597_v45  ;;  %v18204_v42 = vrot.slane %v6734_v57, %v19598_v14 }
 0xad9   :  { %19622 = vst [vmem:[#allocation80_spill] sm:$0xff] %v18189_v39  ;;  %19623 = vst [vmem:[#allocation61_spill] sm:$0xff] %v18192_v36 }
 0xafb   :  { %v7110_v32 = vpop.f32.mrb[112].mxu0  ;;  %v7183_v5 = vpop.f32.mrb[112].mxu1 }
 0xafc   :  { %v18207_v0 = vadd.f32 %v7110_v32, %v18195_v9  ;;  %v18210_v31 = vadd.f32 %v7183_v5, %v18198_v4  ;;  %v7112_v36 = vpop.f32.mrb[113].mxu0  ;;  %v7185_v33 = vpop.f32.mrb[113].mxu1 }
 0xafd   :  { %v18213_v39 = vadd.f32 %v7112_v36, %v18201_v61  ;;  %v18216_v21 = vadd.f32 %v7185_v33, %v18204_v42  ;;  %v7114_v45 = vpop.f32.mrb[114].mxu0  ;;  %v7187_v24 = vpop.f32.mrb[114].mxu1 }
 0xafe   :  { %19624 = vst [vmem:[#allocation62_spill] sm:$0xff] %v18207_v0  ;;  %19625 = vst [vmem:[#allocation63_spill] sm:$0xff] %v18210_v31  ;;  %v18219_v14 = vadd.f32 %v7114_v45, %v18195_v9  ;;  %v18222_v57 = vadd.f32 %v7187_v24, %v18198_v4  ;;  %v7116_v32 = vpop.f32.mrb[115].mxu0  ;;  %v7189_v0 = vpop.f32.mrb[115].mxu1 }
 0xaff   :  { %19626 = vst [vmem:[#allocation64_spill] sm:$0xff] %v18213_v39  ;;  %19627 = vst [vmem:[#allocation73_spill] sm:$0xff] %v18216_v21  ;;  %v18225_v5 = vadd.f32 %v7116_v32, %v18201_v61  ;;  %v18228_v31 = vadd.f32 %v7189_v0, %v18204_v42 }
 0xb00   :  { %19628 = vst [vmem:[#allocation74_spill] sm:$0xff] %v18219_v14  ;;  %19629 = vst [vmem:[#allocation75_spill] sm:$0xff] %v18222_v57 }
 0xb01   :  { %19630 = vst [vmem:[#allocation76_spill] sm:$0xff] %v18225_v5  ;;  %19631 = vst [vmem:[#allocation104_spill] sm:$0xff] %v18228_v31 }
 0xb03   :  { %v7120_v36 = vpop.f32.mrb[116].mxu0  ;;  %v7193_v39 = vpop.f32.mrb[116].mxu1 }
 0xb04   :  { %v18231_v33 = vadd.f32 %v7120_v36, %v18195_v9  ;;  %v18234_v21 = vadd.f32 %v7193_v39, %v18198_v4  ;;  %v7122_v45 = vpop.f32.mrb[117].mxu0  ;;  %v7195_v14 = vpop.f32.mrb[117].mxu1 }
 0xb05   :  { %v18237_v24 = vadd.f32 %v7122_v45, %v18201_v61  ;;  %v18240_v57 = vadd.f32 %v7195_v14, %v18204_v42  ;;  %v7124_v32 = vpop.f32.mrb[118].mxu0  ;;  %v7197_v5 = vpop.f32.mrb[118].mxu1 }
 0xb06   :  { %19632 = vst [vmem:[#allocation49_spill] sm:$0xff] %v18231_v33  ;;  %19633 = vst [vmem:[#allocation50_spill] sm:$0xff] %v18234_v21  ;;  %v18243_v0 = vadd.f32 %v7124_v32, %v18195_v9  ;;  %v18246_v31 = vadd.f32 %v7197_v5, %v18198_v4  ;;  %v7126_v36 = vpop.f32.mrb[119].mxu0  ;;  %v7199_v33 = vpop.f32.mrb[119].mxu1 }
 0xb07   :  { %19634 = vst [vmem:[#allocation51_spill] sm:$0xff] %v18237_v24  ;;  %19635 = vst [vmem:[#allocation52_spill] sm:$0xff] %v18240_v57  ;;  %v18249_v39 = vadd.f32 %v7126_v36, %v18201_v61  ;;  %v18252_v21 = vadd.f32 %v7199_v33, %v18204_v42 }
 0xb08   :  { %19636 = vst [vmem:[#allocation85_spill] sm:$0xff] %v18243_v0  ;;  %19637 = vst [vmem:[#allocation86_spill] sm:$0xff] %v18246_v31 }
 0xb09   :  { %19638 = vst [vmem:[#allocation65_spill] sm:$0xff] %v18249_v39  ;;  %19639 = vst [vmem:[#allocation66_spill] sm:$0xff] %v18252_v21 }
 0xb0b   :  { %v7130_v45 = vpop.f32.mrb[120].mxu0  ;;  %v7203_v24 = vpop.f32.mrb[120].mxu1 }
 0xb0c   :  { %v18255_v14 = vadd.f32 %v7130_v45, %v18195_v9  ;;  %v18258_v57 = vadd.f32 %v7203_v24, %v18198_v4  ;;  %v7132_v32 = vpop.f32.mrb[121].mxu0  ;;  %v7205_v0 = vpop.f32.mrb[121].mxu1 }
 0xb0d   :  { %v18261_v5 = vadd.f32 %v7132_v32, %v18201_v61  ;;  %v18264_v31 = vadd.f32 %v7205_v0, %v18204_v42  ;;  %v7134_v36 = vpop.f32.mrb[122].mxu0  ;;  %v7207_v39 = vpop.f32.mrb[122].mxu1 }
 0xb0e   :  { %19640 = vst [vmem:[#allocation67_spill] sm:$0xff] %v18255_v14  ;;  %19641 = vst [vmem:[#allocation68_spill] sm:$0xff] %v18258_v57  ;;  %v18267_v33 = vadd.f32 %v7134_v36, %v18195_v9  ;;  %v18270_v21 = vadd.f32 %v7207_v39, %v18198_v4  ;;  %v7136_v45 = vpop.f32.mrb[123].mxu0  ;;  %v7209_v14 = vpop.f32.mrb[123].mxu1 }
 0xb0f   :  { %19642 = vst [vmem:[#allocation69_spill] sm:$0xff] %v18261_v5  ;;  %19643 = vst [vmem:[#allocation70_spill] sm:$0xff] %v18264_v31  ;;  %v18273_v24 = vadd.f32 %v7136_v45, %v18201_v61  ;;  %v18276_v57 = vadd.f32 %v7209_v14, %v18204_v42 }
 0xb10   :  { %19644 = vst [vmem:[#allocation71_spill] sm:$0xff] %v18267_v33  ;;  %19645 = vst [vmem:[#allocation72_spill] sm:$0xff] %v18270_v21  ;;  %v6527_v21 = vadd.f32 %v18090_v1, %v18095_v56 }
 0xb11   :  { %19646 = vst [vmem:[#allocation93_spill] sm:$0xff] %v18273_v24  ;;  %19647 = vst [vmem:[#allocation95_spill] sm:$0xff] %v18276_v57 }
 0xb13   :  { %v7140_v32 = vpop.f32.mrb[124].mxu0  ;;  %v7213_v5 = vpop.f32.mrb[124].mxu1 }
 0xb14   :  { %v18279_v0 = vadd.f32 %v7140_v32, %v18195_v9  ;;  %v18282_v31 = vadd.f32 %v7213_v5, %v18198_v4  ;;  %v7142_v36 = vpop.f32.mrb[125].mxu0  ;;  %v7215_v25 = vpop.f32.mrb[125].mxu1  ;;  %v6600_v32 = vadd.f32 %v18092_v20, %v18098_v26  ;;  %v6529_v5 = vadd.f32 %v18100_v48, %v18105_v43 }
 0xb15   :  { %v18285_v39 = vadd.f32 %v7142_v36, %v18201_v61  ;;  %v18288_v49 = vadd.f32 %v7215_v25, %v18204_v42  ;;  %v7144_v45 = vpop.f32.mrb[126].mxu0  ;;  %v7217_v24 = vpop.f32.mrb[126].mxu1  ;;  %v6602_v36 = vadd.f32 %v18102_v18, %v18108_v35 }
 0xb16   :  { %19648 = vst [vmem:[#allocation102_spill] sm:$0xff] %v18279_v0  ;;  %19649 = vst [vmem:[#allocation47_spill] sm:$0xff] %v18282_v31  ;;  %v7146_v14 = vpop.f32.mrb[127].mxu0  ;;  %v7219_v57 = vpop.f32.mrb[127].mxu1 }
 0xb17   :  { %19650 = vst [vmem:[#allocation89_spill] sm:$0xff] %v18285_v39  ;;  %19651 = vst [vmem:[#allocation100_spill] sm:$0xff] %v18288_v49 }
 0xb1c   :  { %v7484_v33 = vpop.f32.mrb[128].mxu0  ;;  %v7525_v60 = vpop.f32.mrb[128].mxu1 }
 0xb1d   :  { %v7532_v25 = vadd.f32 %v7484_v33, %v6527_v21  ;;  %v7534_v41 = vadd.f32 %v7525_v60, %v6600_v32  ;;  %v7486_v12 = vpop.f32.mrb[129].mxu0  ;;  %v7527_v22 = vpop.f32.mrb[129].mxu1  ;;  %v7220_v32 = vadd.f32 %v7219_v57, %v18204_v42 }
 0xb1e   :  { %v7533_v49 = vadd.f32 %v7486_v12, %v6529_v5  ;;  %v7535_v39 = vadd.f32 %v7527_v22, %v6602_v36  ;;  %v7488_v31 = vpop.f32.mrb[130].mxu0  ;;  %v7529_v0 = vpop.f32.mrb[130].mxu1 }
 0xb1f   :  { %v13414_v1 = vmul.f32 -1.442695, %v7532_v25  ;;  %v7489_v56 = vpop.f32.mrb[131].mxu0  ;;  %v7530_v30 = vpop.f32.mrb[131].mxu1 }
 0xb20   :  { %v13415_v20 = vmul.f32 -1.442695, %v7533_v49  ;;  %v13416_v26 = vmul.f32 -1.442695, %v7535_v39  ;;  %v7145_v30 = vadd.f32 %v7144_v45, %v18195_v9  ;;  %v7218_v49 = vadd.f32 %v7217_v24, %v18198_v4 }
 0xb21   :  { %15373 = vpow2.f32 %v13414_v1  ;;  %v7147_v39 = vadd.f32 %v7146_v14, %v18201_v61 }
 0xb22   :  { %15375 = vpow2.f32 %v13415_v20 }
 0xb23   :  { %15377 = vpow2.f32 %v13416_v26 }
 0xb24   :  { %15379 = vtanh.f32 %v7534_v41 }
 0xb2b   :  { %v15374_v48 = vpop.eup %15373 }
 0xb2c   :  { %v15376_v43 = vpop.eup %15375  ;;  %v7821_v18 = vadd.f32 1.0, %v15374_v48 }
 0xb2d   :  { %v7827_v35 = vadd.f32 1.0, %v15376_v43  ;;  %v15378_v60 = vpop.eup %15377 }
 0xb2e   :  { %15381 = vrcp.f32 %v7821_v18  ;;  %v15380_v12 = vpop.eup %15379  ;;  %v7834_v33 = vadd.f32 1.0, %v15378_v60 }
 0xb2f   :  { %15383 = vrcp.f32 %v7827_v35 }
 0xb30   :  { %15385 = vrcp.f32 %v7834_v33 }
 0xb38   :  { %v15382_v22 = vpop.eup %15381 }
 0xb39   :  { %v15384_v31 = vpop.eup %15383  ;;  %v7838_v21 = vmul.f32 %v15382_v22, %v15380_v12 }
 0xb3a   :  { %v7837_v0 = vmul.f32 0.0, %v15384_v31  ;;  %v15386_v42 = vpop.eup %15385 }
 0xb3c   :  { %v18302_v5 = vadd.f32 %v7838_v21, %v7837_v0  ;;  %v7766_v41 = vpop.f32.mrb[132].mxu0  ;;  %v7807_v36 = vpop.f32.mrb[132].mxu1  ;;  %v18402_v0 = vld [vmem:[#allocation19 + $0x80] ss:$16 sps:$4 sm:$0xff]  }
 0xb3d   :  { %v7814_v25 = vadd.f32 %v7766_v41, %v7145_v30  ;;  %v7816_v1 = vadd.f32 %v7807_v36, %v7218_v49  ;;  %v7768_v56 = vpop.f32.mrb[133].mxu0  ;;  %v7809_v20 = vpop.f32.mrb[133].mxu1  ;;  %v18404_v30 = vld [vmem:[#allocation19 + $0x88] ss:$16 sps:$4 sm:$0xff]   ;;  %v18410_v49 = vld [vmem:[#allocation19 + $0xa4] ss:$16 sps:$4 sm:$0xff]  }
 0xb3e   :  { %15387 = vtanh.f32 %v18302_v5  ;;  %v7815_v26 = vadd.f32 %v7768_v56, %v7147_v39  ;;  %v7817_v48 = vadd.f32 %v7809_v20, %v7220_v32  ;;  %v7770_v9 = vpop.f32.mrb[134].mxu0  ;;  %v7811_v45 = vpop.f32.mrb[134].mxu1  ;;  %v18412_v39 = vld [vmem:[#allocation19 + $0xac] ss:$16 sps:$4 sm:$0xff]   ;;  %v18414_v32 = vld [vmem:[#allocation19 + $0xa0] ss:$16 sps:$4 sm:$0xff]  }
 0xb3f   :  { %v13417_v4 = vmul.f32 -1.442695, %v7814_v25  ;;  %v7771_v24 = vpop.f32.mrb[135].mxu0  ;;  %v7812_v61 = vpop.f32.mrb[135].mxu1  ;;  %v18416_v41 = vld [vmem:[#allocation19 + $0xa8] ss:$16 sps:$4 sm:$0xff]  }
 0xb40   :  { %v13418_v14 = vmul.f32 -1.442695, %v7815_v26  ;;  %v13419_v43 = vmul.f32 -1.442695, %v7817_v48  ;;  %v18422_v36 = vld [vmem:[#allocation19 + $0xc4] ss:$16 sps:$4 sm:$0xff]  }
 0xb41   :  { %15389 = vpow2.f32 %v13417_v4  ;;  %v18424_v25 = vld [vmem:[#allocation19 + $0xcc] ss:$16 sps:$4 sm:$0xff]   ;;  %v18428_v56 = vld [vmem:[#allocation19 + $0xc8] ss:$16 sps:$4 sm:$0xff]   ;;  %v18434_v20 = vld [vmem:[#allocation19 + $0xe4] ss:$16 sps:$4 sm:$0xff]  }
 0xb42   :  { %15391 = vpow2.f32 %v13418_v14  ;;  %v18436_v26 = vld [vmem:[#allocation19 + $0xec] ss:$16 sps:$4 sm:$0xff]   ;;  %v18438_v48 = vld [vmem:[#allocation19 + $0xe0] ss:$16 sps:$4 sm:$0xff]   ;;  %v18440_v9 = vld [vmem:[#allocation19 + $0xe8] ss:$16 sps:$4 sm:$0xff]  }
 0xb43   :  { %15393 = vpow2.f32 %v13419_v43  ;;  %v18446_v45 = vld [vmem:[#allocation23 + $0x4] ss:$16 sps:$4 sm:$0xff]   ;;  %v18448_v4 = vld [vmem:[#allocation23 + $0xc] ss:$16 sps:$4 sm:$0xff]  }
 0xb44   :  { %15395 = vtanh.f32 %v7816_v1  ;;  %v18426_v1 = vld [vmem:[#allocation19 + $0xc0] ss:$16 sps:$4 sm:$0xff]  }
 0xb48   :  { %v15388_v57 = vpop.eup %15387 }
 0xb49   :  { %v18305_v18 = vmul.f32 %v15388_v57, %v15386_v42 }
 0xb4b   :  { %19652 = vst [vmem:[#allocation48_spill] sm:$0xff] %v18305_v18  ;;  %v15390_v35 = vpop.eup %15389  ;;  %v7872_v60 = vpack.c.bf16 %v18305_v18, %v18305_v18  ;;  %v18525_v18 = vld [vmem:[#allocation23 + $0xac] ss:$16 sps:$4 sm:$0xff]  }
 0xb4c   :  { %v15392_v12 = vpop.eup %15391  ;;  %v7845_v22 = vadd.f32 1.0, %v15390_v35  ;;  %19663 = vst [vmem:[#allocation43_spill] sm:$0xff] %v18525_v18 }
 0xb4d   :  { %v7851_v31 = vadd.f32 1.0, %v15392_v12  ;;  %8098 = vmatmul.mubr.bf16.vlgmr.msra.gmra.mrb[136].mxu0 %v7872_v60  ;;  %8139 = vmatmul.mubr.bf16.vlgmr.msra.gmra.mrb[136].mxu1 %v7872_v60  ;;  %v19655_v60 = vld [vmem:[#allocation88_spill] sm:$0xff] }
 0xb4e   :  { %15397 = vrcp.f32 %v7845_v22  ;;  %8349 = vmatpush1.bf16.msra.mxu0 %v17956_v34  ;;  %8390 = vmatpush1.bf16.msra.mxu1 %v17958_v47  ;;  %v15394_v34 = vpop.eup %15393 }
 0xb4f   :  { %15399 = vrcp.f32 %v7851_v31  ;;  %8350 = vmatprep.subr.bf16.mxu0 %v17962_v16  ;;  %8391 = vmatprep.subr.bf16.mxu1 %v17964_v17  ;;  %v15396_v47 = vpop.eup %15395 }
 0xb50   :  { %8380 = vmatprep.mubr.bf16.mxu0 %v19480_v51  ;;  %8421 = vmatprep.mubr.bf16.mxu1 %v19480_v51 }
 0xb52   :  { %8351 = vmatpush1.bf16.msra.mxu0 %v17970_v19  ;;  %8392 = vmatpush1.bf16.msra.mxu1 %v17972_v27  ;;  %v7858_v19 = vadd.f32 1.0, %v15394_v34 }
 0xb53   :  { %8352 = vmatprep.subr.bf16.mxu0 %v17976_v15  ;;  %8393 = vmatprep.subr.bf16.mxu1 %v17978_v6  ;;  %v19653_v15 = vld [vmem:[#allocation87_spill] sm:$0xff] }
 0xb54   :  { %15401 = vrcp.f32 %v7858_v19 }
 0xb56   :  { %8353 = vmatpush1.bf16.msra.mxu0 %v17984_v50  ;;  %8394 = vmatpush1.bf16.msra.mxu1 %v17986_v10 }
 0xb57   :  { %8354 = vmatprep.subr.bf16.mxu0 %v17990_v59  ;;  %8395 = vmatprep.subr.bf16.mxu1 %v17992_v3  ;;  %v18350_v3 = vld [vmem:[#allocation19 + $0x4] ss:$16 sps:$4 sm:$0xff]  }
 0xb58   :  { %v15398_v16 = vpop.eup %15397 }
 0xb59   :  { %v15400_v17 = vpop.eup %15399  ;;  %v7862_v21 = vmul.f32 %v15398_v16, %v15396_v47 }
 0xb5a   :  { %v7861_v33 = vmul.f32 0.0, %v15400_v17  ;;  %8355 = vmatpush1.bf16.msra.mxu0 %v17996_v7  ;;  %8396 = vmatpush1.bf16.msra.mxu1 %v17998_v52  ;;  %v18352_v7 = vld [vmem:[#allocation19 + $0xc] ss:$16 sps:$4 sm:$0xff]   ;;  %v18354_v52 = vld [vmem:[#allocation19] ss:$16 sps:$4 sm:$0xff]  }
 0xb5b   :  { %8356 = vmatprep.subr.bf16.mxu0 %v18002_v8  ;;  %8397 = vmatprep.subr.bf16.mxu1 %v18004_v62  ;;  %v18356_v8 = vld [vmem:[#allocation19 + $0x8] ss:$16 sps:$4 sm:$0xff]   ;;  %v18362_v62 = vld [vmem:[#allocation19 + $0x24] ss:$16 sps:$4 sm:$0xff]  }
 0xb5c   :  { %v18327_v27 = vadd.f32 %v7862_v21, %v7861_v33 }
 0xb5e   :  { %15403 = vtanh.f32 %v18327_v27  ;;  %8357 = vmatpush1.bf16.msra.mxu0 %v18008_v2  ;;  %8398 = vmatpush1.bf16.msra.mxu1 %v18010_v11  ;;  %v15402_v6 = vpop.eup %15401  ;;  %v18364_v2 = vld [vmem:[#allocation19 + $0x2c] ss:$16 sps:$4 sm:$0xff]   ;;  %v18366_v11 = vld [vmem:[#allocation19 + $0x20] ss:$16 sps:$4 sm:$0xff]  }
 0xb5f   :  { %8358 = vmatprep.subr.bf16.mxu0 %v18014_v55  ;;  %8399 = vmatprep.subr.bf16.mxu1 %v18016_v46  ;;  %v18368_v55 = vld [vmem:[#allocation19 + $0x28] ss:$16 sps:$4 sm:$0xff]   ;;  %v18374_v46 = vld [vmem:[#allocation19 + $0x44] ss:$16 sps:$4 sm:$0xff]  }
 0xb62   :  { %8359 = vmatpush1.bf16.msra.mxu0 %v19653_v15  ;;  %8400 = vmatpush1.bf16.msra.mxu1 %v18022_v58  ;;  %v18378_v58 = vld [vmem:[#allocation19 + $0x40] ss:$16 sps:$4 sm:$0xff]  }
 0xb63   :  { %8360 = vmatprep.subr.bf16.mxu0 %v18026_v54  ;;  %8401 = vmatprep.subr.bf16.mxu1 %v18028_v28  ;;  %v18380_v54 = vld [vmem:[#allocation19 + $0x48] ss:$16 sps:$4 sm:$0xff]   ;;  %v18386_v28 = vld [vmem:[#allocation19 + $0x64] ss:$16 sps:$4 sm:$0xff]  }
 0xb66   :  { %8361 = vmatpush1.bf16.msra.mxu0 %v18032_v40  ;;  %8402 = vmatpush1.bf16.msra.mxu1 %v18034_v29  ;;  %v18388_v40 = vld [vmem:[#allocation19 + $0x6c] ss:$16 sps:$4 sm:$0xff]   ;;  %v18390_v29 = vld [vmem:[#allocation19 + $0x60] ss:$16 sps:$4 sm:$0xff]  }
 0xb67   :  { %8362 = vmatprep.subr.bf16.mxu0 %v18038_v13  ;;  %8403 = vmatprep.subr.bf16.mxu1 %v18040_v23  ;;  %v18392_v13 = vld [vmem:[#allocation19 + $0x68] ss:$16 sps:$4 sm:$0xff]   ;;  %v18398_v23 = vld [vmem:[#allocation19 + $0x84] ss:$16 sps:$4 sm:$0xff]  }
 0xb68   :  { %v15404_v50 = vpop.eup %15403 }
 0xb69   :  { %v18342_v10 = vmul.f32 %v15404_v50, %v15402_v6 }
 0xb6a   :  { %8363 = vmatpush1.bf16.msra.mxu0 %v18044_v37  ;;  %8404 = vmatpush1.bf16.msra.mxu1 %v18046_v63  ;;  %v18376_v63 = vld [vmem:[#allocation19 + $0x4c] ss:$16 sps:$4 sm:$0xff]  }
 0xb6b   :  { %19654 = vst [vmem:[#allocation101_spill] sm:$0xff] %v18342_v10  ;;  %v8155_v59 = vpack.c.bf16 %v18342_v10, %v18342_v10  ;;  %8681 = vmatprep.subr.bf16.mxu0 %v18350_v3  ;;  %8722 = vmatprep.subr.bf16.mxu1 %v18352_v7  ;;  %v18400_v37 = vld [vmem:[#allocation19 + $0x8c] ss:$16 sps:$4 sm:$0xff]  }
 0xb6c   :  { %v18519_v10 = vld [vmem:[#allocation23 + $0x88] ss:$16 sps:$4 sm:$0xff]  }
 0xb6d   :  { %8381 = vmatmul.mubr.bf16.vlgmr.msra.gmra.mrb[140].mxu0 %v8155_v59  ;;  %8422 = vmatmul.mubr.bf16.vlgmr.msra.gmra.mrb[140].mxu1 %v8155_v59  ;;  %19661 = vst [vmem:[#allocation105_spill] sm:$0xff] %v18519_v10 }
 0xb6e   :  { %8713 = vmatprep.mubr.bf16.mxu0 %v19480_v51  ;;  %8754 = vmatprep.mubr.bf16.mxu1 %v19480_v51 }
 0xb6f   :  { %8682 = vmatpush1.bf16.msra.mxu0 %v18354_v52  ;;  %8723 = vmatpush1.bf16.msra.mxu1 %v18356_v8 }
 0xb70   :  { %8683 = vmatprep.subr.bf16.mxu0 %v18362_v62  ;;  %8724 = vmatprep.subr.bf16.mxu1 %v18364_v2 }
 0xb73   :  { %8684 = vmatpush1.bf16.msra.mxu0 %v18366_v11  ;;  %8725 = vmatpush1.bf16.msra.mxu1 %v18368_v55 }
 0xb74   :  { %8685 = vmatprep.subr.bf16.mxu0 %v18374_v46  ;;  %8726 = vmatprep.subr.bf16.mxu1 %v18376_v63 }
 0xb77   :  { %8686 = vmatpush1.bf16.msra.mxu0 %v18378_v58  ;;  %8727 = vmatpush1.bf16.msra.mxu1 %v18380_v54 }
 0xb78   :  { %8687 = vmatprep.subr.bf16.mxu0 %v18386_v28  ;;  %8728 = vmatprep.subr.bf16.mxu1 %v18388_v40 }
 0xb7b   :  { %8688 = vmatpush1.bf16.msra.mxu0 %v18390_v29  ;;  %8729 = vmatpush1.bf16.msra.mxu1 %v18392_v13 }
 0xb7c   :  { %8689 = vmatprep.subr.bf16.mxu0 %v18398_v23  ;;  %8730 = vmatprep.subr.bf16.mxu1 %v18400_v37 }
 0xb7f   :  { %8690 = vmatpush1.bf16.msra.mxu0 %v18402_v0  ;;  %8731 = vmatpush1.bf16.msra.mxu1 %v18404_v30 }
 0xb80   :  { %8691 = vmatprep.subr.bf16.mxu0 %v18410_v49  ;;  %8732 = vmatprep.subr.bf16.mxu1 %v18412_v39 }
 0xb83   :  { %8692 = vmatpush1.bf16.msra.mxu0 %v18414_v32  ;;  %8733 = vmatpush1.bf16.msra.mxu1 %v18416_v41 }
 0xb84   :  { %8693 = vmatprep.subr.bf16.mxu0 %v18422_v36  ;;  %8734 = vmatprep.subr.bf16.mxu1 %v18424_v25 }
 0xb87   :  { %8694 = vmatpush1.bf16.msra.mxu0 %v18426_v1  ;;  %8735 = vmatpush1.bf16.msra.mxu1 %v18428_v56 }
 0xb88   :  { %8695 = vmatprep.subr.bf16.mxu0 %v18434_v20  ;;  %8736 = vmatprep.subr.bf16.mxu1 %v18436_v26 }
 0xb8b   :  { %8696 = vmatpush1.bf16.msra.mxu0 %v18438_v48  ;;  %8737 = vmatpush1.bf16.msra.mxu1 %v18440_v9 }
 0xb8c   :  { %8964 = vmatprep.subr.bf16.mxu0 %v18446_v45  ;;  %9005 = vmatprep.subr.bf16.mxu1 %v18448_v4 }
 0xc20   :  { %v8099_v24 = vpop.f32.mrb[136].mxu0  ;;  %v8140_v61 = vpop.f32.mrb[136].mxu1 }
 0xc21   :  { %v8147_v14 = vadd.f32 %v8099_v24, %v18111_v53  ;;  %v8149_v42 = vadd.f32 %v8140_v61, %v18114_v44  ;;  %v8101_v57 = vpop.f32.mrb[137].mxu0  ;;  %v8142_v43 = vpop.f32.mrb[137].mxu1 }
 0xc22   :  { %v8148_v35 = vadd.f32 %v8101_v57, %v18117_v38  ;;  %v8150_v12 = vadd.f32 %v8142_v43, %v19655_v60  ;;  %v8103_v22 = vpop.f32.mrb[138].mxu0  ;;  %v8144_v31 = vpop.f32.mrb[138].mxu1 }
 0xc23   :  { %v13484_v34 = vmul.f32 -1.442695, %v8147_v14  ;;  %v8104_v47 = vpop.f32.mrb[139].mxu0  ;;  %v8145_v16 = vpop.f32.mrb[139].mxu1 }
 0xc24   :  { %v13485_v17 = vmul.f32 -1.442695, %v8148_v35  ;;  %v13486_v21 = vmul.f32 -1.442695, %v8150_v12  ;;  %v19656_v35 = vld [vmem:[#allocation102_spill] sm:$0xff]  ;;  %v19657_v12 = vld [vmem:[#allocation47_spill] sm:$0xff] }
 0xc25   :  { %15405 = vpow2.f32 %v13484_v34  ;;  %v19658_v34 = vld [vmem:[#allocation89_spill] sm:$0xff]  ;;  %v19659_v16 = vld [vmem:[#allocation100_spill] sm:$0xff] }
 0xc26   :  { %15407 = vpow2.f32 %v13485_v17 }
 0xc27   :  { %15409 = vpow2.f32 %v13486_v21 }
 0xc28   :  { %15411 = vtanh.f32 %v8149_v42 }
 0xc2f   :  { %v15406_v19 = vpop.eup %15405 }
 0xc30   :  { %v15408_v33 = vpop.eup %15407  ;;  %v8437_v53 = vadd.f32 1.0, %v15406_v19 }
 0xc31   :  { %v8443_v44 = vadd.f32 1.0, %v15408_v33  ;;  %v15410_v38 = vpop.eup %15409 }
 0xc32   :  { %15413 = vrcp.f32 %v8437_v53  ;;  %v15412_v15 = vpop.eup %15411  ;;  %v8450_v24 = vadd.f32 1.0, %v15410_v38 }
 0xc33   :  { %15415 = vrcp.f32 %v8443_v44 }
 0xc34   :  { %15417 = vrcp.f32 %v8450_v24  ;;  %v18468_v24 = vld [vmem:[#allocation23 + $0x8] ss:$16 sps:$4 sm:$0xff]  }
 0xc3c   :  { %v15414_v6 = vpop.eup %15413 }
 0xc3d   :  { %v15416_v50 = vpop.eup %15415  ;;  %v8454_v59 = vmul.f32 %v15414_v6, %v15412_v15 }
 0xc3e   :  { %v8453_v61 = vmul.f32 %v15416_v50, %v18302_v5  ;;  %v15418_v38 = vpop.eup %15417 }
 0xc40   :  { %v18457_v14 = vadd.f32 %v8454_v59, %v8453_v61  ;;  %v8382_v57 = vpop.f32.mrb[140].mxu0  ;;  %v8423_v43 = vpop.f32.mrb[140].mxu1  ;;  %v18466_v59 = vld [vmem:[#allocation23] ss:$16 sps:$4 sm:$0xff]  }
 0xc41   :  { %v8430_v60 = vadd.f32 %v8382_v57, %v19656_v35  ;;  %v8432_v42 = vadd.f32 %v8423_v43, %v19657_v12  ;;  %v8384_v22 = vpop.f32.mrb[141].mxu0  ;;  %v8425_v31 = vpop.f32.mrb[141].mxu1  ;;  %v18472_v43 = vld [vmem:[#allocation23 + $0x24] ss:$16 sps:$4 sm:$0xff]   ;;  %v18474_v35 = vld [vmem:[#allocation23 + $0x2c] ss:$16 sps:$4 sm:$0xff]  }
 0xc42   :  { %15419 = vtanh.f32 %v18457_v14  ;;  %v8431_v47 = vadd.f32 %v8384_v22, %v19658_v34  ;;  %v8433_v17 = vadd.f32 %v8425_v31, %v19659_v16  ;;  %v8386_v21 = vpop.f32.mrb[142].mxu0  ;;  %v8427_v19 = vpop.f32.mrb[142].mxu1  ;;  %v18478_v31 = vld [vmem:[#allocation23 + $0x20] ss:$16 sps:$4 sm:$0xff]   ;;  %v18480_v34 = vld [vmem:[#allocation23 + $0x28] ss:$16 sps:$4 sm:$0xff]  }
 0xc43   :  { %v13487_v5 = vmul.f32 -1.442695, %v8430_v60  ;;  %v8387_v33 = vpop.f32.mrb[143].mxu0  ;;  %v8428_v53 = vpop.f32.mrb[143].mxu1  ;;  %v18492_v16 = vld [vmem:[#allocation23 + $0x40] ss:$16 sps:$4 sm:$0xff]  }
 0xc44   :  { %v13488_v44 = vmul.f32 -1.442695, %v8431_v47  ;;  %v13489_v6 = vmul.f32 -1.442695, %v8433_v17  ;;  %v18484_v47 = vld [vmem:[#allocation23 + $0x44] ss:$16 sps:$4 sm:$0xff]  }
 0xc45   :  { %15421 = vpow2.f32 %v13487_v5  ;;  %v18494_v17 = vld [vmem:[#allocation23 + $0x48] ss:$16 sps:$4 sm:$0xff]   ;;  %v18498_v21 = vld [vmem:[#allocation23 + $0x64] ss:$16 sps:$4 sm:$0xff]   ;;  %v18500_v19 = vld [vmem:[#allocation23 + $0x6c] ss:$16 sps:$4 sm:$0xff]  }
 0xc46   :  { %15423 = vpow2.f32 %v13488_v44  ;;  %v18504_v33 = vld [vmem:[#allocation23 + $0x60] ss:$16 sps:$4 sm:$0xff]   ;;  %v18506_v53 = vld [vmem:[#allocation23 + $0x68] ss:$16 sps:$4 sm:$0xff]  }
 0xc47   :  { %15425 = vpow2.f32 %v13489_v6 }
 0xc48   :  { %15427 = vtanh.f32 %v8432_v42  ;;  %v18486_v42 = vld [vmem:[#allocation23 + $0x4c] ss:$16 sps:$4 sm:$0xff]  }
 0xc4c   :  { %v15420_v15 = vpop.eup %15419 }
 0xc4d   :  { %v18464_v50 = vmul.f32 %v15420_v15, %v15418_v38  ;;  %v18510_v38 = vld [vmem:[#allocation23 + $0x84] ss:$16 sps:$4 sm:$0xff]   ;;  %v18512_v15 = vld [vmem:[#allocation23 + $0x8c] ss:$16 sps:$4 sm:$0xff]  }
 0xc4f   :  { %19660 = vst [vmem:[#allocation103_spill] sm:$0xff] %v18464_v50  ;;  %v15422_v61 = vpop.eup %15421  ;;  %v8488_v57 = vpack.c.bf16 %v18464_v50, %v18464_v50  ;;  %v18523_v50 = vld [vmem:[#allocation23 + $0xa4] ss:$16 sps:$4 sm:$0xff]  }
 0xc50   :  { %v15424_v60 = vpop.eup %15423  ;;  %v8461_v12 = vadd.f32 1.0, %v15422_v61  ;;  %19662 = vst [vmem:[#allocation94_spill] sm:$0xff] %v18523_v50 }
 0xc51   :  { %v8467_v22 = vadd.f32 1.0, %v15424_v60  ;;  %8714 = vmatmul.mubr.bf16.vlgmr.msra.gmra.mrb[144].mxu0 %v8488_v57  ;;  %8755 = vmatmul.mubr.bf16.vlgmr.msra.gmra.mrb[144].mxu1 %v8488_v57  ;;  %v15426_v5 = vpop.eup %15425 }
 0xc52   :  { %15429 = vrcp.f32 %v8461_v12  ;;  %8965 = vmatpush1.bf16.msra.mxu0 %v18466_v59  ;;  %9006 = vmatpush1.bf16.msra.mxu1 %v18468_v24  ;;  %v15428_v44 = vpop.eup %15427  ;;  %v8474_v60 = vadd.f32 1.0, %v15426_v5  ;;  %v18534_v5 = vld [vmem:[#allocation23 + $0xa8] ss:$16 sps:$4 sm:$0xff]  }
 0xc53   :  { %15431 = vrcp.f32 %v8467_v22  ;;  %8966 = vmatprep.subr.bf16.mxu0 %v18472_v43  ;;  %9007 = vmatprep.subr.bf16.mxu1 %v18474_v35  ;;  %v18517_v22 = vld [vmem:[#allocation23 + $0x80] ss:$16 sps:$4 sm:$0xff]   ;;  %19665 = vst [vmem:[#allocation46_spill] sm:$0xff] %v18534_v5 }
 0xc54   :  { %8996 = vmatprep.mubr.bf16.mxu0 %v19480_v51  ;;  %9037 = vmatprep.mubr.bf16.mxu1 %v19480_v51  ;;  %15433 = vrcp.f32 %v8474_v60  ;;  %v18546_v60 = vld [vmem:[#allocation23 + $0xc8] ss:$16 sps:$4 sm:$0xff]  }
 0xc56   :  { %8967 = vmatpush1.bf16.msra.mxu0 %v18478_v31  ;;  %9008 = vmatpush1.bf16.msra.mxu1 %v18480_v34 }
 0xc57   :  { %8968 = vmatprep.subr.bf16.mxu0 %v18484_v47  ;;  %9009 = vmatprep.subr.bf16.mxu1 %v18486_v42 }
 0xc5a   :  { %8969 = vmatpush1.bf16.msra.mxu0 %v18492_v16  ;;  %9010 = vmatpush1.bf16.msra.mxu1 %v18494_v17 }
 0xc5b   :  { %8970 = vmatprep.subr.bf16.mxu0 %v18498_v21  ;;  %9011 = vmatprep.subr.bf16.mxu1 %v18500_v19 }
 0xc5c   :  { %v15430_v6 = vpop.eup %15429 }
 0xc5d   :  { %v15432_v61 = vpop.eup %15431  ;;  %v8478_v57 = vmul.f32 %v15430_v6, %v15428_v44  ;;  %v18538_v6 = vld [vmem:[#allocation23 + $0xc4] ss:$16 sps:$4 sm:$0xff]  }
 0xc5e   :  { %v8477_v12 = vmul.f32 %v15432_v61, %v18327_v27  ;;  %8971 = vmatpush1.bf16.msra.mxu0 %v18504_v33  ;;  %9012 = vmatpush1.bf16.msra.mxu1 %v18506_v53  ;;  %v18532_v27 = vld [vmem:[#allocation23 + $0xa0] ss:$16 sps:$4 sm:$0xff]   ;;  %19666 = vst [vmem:[#allocation45_spill] sm:$0xff] %v18538_v6  ;;  %v18540_v61 = vld [vmem:[#allocation23 + $0xcc] ss:$16 sps:$4 sm:$0xff]  }
 0xc5f   :  { %8972 = vmatprep.subr.bf16.mxu0 %v18510_v38  ;;  %9013 = vmatprep.subr.bf16.mxu1 %v18512_v15  ;;  %19664 = vst [vmem:[#allocation44_spill] sm:$0xff] %v18532_v27 }
 0xc60   :  { %v18527_v44 = vadd.f32 %v8478_v57, %v8477_v12  ;;  %v18544_v57 = vld [vmem:[#allocation23 + $0xc0] ss:$16 sps:$4 sm:$0xff]   ;;  %v18550_v12 = vld [vmem:[#allocation23 + $0xe4] ss:$16 sps:$4 sm:$0xff]  }
 0xc61   :  { %19667 = vst [vmem:[#allocation87_spill] sm:$0xff] %v18544_v57 }
 0xc62   :  { %15435 = vtanh.f32 %v18527_v44  ;;  %8973 = vmatpush1.bf16.msra.mxu0 %v18517_v22  ;;  %9014 = vmatpush1.bf16.msra.mxu1 %v18519_v10 }
 0xc63   :  { %8974 = vmatprep.subr.bf16.mxu0 %v18523_v50  ;;  %9015 = vmatprep.subr.bf16.mxu1 %v18525_v18  ;;  %v18552_v50 = vld [vmem:[#allocation23 + $0xec] ss:$16 sps:$4 sm:$0xff]   ;;  %v18556_v18 = vld [vmem:[#allocation23 + $0xe0] ss:$16 sps:$4 sm:$0xff]  }
 0xc66   :  { %8975 = vmatpush1.bf16.msra.mxu0 %v18532_v27  ;;  %9016 = vmatpush1.bf16.msra.mxu1 %v18534_v5  ;;  %v18558_v27 = vld [vmem:[#allocation23 + $0xe8] ss:$16 sps:$4 sm:$0xff]   ;;  %v15434_v5 = vpop.eup %15433 }
 0xc67   :  { %8976 = vmatprep.subr.bf16.mxu0 %v18538_v6  ;;  %9017 = vmatprep.subr.bf16.mxu1 %v18540_v61 }
 0xc6a   :  { %8977 = vmatpush1.bf16.msra.mxu0 %v18544_v57  ;;  %9018 = vmatpush1.bf16.msra.mxu1 %v18546_v60 }
 0xc6b   :  { %8978 = vmatprep.subr.bf16.mxu0 %v18550_v12  ;;  %9019 = vmatprep.subr.bf16.mxu1 %v18552_v50 }
 0xc6c   :  { %v15436_v6 = vpop.eup %15435 }
 0xc6d   :  { %v18562_v10 = vmul.f32 %v15436_v6, %v15434_v5  ;;  %v19674_v6 = vld [vmem:[#allocation72_spill] sm:$0xff] }
 0xc6e   :  { %8979 = vmatpush1.bf16.msra.mxu0 %v18556_v18  ;;  %9020 = vmatpush1.bf16.msra.mxu1 %v18558_v27 }
 0xc6f   :  { %19668 = vst [vmem:[#allocation88_spill] sm:$0xff] %v18562_v10  ;;  %v8771_v57 = vpack.c.bf16 %v18562_v10, %v18562_v10  ;;  %9297 = vmatprep.subr.bf16.mxu0 %v18350_v3  ;;  %9338 = vmatprep.subr.bf16.mxu1 %v18352_v7  ;;  %v18829_v10 = vld [vmem:[#allocation23 + $0x80] ss:$16 sps:$4 sm:$0xff]  }
 0xc71   :  { %8997 = vmatmul.mubr.bf16.vlgmr.msra.gmra.mrb[148].mxu0 %v8771_v57  ;;  %9038 = vmatmul.mubr.bf16.vlgmr.msra.gmra.mrb[148].mxu1 %v8771_v57 }
 0xc72   :  { %9298 = vmatpush1.bf16.msra.mxu0 %v18354_v52  ;;  %9339 = vmatpush1.bf16.msra.mxu1 %v18356_v8  ;;  %v19669_v52 = vld [vmem:[#allocation53_spill] sm:$0xff] }
 0xc73   :  { %9299 = vmatprep.subr.bf16.mxu0 %v18362_v62  ;;  %9340 = vmatprep.subr.bf16.mxu1 %v18364_v2  ;;  %v19670_v62 = vld [vmem:[#allocation54_spill] sm:$0xff] }
 0xc74   :  { %9329 = vmatprep.mubr.bf16.mxu0 %v19480_v51  ;;  %9370 = vmatprep.mubr.bf16.mxu1 %v19480_v51 }
 0xc76   :  { %9300 = vmatpush1.bf16.msra.mxu0 %v18366_v11  ;;  %9341 = vmatpush1.bf16.msra.mxu1 %v18368_v55 }
 0xc77   :  { %9301 = vmatprep.subr.bf16.mxu0 %v18374_v46  ;;  %9342 = vmatprep.subr.bf16.mxu1 %v18376_v63  ;;  %v19671_v46 = vld [vmem:[#allocation55_spill] sm:$0xff] }
 0xc7a   :  { %9302 = vmatpush1.bf16.msra.mxu0 %v18378_v58  ;;  %9343 = vmatpush1.bf16.msra.mxu1 %v18380_v54  ;;  %v19672_v58 = vld [vmem:[#allocation56_spill] sm:$0xff] }
 0xc7b   :  { %9303 = vmatprep.subr.bf16.mxu0 %v18386_v28  ;;  %9344 = vmatprep.subr.bf16.mxu1 %v18388_v40 }
 0xc7e   :  { %9304 = vmatpush1.bf16.msra.mxu0 %v18390_v29  ;;  %9345 = vmatpush1.bf16.msra.mxu1 %v18392_v13 }
 0xc7f   :  { %9305 = vmatprep.subr.bf16.mxu0 %v18398_v23  ;;  %9346 = vmatprep.subr.bf16.mxu1 %v18400_v37 }
 0xc82   :  { %9306 = vmatpush1.bf16.msra.mxu0 %v18402_v0  ;;  %9347 = vmatpush1.bf16.msra.mxu1 %v18404_v30 }
 0xc83   :  { %9307 = vmatprep.subr.bf16.mxu0 %v18410_v49  ;;  %9348 = vmatprep.subr.bf16.mxu1 %v18412_v39 }
 0xc86   :  { %9308 = vmatpush1.bf16.msra.mxu0 %v18414_v32  ;;  %9349 = vmatpush1.bf16.msra.mxu1 %v18416_v41 }
 0xc87   :  { %9309 = vmatprep.subr.bf16.mxu0 %v18422_v36  ;;  %9350 = vmatprep.subr.bf16.mxu1 %v18424_v25 }
 0xc8a   :  { %9310 = vmatpush1.bf16.msra.mxu0 %v18426_v1  ;;  %9351 = vmatpush1.bf16.msra.mxu1 %v18428_v56 }
 0xc8b   :  { %9311 = vmatprep.subr.bf16.mxu0 %v18434_v20  ;;  %9352 = vmatprep.subr.bf16.mxu1 %v18436_v26 }
 0xc8e   :  { %9312 = vmatpush1.bf16.msra.mxu0 %v18438_v48  ;;  %9353 = vmatpush1.bf16.msra.mxu1 %v18440_v9 }
 0xc8f   :  { %9580 = vmatprep.subr.bf16.mxu0 %v18446_v45  ;;  %9621 = vmatprep.subr.bf16.mxu1 %v18448_v4  ;;  %v19673_v4 = vld [vmem:[#allocation71_spill] sm:$0xff] }
 0xd24   :  { %v8715_v3 = vpop.f32.mrb[144].mxu0  ;;  %v8756_v7 = vpop.f32.mrb[144].mxu1 }
 0xd25   :  { %v8763_v8 = vadd.f32 %v8715_v3, %v19669_v52  ;;  %v8765_v2 = vadd.f32 %v8756_v7, %v19670_v62  ;;  %v8717_v11 = vpop.f32.mrb[145].mxu0  ;;  %v8758_v55 = vpop.f32.mrb[145].mxu1  ;;  %v19675_v52 = vld [vmem:[#allocation93_spill] sm:$0xff]  ;;  %v19676_v62 = vld [vmem:[#allocation95_spill] sm:$0xff] }
 0xd26   :  { %v8764_v63 = vadd.f32 %v8717_v11, %v19671_v46  ;;  %v8766_v54 = vadd.f32 %v8758_v55, %v19672_v58  ;;  %v8719_v28 = vpop.f32.mrb[146].mxu0  ;;  %v8760_v40 = vpop.f32.mrb[146].mxu1 }
 0xd27   :  { %v13554_v29 = vmul.f32 -1.442695, %v8763_v8  ;;  %v8720_v13 = vpop.f32.mrb[147].mxu0  ;;  %v8761_v23 = vpop.f32.mrb[147].mxu1 }
 0xd28   :  { %v13555_v37 = vmul.f32 -1.442695, %v8764_v63  ;;  %v13556_v0 = vmul.f32 -1.442695, %v8766_v54 }
 0xd29   :  { %15437 = vpow2.f32 %v13554_v29 }
 0xd2a   :  { %15439 = vpow2.f32 %v13555_v37 }
 0xd2b   :  { %15441 = vpow2.f32 %v13556_v0 }
 0xd2c   :  { %15443 = vtanh.f32 %v8765_v2 }
 0xd33   :  { %v15438_v30 = vpop.eup %15437 }
 0xd34   :  { %v15440_v49 = vpop.eup %15439  ;;  %v9053_v39 = vadd.f32 1.0, %v15438_v30 }
 0xd35   :  { %v9059_v32 = vadd.f32 1.0, %v15440_v49  ;;  %v15442_v41 = vpop.eup %15441 }
 0xd36   :  { %15445 = vrcp.f32 %v9053_v39  ;;  %v15444_v36 = vpop.eup %15443  ;;  %v9066_v20 = vadd.f32 1.0, %v15442_v41  ;;  %v18678_v39 = vld [vmem:[#allocation19 + $0x20] ss:$16 sps:$4 sm:$0xff]   ;;  %v18686_v41 = vld [vmem:[#allocation19 + $0x44] ss:$16 sps:$4 sm:$0xff]  }
 0xd37   :  { %15447 = vrcp.f32 %v9059_v32  ;;  %v18680_v32 = vld [vmem:[#allocation19 + $0x28] ss:$16 sps:$4 sm:$0xff]  }
 0xd38   :  { %15449 = vrcp.f32 %v9066_v20  ;;  %v18700_v20 = vld [vmem:[#allocation19 + $0x6c] ss:$16 sps:$4 sm:$0xff]  }
 0xd40   :  { %v15446_v25 = vpop.eup %15445 }
 0xd41   :  { %v15448_v1 = vpop.eup %15447  ;;  %v9070_v56 = vmul.f32 %v15446_v25, %v15444_v36  ;;  %v18688_v36 = vld [vmem:[#allocation19 + $0x4c] ss:$16 sps:$4 sm:$0xff]   ;;  %v18690_v25 = vld [vmem:[#allocation19 + $0x40] ss:$16 sps:$4 sm:$0xff]  }
 0xd42   :  { %v9069_v26 = vmul.f32 %v15448_v1, %v18457_v14  ;;  %v15450_v54 = vpop.eup %15449  ;;  %v18692_v1 = vld [vmem:[#allocation19 + $0x48] ss:$16 sps:$4 sm:$0xff]  }
 0xd44   :  { %v18609_v48 = vadd.f32 %v9070_v56, %v9069_v26  ;;  %v8998_v9 = vpop.f32.mrb[148].mxu0  ;;  %v9039_v45 = vpop.f32.mrb[148].mxu1  ;;  %v18698_v56 = vld [vmem:[#allocation19 + $0x64] ss:$16 sps:$4 sm:$0xff]   ;;  %v18702_v26 = vld [vmem:[#allocation19 + $0x60] ss:$16 sps:$4 sm:$0xff]  }
 0xd45   :  { %v9046_v5 = vadd.f32 %v8998_v9, %v19673_v4  ;;  %v9048_v57 = vadd.f32 %v9039_v45, %v19674_v6  ;;  %v9000_v3 = vpop.f32.mrb[149].mxu0  ;;  %v9041_v7 = vpop.f32.mrb[149].mxu1  ;;  %v18704_v9 = vld [vmem:[#allocation19 + $0x68] ss:$16 sps:$4 sm:$0xff]   ;;  %v18710_v45 = vld [vmem:[#allocation19 + $0x84] ss:$16 sps:$4 sm:$0xff]  }
 0xd46   :  { %15451 = vtanh.f32 %v18609_v48  ;;  %v9047_v8 = vadd.f32 %v9000_v3, %v19675_v52  ;;  %v9049_v2 = vadd.f32 %v9041_v7, %v19676_v62  ;;  %v9002_v11 = vpop.f32.mrb[150].mxu0  ;;  %v9043_v55 = vpop.f32.mrb[150].mxu1  ;;  %v18712_v4 = vld [vmem:[#allocation19 + $0x8c] ss:$16 sps:$4 sm:$0xff]   ;;  %v18716_v6 = vld [vmem:[#allocation19 + $0x88] ss:$16 sps:$4 sm:$0xff]  }
 0xd47   :  { %v13557_v14 = vmul.f32 -1.442695, %v9046_v5  ;;  %v9003_v46 = vpop.f32.mrb[151].mxu0  ;;  %v9044_v63 = vpop.f32.mrb[151].mxu1  ;;  %v18714_v5 = vld [vmem:[#allocation19 + $0x80] ss:$16 sps:$4 sm:$0xff]  }
 0xd48   :  { %v13558_v58 = vmul.f32 -1.442695, %v9047_v8  ;;  %v13559_v40 = vmul.f32 -1.442695, %v9049_v2  ;;  %v18724_v3 = vld [vmem:[#allocation19 + $0xac] ss:$16 sps:$4 sm:$0xff]  }
 0xd49   :  { %15453 = vpow2.f32 %v13557_v14  ;;  %v18726_v7 = vld [vmem:[#allocation19 + $0xa0] ss:$16 sps:$4 sm:$0xff]   ;;  %v18728_v52 = vld [vmem:[#allocation19 + $0xa8] ss:$16 sps:$4 sm:$0xff]   ;;  %v18734_v8 = vld [vmem:[#allocation19 + $0xc4] ss:$16 sps:$4 sm:$0xff]  }
 0xd4a   :  { %15455 = vpow2.f32 %v13558_v58  ;;  %v18736_v62 = vld [vmem:[#allocation19 + $0xcc] ss:$16 sps:$4 sm:$0xff]   ;;  %v18738_v2 = vld [vmem:[#allocation19 + $0xc0] ss:$16 sps:$4 sm:$0xff]   ;;  %v18740_v11 = vld [vmem:[#allocation19 + $0xc8] ss:$16 sps:$4 sm:$0xff]  }
 0xd4b   :  { %15457 = vpow2.f32 %v13559_v40  ;;  %v18746_v55 = vld [vmem:[#allocation19 + $0xe4] ss:$16 sps:$4 sm:$0xff]   ;;  %v18748_v14 = vld [vmem:[#allocation19 + $0xec] ss:$16 sps:$4 sm:$0xff]   ;;  %v18750_v46 = vld [vmem:[#allocation19 + $0xe0] ss:$16 sps:$4 sm:$0xff]  }
 0xd4c   :  { %15459 = vtanh.f32 %v9048_v57  ;;  %v18722_v57 = vld [vmem:[#allocation19 + $0xa4] ss:$16 sps:$4 sm:$0xff]   ;;  %v18752_v63 = vld [vmem:[#allocation19 + $0xe8] ss:$16 sps:$4 sm:$0xff]  }
 0xd4d   :  { %v18758_v58 = vld [vmem:[#allocation23 + $0x4] ss:$16 sps:$4 sm:$0xff]  }
 0xd50   :  { %v15452_v28 = vpop.eup %15451 }
 0xd51   :  { %v18616_v29 = vmul.f32 %v15452_v28, %v15450_v54  ;;  %v18760_v54 = vld [vmem:[#allocation23 + $0xc] ss:$16 sps:$4 sm:$0xff]  }
 0xd53   :  { %19677 = vst [vmem:[#allocation102_spill] sm:$0xff] %v18616_v29  ;;  %v15454_v13 = vpop.eup %15453  ;;  %v9104_v23 = vpack.c.bf16 %v18616_v29, %v18616_v29  ;;  %v18837_v29 = vld [vmem:[#allocation23 + $0xac] ss:$16 sps:$4 sm:$0xff]  }
 0xd54   :  { %v15456_v37 = vpop.eup %15455  ;;  %v9077_v0 = vadd.f32 1.0, %v15454_v13  ;;  %v19686_v13 = vld [vmem:[#allocation81_spill] sm:$0xff]  ;;  %19697 = vst [vmem:[#allocation54_spill] sm:$0xff] %v18837_v29 }
 0xd55   :  { %v9083_v30 = vadd.f32 1.0, %v15456_v37  ;;  %9330 = vmatmul.mubr.bf16.vlgmr.msra.gmra.mrb[152].mxu0 %v9104_v23  ;;  %9371 = vmatmul.mubr.bf16.vlgmr.msra.gmra.mrb[152].mxu1 %v9104_v23  ;;  %v19687_v37 = vld [vmem:[#allocation82_spill] sm:$0xff] }
 0xd56   :  { %15461 = vrcp.f32 %v9077_v0  ;;  %9581 = vmatpush1.bf16.msra.mxu0 %v18466_v59  ;;  %9622 = vmatpush1.bf16.msra.mxu1 %v18468_v24  ;;  %v15458_v59 = vpop.eup %15457 }
 0xd57   :  { %15463 = vrcp.f32 %v9083_v30  ;;  %9582 = vmatprep.subr.bf16.mxu0 %v18472_v43  ;;  %9623 = vmatprep.subr.bf16.mxu1 %v18474_v35  ;;  %v15460_v24 = vpop.eup %15459 }
 0xd58   :  { %9612 = vmatprep.mubr.bf16.mxu0 %v19480_v51  ;;  %9653 = vmatprep.mubr.bf16.mxu1 %v19480_v51 }
 0xd5a   :  { %9583 = vmatpush1.bf16.msra.mxu0 %v18478_v31  ;;  %9624 = vmatpush1.bf16.msra.mxu1 %v18480_v34  ;;  %v9090_v31 = vadd.f32 1.0, %v15458_v59 }
 0xd5b   :  { %9584 = vmatprep.subr.bf16.mxu0 %v18484_v47  ;;  %9625 = vmatprep.subr.bf16.mxu1 %v18486_v42  ;;  %v19678_v42 = vld [vmem:[#allocation105_spill] sm:$0xff] }
 0xd5c   :  { %15465 = vrcp.f32 %v9090_v31 }
 0xd5e   :  { %9585 = vmatpush1.bf16.msra.mxu0 %v18492_v16  ;;  %9626 = vmatpush1.bf16.msra.mxu1 %v18494_v17  ;;  %v19679_v16 = vld [vmem:[#allocation94_spill] sm:$0xff]  ;;  %v19680_v17 = vld [vmem:[#allocation43_spill] sm:$0xff] }
 0xd5f   :  { %9586 = vmatprep.subr.bf16.mxu0 %v18498_v21  ;;  %9627 = vmatprep.subr.bf16.mxu1 %v18500_v19  ;;  %v19681_v21 = vld [vmem:[#allocation44_spill] sm:$0xff]  ;;  %v19682_v19 = vld [vmem:[#allocation46_spill] sm:$0xff] }
 0xd60   :  { %v15462_v43 = vpop.eup %15461 }
 0xd61   :  { %v15464_v35 = vpop.eup %15463  ;;  %v9094_v49 = vmul.f32 %v15462_v43, %v15460_v24  ;;  %v19688_v24 = vld [vmem:[#allocation83_spill] sm:$0xff] }
 0xd62   :  { %v9093_v34 = vmul.f32 %v15464_v35, %v18527_v44  ;;  %9587 = vmatpush1.bf16.msra.mxu0 %v18504_v33  ;;  %9628 = vmatpush1.bf16.msra.mxu1 %v18506_v53  ;;  %v19683_v33 = vld [vmem:[#allocation45_spill] sm:$0xff]  ;;  %v19684_v53 = vld [vmem:[#allocation87_spill] sm:$0xff]  ;;  %v19689_v35 = vld [vmem:[#allocation84_spill] sm:$0xff] }
 0xd63   :  { %9588 = vmatprep.subr.bf16.mxu0 %v18510_v38  ;;  %9629 = vmatprep.subr.bf16.mxu1 %v18512_v15 }
 0xd64   :  { %v18639_v47 = vadd.f32 %v9094_v49, %v9093_v34 }
 0xd66   :  { %15467 = vtanh.f32 %v18639_v47  ;;  %9589 = vmatpush1.bf16.msra.mxu0 %v18517_v22  ;;  %9630 = vmatpush1.bf16.msra.mxu1 %v19678_v42  ;;  %v15466_v38 = vpop.eup %15465 }
 0xd67   :  { %9590 = vmatprep.subr.bf16.mxu0 %v19679_v16  ;;  %9631 = vmatprep.subr.bf16.mxu1 %v19680_v17 }
 0xd6a   :  { %9591 = vmatpush1.bf16.msra.mxu0 %v19681_v21  ;;  %9632 = vmatpush1.bf16.msra.mxu1 %v19682_v19 }
 0xd6b   :  { %9592 = vmatprep.subr.bf16.mxu0 %v19683_v33  ;;  %9633 = vmatprep.subr.bf16.mxu1 %v18540_v61  ;;  %v18662_v61 = vld [vmem:[#allocation19 + $0x4] ss:$16 sps:$4 sm:$0xff]  }
 0xd6e   :  { %9593 = vmatpush1.bf16.msra.mxu0 %v19684_v53  ;;  %9634 = vmatpush1.bf16.msra.mxu1 %v18546_v60  ;;  %v18664_v60 = vld [vmem:[#allocation19 + $0xc] ss:$16 sps:$4 sm:$0xff]  }
 0xd6f   :  { %9594 = vmatprep.subr.bf16.mxu0 %v18550_v12  ;;  %9635 = vmatprep.subr.bf16.mxu1 %v18552_v50  ;;  %v18666_v50 = vld [vmem:[#allocation19] ss:$16 sps:$4 sm:$0xff]   ;;  %v18668_v12 = vld [vmem:[#allocation19 + $0x8] ss:$16 sps:$4 sm:$0xff]  }
 0xd70   :  { %v15468_v15 = vpop.eup %15467 }
 0xd71   :  { %v18654_v22 = vmul.f32 %v15468_v15, %v15466_v38 }
 0xd72   :  { %9595 = vmatpush1.bf16.msra.mxu0 %v18556_v18  ;;  %9636 = vmatpush1.bf16.msra.mxu1 %v18558_v27  ;;  %v18674_v18 = vld [vmem:[#allocation19 + $0x24] ss:$16 sps:$4 sm:$0xff]   ;;  %v18676_v27 = vld [vmem:[#allocation19 + $0x2c] ss:$16 sps:$4 sm:$0xff]  }
 0xd73   :  { %19685 = vst [vmem:[#allocation47_spill] sm:$0xff] %v18654_v22  ;;  %v9387_v44 = vpack.c.bf16 %v18654_v22, %v18654_v22  ;;  %9913 = vmatprep.subr.bf16.mxu0 %v18662_v61  ;;  %9954 = vmatprep.subr.bf16.mxu1 %v18664_v60  ;;  %v18831_v22 = vld [vmem:[#allocation23 + $0x88] ss:$16 sps:$4 sm:$0xff]  }
 0xd74   :  { %19695 = vst [vmem:[#allocation100_spill] sm:$0xff] %v18831_v22 }
 0xd75   :  { %9613 = vmatmul.mubr.bf16.vlgmr.msra.gmra.mrb[156].mxu0 %v9387_v44  ;;  %9654 = vmatmul.mubr.bf16.vlgmr.msra.gmra.mrb[156].mxu1 %v9387_v44 }
 0xd76   :  { %9945 = vmatprep.mubr.bf16.mxu0 %v19480_v51  ;;  %9986 = vmatprep.mubr.bf16.mxu1 %v19480_v51 }
 0xd77   :  { %9914 = vmatpush1.bf16.msra.mxu0 %v18666_v50  ;;  %9955 = vmatpush1.bf16.msra.mxu1 %v18668_v12 }
 0xd78   :  { %9915 = vmatprep.subr.bf16.mxu0 %v18674_v18  ;;  %9956 = vmatprep.subr.bf16.mxu1 %v18676_v27 }
 0xd7b   :  { %9916 = vmatpush1.bf16.msra.mxu0 %v18678_v39  ;;  %9957 = vmatpush1.bf16.msra.mxu1 %v18680_v32 }
 0xd7c   :  { %9917 = vmatprep.subr.bf16.mxu0 %v18686_v41  ;;  %9958 = vmatprep.subr.bf16.mxu1 %v18688_v36 }
 0xd7f   :  { %9918 = vmatpush1.bf16.msra.mxu0 %v18690_v25  ;;  %9959 = vmatpush1.bf16.msra.mxu1 %v18692_v1 }
 0xd80   :  { %9919 = vmatprep.subr.bf16.mxu0 %v18698_v56  ;;  %9960 = vmatprep.subr.bf16.mxu1 %v18700_v20 }
 0xd83   :  { %9920 = vmatpush1.bf16.msra.mxu0 %v18702_v26  ;;  %9961 = vmatpush1.bf16.msra.mxu1 %v18704_v9 }
 0xd84   :  { %9921 = vmatprep.subr.bf16.mxu0 %v18710_v45  ;;  %9962 = vmatprep.subr.bf16.mxu1 %v18712_v4 }
 0xd87   :  { %9922 = vmatpush1.bf16.msra.mxu0 %v18714_v5  ;;  %9963 = vmatpush1.bf16.msra.mxu1 %v18716_v6 }
 0xd88   :  { %9923 = vmatprep.subr.bf16.mxu0 %v18722_v57  ;;  %9964 = vmatprep.subr.bf16.mxu1 %v18724_v3 }
 0xd8b   :  { %9924 = vmatpush1.bf16.msra.mxu0 %v18726_v7  ;;  %9965 = vmatpush1.bf16.msra.mxu1 %v18728_v52 }
 0xd8c   :  { %9925 = vmatprep.subr.bf16.mxu0 %v18734_v8  ;;  %9966 = vmatprep.subr.bf16.mxu1 %v18736_v62 }
 0xd8f   :  { %9926 = vmatpush1.bf16.msra.mxu0 %v18738_v2  ;;  %9967 = vmatpush1.bf16.msra.mxu1 %v18740_v11 }
 0xd90   :  { %9927 = vmatprep.subr.bf16.mxu0 %v18746_v55  ;;  %9968 = vmatprep.subr.bf16.mxu1 %v18748_v14 }
 0xd93   :  { %9928 = vmatpush1.bf16.msra.mxu0 %v18750_v46  ;;  %9969 = vmatpush1.bf16.msra.mxu1 %v18752_v63 }
 0xd94   :  { %10196 = vmatprep.subr.bf16.mxu0 %v18758_v58  ;;  %10237 = vmatprep.subr.bf16.mxu1 %v18760_v54 }
 0xe28   :  { %v9331_v28 = vpop.f32.mrb[152].mxu0  ;;  %v9372_v40 = vpop.f32.mrb[152].mxu1 }
 0xe29   :  { %v9379_v23 = vadd.f32 %v9331_v28, %v19686_v13  ;;  %v9381_v0 = vadd.f32 %v9372_v40, %v19687_v37  ;;  %v9333_v30 = vpop.f32.mrb[153].mxu0  ;;  %v9374_v59 = vpop.f32.mrb[153].mxu1 }
 0xe2a   :  { %v9380_v43 = vadd.f32 %v9333_v30, %v19688_v24  ;;  %v9382_v49 = vadd.f32 %v9374_v59, %v19689_v35  ;;  %v9335_v31 = vpop.f32.mrb[154].mxu0  ;;  %v9376_v34 = vpop.f32.mrb[154].mxu1  ;;  %v19690_v35 = vld [vmem:[#allocation67_spill] sm:$0xff] }
 0xe2b   :  { %v13624_v42 = vmul.f32 -1.442695, %v9379_v23  ;;  %v9336_v16 = vpop.f32.mrb[155].mxu0  ;;  %v9377_v17 = vpop.f32.mrb[155].mxu1  ;;  %v19691_v31 = vld [vmem:[#allocation68_spill] sm:$0xff] }
 0xe2c   :  { %v13625_v21 = vmul.f32 -1.442695, %v9380_v43  ;;  %v13626_v19 = vmul.f32 -1.442695, %v9382_v49  ;;  %v19692_v16 = vld [vmem:[#allocation69_spill] sm:$0xff] }
 0xe2d   :  { %15469 = vpow2.f32 %v13624_v42 }
 0xe2e   :  { %15471 = vpow2.f32 %v13625_v21  ;;  %v19693_v21 = vld [vmem:[#allocation70_spill] sm:$0xff] }
 0xe2f   :  { %15473 = vpow2.f32 %v13626_v19 }
 0xe30   :  { %15475 = vtanh.f32 %v9381_v0 }
 0xe37   :  { %v15470_v33 = vpop.eup %15469 }
 0xe38   :  { %v15472_v53 = vpop.eup %15471  ;;  %v9669_v38 = vadd.f32 1.0, %v15470_v33 }
 0xe39   :  { %v9675_v15 = vadd.f32 1.0, %v15472_v53  ;;  %v15474_v44 = vpop.eup %15473 }
 0xe3a   :  { %15477 = vrcp.f32 %v9669_v38  ;;  %v15476_v28 = vpop.eup %15475  ;;  %v9682_v23 = vadd.f32 1.0, %v15474_v44 }
 0xe3b   :  { %15479 = vrcp.f32 %v9675_v15 }
 0xe3c   :  { %15481 = vrcp.f32 %v9682_v23  ;;  %v18778_v23 = vld [vmem:[#allocation23] ss:$16 sps:$4 sm:$0xff]  }
 0xe44   :  { %v15478_v40 = vpop.eup %15477 }
 0xe45   :  { %v15480_v13 = vpop.eup %15479  ;;  %v9686_v37 = vmul.f32 %v15478_v40, %v15476_v28 }
 0xe46   :  { %v9685_v30 = vmul.f32 %v15480_v13, %v18609_v48  ;;  %v15482_v28 = vpop.eup %15481 }
 0xe48   :  { %v18769_v59 = vadd.f32 %v9686_v37, %v9685_v30  ;;  %v9614_v24 = vpop.f32.mrb[156].mxu0  ;;  %v9655_v43 = vpop.f32.mrb[156].mxu1  ;;  %v18780_v30 = vld [vmem:[#allocation23 + $0x8] ss:$16 sps:$4 sm:$0xff]  }
 0xe49   :  { %v9662_v49 = vadd.f32 %v9614_v24, %v19690_v35  ;;  %v9664_v0 = vadd.f32 %v9655_v43, %v19691_v31  ;;  %v9616_v34 = vpop.f32.mrb[157].mxu0  ;;  %v9657_v42 = vpop.f32.mrb[157].mxu1  ;;  %v18784_v35 = vld [vmem:[#allocation23 + $0x24] ss:$16 sps:$4 sm:$0xff]  }
 0xe4a   :  { %15483 = vtanh.f32 %v18769_v59  ;;  %v9663_v17 = vadd.f32 %v9616_v34, %v19692_v16  ;;  %v9665_v19 = vadd.f32 %v9657_v42, %v19693_v21  ;;  %v9618_v33 = vpop.f32.mrb[158].mxu0  ;;  %v9659_v53 = vpop.f32.mrb[158].mxu1  ;;  %v18790_v16 = vld [vmem:[#allocation23 + $0x20] ss:$16 sps:$4 sm:$0xff]   ;;  %v18796_v21 = vld [vmem:[#allocation23 + $0x44] ss:$16 sps:$4 sm:$0xff]  }
 0xe4b   :  { %v13627_v48 = vmul.f32 -1.442695, %v9662_v49  ;;  %v9619_v38 = vpop.f32.mrb[159].mxu0  ;;  %v9660_v15 = vpop.f32.mrb[159].mxu1  ;;  %v18786_v49 = vld [vmem:[#allocation23 + $0x2c] ss:$16 sps:$4 sm:$0xff]  }
 0xe4c   :  { %v13628_v44 = vmul.f32 -1.442695, %v9663_v17  ;;  %v13629_v13 = vmul.f32 -1.442695, %v9665_v19  ;;  %v18792_v17 = vld [vmem:[#allocation23 + $0x28] ss:$16 sps:$4 sm:$0xff]  }
 0xe4d   :  { %15485 = vpow2.f32 %v13627_v48  ;;  %v18804_v19 = vld [vmem:[#allocation23 + $0x40] ss:$16 sps:$4 sm:$0xff]   ;;  %v18806_v33 = vld [vmem:[#allocation23 + $0x48] ss:$16 sps:$4 sm:$0xff]   ;;  %v18810_v53 = vld [vmem:[#allocation23 + $0x64] ss:$16 sps:$4 sm:$0xff]  }
 0xe4e   :  { %15487 = vpow2.f32 %v13628_v44  ;;  %v18812_v48 = vld [vmem:[#allocation23 + $0x6c] ss:$16 sps:$4 sm:$0xff]   ;;  %v18816_v15 = vld [vmem:[#allocation23 + $0x60] ss:$16 sps:$4 sm:$0xff]   ;;  %v18818_v44 = vld [vmem:[#allocation23 + $0x68] ss:$16 sps:$4 sm:$0xff]  }
 0xe4f   :  { %15489 = vpow2.f32 %v13629_v13  ;;  %v18824_v13 = vld [vmem:[#allocation23 + $0x8c] ss:$16 sps:$4 sm:$0xff]  }
 0xe50   :  { %15491 = vtanh.f32 %v9664_v0  ;;  %v18798_v0 = vld [vmem:[#allocation23 + $0x4c] ss:$16 sps:$4 sm:$0xff]  }
 0xe54   :  { %v15484_v40 = vpop.eup %15483 }
 0xe55   :  { %v18776_v37 = vmul.f32 %v15484_v40, %v15482_v28  ;;  %v18822_v40 = vld [vmem:[#allocation23 + $0x84] ss:$16 sps:$4 sm:$0xff]  }
 0xe57   :  { %19694 = vst [vmem:[#allocation89_spill] sm:$0xff] %v18776_v37  ;;  %v15486_v24 = vpop.eup %15485  ;;  %v9720_v43 = vpack.c.bf16 %v18776_v37, %v18776_v37  ;;  %v18835_v37 = vld [vmem:[#allocation23 + $0xa4] ss:$16 sps:$4 sm:$0xff]  }
 0xe58   :  { %v15488_v31 = vpop.eup %15487  ;;  %v9693_v34 = vadd.f32 1.0, %v15486_v24  ;;  %19696 = vst [vmem:[#allocation53_spill] sm:$0xff] %v18835_v37 }
 0xe59   :  { %v9699_v42 = vadd.f32 1.0, %v15488_v31  ;;  %9946 = vmatmul.mubr.bf16.vlgmr.msra.gmra.mrb[160].mxu0 %v9720_v43  ;;  %9987 = vmatmul.mubr.bf16.vlgmr.msra.gmra.mrb[160].mxu1 %v9720_v43  ;;  %v15490_v38 = vpop.eup %15489 }
 0xe5a   :  { %15493 = vrcp.f32 %v9693_v34  ;;  %10197 = vmatpush1.bf16.msra.mxu0 %v18778_v23  ;;  %10238 = vmatpush1.bf16.msra.mxu1 %v18780_v30  ;;  %v15492_v28 = vpop.eup %15491  ;;  %v9706_v34 = vadd.f32 1.0, %v15490_v38  ;;  %v18846_v38 = vld [vmem:[#allocation23 + $0xa8] ss:$16 sps:$4 sm:$0xff]  }
 0xe5b   :  { %15495 = vrcp.f32 %v9699_v42  ;;  %10198 = vmatprep.subr.bf16.mxu0 %v18784_v35  ;;  %10239 = vmatprep.subr.bf16.mxu1 %v18786_v49  ;;  %19699 = vst [vmem:[#allocation56_spill] sm:$0xff] %v18846_v38 }
 0xe5c   :  { %10228 = vmatprep.mubr.bf16.mxu0 %v19480_v51  ;;  %10269 = vmatprep.mubr.bf16.mxu1 %v19480_v51  ;;  %15497 = vrcp.f32 %v9706_v34  ;;  %v18858_v34 = vld [vmem:[#allocation23 + $0xc8] ss:$16 sps:$4 sm:$0xff]  }
 0xe5e   :  { %10199 = vmatpush1.bf16.msra.mxu0 %v18790_v16  ;;  %10240 = vmatpush1.bf16.msra.mxu1 %v18792_v17 }
 0xe5f   :  { %10200 = vmatprep.subr.bf16.mxu0 %v18796_v21  ;;  %10241 = vmatprep.subr.bf16.mxu1 %v18798_v0 }
 0xe62   :  { %10201 = vmatpush1.bf16.msra.mxu0 %v18804_v19  ;;  %10242 = vmatpush1.bf16.msra.mxu1 %v18806_v33 }
 0xe63   :  { %10202 = vmatprep.subr.bf16.mxu0 %v18810_v53  ;;  %10243 = vmatprep.subr.bf16.mxu1 %v18812_v48 }
 0xe64   :  { %v15494_v24 = vpop.eup %15493 }
 0xe65   :  { %v15496_v43 = vpop.eup %15495  ;;  %v9710_v31 = vmul.f32 %v15494_v24, %v15492_v28  ;;  %v18850_v24 = vld [vmem:[#allocation23 + $0xc4] ss:$16 sps:$4 sm:$0xff]  }
 0xe66   :  { %v9709_v42 = vmul.f32 %v15496_v43, %v18639_v47  ;;  %10203 = vmatpush1.bf16.msra.mxu0 %v18816_v15  ;;  %10244 = vmatpush1.bf16.msra.mxu1 %v18818_v44  ;;  %v18844_v47 = vld [vmem:[#allocation23 + $0xa0] ss:$16 sps:$4 sm:$0xff]   ;;  %19700 = vst [vmem:[#allocation71_spill] sm:$0xff] %v18850_v24  ;;  %v18852_v43 = vld [vmem:[#allocation23 + $0xcc] ss:$16 sps:$4 sm:$0xff]  }
 0xe67   :  { %10204 = vmatprep.subr.bf16.mxu0 %v18822_v40  ;;  %10245 = vmatprep.subr.bf16.mxu1 %v18824_v13  ;;  %19698 = vst [vmem:[#allocation55_spill] sm:$0xff] %v18844_v47 }
 0xe68   :  { %v18839_v28 = vadd.f32 %v9710_v31, %v9709_v42  ;;  %v18856_v31 = vld [vmem:[#allocation23 + $0xc0] ss:$16 sps:$4 sm:$0xff]   ;;  %v18862_v42 = vld [vmem:[#allocation23 + $0xe4] ss:$16 sps:$4 sm:$0xff]  }
 0xe69   :  { %19701 = vst [vmem:[#allocation72_spill] sm:$0xff] %v18856_v31 }
 0xe6a   :  { %15499 = vtanh.f32 %v18839_v28  ;;  %10205 = vmatpush1.bf16.msra.mxu0 %v18829_v10  ;;  %10246 = vmatpush1.bf16.msra.mxu1 %v18831_v22 }
 0xe6b   :  { %10206 = vmatprep.subr.bf16.mxu0 %v18835_v37  ;;  %10247 = vmatprep.subr.bf16.mxu1 %v18837_v29  ;;  %v18864_v37 = vld [vmem:[#allocation23 + $0xec] ss:$16 sps:$4 sm:$0xff]   ;;  %v18868_v29 = vld [vmem:[#allocation23 + $0xe0] ss:$16 sps:$4 sm:$0xff]  }
 0xe6e   :  { %10207 = vmatpush1.bf16.msra.mxu0 %v18844_v47  ;;  %10248 = vmatpush1.bf16.msra.mxu1 %v18846_v38  ;;  %v18870_v47 = vld [vmem:[#allocation23 + $0xe8] ss:$16 sps:$4 sm:$0xff]   ;;  %v15498_v38 = vpop.eup %15497 }
 0xe6f   :  { %10208 = vmatprep.subr.bf16.mxu0 %v18850_v24  ;;  %10249 = vmatprep.subr.bf16.mxu1 %v18852_v43 }
 0xe72   :  { %10209 = vmatpush1.bf16.msra.mxu0 %v18856_v31  ;;  %10250 = vmatpush1.bf16.msra.mxu1 %v18858_v34 }
 0xe73   :  { %10210 = vmatprep.subr.bf16.mxu0 %v18862_v42  ;;  %10251 = vmatprep.subr.bf16.mxu1 %v18864_v37 }
 0xe74   :  { %v15500_v24 = vpop.eup %15499 }
 0xe75   :  { %v18874_v22 = vmul.f32 %v15500_v24, %v15498_v38  ;;  %v19708_v24 = vld [vmem:[#allocation86_spill] sm:$0xff] }
 0xe76   :  { %10211 = vmatpush1.bf16.msra.mxu0 %v18868_v29  ;;  %10252 = vmatpush1.bf16.msra.mxu1 %v18870_v47 }
 0xe77   :  { %19702 = vst [vmem:[#allocation93_spill] sm:$0xff] %v18874_v22  ;;  %v10003_v31 = vpack.c.bf16 %v18874_v22, %v18874_v22  ;;  %10529 = vmatprep.subr.bf16.mxu0 %v18662_v61  ;;  %10570 = vmatprep.subr.bf16.mxu1 %v18664_v60  ;;  %v19147_v22 = vld [vmem:[#allocation23 + $0xa4] ss:$16 sps:$4 sm:$0xff]  }
 0xe78   :  { %19730 = vst [vmem:[#allocation44_spill] sm:$0xff] %v19147_v22 }
 0xe79   :  { %10229 = vmatmul.mubr.bf16.vlgmr.msra.gmra.mrb[164].mxu0 %v10003_v31  ;;  %10270 = vmatmul.mubr.bf16.vlgmr.msra.gmra.mrb[164].mxu1 %v10003_v31 }
 0xe7a   :  { %10530 = vmatpush1.bf16.msra.mxu0 %v18666_v50  ;;  %10571 = vmatpush1.bf16.msra.mxu1 %v18668_v12  ;;  %v19703_v50 = vld [vmem:[#allocation90_spill] sm:$0xff] }
 0xe7b   :  { %10531 = vmatprep.subr.bf16.mxu0 %v18674_v18  ;;  %10572 = vmatprep.subr.bf16.mxu1 %v18676_v27  ;;  %v19704_v18 = vld [vmem:[#allocation91_spill] sm:$0xff] }
 0xe7c   :  { %10561 = vmatprep.mubr.bf16.mxu0 %v19480_v51  ;;  %10602 = vmatprep.mubr.bf16.mxu1 %v19480_v51 }
 0xe7e   :  { %10532 = vmatpush1.bf16.msra.mxu0 %v18678_v39  ;;  %10573 = vmatpush1.bf16.msra.mxu1 %v18680_v32 }
 0xe7f   :  { %10533 = vmatprep.subr.bf16.mxu0 %v18686_v41  ;;  %10574 = vmatprep.subr.bf16.mxu1 %v18688_v36  ;;  %v19705_v41 = vld [vmem:[#allocation92_spill] sm:$0xff] }
 0xe82   :  { %10534 = vmatpush1.bf16.msra.mxu0 %v18690_v25  ;;  %10575 = vmatpush1.bf16.msra.mxu1 %v18692_v1  ;;  %v19706_v25 = vld [vmem:[#allocation96_spill] sm:$0xff] }
 0xe83   :  { %10535 = vmatprep.subr.bf16.mxu0 %v18698_v56  ;;  %10576 = vmatprep.subr.bf16.mxu1 %v18700_v20 }
 0xe86   :  { %10536 = vmatpush1.bf16.msra.mxu0 %v18702_v26  ;;  %10577 = vmatpush1.bf16.msra.mxu1 %v18704_v9 }
 0xe87   :  { %10537 = vmatprep.subr.bf16.mxu0 %v18710_v45  ;;  %10578 = vmatprep.subr.bf16.mxu1 %v18712_v4 }
 0xe8a   :  { %10538 = vmatpush1.bf16.msra.mxu0 %v18714_v5  ;;  %10579 = vmatpush1.bf16.msra.mxu1 %v18716_v6 }
 0xe8b   :  { %10539 = vmatprep.subr.bf16.mxu0 %v18722_v57  ;;  %10580 = vmatprep.subr.bf16.mxu1 %v18724_v3 }
 0xe8e   :  { %10540 = vmatpush1.bf16.msra.mxu0 %v18726_v7  ;;  %10581 = vmatpush1.bf16.msra.mxu1 %v18728_v52 }
 0xe8f   :  { %10541 = vmatprep.subr.bf16.mxu0 %v18734_v8  ;;  %10582 = vmatprep.subr.bf16.mxu1 %v18736_v62 }
 0xe92   :  { %10542 = vmatpush1.bf16.msra.mxu0 %v18738_v2  ;;  %10583 = vmatpush1.bf16.msra.mxu1 %v18740_v11 }
 0xe93   :  { %10543 = vmatprep.subr.bf16.mxu0 %v18746_v55  ;;  %10584 = vmatprep.subr.bf16.mxu1 %v18748_v14 }
 0xe96   :  { %10544 = vmatpush1.bf16.msra.mxu0 %v18750_v46  ;;  %10585 = vmatpush1.bf16.msra.mxu1 %v18752_v63 }
 0xe97   :  { %10812 = vmatprep.subr.bf16.mxu0 %v18758_v58  ;;  %10853 = vmatprep.subr.bf16.mxu1 %v18760_v54  ;;  %v19707_v54 = vld [vmem:[#allocation85_spill] sm:$0xff] }
 0xf2c   :  { %v9947_v61 = vpop.f32.mrb[160].mxu0  ;;  %v9988_v60 = vpop.f32.mrb[160].mxu1 }
 0xf2d   :  { %v9995_v12 = vadd.f32 %v9947_v61, %v19703_v50  ;;  %v9997_v27 = vadd.f32 %v9988_v60, %v19704_v18  ;;  %v9949_v39 = vpop.f32.mrb[161].mxu0  ;;  %v9990_v32 = vpop.f32.mrb[161].mxu1  ;;  %v19709_v50 = vld [vmem:[#allocation65_spill] sm:$0xff]  ;;  %v19710_v18 = vld [vmem:[#allocation66_spill] sm:$0xff] }
 0xf2e   :  { %v9996_v36 = vadd.f32 %v9949_v39, %v19705_v41  ;;  %v9998_v1 = vadd.f32 %v9990_v32, %v19706_v25  ;;  %v9951_v56 = vpop.f32.mrb[162].mxu0  ;;  %v9992_v20 = vpop.f32.mrb[162].mxu1 }
 0xf2f   :  { %v13694_v26 = vmul.f32 -1.442695, %v9995_v12  ;;  %v9952_v9 = vpop.f32.mrb[163].mxu0  ;;  %v9993_v45 = vpop.f32.mrb[163].mxu1 }
 0xf30   :  { %v13695_v4 = vmul.f32 -1.442695, %v9996_v36  ;;  %v13696_v5 = vmul.f32 -1.442695, %v9998_v1 }
 0xf31   :  { %15501 = vpow2.f32 %v13694_v26 }
 0xf32   :  { %15503 = vpow2.f32 %v13695_v4 }
 0xf33   :  { %15505 = vpow2.f32 %v13696_v5 }
 0xf34   :  { %15507 = vtanh.f32 %v9997_v27 }
 0xf3b   :  { %v15502_v6 = vpop.eup %15501 }
 0xf3c   :  { %v15504_v57 = vpop.eup %15503  ;;  %v10285_v3 = vadd.f32 1.0, %v15502_v6 }
 0xf3d   :  { %v10291_v7 = vadd.f32 1.0, %v15504_v57  ;;  %v15506_v52 = vpop.eup %15505 }
 0xf3e   :  { %15509 = vrcp.f32 %v10285_v3  ;;  %v15508_v8 = vpop.eup %15507  ;;  %v10298_v55 = vadd.f32 1.0, %v15506_v52  ;;  %v18990_v3 = vld [vmem:[#allocation19 + $0x20] ss:$16 sps:$4 sm:$0xff]   ;;  %v18998_v52 = vld [vmem:[#allocation19 + $0x44] ss:$16 sps:$4 sm:$0xff]  }
 0xf3f   :  { %15511 = vrcp.f32 %v10291_v7  ;;  %v18992_v7 = vld [vmem:[#allocation19 + $0x28] ss:$16 sps:$4 sm:$0xff]  }
 0xf40   :  { %15513 = vrcp.f32 %v10298_v55  ;;  %v19012_v55 = vld [vmem:[#allocation19 + $0x6c] ss:$16 sps:$4 sm:$0xff]  }
 0xf48   :  { %v15510_v62 = vpop.eup %15509 }
 0xf49   :  { %v15512_v2 = vpop.eup %15511  ;;  %v10302_v11 = vmul.f32 %v15510_v62, %v15508_v8  ;;  %v19000_v8 = vld [vmem:[#allocation19 + $0x4c] ss:$16 sps:$4 sm:$0xff]   ;;  %v19002_v62 = vld [vmem:[#allocation19 + $0x40] ss:$16 sps:$4 sm:$0xff]  }
 0xf4a   :  { %v10301_v14 = vmul.f32 %v15512_v2, %v18769_v59  ;;  %v15514_v1 = vpop.eup %15513  ;;  %v19004_v2 = vld [vmem:[#allocation19 + $0x48] ss:$16 sps:$4 sm:$0xff]  }
 0xf4c   :  { %v18921_v46 = vadd.f32 %v10302_v11, %v10301_v14  ;;  %v10230_v63 = vpop.f32.mrb[164].mxu0  ;;  %v10271_v58 = vpop.f32.mrb[164].mxu1  ;;  %v19010_v11 = vld [vmem:[#allocation19 + $0x64] ss:$16 sps:$4 sm:$0xff]   ;;  %v19014_v14 = vld [vmem:[#allocation19 + $0x60] ss:$16 sps:$4 sm:$0xff]  }
 0xf4d   :  { %v10278_v38 = vadd.f32 %v10230_v63, %v19707_v54  ;;  %v10280_v31 = vadd.f32 %v10271_v58, %v19708_v24  ;;  %v10232_v61 = vpop.f32.mrb[165].mxu0  ;;  %v10273_v60 = vpop.f32.mrb[165].mxu1  ;;  %v19016_v63 = vld [vmem:[#allocation19 + $0x68] ss:$16 sps:$4 sm:$0xff]   ;;  %v19022_v58 = vld [vmem:[#allocation19 + $0x84] ss:$16 sps:$4 sm:$0xff]  }
 0xf4e   :  { %15515 = vtanh.f32 %v18921_v46  ;;  %v10279_v12 = vadd.f32 %v10232_v61, %v19709_v50  ;;  %v10281_v27 = vadd.f32 %v10273_v60, %v19710_v18  ;;  %v10234_v39 = vpop.f32.mrb[166].mxu0  ;;  %v10275_v32 = vpop.f32.mrb[166].mxu1  ;;  %v19024_v54 = vld [vmem:[#allocation19 + $0x8c] ss:$16 sps:$4 sm:$0xff]   ;;  %v19028_v24 = vld [vmem:[#allocation19 + $0x88] ss:$16 sps:$4 sm:$0xff]  }
 0xf4f   :  { %v13697_v59 = vmul.f32 -1.442695, %v10278_v38  ;;  %v10235_v41 = vpop.f32.mrb[167].mxu0  ;;  %v10276_v36 = vpop.f32.mrb[167].mxu1  ;;  %v19026_v38 = vld [vmem:[#allocation19 + $0x80] ss:$16 sps:$4 sm:$0xff]  }
 0xf50   :  { %v13698_v25 = vmul.f32 -1.442695, %v10279_v12  ;;  %v13699_v20 = vmul.f32 -1.442695, %v10281_v27  ;;  %v19036_v61 = vld [vmem:[#allocation19 + $0xac] ss:$16 sps:$4 sm:$0xff]  }
 0xf51   :  { %15517 = vpow2.f32 %v13697_v59  ;;  %v19038_v60 = vld [vmem:[#allocation19 + $0xa0] ss:$16 sps:$4 sm:$0xff]   ;;  %v19040_v50 = vld [vmem:[#allocation19 + $0xa8] ss:$16 sps:$4 sm:$0xff]   ;;  %v19046_v12 = vld [vmem:[#allocation19 + $0xc4] ss:$16 sps:$4 sm:$0xff]  }
 0xf52   :  { %15519 = vpow2.f32 %v13698_v25  ;;  %v19048_v18 = vld [vmem:[#allocation19 + $0xcc] ss:$16 sps:$4 sm:$0xff]   ;;  %v19050_v27 = vld [vmem:[#allocation19 + $0xc0] ss:$16 sps:$4 sm:$0xff]   ;;  %v19052_v39 = vld [vmem:[#allocation19 + $0xc8] ss:$16 sps:$4 sm:$0xff]  }
 0xf53   :  { %15521 = vpow2.f32 %v13699_v20  ;;  %v19058_v32 = vld [vmem:[#allocation19 + $0xe4] ss:$16 sps:$4 sm:$0xff]   ;;  %v19060_v59 = vld [vmem:[#allocation19 + $0xec] ss:$16 sps:$4 sm:$0xff]   ;;  %v19062_v41 = vld [vmem:[#allocation19 + $0xe0] ss:$16 sps:$4 sm:$0xff]  }
 0xf54   :  { %15523 = vtanh.f32 %v10280_v31  ;;  %v19034_v31 = vld [vmem:[#allocation19 + $0xa4] ss:$16 sps:$4 sm:$0xff]   ;;  %v19064_v36 = vld [vmem:[#allocation19 + $0xe8] ss:$16 sps:$4 sm:$0xff]  }
 0xf55   :  { %v19070_v25 = vld [vmem:[#allocation23 + $0x4] ss:$16 sps:$4 sm:$0xff]  }
 0xf58   :  { %v15516_v56 = vpop.eup %15515 }
 0xf59   :  { %v18928_v26 = vmul.f32 %v15516_v56, %v15514_v1  ;;  %v19072_v1 = vld [vmem:[#allocation23 + $0xc] ss:$16 sps:$4 sm:$0xff]  }
 0xf5b   :  { %19711 = vst [vmem:[#allocation95_spill] sm:$0xff] %v18928_v26  ;;  %v15518_v9 = vpop.eup %15517  ;;  %v10336_v45 = vpack.c.bf16 %v18928_v26, %v18928_v26  ;;  %v19143_v26 = vld [vmem:[#allocation23 + $0x88] ss:$16 sps:$4 sm:$0xff]  }
 0xf5c   :  { %v15520_v4 = vpop.eup %15519  ;;  %v10309_v5 = vadd.f32 1.0, %v15518_v9  ;;  %v19720_v9 = vld [vmem:[#allocation97_spill] sm:$0xff]  ;;  %19729 = vst [vmem:[#allocation43_spill] sm:$0xff] %v19143_v26 }
 0xf5d   :  { %v10315_v6 = vadd.f32 1.0, %v15520_v4  ;;  %10562 = vmatmul.mubr.bf16.vlgmr.msra.gmra.mrb[168].mxu0 %v10336_v45  ;;  %10603 = vmatmul.mubr.bf16.vlgmr.msra.gmra.mrb[168].mxu1 %v10336_v45  ;;  %v19721_v4 = vld [vmem:[#allocation98_spill] sm:$0xff] }
 0xf5e   :  { %15525 = vrcp.f32 %v10309_v5  ;;  %10813 = vmatpush1.bf16.msra.mxu0 %v18778_v23  ;;  %10854 = vmatpush1.bf16.msra.mxu1 %v18780_v30  ;;  %v15522_v23 = vpop.eup %15521 }
 0xf5f   :  { %15527 = vrcp.f32 %v10315_v6  ;;  %10814 = vmatprep.subr.bf16.mxu0 %v18784_v35  ;;  %10855 = vmatprep.subr.bf16.mxu1 %v18786_v49  ;;  %v15524_v30 = vpop.eup %15523 }
 0xf60   :  { %10844 = vmatprep.mubr.bf16.mxu0 %v19480_v51  ;;  %10885 = vmatprep.mubr.bf16.mxu1 %v19480_v51 }
 0xf62   :  { %10815 = vmatpush1.bf16.msra.mxu0 %v18790_v16  ;;  %10856 = vmatpush1.bf16.msra.mxu1 %v18792_v17  ;;  %v10322_v16 = vadd.f32 1.0, %v15522_v23 }
 0xf63   :  { %10816 = vmatprep.subr.bf16.mxu0 %v18796_v21  ;;  %10857 = vmatprep.subr.bf16.mxu1 %v18798_v0  ;;  %v19712_v0 = vld [vmem:[#allocation100_spill] sm:$0xff] }
 0xf64   :  { %15529 = vrcp.f32 %v10322_v16 }
 0xf66   :  { %10817 = vmatpush1.bf16.msra.mxu0 %v18804_v19  ;;  %10858 = vmatpush1.bf16.msra.mxu1 %v18806_v33  ;;  %v19713_v19 = vld [vmem:[#allocation53_spill] sm:$0xff]  ;;  %v19714_v33 = vld [vmem:[#allocation54_spill] sm:$0xff] }
 0xf67   :  { %10818 = vmatprep.subr.bf16.mxu0 %v18810_v53  ;;  %10859 = vmatprep.subr.bf16.mxu1 %v18812_v48  ;;  %v19715_v53 = vld [vmem:[#allocation55_spill] sm:$0xff]  ;;  %v19716_v48 = vld [vmem:[#allocation56_spill] sm:$0xff] }
 0xf68   :  { %v15526_v35 = vpop.eup %15525 }
 0xf69   :  { %v15528_v49 = vpop.eup %15527  ;;  %v10326_v57 = vmul.f32 %v15526_v35, %v15524_v30  ;;  %v19722_v30 = vld [vmem:[#allocation99_spill] sm:$0xff] }
 0xf6a   :  { %v10325_v17 = vmul.f32 %v15528_v49, %v18839_v28  ;;  %10819 = vmatpush1.bf16.msra.mxu0 %v18816_v15  ;;  %10860 = vmatpush1.bf16.msra.mxu1 %v18818_v44  ;;  %v19717_v15 = vld [vmem:[#allocation71_spill] sm:$0xff]  ;;  %v19718_v44 = vld [vmem:[#allocation72_spill] sm:$0xff]  ;;  %v19723_v49 = vld [vmem:[#allocation57_spill] sm:$0xff] }
 0xf6b   :  { %10820 = vmatprep.subr.bf16.mxu0 %v18822_v40  ;;  %10861 = vmatprep.subr.bf16.mxu1 %v18824_v13 }
 0xf6c   :  { %v18951_v21 = vadd.f32 %v10326_v57, %v10325_v17 }
 0xf6e   :  { %15531 = vtanh.f32 %v18951_v21  ;;  %10821 = vmatpush1.bf16.msra.mxu0 %v18829_v10  ;;  %10862 = vmatpush1.bf16.msra.mxu1 %v19712_v0  ;;  %v15530_v40 = vpop.eup %15529 }
 0xf6f   :  { %10822 = vmatprep.subr.bf16.mxu0 %v19713_v19  ;;  %10863 = vmatprep.subr.bf16.mxu1 %v19714_v33 }
 0xf72   :  { %10823 = vmatpush1.bf16.msra.mxu0 %v19715_v53  ;;  %10864 = vmatpush1.bf16.msra.mxu1 %v19716_v48 }
 0xf73   :  { %10824 = vmatprep.subr.bf16.mxu0 %v19717_v15  ;;  %10865 = vmatprep.subr.bf16.mxu1 %v18852_v43  ;;  %v18974_v43 = vld [vmem:[#allocation19 + $0x4] ss:$16 sps:$4 sm:$0xff]  }
 0xf76   :  { %10825 = vmatpush1.bf16.msra.mxu0 %v19718_v44  ;;  %10866 = vmatpush1.bf16.msra.mxu1 %v18858_v34  ;;  %v18976_v34 = vld [vmem:[#allocation19 + $0xc] ss:$16 sps:$4 sm:$0xff]  }
 0xf77   :  { %10826 = vmatprep.subr.bf16.mxu0 %v18862_v42  ;;  %10867 = vmatprep.subr.bf16.mxu1 %v18864_v37  ;;  %v18978_v37 = vld [vmem:[#allocation19] ss:$16 sps:$4 sm:$0xff]   ;;  %v18980_v42 = vld [vmem:[#allocation19 + $0x8] ss:$16 sps:$4 sm:$0xff]  }
 0xf78   :  { %v15532_v10 = vpop.eup %15531 }
 0xf79   :  { %v18966_v13 = vmul.f32 %v15532_v10, %v15530_v40 }
 0xf7a   :  { %10827 = vmatpush1.bf16.msra.mxu0 %v18868_v29  ;;  %10868 = vmatpush1.bf16.msra.mxu1 %v18870_v47  ;;  %v18986_v29 = vld [vmem:[#allocation19 + $0x24] ss:$16 sps:$4 sm:$0xff]   ;;  %v18988_v47 = vld [vmem:[#allocation19 + $0x2c] ss:$16 sps:$4 sm:$0xff]  }
 0xf7b   :  { %19719 = vst [vmem:[#allocation105_spill] sm:$0xff] %v18966_v13  ;;  %v10619_v28 = vpack.c.bf16 %v18966_v13, %v18966_v13  ;;  %11145 = vmatprep.subr.bf16.mxu0 %v18974_v43  ;;  %11186 = vmatprep.subr.bf16.mxu1 %v18976_v34  ;;  %v19149_v13 = vld [vmem:[#allocation23 + $0xac] ss:$16 sps:$4 sm:$0xff]  }
 0xf7c   :  { %19731 = vst [vmem:[#allocation46_spill] sm:$0xff] %v19149_v13 }
 0xf7d   :  { %10845 = vmatmul.mubr.bf16.vlgmr.msra.gmra.mrb[172].mxu0 %v10619_v28  ;;  %10886 = vmatmul.mubr.bf16.vlgmr.msra.gmra.mrb[172].mxu1 %v10619_v28 }
 0xf7e   :  { %11177 = vmatprep.mubr.bf16.mxu0 %v19480_v51  ;;  %11218 = vmatprep.mubr.bf16.mxu1 %v19480_v51 }
 0xf7f   :  { %11146 = vmatpush1.bf16.msra.mxu0 %v18978_v37  ;;  %11187 = vmatpush1.bf16.msra.mxu1 %v18980_v42 }
 0xf80   :  { %11147 = vmatprep.subr.bf16.mxu0 %v18986_v29  ;;  %11188 = vmatprep.subr.bf16.mxu1 %v18988_v47 }
 0xf83   :  { %11148 = vmatpush1.bf16.msra.mxu0 %v18990_v3  ;;  %11189 = vmatpush1.bf16.msra.mxu1 %v18992_v7 }
 0xf84   :  { %11149 = vmatprep.subr.bf16.mxu0 %v18998_v52  ;;  %11190 = vmatprep.subr.bf16.mxu1 %v19000_v8 }
 0xf87   :  { %11150 = vmatpush1.bf16.msra.mxu0 %v19002_v62  ;;  %11191 = vmatpush1.bf16.msra.mxu1 %v19004_v2 }
 0xf88   :  { %11151 = vmatprep.subr.bf16.mxu0 %v19010_v11  ;;  %11192 = vmatprep.subr.bf16.mxu1 %v19012_v55 }
 0xf8b   :  { %11152 = vmatpush1.bf16.msra.mxu0 %v19014_v14  ;;  %11193 = vmatpush1.bf16.msra.mxu1 %v19016_v63 }
 0xf8c   :  { %11153 = vmatprep.subr.bf16.mxu0 %v19022_v58  ;;  %11194 = vmatprep.subr.bf16.mxu1 %v19024_v54 }
 0xf8f   :  { %11154 = vmatpush1.bf16.msra.mxu0 %v19026_v38  ;;  %11195 = vmatpush1.bf16.msra.mxu1 %v19028_v24 }
 0xf90   :  { %11155 = vmatprep.subr.bf16.mxu0 %v19034_v31  ;;  %11196 = vmatprep.subr.bf16.mxu1 %v19036_v61 }
 0xf93   :  { %11156 = vmatpush1.bf16.msra.mxu0 %v19038_v60  ;;  %11197 = vmatpush1.bf16.msra.mxu1 %v19040_v50 }
 0xf94   :  { %11157 = vmatprep.subr.bf16.mxu0 %v19046_v12  ;;  %11198 = vmatprep.subr.bf16.mxu1 %v19048_v18 }
 0xf97   :  { %11158 = vmatpush1.bf16.msra.mxu0 %v19050_v27  ;;  %11199 = vmatpush1.bf16.msra.mxu1 %v19052_v39 }
 0xf98   :  { %11159 = vmatprep.subr.bf16.mxu0 %v19058_v32  ;;  %11200 = vmatprep.subr.bf16.mxu1 %v19060_v59 }
 0xf9b   :  { %11160 = vmatpush1.bf16.msra.mxu0 %v19062_v41  ;;  %11201 = vmatpush1.bf16.msra.mxu1 %v19064_v36 }
 0xf9c   :  { %11428 = vmatprep.subr.bf16.mxu0 %v19070_v25  ;;  %11469 = vmatprep.subr.bf16.mxu1 %v19072_v1 }
0x1030   :  { %v10563_v56 = vpop.f32.mrb[168].mxu0  ;;  %v10604_v20 = vpop.f32.mrb[168].mxu1 }
0x1031   :  { %v10611_v45 = vadd.f32 %v10563_v56, %v19720_v9  ;;  %v10613_v5 = vadd.f32 %v10604_v20, %v19721_v4  ;;  %v10565_v6 = vpop.f32.mrb[169].mxu0  ;;  %v10606_v23 = vpop.f32.mrb[169].mxu1 }
0x1032   :  { %v10612_v35 = vadd.f32 %v10565_v6, %v19722_v30  ;;  %v10614_v57 = vadd.f32 %v10606_v23, %v19723_v49  ;;  %v10567_v16 = vpop.f32.mrb[170].mxu0  ;;  %v10608_v17 = vpop.f32.mrb[170].mxu1  ;;  %v19724_v49 = vld [vmem:[#allocation49_spill] sm:$0xff] }
0x1033   :  { %v13764_v0 = vmul.f32 -1.442695, %v10611_v45  ;;  %v10568_v19 = vpop.f32.mrb[171].mxu0  ;;  %v10609_v33 = vpop.f32.mrb[171].mxu1  ;;  %v19725_v16 = vld [vmem:[#allocation50_spill] sm:$0xff] }
0x1034   :  { %v13765_v53 = vmul.f32 -1.442695, %v10612_v35  ;;  %v13766_v48 = vmul.f32 -1.442695, %v10614_v57  ;;  %v19726_v19 = vld [vmem:[#allocation51_spill] sm:$0xff] }
0x1035   :  { %15533 = vpow2.f32 %v13764_v0 }
0x1036   :  { %15535 = vpow2.f32 %v13765_v53  ;;  %v19727_v53 = vld [vmem:[#allocation52_spill] sm:$0xff] }
0x1037   :  { %15537 = vpow2.f32 %v13766_v48 }
0x1038   :  { %15539 = vtanh.f32 %v10613_v5 }
0x103f   :  { %v15534_v15 = vpop.eup %15533 }
0x1040   :  { %v15536_v44 = vpop.eup %15535  ;;  %v10901_v40 = vadd.f32 1.0, %v15534_v15 }
0x1041   :  { %v10907_v10 = vadd.f32 1.0, %v15536_v44  ;;  %v15538_v28 = vpop.eup %15537 }
0x1042   :  { %15541 = vrcp.f32 %v10901_v40  ;;  %v15540_v56 = vpop.eup %15539  ;;  %v10914_v45 = vadd.f32 1.0, %v15538_v28 }
0x1043   :  { %15543 = vrcp.f32 %v10907_v10 }
0x1044   :  { %15545 = vrcp.f32 %v10914_v45  ;;  %v19090_v45 = vld [vmem:[#allocation23] ss:$16 sps:$4 sm:$0xff]  }
0x104c   :  { %v15542_v20 = vpop.eup %15541 }
0x104d   :  { %v15544_v9 = vpop.eup %15543  ;;  %v10918_v4 = vmul.f32 %v15542_v20, %v15540_v56 }
0x104e   :  { %v10917_v6 = vmul.f32 %v15544_v9, %v18921_v46  ;;  %v15546_v56 = vpop.eup %15545 }
0x1050   :  { %v19081_v23 = vadd.f32 %v10918_v4, %v10917_v6  ;;  %v10846_v30 = vpop.f32.mrb[172].mxu0  ;;  %v10887_v35 = vpop.f32.mrb[172].mxu1  ;;  %v19092_v6 = vld [vmem:[#allocation23 + $0x8] ss:$16 sps:$4 sm:$0xff]  }
0x1051   :  { %v10894_v57 = vadd.f32 %v10846_v30, %v19724_v49  ;;  %v10896_v5 = vadd.f32 %v10887_v35, %v19725_v16  ;;  %v10848_v17 = vpop.f32.mrb[173].mxu0  ;;  %v10889_v0 = vpop.f32.mrb[173].mxu1  ;;  %v19096_v49 = vld [vmem:[#allocation23 + $0x24] ss:$16 sps:$4 sm:$0xff]  }
0x1052   :  { %15547 = vtanh.f32 %v19081_v23  ;;  %v10895_v33 = vadd.f32 %v10848_v17, %v19726_v19  ;;  %v10897_v48 = vadd.f32 %v10889_v0, %v19727_v53  ;;  %v10850_v15 = vpop.f32.mrb[174].mxu0  ;;  %v10891_v44 = vpop.f32.mrb[174].mxu1  ;;  %v19102_v19 = vld [vmem:[#allocation23 + $0x20] ss:$16 sps:$4 sm:$0xff]   ;;  %v19108_v53 = vld [vmem:[#allocation23 + $0x44] ss:$16 sps:$4 sm:$0xff]  }
0x1053   :  { %v13767_v46 = vmul.f32 -1.442695, %v10894_v57  ;;  %v10851_v40 = vpop.f32.mrb[175].mxu0  ;;  %v10892_v10 = vpop.f32.mrb[175].mxu1  ;;  %v19098_v57 = vld [vmem:[#allocation23 + $0x2c] ss:$16 sps:$4 sm:$0xff]  }
0x1054   :  { %v13768_v28 = vmul.f32 -1.442695, %v10895_v33  ;;  %v13769_v9 = vmul.f32 -1.442695, %v10897_v48  ;;  %v19104_v33 = vld [vmem:[#allocation23 + $0x28] ss:$16 sps:$4 sm:$0xff]  }
0x1055   :  { %15549 = vpow2.f32 %v13767_v46  ;;  %v19116_v48 = vld [vmem:[#allocation23 + $0x40] ss:$16 sps:$4 sm:$0xff]   ;;  %v19118_v15 = vld [vmem:[#allocation23 + $0x48] ss:$16 sps:$4 sm:$0xff]   ;;  %v19122_v44 = vld [vmem:[#allocation23 + $0x64] ss:$16 sps:$4 sm:$0xff]  }
0x1056   :  { %15551 = vpow2.f32 %v13768_v28  ;;  %v19124_v46 = vld [vmem:[#allocation23 + $0x6c] ss:$16 sps:$4 sm:$0xff]   ;;  %v19128_v10 = vld [vmem:[#allocation23 + $0x60] ss:$16 sps:$4 sm:$0xff]   ;;  %v19130_v28 = vld [vmem:[#allocation23 + $0x68] ss:$16 sps:$4 sm:$0xff]  }
0x1057   :  { %15553 = vpow2.f32 %v13769_v9  ;;  %v19136_v9 = vld [vmem:[#allocation23 + $0x8c] ss:$16 sps:$4 sm:$0xff]  }
0x1058   :  { %15555 = vtanh.f32 %v10896_v5  ;;  %v19110_v5 = vld [vmem:[#allocation23 + $0x4c] ss:$16 sps:$4 sm:$0xff]  }
0x105c   :  { %v15548_v20 = vpop.eup %15547 }
0x105d   :  { %v19088_v4 = vmul.f32 %v15548_v20, %v15546_v56  ;;  %v19134_v20 = vld [vmem:[#allocation23 + $0x84] ss:$16 sps:$4 sm:$0xff]  }
0x105f   :  { %19728 = vst [vmem:[#allocation94_spill] sm:$0xff] %v19088_v4  ;;  %v15550_v30 = vpop.eup %15549  ;;  %v10952_v35 = vpack.c.bf16 %v19088_v4, %v19088_v4  ;;  %v19141_v4 = vld [vmem:[#allocation23 + $0x80] ss:$16 sps:$4 sm:$0xff]  }
0x1060   :  { %v15552_v16 = vpop.eup %15551  ;;  %v10925_v17 = vadd.f32 1.0, %v15550_v30 }
0x1061   :  { %v10931_v0 = vadd.f32 1.0, %v15552_v16  ;;  %11178 = vmatmul.mubr.bf16.vlgmr.msra.gmra.mrb[176].mxu0 %v10952_v35  ;;  %11219 = vmatmul.mubr.bf16.vlgmr.msra.gmra.mrb[176].mxu1 %v10952_v35  ;;  %v15554_v40 = vpop.eup %15553 }
0x1062   :  { %15557 = vrcp.f32 %v10925_v17  ;;  %11429 = vmatpush1.bf16.msra.mxu0 %v19090_v45  ;;  %11470 = vmatpush1.bf16.msra.mxu1 %v19092_v6  ;;  %v15556_v56 = vpop.eup %15555  ;;  %v10938_v17 = vadd.f32 1.0, %v15554_v40  ;;  %v19158_v40 = vld [vmem:[#allocation23 + $0xa8] ss:$16 sps:$4 sm:$0xff]  }
0x1063   :  { %15559 = vrcp.f32 %v10931_v0  ;;  %11430 = vmatprep.subr.bf16.mxu0 %v19096_v49  ;;  %11471 = vmatprep.subr.bf16.mxu1 %v19098_v57  ;;  %19733 = vst [vmem:[#allocation87_spill] sm:$0xff] %v19158_v40 }
0x1064   :  { %11460 = vmatprep.mubr.bf16.mxu0 %v19480_v51  ;;  %11501 = vmatprep.mubr.bf16.mxu1 %v19480_v51  ;;  %15561 = vrcp.f32 %v10938_v17  ;;  %v19170_v17 = vld [vmem:[#allocation23 + $0xc8] ss:$16 sps:$4 sm:$0xff]  }
0x1066   :  { %11431 = vmatpush1.bf16.msra.mxu0 %v19102_v19  ;;  %11472 = vmatpush1.bf16.msra.mxu1 %v19104_v33 }
0x1067   :  { %11432 = vmatprep.subr.bf16.mxu0 %v19108_v53  ;;  %11473 = vmatprep.subr.bf16.mxu1 %v19110_v5 }
0x106a   :  { %11433 = vmatpush1.bf16.msra.mxu0 %v19116_v48  ;;  %11474 = vmatpush1.bf16.msra.mxu1 %v19118_v15 }
0x106b   :  { %11434 = vmatprep.subr.bf16.mxu0 %v19122_v44  ;;  %11475 = vmatprep.subr.bf16.mxu1 %v19124_v46 }
0x106c   :  { %v15558_v30 = vpop.eup %15557 }
0x106d   :  { %v15560_v35 = vpop.eup %15559  ;;  %v10942_v16 = vmul.f32 %v15558_v30, %v15556_v56  ;;  %v19162_v30 = vld [vmem:[#allocation23 + $0xc4] ss:$16 sps:$4 sm:$0xff]  }
0x106e   :  { %v10941_v0 = vmul.f32 %v15560_v35, %v18951_v21  ;;  %11435 = vmatpush1.bf16.msra.mxu0 %v19128_v10  ;;  %11476 = vmatpush1.bf16.msra.mxu1 %v19130_v28  ;;  %v19156_v21 = vld [vmem:[#allocation23 + $0xa0] ss:$16 sps:$4 sm:$0xff]   ;;  %19734 = vst [vmem:[#allocation81_spill] sm:$0xff] %v19162_v30  ;;  %v19164_v35 = vld [vmem:[#allocation23 + $0xcc] ss:$16 sps:$4 sm:$0xff]  }
0x106f   :  { %11436 = vmatprep.subr.bf16.mxu0 %v19134_v20  ;;  %11477 = vmatprep.subr.bf16.mxu1 %v19136_v9  ;;  %19732 = vst [vmem:[#allocation45_spill] sm:$0xff] %v19156_v21 }
0x1070   :  { %v19151_v56 = vadd.f32 %v10942_v16, %v10941_v0  ;;  %v19168_v16 = vld [vmem:[#allocation23 + $0xc0] ss:$16 sps:$4 sm:$0xff]   ;;  %v19174_v0 = vld [vmem:[#allocation23 + $0xe4] ss:$16 sps:$4 sm:$0xff]  }
0x1071   :  { %19735 = vst [vmem:[#allocation82_spill] sm:$0xff] %v19168_v16 }
0x1072   :  { %15563 = vtanh.f32 %v19151_v56  ;;  %11437 = vmatpush1.bf16.msra.mxu0 %v19141_v4  ;;  %11478 = vmatpush1.bf16.msra.mxu1 %v19143_v26 }
0x1073   :  { %11438 = vmatprep.subr.bf16.mxu0 %v19147_v22  ;;  %11479 = vmatprep.subr.bf16.mxu1 %v19149_v13  ;;  %v19176_v22 = vld [vmem:[#allocation23 + $0xec] ss:$16 sps:$4 sm:$0xff]   ;;  %v19180_v13 = vld [vmem:[#allocation23 + $0xe0] ss:$16 sps:$4 sm:$0xff]  }
0x1076   :  { %11439 = vmatpush1.bf16.msra.mxu0 %v19156_v21  ;;  %11480 = vmatpush1.bf16.msra.mxu1 %v19158_v40  ;;  %v19182_v21 = vld [vmem:[#allocation23 + $0xe8] ss:$16 sps:$4 sm:$0xff]   ;;  %v15562_v40 = vpop.eup %15561 }
0x1077   :  { %11440 = vmatprep.subr.bf16.mxu0 %v19162_v30  ;;  %11481 = vmatprep.subr.bf16.mxu1 %v19164_v35 }
0x107a   :  { %11441 = vmatpush1.bf16.msra.mxu0 %v19168_v16  ;;  %11482 = vmatpush1.bf16.msra.mxu1 %v19170_v17 }
0x107b   :  { %11442 = vmatprep.subr.bf16.mxu0 %v19174_v0  ;;  %11483 = vmatprep.subr.bf16.mxu1 %v19176_v22 }
0x107c   :  { %v15564_v30 = vpop.eup %15563 }
0x107d   :  { %v19186_v26 = vmul.f32 %v15564_v30, %v15562_v40  ;;  %v19741_v30 = vld [vmem:[#allocation75_spill] sm:$0xff] }
0x107e   :  { %11443 = vmatpush1.bf16.msra.mxu0 %v19180_v13  ;;  %11484 = vmatpush1.bf16.msra.mxu1 %v19182_v21 }
0x107f   :  { %v11235_v16 = vpack.c.bf16 %v19186_v26, %v19186_v26  ;;  %11761 = vmatprep.subr.bf16.mxu0 %v18974_v43  ;;  %11802 = vmatprep.subr.bf16.mxu1 %v18976_v34 }
0x1081   :  { %11461 = vmatmul.mubr.bf16.vlgmr.msra.gmra.mrb[180].mxu0 %v11235_v16  ;;  %11502 = vmatmul.mubr.bf16.vlgmr.msra.gmra.mrb[180].mxu1 %v11235_v16 }
0x1082   :  { %11762 = vmatpush1.bf16.msra.mxu0 %v18978_v37  ;;  %11803 = vmatpush1.bf16.msra.mxu1 %v18980_v42  ;;  %v19736_v37 = vld [vmem:[#allocation58_spill] sm:$0xff] }
0x1083   :  { %11763 = vmatprep.subr.bf16.mxu0 %v18986_v29  ;;  %11804 = vmatprep.subr.bf16.mxu1 %v18988_v47  ;;  %v19737_v29 = vld [vmem:[#allocation59_spill] sm:$0xff] }
0x1084   :  { %11793 = vmatprep.mubr.bf16.mxu0 %v19480_v51  ;;  %11834 = vmatprep.mubr.bf16.mxu1 %v19480_v51 }
0x1086   :  { %11764 = vmatpush1.bf16.msra.mxu0 %v18990_v3  ;;  %11805 = vmatpush1.bf16.msra.mxu1 %v18992_v7 }
0x1087   :  { %11765 = vmatprep.subr.bf16.mxu0 %v18998_v52  ;;  %11806 = vmatprep.subr.bf16.mxu1 %v19000_v8  ;;  %v19738_v52 = vld [vmem:[#allocation60_spill] sm:$0xff] }
0x108a   :  { %11766 = vmatpush1.bf16.msra.mxu0 %v19002_v62  ;;  %11807 = vmatpush1.bf16.msra.mxu1 %v19004_v2  ;;  %v19739_v62 = vld [vmem:[#allocation77_spill] sm:$0xff] }
0x108b   :  { %11767 = vmatprep.subr.bf16.mxu0 %v19010_v11  ;;  %11808 = vmatprep.subr.bf16.mxu1 %v19012_v55 }
0x108e   :  { %11768 = vmatpush1.bf16.msra.mxu0 %v19014_v14  ;;  %11809 = vmatpush1.bf16.msra.mxu1 %v19016_v63 }
0x108f   :  { %11769 = vmatprep.subr.bf16.mxu0 %v19022_v58  ;;  %11810 = vmatprep.subr.bf16.mxu1 %v19024_v54 }
0x1092   :  { %11770 = vmatpush1.bf16.msra.mxu0 %v19026_v38  ;;  %11811 = vmatpush1.bf16.msra.mxu1 %v19028_v24 }
0x1093   :  { %11771 = vmatprep.subr.bf16.mxu0 %v19034_v31  ;;  %11812 = vmatprep.subr.bf16.mxu1 %v19036_v61 }
0x1096   :  { %11772 = vmatpush1.bf16.msra.mxu0 %v19038_v60  ;;  %11813 = vmatpush1.bf16.msra.mxu1 %v19040_v50 }
0x1097   :  { %11773 = vmatprep.subr.bf16.mxu0 %v19046_v12  ;;  %11814 = vmatprep.subr.bf16.mxu1 %v19048_v18 }
0x109a   :  { %11774 = vmatpush1.bf16.msra.mxu0 %v19050_v27  ;;  %11815 = vmatpush1.bf16.msra.mxu1 %v19052_v39 }
0x109b   :  { %11775 = vmatprep.subr.bf16.mxu0 %v19058_v32  ;;  %11816 = vmatprep.subr.bf16.mxu1 %v19060_v59 }
0x109e   :  { %11776 = vmatpush1.bf16.msra.mxu0 %v19062_v41  ;;  %11817 = vmatpush1.bf16.msra.mxu1 %v19064_v36 }
0x109f   :  { %12044 = vmatprep.subr.bf16.mxu0 %v19070_v25  ;;  %12085 = vmatprep.subr.bf16.mxu1 %v19072_v1  ;;  %v19740_v1 = vld [vmem:[#allocation74_spill] sm:$0xff] }
0x1134   :  { %v11179_v43 = vpop.f32.mrb[176].mxu0  ;;  %v11220_v34 = vpop.f32.mrb[176].mxu1 }
0x1135   :  { %v11227_v42 = vadd.f32 %v11179_v43, %v19736_v37  ;;  %v11229_v47 = vadd.f32 %v11220_v34, %v19737_v29  ;;  %v11181_v3 = vpop.f32.mrb[177].mxu0  ;;  %v11222_v7 = vpop.f32.mrb[177].mxu1  ;;  %v19742_v37 = vld [vmem:[#allocation76_spill] sm:$0xff] }
0x1136   :  { %v11228_v8 = vadd.f32 %v11181_v3, %v19738_v52  ;;  %v11230_v2 = vadd.f32 %v11222_v7, %v19739_v62  ;;  %v11183_v11 = vpop.f32.mrb[178].mxu0  ;;  %v11224_v55 = vpop.f32.mrb[178].mxu1  ;;  %v19743_v29 = vld [vmem:[#allocation104_spill] sm:$0xff] }
0x1137   :  { %v13834_v14 = vmul.f32 -1.442695, %v11227_v42  ;;  %v11184_v63 = vpop.f32.mrb[179].mxu0  ;;  %v11225_v58 = vpop.f32.mrb[179].mxu1 }
0x1138   :  { %v13835_v54 = vmul.f32 -1.442695, %v11228_v8  ;;  %v13836_v38 = vmul.f32 -1.442695, %v11230_v2 }
0x1139   :  { %15565 = vpow2.f32 %v13834_v14 }
0x113a   :  { %15567 = vpow2.f32 %v13835_v54 }
0x113b   :  { %15569 = vpow2.f32 %v13836_v38 }
0x113c   :  { %15571 = vtanh.f32 %v11229_v47 }
0x1143   :  { %v15566_v24 = vpop.eup %15565 }
0x1144   :  { %v15568_v31 = vpop.eup %15567  ;;  %v11517_v61 = vadd.f32 1.0, %v15566_v24 }
0x1145   :  { %v11523_v60 = vadd.f32 1.0, %v15568_v31  ;;  %v15570_v50 = vpop.eup %15569  ;;  %v15094_v31 = vld [vmem:[#allocation26] sm:$0xff]  }
0x1146   :  { %15573 = vrcp.f32 %v11517_v61  ;;  %v15572_v12 = vpop.eup %15571  ;;  %v11530_v32 = vadd.f32 1.0, %v15570_v50  ;;  %v15098_v61 = vld [vmem:[#allocation26 + $0x10] sm:$0xff]   ;;  %v15102_v50 = vld [vmem:[#allocation26 + $0x20] sm:$0xff]  }
0x1147   :  { %15575 = vrcp.f32 %v11523_v60  ;;  %v15100_v60 = vld [vmem:[#allocation26 + $0x18] sm:$0xff]  }
0x1148   :  { %15577 = vrcp.f32 %v11530_v32  ;;  %v15107_v32 = vld [vmem:[#allocation26 + $0x78] sm:$0xff]  }
0x1150   :  { %v15574_v18 = vpop.eup %15573 }
0x1151   :  { %v15576_v27 = vpop.eup %15575  ;;  %v11534_v39 = vmul.f32 %v15574_v18, %v15572_v12  ;;  %v15103_v12 = vld [vmem:[#allocation26 + $0x68] sm:$0xff]  }
0x1152   :  { %v11533_v59 = vmul.f32 %v15576_v27, %v19081_v23  ;;  %v15578_v2 = vpop.eup %15577  ;;  %v15104_v18 = vld [vmem:[#allocation26 + $0x28] sm:$0xff]   ;;  %v15105_v27 = vld [vmem:[#allocation26 + $0x70] sm:$0xff]  }
0x1154   :  { %v19233_v41 = vadd.f32 %v11534_v39, %v11533_v59  ;;  %v11462_v36 = vpop.f32.mrb[180].mxu0  ;;  %v11503_v25 = vpop.f32.mrb[180].mxu1  ;;  %v15106_v39 = vld [vmem:[#allocation26 + $0x30] sm:$0xff]   ;;  %v15108_v59 = vld [vmem:[#allocation26 + $0x38] sm:$0xff]  }
0x1155   :  { %v11510_v40 = vadd.f32 %v11462_v36, %v19740_v1  ;;  %v11512_v16 = vadd.f32 %v11503_v25, %v19741_v30  ;;  %v11464_v43 = vpop.f32.mrb[181].mxu0  ;;  %v11505_v34 = vpop.f32.mrb[181].mxu1  ;;  %v15109_v36 = vld [vmem:[#allocation29] sm:$0xff]   ;;  %v15110_v25 = vld [vmem:[#allocation29 + $0x8] sm:$0xff]   ;;  %v15111_v1 = vld [vmem:[#allocation29 + $0x10] sm:$0xff]  }
0x1156   :  { %15579 = vtanh.f32 %v19233_v41  ;;  %v11511_v42 = vadd.f32 %v11464_v43, %v19742_v37  ;;  %v11513_v47 = vadd.f32 %v11505_v34, %v19743_v29  ;;  %v11466_v3 = vpop.f32.mrb[182].mxu0  ;;  %v11507_v7 = vpop.f32.mrb[182].mxu1  ;;  %v19751_v43 = vld [vmem:[#allocation78_spill] sm:$0xff]  ;;  %v19752_v37 = vld [vmem:[#allocation79_spill] sm:$0xff] }
0x1157   :  { %v13837_v23 = vmul.f32 -1.442695, %v11510_v40  ;;  %v11467_v52 = vpop.f32.mrb[183].mxu0  ;;  %v11508_v8 = vpop.f32.mrb[183].mxu1  ;;  %v15112_v40 = vld [vmem:[#allocation29 + $0x18] sm:$0xff]   ;;  %v19753_v3 = vld [vmem:[#allocation80_spill] sm:$0xff] }
0x1158   :  { %v13838_v62 = vmul.f32 -1.442695, %v11511_v42  ;;  %v13839_v55 = vmul.f32 -1.442695, %v11513_v47 }
0x1159   :  { %15581 = vpow2.f32 %v13837_v23  ;;  %v19754_v23 = vld [vmem:[#allocation61_spill] sm:$0xff] }
0x115a   :  { %15583 = vpow2.f32 %v13838_v62 }
0x115b   :  { %15585 = vpow2.f32 %v13839_v55 }
0x115c   :  { %15587 = vtanh.f32 %v11512_v16 }
0x1160   :  { %v15580_v11 = vpop.eup %15579 }
0x1161   :  { %v19240_v14 = vmul.f32 %v15580_v11, %v15578_v2 }
0x1163   :  { %v15582_v63 = vpop.eup %15581  ;;  %v11568_v58 = vpack.c.bf16 %v19240_v14, %v19240_v14 }
0x1164   :  { %v15584_v54 = vpop.eup %15583  ;;  %v11541_v38 = vadd.f32 1.0, %v15582_v63 }
0x1165   :  { %v11547_v24 = vadd.f32 1.0, %v15584_v54  ;;  %11794 = vmatmul.mubr.bf16.vlgmr.msra.gmra.mrb[184].mxu0 %v11568_v58  ;;  %11835 = vmatmul.mubr.bf16.vlgmr.msra.gmra.mrb[184].mxu1 %v11568_v58 }
0x1166   :  { %15589 = vrcp.f32 %v11541_v38  ;;  %12045 = vmatpush1.bf16.msra.mxu0 %v19090_v45  ;;  %12086 = vmatpush1.bf16.msra.mxu1 %v19092_v6  ;;  %v15586_v45 = vpop.eup %15585 }
0x1167   :  { %15591 = vrcp.f32 %v11547_v24  ;;  %12046 = vmatprep.subr.bf16.mxu0 %v19096_v49  ;;  %12087 = vmatprep.subr.bf16.mxu1 %v19098_v57  ;;  %v15588_v6 = vpop.eup %15587 }
0x1168   :  { %12076 = vmatprep.mubr.bf16.mxu0 %v19480_v51  ;;  %12117 = vmatprep.mubr.bf16.mxu1 %v19480_v51 }
0x116a   :  { %12047 = vmatpush1.bf16.msra.mxu0 %v19102_v19  ;;  %12088 = vmatpush1.bf16.msra.mxu1 %v19104_v33  ;;  %v11554_v19 = vadd.f32 1.0, %v15586_v45 }
0x116b   :  { %12048 = vmatprep.subr.bf16.mxu0 %v19108_v53  ;;  %12089 = vmatprep.subr.bf16.mxu1 %v19110_v5  ;;  %v19744_v5 = vld [vmem:[#allocation43_spill] sm:$0xff] }
0x116c   :  { %15593 = vrcp.f32 %v11554_v19 }
0x116e   :  { %12049 = vmatpush1.bf16.msra.mxu0 %v19116_v48  ;;  %12090 = vmatpush1.bf16.msra.mxu1 %v19118_v15  ;;  %v19745_v48 = vld [vmem:[#allocation44_spill] sm:$0xff]  ;;  %v19746_v15 = vld [vmem:[#allocation46_spill] sm:$0xff] }
0x116f   :  { %12050 = vmatprep.subr.bf16.mxu0 %v19122_v44  ;;  %12091 = vmatprep.subr.bf16.mxu1 %v19124_v46  ;;  %v19747_v44 = vld [vmem:[#allocation45_spill] sm:$0xff]  ;;  %v19748_v46 = vld [vmem:[#allocation87_spill] sm:$0xff] }
0x1170   :  { %v15590_v49 = vpop.eup %15589 }
0x1171   :  { %v15592_v51 = vpop.eup %15591  ;;  %v11558_v57 = vmul.f32 %v15590_v49, %v15588_v6 }
0x1172   :  { %v11557_v33 = vmul.f32 %v15592_v51, %v19151_v56  ;;  %12051 = vmatpush1.bf16.msra.mxu0 %v19128_v10  ;;  %12092 = vmatpush1.bf16.msra.mxu1 %v19130_v28  ;;  %v19749_v10 = vld [vmem:[#allocation81_spill] sm:$0xff]  ;;  %v19750_v28 = vld [vmem:[#allocation82_spill] sm:$0xff] }
0x1173   :  { %12052 = vmatprep.subr.bf16.mxu0 %v19134_v20  ;;  %12093 = vmatprep.subr.bf16.mxu1 %v19136_v9 }
0x1174   :  { %v19263_v53 = vadd.f32 %v11558_v57, %v11557_v33 }
0x1176   :  { %15595 = vtanh.f32 %v19263_v53  ;;  %12053 = vmatpush1.bf16.msra.mxu0 %v19141_v4  ;;  %12094 = vmatpush1.bf16.msra.mxu1 %v19744_v5  ;;  %v15594_v20 = vpop.eup %15593 }
0x1177   :  { %12054 = vmatprep.subr.bf16.mxu0 %v19745_v48  ;;  %12095 = vmatprep.subr.bf16.mxu1 %v19746_v15 }
0x117a   :  { %12055 = vmatpush1.bf16.msra.mxu0 %v19747_v44  ;;  %12096 = vmatpush1.bf16.msra.mxu1 %v19748_v46  ;;  %v19755_v46 = vld [vmem:[#allocation62_spill] sm:$0xff] }
0x117b   :  { %12056 = vmatprep.subr.bf16.mxu0 %v19749_v10  ;;  %12097 = vmatprep.subr.bf16.mxu1 %v19164_v35  ;;  %v15093_v35 = vld [vmem:[#allocation26 + $0x40] sm:$0xff]  }
0x117e   :  { %12057 = vmatpush1.bf16.msra.mxu0 %v19750_v28  ;;  %12098 = vmatpush1.bf16.msra.mxu1 %v19170_v17  ;;  %v15095_v17 = vld [vmem:[#allocation26 + $0x48] sm:$0xff]  }
0x117f   :  { %12058 = vmatprep.subr.bf16.mxu0 %v19174_v0  ;;  %12099 = vmatprep.subr.bf16.mxu1 %v19176_v22  ;;  %v15096_v0 = vld [vmem:[#allocation26 + $0x8] sm:$0xff]   ;;  %v15097_v22 = vld [vmem:[#allocation26 + $0x50] sm:$0xff]  }
0x1180   :  { %v15596_v4 = vpop.eup %15595  ;;  %v19756_v28 = vld [vmem:[#allocation63_spill] sm:$0xff] }
0x1181   :  { %v19278_v9 = vmul.f32 %v15596_v4, %v15594_v20 }
0x1182   :  { %12059 = vmatpush1.bf16.msra.mxu0 %v19180_v13  ;;  %12100 = vmatpush1.bf16.msra.mxu1 %v19182_v21  ;;  %v15099_v13 = vld [vmem:[#allocation26 + $0x58] sm:$0xff]   ;;  %v15101_v21 = vld [vmem:[#allocation26 + $0x60] sm:$0xff]  }
0x1183   :  { %v11851_v56 = vpack.c.bf16 %v19278_v9, %v19278_v9  ;;  %13936 = vmatprep.subr.bf16.mxu0 %v15093_v35  ;;  %13988 = vmatprep.subr.bf16.mxu1 %v15109_v36  ;;  %v19757_v35 = vld [vmem:[#allocation64_spill] sm:$0xff] }
0x1185   :  { %12077 = vmatmul.mubr.bf16.vlgmr.msra.gmra.mrb[188].mxu0 %v11851_v56  ;;  %12118 = vmatmul.mubr.bf16.vlgmr.msra.gmra.mrb[188].mxu1 %v11851_v56 }
0x1186   :  { %13937 = vmatpush3.bf16.msra.mxu0 %v15094_v31  ;;  %13989 = vmatpush3.bf16.msra.mxu1 %v15109_v36 }
0x1187   :  { %13938 = vmatprep.subr.bf16.mxu0 %v15095_v17  ;;  %13990 = vmatprep.subr.bf16.mxu1 %v15110_v25  ;;  %v19758_v17 = vld [vmem:[#allocation73_spill] sm:$0xff] }
0x118a   :  { %13939 = vmatpush3.bf16.msra.mxu0 %v15096_v0  ;;  %13991 = vmatpush3.bf16.msra.mxu1 %v15110_v25 }
0x118b   :  { %13940 = vmatprep.subr.bf16.mxu0 %v15097_v22  ;;  %13992 = vmatprep.subr.bf16.mxu1 %v15111_v1 }
0x118e   :  { %13941 = vmatpush3.bf16.msra.mxu0 %v15098_v61  ;;  %13993 = vmatpush3.bf16.msra.mxu1 %v15111_v1 }
0x118f   :  { %13942 = vmatprep.subr.bf16.mxu0 %v15099_v13  ;;  %13994 = vmatprep.subr.bf16.mxu1 %v15112_v40 }
0x1192   :  { %13943 = vmatpush3.bf16.msra.mxu0 %v15100_v60  ;;  %13995 = vmatpush3.bf16.msra.mxu1 %v15112_v40 }
0x1193   :  { %13944 = vmatprep.subr.bf16.mxu0 %v15101_v21 }
0x1196   :  { %13945 = vmatpush3.bf16.msra.mxu0 %v15102_v50 }
0x1197   :  { %13946 = vmatprep.subr.bf16.mxu0 %v15103_v12 }
0x119a   :  { %13947 = vmatpush3.bf16.msra.mxu0 %v15104_v18 }
0x119b   :  { %13948 = vmatprep.subr.bf16.mxu0 %v15105_v27 }
0x119e   :  { %13949 = vmatpush3.bf16.msra.mxu0 %v15106_v39 }
0x119f   :  { %13950 = vmatprep.subr.bf16.mxu0 %v15107_v32 }
0x11a2   :  { %13951 = vmatpush3.bf16.msra.mxu0 %v15108_v59 }
0x1238   :  { %v11795_v30 = vpop.f32.mrb[184].mxu0  ;;  %v11836_v16 = vpop.f32.mrb[184].mxu1 }
0x1239   :  { %v11843_v34 = vadd.f32 %v11795_v30, %v19751_v43  ;;  %v11845_v42 = vadd.f32 %v11836_v16, %v19752_v37  ;;  %v11797_v29 = vpop.f32.mrb[185].mxu0  ;;  %v11838_v47 = vpop.f32.mrb[185].mxu1 }
0x123a   :  { %v11844_v7 = vadd.f32 %v11797_v29, %v19753_v3  ;;  %v11846_v52 = vadd.f32 %v11838_v47, %v19754_v23  ;;  %v11799_v8 = vpop.f32.mrb[186].mxu0  ;;  %v11840_v62 = vpop.f32.mrb[186].mxu1  ;;  %v19760_v23 = vld [vmem:[#allocation103_spill] sm:$0xff] }
0x123b   :  { %v13904_v2 = vmul.f32 -1.442695, %v11843_v34  ;;  %v11800_v11 = vpop.f32.mrb[187].mxu0  ;;  %v11841_v55 = vpop.f32.mrb[187].mxu1  ;;  %v19761_v8 = vld [vmem:[#allocation105_spill] sm:$0xff] }
0x123c   :  { %v13905_v63 = vmul.f32 -1.442695, %v11844_v7  ;;  %v13906_v58 = vmul.f32 -1.442695, %v11846_v52  ;;  %v19759_v7 = vld [vmem:[#allocation48_spill] sm:$0xff]  ;;  %v12199_v62 = vpack.c.bf16 %v19761_v8, %v19186_v26  ;;  %v19763_v11 = vld [vmem:[#allocation89_spill] sm:$0xff] }
0x123d   :  { %15597 = vpow2.f32 %v13904_v2  ;;  %v12196_v52 = vpack.c.bf16 %v19760_v23, %v19759_v7  ;;  %v19762_v2 = vld [vmem:[#allocation102_spill] sm:$0xff]  ;;  %v19764_v55 = vld [vmem:[#allocation93_spill] sm:$0xff] }
0x123e   :  { %15599 = vpow2.f32 %v13905_v63  ;;  %v19765_v63 = vld [vmem:[#allocation47_spill] sm:$0xff] }
0x123f   :  { %15601 = vpow2.f32 %v13906_v58  ;;  %v12201_v58 = vpack.c.bf16 %v19765_v63, %v19764_v55 }
0x1240   :  { %15603 = vtanh.f32 %v11845_v42 }
0x1247   :  { %v15598_v54 = vpop.eup %15597 }
0x1248   :  { %v15600_v38 = vpop.eup %15599  ;;  %v12133_v24 = vadd.f32 1.0, %v15598_v54  ;;  %v19766_v54 = vld [vmem:[#allocation95_spill] sm:$0xff] }
0x1249   :  { %v12139_v45 = vadd.f32 1.0, %v15600_v38  ;;  %v15602_v6 = vpop.eup %15601  ;;  %v19767_v38 = vld [vmem:[#allocation94_spill] sm:$0xff] }
0x124a   :  { %15605 = vrcp.f32 %v12133_v24  ;;  %v15604_v49 = vpop.eup %15603  ;;  %v12146_v33 = vadd.f32 1.0, %v15602_v6  ;;  %v19768_v24 = vld [vmem:[#allocation88_spill] sm:$0xff] }
0x124b   :  { %15607 = vrcp.f32 %v12139_v45  ;;  %v19769_v45 = vld [vmem:[#allocation101_spill] sm:$0xff] }
0x124c   :  { %15609 = vrcp.f32 %v12146_v33  ;;  %v12203_v6 = vpack.c.bf16 %v19769_v45, %v19768_v24 }
0x1254   :  { %v15606_v51 = vpop.eup %15605 }
0x1255   :  { %v15608_v57 = vpop.eup %15607  ;;  %v12150_v19 = vmul.f32 %v15606_v51, %v15604_v49  ;;  %v15113_v49 = vld [vmem:[#allocation29 + $0x20] sm:$0xff]   ;;  %v15114_v51 = vld [vmem:[#allocation29 + $0x28] sm:$0xff]  }
0x1256   :  { %v12149_v5 = vmul.f32 %v15608_v57, %v19233_v41  ;;  %v15610_v50 = vpop.eup %15609  ;;  %13996 = vmatprep.subr.bf16.mxu1 %v15113_v49  ;;  %v15115_v57 = vld [vmem:[#allocation29 + $0x30] sm:$0xff]  }
0x1257   :  { %13997 = vmatpush3.bf16.msra.mxu1 %v15113_v49 }
0x1258   :  { %v12078_v48 = vpop.f32.mrb[188].mxu0  ;;  %v12119_v15 = vpop.f32.mrb[188].mxu1  ;;  %v12151_v44 = vadd.f32 %v12150_v19, %v12149_v5  ;;  %13998 = vmatprep.subr.bf16.mxu1 %v15114_v51  ;;  %v15116_v19 = vld [vmem:[#allocation29 + $0x38] sm:$0xff]  }
0x1259   :  { %v12126_v10 = vadd.f32 %v12078_v48, %v19755_v46  ;;  %v12128_v20 = vadd.f32 %v12119_v15, %v19756_v28  ;;  %v12080_v4 = vpop.f32.mrb[189].mxu0  ;;  %v12121_v56 = vpop.f32.mrb[189].mxu1 }
0x125a   :  { %v12127_v31 = vadd.f32 %v12080_v4, %v19757_v35  ;;  %v12129_v0 = vadd.f32 %v12121_v56, %v19758_v17  ;;  %v12082_v22 = vpop.f32.mrb[190].mxu0  ;;  %v12123_v61 = vpop.f32.mrb[190].mxu1  ;;  %15611 = vtanh.f32 %v12151_v44  ;;  %v13910_v44 = vld [vmem:[#allocation28] ss:$0 sm:$0xff] }
0x125b   :  { %v13907_v13 = vmul.f32 -1.442695, %v12126_v10  ;;  %v12083_v60 = vpop.f32.mrb[191].mxu0  ;;  %v12124_v41 = vpop.f32.mrb[191].mxu1  ;;  %13999 = vmatpush3.bf16.msra.mxu1 %v15114_v51 }
0x125c   :  { %v13908_v21 = vmul.f32 -1.442695, %v12127_v31  ;;  %v13909_v18 = vmul.f32 -1.442695, %v12129_v0  ;;  %14000 = vmatprep.subr.bf16.mxu1 %v15115_v57 }
0x125d   :  { %15613 = vpow2.f32 %v13907_v13 }
0x125e   :  { %15615 = vpow2.f32 %v13908_v21 }
0x125f   :  { %15617 = vpow2.f32 %v13909_v18  ;;  %14001 = vmatpush3.bf16.msra.mxu1 %v15115_v57 }
0x1260   :  { %15619 = vtanh.f32 %v12128_v20  ;;  %14002 = vmatprep.subr.bf16.mxu1 %v15116_v19 }
0x1263   :  { %14003 = vmatpush3.bf16.msra.mxu1 %v15116_v19 }
0x1264   :  { %v15612_v12 = vpop.eup %15611 }
0x1265   :  { %v12153_v27 = vmul.f32 %v15612_v12, %v15610_v50 }
0x1267   :  { %v15614_v39 = vpop.eup %15613  ;;  %v12202_v26 = vpack.c.bf16 %v12153_v27, %v19240_v14 }
0x1268   :  { %v15616_v32 = vpop.eup %15615  ;;  %v12157_v59 = vadd.f32 1.0, %v15614_v39 }
0x1269   :  { %v12163_v36 = vadd.f32 1.0, %v15616_v32  ;;  %v15618_v25 = vpop.eup %15617 }
0x126a   :  { %15621 = vrcp.f32 %v12157_v59  ;;  %v15620_v1 = vpop.eup %15619  ;;  %v12170_v43 = vadd.f32 1.0, %v15618_v25 }
0x126b   :  { %15623 = vrcp.f32 %v12163_v36 }
0x126c   :  { %15625 = vrcp.f32 %v12170_v43 }
0x1274   :  { %v15622_v40 = vpop.eup %15621 }
0x1275   :  { %v15624_v30 = vpop.eup %15623  ;;  %v12174_v16 = vmul.f32 %v15622_v40, %v15620_v1 }
0x1276   :  { %v12173_v34 = vmul.f32 %v15624_v30, %v19263_v53  ;;  %v15626_v42 = vpop.eup %15625  ;;  %v12198_v53 = vpack.c.bf16 %v19763_v11, %v19762_v2 }
0x1278   :  { %v12175_v37 = vadd.f32 %v12174_v16, %v12173_v34 }
0x127a   :  { %15627 = vtanh.f32 %v12175_v37  ;;  %v13927_v37 = vld [vmem:[#allocation31] ss:$0 sm:$0xff] }
0x1284   :  { %v15628_v29 = vpop.eup %15627 }
0x1285   :  { %v12177_v47 = vmul.f32 %v15628_v29, %v15626_v42 }
0x1287   :  { %v12197_v3 = vpack.c.bf16 %v19278_v9, %v12177_v47  ;;  %v12200_v9 = vpack.c.bf16 %v19767_v38, %v19766_v54 }
0x1289   :  { %12371 = vmatprep.mubr.bf16.mxu0 %v12197_v3 }
0x128a   :  { %12372 = vmatmul.mubr.bf16.vlgmr.msra.gmra.mrb[192].mxu0 %v12196_v52 }
0x128b   :  { %12379 = vmatprep.mubr.bf16.mxu0 %v12199_v62 }
0x1292   :  { %12380 = vmatmul.mubr.bf16.gmra.mrb[196].mxu0 %v12198_v53 }
0x1293   :  { %12387 = vmatprep.mubr.bf16.mxu0 %v12201_v58 }
0x129a   :  { %12388 = vmatmul.mubr.bf16.gmra.mrb[200].mxu0 %v12200_v9 }
0x129b   :  { %12395 = vmatprep.mubr.bf16.mxu0 %v12203_v6 }
0x12a2   :  { %12396 = vmatmul.mubr.bf16.gmra.mrb[204].mxu0 %v12202_v26 }
0x135d   :  { %v13952_v33 = vpop.f32.mrb[192].mxu0 }
0x135e   :  { %v13953_v5 = vpop.f32.mrb[193].mxu0 }
0x135f   :  { %v13954_v48 = vadd.f32 %v13953_v5, %v13952_v33  ;;  %v13955_v15 = vpop.f32.mrb[194].mxu0 }
0x1360   :  { %v13956_v46 = vpop.f32.mrb[195].mxu0 }
0x1361   :  { %v13957_v14 = vadd.f32 %v13956_v46, %v13955_v15  ;;  %v12374_v10 = vadd.f32 %v13954_v48, %v13910_v44 }
0x1363   :  { %v12377_v28 = vadd.f32 %v13957_v14, %v13910_v44 }
0x1365   :  { %v13958_v20 = vpop.f32.mrb[196].mxu0  ;;  %v12404_v4 = vpack.c.bf16 %v12377_v28, %v12374_v10 }
0x1366   :  { %v13959_v56 = vpop.f32.mrb[197].mxu0 }
0x1367   :  { %v13960_v35 = vadd.f32 %v13959_v56, %v13958_v20  ;;  %v13961_v31 = vpop.f32.mrb[198].mxu0  ;;  %14004 = vmatprep.mubr.bf16.mxu1 %v12404_v4 }
0x1368   :  { %v13962_v17 = vpop.f32.mrb[199].mxu0 }
0x1369   :  { %v13963_v0 = vadd.f32 %v13962_v17, %v13961_v31  ;;  %v12382_v22 = vadd.f32 %v13960_v35, %v13910_v44 }
0x136b   :  { %v12385_v61 = vadd.f32 %v13963_v0, %v13910_v44 }
0x136d   :  { %v12405_v13 = vpack.c.bf16 %v12385_v61, %v12382_v22  ;;  %v13964_v60 = vpop.f32.mrb[200].mxu0 }
0x136e   :  { %v13965_v41 = vpop.f32.mrb[201].mxu0 }
0x136f   :  { %v13966_v21 = vadd.f32 %v13965_v41, %v13964_v60  ;;  %v13967_v50 = vpop.f32.mrb[202].mxu0  ;;  %14005 = vmatmul.mubr.bf16.vlgmr.msra.gmra.mrb[192].mxu1 %v12405_v13 }
0x1370   :  { %v13968_v12 = vpop.f32.mrb[203].mxu0 }
0x1371   :  { %v13969_v18 = vadd.f32 %v13968_v12, %v13967_v50  ;;  %v12390_v27 = vadd.f32 %v13966_v21, %v13910_v44 }
0x1373   :  { %v12393_v39 = vadd.f32 %v13969_v18, %v13910_v44 }
0x1375   :  { %v13970_v32 = vpop.f32.mrb[204].mxu0  ;;  %v12406_v59 = vpack.c.bf16 %v12393_v39, %v12390_v27 }
0x1376   :  { %v13971_v36 = vpop.f32.mrb[205].mxu0 }
0x1377   :  { %v13972_v25 = vadd.f32 %v13971_v36, %v13970_v32  ;;  %v13973_v1 = vpop.f32.mrb[206].mxu0  ;;  %14008 = vmatprep.mubr.bf16.mxu1 %v12406_v59 }
0x1378   :  { %v13974_v40 = vpop.f32.mrb[207].mxu0 }
0x1379   :  { %v13975_v30 = vadd.f32 %v13974_v40, %v13973_v1  ;;  %v12398_v16 = vadd.f32 %v13972_v25, %v13910_v44 }
0x137b   :  { %v12401_v43 = vadd.f32 %v13975_v30, %v13910_v44 }
0x137d   :  { %v12407_v34 = vpack.c.bf16 %v12401_v43, %v12398_v16 }
0x137f   :  { %14009 = vmatmul.mubr.bf16.gmra.mrb[196].mxu1 %v12407_v34 }
0x1442   :  { %v14006_v42 = vpop.f32.mrb[192].mxu1 }
0x1443   :  { %v12522_v29 = vadd.f32 %v14006_v42, %v13927_v37  ;;  %v12513_v47 = vpop.f32.mrb[193].mxu1 }
0x1444   :  { %v12514_v3 = vadd.f32 %v13927_v37, %v12513_v47  ;;  %v14007_v7 = vpop.f32.mrb[194].mxu1 }
0x1445   :  { %12546 = vst [vmem:[#allocation32 + $0x10] sm:$0xff] %v12522_v29  ;;  %v12525_v23 = vadd.f32 %v14007_v7, %v13927_v37  ;;  %v12516_v52 = vpop.f32.mrb[195].mxu1 }
0x1446   :  { %12544 = vst [vmem:[#allocation32] sm:$0xff] %v12514_v3  ;;  %v12517_v8 = vadd.f32 %v13927_v37, %v12516_v52 }
0x1447   :  { %12547 = vst [vmem:[#allocation32 + $0x18] sm:$0xff] %v12525_v23 }
0x1448   :  { %12545 = vst [vmem:[#allocation32 + $0x8] sm:$0xff] %v12517_v8 }
0x1452   :  { %v14010_v62 = vpop.f32.mrb[196].mxu1 }
0x1453   :  { %v12538_v2 = vadd.f32 %v14010_v62, %v13927_v37  ;;  %v12529_v11 = vpop.f32.mrb[197].mxu1 }
0x1454   :  { %v12530_v53 = vadd.f32 %v13927_v37, %v12529_v11  ;;  %v14011_v55 = vpop.f32.mrb[198].mxu1 }
0x1455   :  { %12550 = vst [vmem:[#allocation32 + $0x30] sm:$0xff] %v12538_v2  ;;  %v12541_v63 = vadd.f32 %v14011_v55, %v13927_v37  ;;  %v12532_v58 = vpop.f32.mrb[199].mxu1 }
0x1456   :  { %12548 = vst [vmem:[#allocation32 + $0x20] sm:$0xff] %v12530_v53  ;;  %v12533_v54 = vadd.f32 %v13927_v37, %v12532_v58 }
0x1457   :  { %12551 = vst [vmem:[#allocation32 + $0x38] sm:$0xff] %v12541_v63 }
0x1458   :  { %12549 = vst [vmem:[#allocation32 + $0x28] sm:$0xff] %v12533_v54 }
0x1459   :  { %16044 = shalt.err (!%p16041_p0)
}
0x145a   :  { %s19770_s13 = sld [smem:[#allocation109_spill]] }
0x1460   :  { %s16045_s0 = scalar_lea.hbm %s19770_s13, 1024 }
0x1461   :  { %p16046_p1 = scmp.ne.s32.totalorder %s19770_s13, %s16045_s0  ;;  %p16049_p2 = scmp.lt.u32.totalorder %s16045_s0, %s19770_s13 }
0x1463   :  { %p16051_p3 = pnand %p16049_p2, %p16046_p1 }
0x1465   :  { %16054 = shalt.err (!%p16051_p3)
}
0x1466   :  { %12563 = dma.vmem_to_hbm [thread:$0]  %s12558_s20, 1024, %s19770_s13, [#allocation7], %s16088_s15, %s16088_s15, %s16089_s11  }
0x1467   :  { %16073 = dma.done.wait [#allocation7], 1024  }
0x1468   :  { %16074 = vsyncadd [#allocation7], 4294966272 }
0x1469   :  { %12567 = vsyncpa [#allocation6], 1 }
0x146a   :  { %12568 = vsyncpa [#allocation9], 1 }
0x146b   :  { %12569 = vsyncpa [#allocation12], 1 }
0x146c   :  { %12570 = vsyncpa [#allocation15], 1 }
0x146d   :  { %12571 = vsyncpa [#allocation18], 1 }
0x146e   :  { %12572 = vsyncpa [#allocation21], 1 }
0x146f   :  { %12573 = vsyncpa [#allocation24], 1 }
0x1470   :  { %12574 = vsyncpa [#allocation27], 1 }
0x1471   :  { %12575 = vsyncpa [#allocation30], 1 }
0x1472   :  { %12576 = vsyncpa [#allocation7], 1 }

</bundles_post_ra>
